<compile_context>
chip_gen: v7x
topology: tpu7x:2x2x1
jax: 0.10.0
libtpu: 0.0.40
codegen_flags: <defaults>
</compile_context>

<pallas_src>
import functools
import math

import jax
import jax.numpy as jnp
from jax.experimental import pallas as pl
from jax.experimental.pallas import tpu as pltpu

EPS = 1e-5
C1_PAD = 128   # block-1 output channels lane-padded 64 -> 128
K1_PAD = 32    # block-1 im2col contraction padded 27 -> 32


def calc_after_block(s, kernel_size=3, stride=1, padding=1):
    conv_size = (s - kernel_size + 2 * padding) // stride + 1
    return math.ceil((conv_size - 2) / 2) + 1


# ---------------- fused Pallas kernel ----------------

def _teachernet5_kernel(p1_ref, w1_ref, s1_ref, b1_ref,
                        w2_ref, s2_ref, b2_ref,
                        w3_ref, s3_ref, b3_ref,
                        w4_ref, s4_ref, b4_ref,
                        wc_ref, bc_ref,
                        o_ref,
                        x2_ref, x3_ref, x4_ref,
                        *, N, H1, W1):
    f32 = jnp.float32

    # zero the padded inter-block activation scratches once (pad rows/cols stay zero)
    x2_ref[...] = jnp.zeros(x2_ref.shape, x2_ref.dtype)
    x3_ref[...] = jnp.zeros(x3_ref.shape, x3_ref.dtype)
    x4_ref[...] = jnp.zeros(x4_ref.shape, x4_ref.dtype)

    def bn_relu(acc, s_ref, b_ref):
        # folded inference BatchNorm (+ conv bias) and ReLU, f32 epilogue
        return jnp.maximum(acc * s_ref[...] + b_ref[...], 0.0)

    def pool_row_pair(a, b):
        # a, b: [W, C] f32 = conv+BN+ReLU rows 2i and 2i+1 (valid columns only)
        rm = jnp.maximum(a, b)
        w_, c_ = rm.shape
        rm = rm.reshape(w_ // 2, 2, c_)
        return jnp.maximum(rm[:, 0, :], rm[:, 1, :])          # [W//2, C] f32

    def store_padded(dst_ref, Wo):
        # write pooled row i of image n into the NEXT block's padded flat layout
        Wpo = Wo + 2
        def emit(n, i, pr):
            dst_ref[n, pl.ds((i + 1) * Wpo + 1, Wo), :] = pr.astype(dst_ref.dtype)
        return emit

    # ---- block 1: single K=32 matmul for the whole batch (im2col built in XLA) ----
    y1 = bn_relu(jnp.dot(p1_ref[...], w1_ref[...], preferred_element_type=f32),
                 s1_ref, b1_ref)                               # [N*H1*W1, 128] f32
    H2, W2 = H1 // 2, W1 // 2
    emit2 = store_padded(x2_ref, W2)
    for n in range(N):
        base = n * H1 * W1
        for i in range(H2):
            a = y1[base + (2 * i) * W1: base + (2 * i) * W1 + W1]
            b = y1[base + (2 * i + 1) * W1: base + (2 * i + 1) * W1 + W1]
            emit2(n, i, pool_row_pair(a, b))

    # ---- blocks 2..4: merged 9-tap single matmul per block, batched over images ----
    def conv_block(x_ref, w_ref, s_ref, b_ref, H, W, emit):
        Wp = W + 2                       # padded row width of the flat input layout
        Mv = H * Wp                      # conv evaluated at all Wp columns (2 junk/row)
        slabs = []
        for dy in range(3):
            for dx in range(3):
                parts = [x_ref[n, pl.ds(dy * Wp + dx, Mv), :] for n in range(N)]
                slabs.append(parts[0] if N == 1 else jnp.concatenate(parts, axis=0))
        patch = jnp.concatenate(slabs, axis=-1)                # [N*Mv, 9*Cin] bf16
        y = bn_relu(jnp.dot(patch, w_ref[...], preferred_element_type=f32),
                    s_ref, b_ref)                              # [N*Mv, Cout] f32
        for n in range(N):
            base = n * Mv
            for i in range(H // 2):
                a = y[base + (2 * i) * Wp: base + (2 * i) * Wp + W]
                b = y[base + (2 * i + 1) * Wp: base + (2 * i + 1) * Wp + W]
                emit(n, i, pool_row_pair(a, b))

    H3, W3 = H2 // 2, W2 // 2
    conv_block(x2_ref, w2_ref, s2_ref, b2_ref, H2, W2, store_padded(x3_ref, W3))
    H4, W4 = H3 // 2, W3 // 2
    conv_block(x3_ref, w3_ref, s3_ref, b3_ref, H3, W3, store_padded(x4_ref, W4))

    Hf, Wf = H4 // 2, W4 // 2
    feats = [[None] * Hf for _ in range(N)]
    def emit_feat(n, i, pr):
        feats[n][i] = pr                                        # [Wf, 512] f32
    conv_block(x4_ref, w4_ref, s4_ref, b4_ref, H4, W4, emit_feat)

    # ---- classifier: 5 Linears collapsed offline to one [feat_dim, 12] matmul + bias ----
    C4 = feats[0][0].shape[-1]
    n_out = bc_ref.shape[-1]
    outs = []
    for n in range(N):
        acc = jnp.zeros((1, n_out), f32)
        for h in range(Hf):
            row = feats[n][h]
            for w in range(Wf):
                k = h * Wf + w    # (h, w, c) flatten order was folded into wc offline
                acc = acc + jnp.dot(row[w:w + 1, :].astype(jnp.bfloat16),
                                    wc_ref[pl.ds(k * C4, C4), :],
                                    preferred_element_type=f32)
        outs.append(acc)
    out = outs[0] if N == 1 else jnp.concatenate(outs, axis=0)
    o_ref[...] = out + bc_ref[...]


# ---------------- wrapper ----------------

def teacher_net5_forward(x_nchw, params):
    (w1, s1, b1, w2, s2, b2, w3, s3, b3, w4, s4, b4, wc, bc) = params
    N, Cin, H1, W1 = x_nchw.shape
    assert 9 * Cin <= K1_PAD

    # NCHW -> NHWC, 3x3 im2col of the tiny input in XLA, K padded 27 -> 32, bf16
    x = jnp.transpose(x_nchw, (0, 2, 3, 1)).astype(jnp.float32)
    xp = jnp.pad(x, ((0, 0), (1, 1), (1, 1), (0, 0)))
    taps = [xp[:, dy:dy + H1, dx:dx + W1, :] for dy in range(3) for dx in range(3)]
    p1 = jnp.concatenate(taps, axis=-1).reshape(N * H1 * W1, 9 * Cin)
    p1 = jnp.pad(p1, ((0, 0), (0, K1_PAD - 9 * Cin))).astype(jnp.bfloat16)

    H2, W2 = H1 // 2, W1 // 2
    H3, W3 = H2 // 2, W2 // 2
    H4, W4 = H3 // 2, W3 // 2
    for s_ in (H1, W1, H2, W2, H3, W3, H4, W4):
        assert s_ % 2 == 0, "kernel assumes even spatial sizes at every conv block"
    # TODO(synk): odd intermediate sizes would need MaxPool2d floor/ceil handling.

    Cx2 = w2.shape[0] // 9      # block-2 input channels (block-1 Cout, lane-padded)
    Cx3 = w3.shape[0] // 9
    Cx4 = w4.shape[0] // 9
    n_out = wc.shape[1]

    in_arrays = [p1, w1, s1, b1, w2, s2, b2, w3, s3, b3, w4, s4, b4, wc, bc]
    in_specs = [pl.BlockSpec(a.shape, lambda i: (0, 0)) for a in in_arrays]

    kernel = functools.partial(_teachernet5_kernel, N=N, H1=H1, W1=W1)
    return pl.pallas_call(
        kernel,
        out_shape=jax.ShapeDtypeStruct((N, n_out), jnp.float32),
        grid_spec=pltpu.PrefetchScalarGridSpec(
            num_scalar_prefetch=0,
            grid=(1,),
            in_specs=in_specs,
            out_specs=pl.BlockSpec((N, n_out), lambda i: (0, 0)),
            scratch_shapes=[
                pltpu.VMEM((N, (H2 + 3) * (W2 + 2), Cx2), jnp.bfloat16),
                pltpu.VMEM((N, (H3 + 3) * (W3 + 2), Cx3), jnp.bfloat16),
                pltpu.VMEM((N, (H4 + 3) * (W4 + 2), Cx4), jnp.bfloat16),
            ],
        ),
        compiler_params=pltpu.CompilerParams(
            dimension_semantics=("arbitrary",),
            vmem_limit_bytes=32 * 1024 * 1024,
        ),
    )(*in_arrays)


# ---------------- parameter construction / offline folding ----------------

def init_raw_params(key, image_size):
    channels = [3, 64, 128, 256, 512]
    keys = iter(jax.random.split(key, 4 * 6 + 5 * 2))
    conv_raw = []
    for i in range(4):
        cin, cout = channels[i], channels[i + 1]
        w = jax.random.normal(next(keys), (3, 3, cin, cout), jnp.float32) * 0.05
        b = jax.random.normal(next(keys), (cout,), jnp.float32) * 0.01
        gamma = 1.0 + 0.1 * jax.random.normal(next(keys), (cout,), jnp.float32)
        beta = 0.1 * jax.random.normal(next(keys), (cout,), jnp.float32)
        mean = 0.1 * jax.random.normal(next(keys), (cout,), jnp.float32)
        var = jax.random.uniform(next(keys), (cout,), jnp.float32, minval=0.5, maxval=1.5)
        conv_raw.append((w, b, gamma, beta, mean, var))

    s = image_size
    for _ in range(4):
        s = calc_after_block(s)
    feat_dim = s * s * channels[-1]
    dims = [feat_dim, 1024, 128, 64, 32, 12]
    lin_raw = []
    for i in range(5):
        w = jax.random.normal(next(keys), (dims[i], dims[i + 1]), jnp.float32) * 0.05
        b = jax.random.normal(next(keys), (dims[i + 1],), jnp.float32) * 0.01
        lin_raw.append((w, b))
    return conv_raw, lin_raw


def prepare_params(conv_raw, lin_raw, image_size):
    """Offline folding: BN -> scale/bias, tap-major [9*Cin, Cout] weights (bf16),
    block-1 K/Cout padding, NCHW-flatten permutation + collapse of the 5 Linears."""
    conv_p = []
    for bi, (w, b, gamma, beta, mean, var) in enumerate(conv_raw):
        kh, kw, cin, cout = w.shape
        scale = gamma / jnp.sqrt(var + EPS)
        bias = beta + scale * (b - mean)
        if bi == 0:
            wt = w.reshape(kh * kw * cin, cout)                          # [27, 64]
            wt = jnp.pad(wt, ((0, K1_PAD - kh * kw * cin), (0, C1_PAD - cout)))
            scale = jnp.pad(scale, (0, C1_PAD - cout))
            bias = jnp.pad(bias, (0, C1_PAD - cout))
        else:
            if bi == 1:   # block-1 output channels were lane-padded 64 -> 128
                w = jnp.pad(w, ((0, 0), (0, 0), (0, C1_PAD - cin), (0, 0)))
                cin = C1_PAD
            wt = w.reshape(kh * kw * cin, cout)                          # [9*Cin, Cout]
        conv_p.append((wt.astype(jnp.bfloat16),
                       scale.reshape(1, -1).astype(jnp.float32),
                       bias.reshape(1, -1).astype(jnp.float32)))

    # classifier: fold PyTorch NCHW flatten (c,h,w) -> our (h,w,c) row order into W1,
    # then collapse the 5 activation-free Linears into one matmul (exact in real arithmetic).
    s_sp = image_size
    for _ in range(len(conv_raw)):
        s_sp = calc_after_block(s_sp)
    c_last = conv_raw[-1][0].shape[3]
    w_first, b_first = lin_raw[0]
    d1 = w_first.shape[1]
    w_acc = w_first.reshape(c_last, s_sp, s_sp, d1).transpose(1, 2, 0, 3).reshape(-1, d1)
    b_acc = b_first
    for wk, bk in lin_raw[1:]:
        b_acc = jnp.matmul(b_acc, wk, precision=jax.lax.Precision.HIGHEST) + bk
        w_acc = jnp.matmul(w_acc, wk, precision=jax.lax.Precision.HIGHEST)
    wc = w_acc.astype(jnp.bfloat16)                      # [feat_dim, 12]
    bc = b_acc.reshape(1, -1).astype(jnp.float32)

    (w1, s1, b1), (w2, s2, b2), (w3, s3, b3), (w4, s4, b4) = conv_p
    return (w1, s1, b1, w2, s2, b2, w3, s3, b3, w4, s4, b4, wc, bc)


if __name__ == "__main__":
    key = jax.random.PRNGKey(0)
    kx, kp = jax.random.split(key)
    image_size = 16                 # -> 1x1x512 features after the 4 conv blocks
    x = jax.random.normal(kx, (2, 3, image_size, image_size), jnp.float32)

    conv_raw, lin_raw = init_raw_params(kp, image_size)
    params = prepare_params(conv_raw, lin_raw, image_size)

    fwd = jax.jit(teacher_net5_forward)
    out = jax.block_until_ready(fwd(x, params))

    assert out.shape == (2, 12), out.shape
    assert bool(jnp.all(jnp.isfinite(out)))
    print("KERNEL_OK")
</pallas_src>

<mosaic_0001>
module attributes {stable_mosaic.version = 11 : i64} {
  func.func @_teachernet5_kernel(%arg0: i32, %arg1: memref<512x32xbf16, #tpu.memory_space<vmem>>, %arg2: memref<32x128xbf16, #tpu.memory_space<vmem>>, %arg3: memref<1x128xf32, #tpu.memory_space<vmem>>, %arg4: memref<1x128xf32, #tpu.memory_space<vmem>>, %arg5: memref<1152x128xbf16, #tpu.memory_space<vmem>>, %arg6: memref<1x128xf32, #tpu.memory_space<vmem>>, %arg7: memref<1x128xf32, #tpu.memory_space<vmem>>, %arg8: memref<1152x256xbf16, #tpu.memory_space<vmem>>, %arg9: memref<1x256xf32, #tpu.memory_space<vmem>>, %arg10: memref<1x256xf32, #tpu.memory_space<vmem>>, %arg11: memref<2304x512xbf16, #tpu.memory_space<vmem>>, %arg12: memref<1x512xf32, #tpu.memory_space<vmem>>, %arg13: memref<1x512xf32, #tpu.memory_space<vmem>>, %arg14: memref<512x12xbf16, #tpu.memory_space<vmem>>, %arg15: memref<1x12xf32, #tpu.memory_space<vmem>>, %arg16: memref<2x12xf32, #tpu.memory_space<vmem>>, %arg17: memref<2x110x128xbf16, #tpu.memory_space<vmem>>, %arg18: memref<2x42x128xbf16, #tpu.memory_space<vmem>>, %arg19: memref<2x20x256xbf16, #tpu.memory_space<vmem>>) attributes {dimension_semantics = [#tpu.dimension_semantics<arbitrary>], iteration_bounds = array<i64: 1>, scalar_prefetch = 0 : i64, scratch_operands = 3 : i64, tpu.core_type = #tpu.core_type<tc>, window_params = [{pipeline_mode = #tpu.pipeline_mode<synchronous>, transform_indices = @transform_0, window_bounds = array<i64: 512, 32>}, {pipeline_mode = #tpu.pipeline_mode<synchronous>, transform_indices = @transform_1, window_bounds = array<i64: 32, 128>}, {pipeline_mode = #tpu.pipeline_mode<synchronous>, transform_indices = @transform_2, window_bounds = array<i64: 1, 128>}, {pipeline_mode = #tpu.pipeline_mode<synchronous>, transform_indices = @transform_3, window_bounds = array<i64: 1, 128>}, {pipeline_mode = #tpu.pipeline_mode<synchronous>, transform_indices = @transform_4, window_bounds = array<i64: 1152, 128>}, {pipeline_mode = #tpu.pipeline_mode<synchronous>, transform_indices = @transform_5, window_bounds = array<i64: 1, 128>}, {pipeline_mode = #tpu.pipeline_mode<synchronous>, transform_indices = @transform_6, window_bounds = array<i64: 1, 128>}, {pipeline_mode = #tpu.pipeline_mode<synchronous>, transform_indices = @transform_7, window_bounds = array<i64: 1152, 256>}, {pipeline_mode = #tpu.pipeline_mode<synchronous>, transform_indices = @transform_8, window_bounds = array<i64: 1, 256>}, {pipeline_mode = #tpu.pipeline_mode<synchronous>, transform_indices = @transform_9, window_bounds = array<i64: 1, 256>}, {pipeline_mode = #tpu.pipeline_mode<synchronous>, transform_indices = @transform_10, window_bounds = array<i64: 2304, 512>}, {pipeline_mode = #tpu.pipeline_mode<synchronous>, transform_indices = @transform_11, window_bounds = array<i64: 1, 512>}, {pipeline_mode = #tpu.pipeline_mode<synchronous>, transform_indices = @transform_12, window_bounds = array<i64: 1, 512>}, {pipeline_mode = #tpu.pipeline_mode<synchronous>, transform_indices = @transform_13, window_bounds = array<i64: 512, 12>}, {pipeline_mode = #tpu.pipeline_mode<synchronous>, transform_indices = @transform_14, window_bounds = array<i64: 1, 12>}, {pipeline_mode = #tpu.pipeline_mode<synchronous>, transform_indices = @transform_15, window_bounds = array<i64: 2, 12>}]} {
    %cst = arith.constant 0.000000e+00 : bf16
    %0 = vector.broadcast %cst : bf16 to vector<2x110x128xbf16>
    %c0 = arith.constant 0 : index
    %c0_0 = arith.constant 0 : index
    %c0_1 = arith.constant 0 : index
    %1 = vector.load %arg17[%c0, %c0_0, %c0_1] : memref<2x110x128xbf16, #tpu.memory_space<vmem>>, vector<2x110x128xbf16>
    tpu.vector_store %arg17[%c0, %c0_0, %c0_1], %0 {strides = array<i32>} : memref<2x110x128xbf16, #tpu.memory_space<vmem>>, vector<2x110x128xbf16>,
    %cst_2 = arith.constant 0.000000e+00 : bf16
    %2 = vector.broadcast %cst_2 : bf16 to vector<2x42x128xbf16>
    %c0_3 = arith.constant 0 : index
    %c0_4 = arith.constant 0 : index
    %c0_5 = arith.constant 0 : index
    %3 = vector.load %arg18[%c0_3, %c0_4, %c0_5] : memref<2x42x128xbf16, #tpu.memory_space<vmem>>, vector<2x42x128xbf16>
    tpu.vector_store %arg18[%c0_3, %c0_4, %c0_5], %2 {strides = array<i32>} : memref<2x42x128xbf16, #tpu.memory_space<vmem>>, vector<2x42x128xbf16>,
    %cst_6 = arith.constant 0.000000e+00 : bf16
    %4 = vector.broadcast %cst_6 : bf16 to vector<2x20x256xbf16>
    %c0_7 = arith.constant 0 : index
    %c0_8 = arith.constant 0 : index
    %c0_9 = arith.constant 0 : index
    %5 = vector.load %arg19[%c0_7, %c0_8, %c0_9] : memref<2x20x256xbf16, #tpu.memory_space<vmem>>, vector<2x20x256xbf16>
    tpu.vector_store %arg19[%c0_7, %c0_8, %c0_9], %4 {strides = array<i32>} : memref<2x20x256xbf16, #tpu.memory_space<vmem>>, vector<2x20x256xbf16>,
    %c0_10 = arith.constant 0 : index
    %c0_11 = arith.constant 0 : index
    %6 = vector.load %arg1[%c0_10, %c0_11] : memref<512x32xbf16, #tpu.memory_space<vmem>>, vector<512x32xbf16>
    %c0_12 = arith.constant 0 : index
    %c0_13 = arith.constant 0 : index
    %7 = vector.load %arg2[%c0_12, %c0_13] : memref<32x128xbf16, #tpu.memory_space<vmem>>, vector<32x128xbf16>
    %cst_14 = arith.constant dense<0.000000e+00> : vector<512x128xf32>
    %8 = tpu.matmul %6, %7, %cst_14 {dimension_numbers = #tpu.dot_dimension_numbers<[1], [0], [0], [1], [0, 0, 1, 1], [], []>} : vector<512x32xbf16>, vector<32x128xbf16>, vector<512x128xf32> -> vector<512x128xf32>
    %c0_15 = arith.constant 0 : index
    %c0_16 = arith.constant 0 : index
    %9 = vector.load %arg3[%c0_15, %c0_16] : memref<1x128xf32, #tpu.memory_space<vmem>>, vector<1x128xf32>
    %10 = vector.broadcast %9 : vector<1x128xf32> to vector<512x128xf32>
    %11 = arith.mulf %8, %10 : vector<512x128xf32>
    %c0_17 = arith.constant 0 : index
    %c0_18 = arith.constant 0 : index
    %12 = vector.load %arg4[%c0_17, %c0_18] : memref<1x128xf32, #tpu.memory_space<vmem>>, vector<1x128xf32>
    %13 = vector.broadcast %12 : vector<1x128xf32> to vector<512x128xf32>
    %14 = arith.addf %11, %13 : vector<512x128xf32>
    %cst_19 = arith.constant 0.000000e+00 : f32
    %15 = vector.broadcast %cst_19 : f32 to vector<512x128xf32>
    %16 = arith.maximumf %14, %15 : vector<512x128xf32>
    %17 = vector.extract_strided_slice %16 {offsets = [0, 0], sizes = [16, 128], strides = [1, 1]} : vector<512x128xf32> to vector<16x128xf32>
    %18 = vector.extract_strided_slice %16 {offsets = [16, 0], sizes = [16, 128], strides = [1, 1]} : vector<512x128xf32> to vector<16x128xf32>
    %19 = arith.maximumf %17, %18 : vector<16x128xf32>
    %20 = vector.shape_cast %19 : vector<16x128xf32> to vector<8x2x128xf32>
    %21 = vector.extract_strided_slice %20 {offsets = [0, 0, 0], sizes = [8, 1, 128], strides = [1, 1, 1]} : vector<8x2x128xf32> to vector<8x1x128xf32>
    %22 = vector.shape_cast %21 : vector<8x1x128xf32> to vector<8x128xf32>
    %23 = vector.extract_strided_slice %20 {offsets = [0, 1, 0], sizes = [8, 1, 128], strides = [1, 1, 1]} : vector<8x2x128xf32> to vector<8x1x128xf32>
    %24 = vector.shape_cast %23 : vector<8x1x128xf32> to vector<8x128xf32>
    %25 = arith.maximumf %22, %24 : vector<8x128xf32>
    %26 = arith.truncf %25 : vector<8x128xf32> to vector<8x128xbf16>
    %c0_20 = arith.constant 0 : index
    %c11 = arith.constant 11 : index
    %c0_21 = arith.constant 0 : index
    %27 = vector.load %arg17[%c0_20, %c11, %c0_21] : memref<2x110x128xbf16, #tpu.memory_space<vmem>>, vector<1x8x128xbf16>
    %28 = vector.shape_cast %27 : vector<1x8x128xbf16> to vector<8x128xbf16>
    %29 = vector.shape_cast %26 : vector<8x128xbf16> to vector<1x8x128xbf16>
    tpu.vector_store %arg17[%c0_20, %c11, %c0_21], %29 {strides = array<i32>} : memref<2x110x128xbf16, #tpu.memory_space<vmem>>, vector<1x8x128xbf16>,
    %30 = vector.extract_strided_slice %16 {offsets = [32, 0], sizes = [16, 128], strides = [1, 1]} : vector<512x128xf32> to vector<16x128xf32>
    %31 = vector.extract_strided_slice %16 {offsets = [48, 0], sizes = [16, 128], strides = [1, 1]} : vector<512x128xf32> to vector<16x128xf32>
    %32 = arith.maximumf %30, %31 : vector<16x128xf32>
    %33 = vector.shape_cast %32 : vector<16x128xf32> to vector<8x2x128xf32>
    %34 = vector.extract_strided_slice %33 {offsets = [0, 0, 0], sizes = [8, 1, 128], strides = [1, 1, 1]} : vector<8x2x128xf32> to vector<8x1x128xf32>
    %35 = vector.shape_cast %34 : vector<8x1x128xf32> to vector<8x128xf32>
    %36 = vector.extract_strided_slice %33 {offsets = [0, 1, 0], sizes = [8, 1, 128], strides = [1, 1, 1]} : vector<8x2x128xf32> to vector<8x1x128xf32>
    %37 = vector.shape_cast %36 : vector<8x1x128xf32> to vector<8x128xf32>
    %38 = arith.maximumf %35, %37 : vector<8x128xf32>
    %39 = arith.truncf %38 : vector<8x128xf32> to vector<8x128xbf16>
    %c0_22 = arith.constant 0 : index
    %c21 = arith.constant 21 : index
    %c0_23 = arith.constant 0 : index
    %40 = vector.load %arg17[%c0_22, %c21, %c0_23] : memref<2x110x128xbf16, #tpu.memory_space<vmem>>, vector<1x8x128xbf16>
    %41 = vector.shape_cast %40 : vector<1x8x128xbf16> to vector<8x128xbf16>
    %42 = vector.shape_cast %39 : vector<8x128xbf16> to vector<1x8x128xbf16>
    tpu.vector_store %arg17[%c0_22, %c21, %c0_23], %42 {strides = array<i32>} : memref<2x110x128xbf16, #tpu.memory_space<vmem>>, vector<1x8x128xbf16>,
    %43 = vector.extract_strided_slice %16 {offsets = [64, 0], sizes = [16, 128], strides = [1, 1]} : vector<512x128xf32> to vector<16x128xf32>
    %44 = vector.extract_strided_slice %16 {offsets = [80, 0], sizes = [16, 128], strides = [1, 1]} : vector<512x128xf32> to vector<16x128xf32>
    %45 = arith.maximumf %43, %44 : vector<16x128xf32>
    %46 = vector.shape_cast %45 : vector<16x128xf32> to vector<8x2x128xf32>
    %47 = vector.extract_strided_slice %46 {offsets = [0, 0, 0], sizes = [8, 1, 128], strides = [1, 1, 1]} : vector<8x2x128xf32> to vector<8x1x128xf32>
    %48 = vector.shape_cast %47 : vector<8x1x128xf32> to vector<8x128xf32>
    %49 = vector.extract_strided_slice %46 {offsets = [0, 1, 0], sizes = [8, 1, 128], strides = [1, 1, 1]} : vector<8x2x128xf32> to vector<8x1x128xf32>
    %50 = vector.shape_cast %49 : vector<8x1x128xf32> to vector<8x128xf32>
    %51 = arith.maximumf %48, %50 : vector<8x128xf32>
    %52 = arith.truncf %51 : vector<8x128xf32> to vector<8x128xbf16>
    %c0_24 = arith.constant 0 : index
    %c31 = arith.constant 31 : index
    %c0_25 = arith.constant 0 : index
    %53 = vector.load %arg17[%c0_24, %c31, %c0_25] : memref<2x110x128xbf16, #tpu.memory_space<vmem>>, vector<1x8x128xbf16>
    %54 = vector.shape_cast %53 : vector<1x8x128xbf16> to vector<8x128xbf16>
    %55 = vector.shape_cast %52 : vector<8x128xbf16> to vector<1x8x128xbf16>
    tpu.vector_store %arg17[%c0_24, %c31, %c0_25], %55 {strides = array<i32>} : memref<2x110x128xbf16, #tpu.memory_space<vmem>>, vector<1x8x128xbf16>,
    %56 = vector.extract_strided_slice %16 {offsets = [96, 0], sizes = [16, 128], strides = [1, 1]} : vector<512x128xf32> to vector<16x128xf32>
    %57 = vector.extract_strided_slice %16 {offsets = [112, 0], sizes = [16, 128], strides = [1, 1]} : vector<512x128xf32> to vector<16x128xf32>
    %58 = arith.maximumf %56, %57 : vector<16x128xf32>
    %59 = vector.shape_cast %58 : vector<16x128xf32> to vector<8x2x128xf32>
    %60 = vector.extract_strided_slice %59 {offsets = [0, 0, 0], sizes = [8, 1, 128], strides = [1, 1, 1]} : vector<8x2x128xf32> to vector<8x1x128xf32>
    %61 = vector.shape_cast %60 : vector<8x1x128xf32> to vector<8x128xf32>
    %62 = vector.extract_strided_slice %59 {offsets = [0, 1, 0], sizes = [8, 1, 128], strides = [1, 1, 1]} : vector<8x2x128xf32> to vector<8x1x128xf32>
    %63 = vector.shape_cast %62 : vector<8x1x128xf32> to vector<8x128xf32>
    %64 = arith.maximumf %61, %63 : vector<8x128xf32>
    %65 = arith.truncf %64 : vector<8x128xf32> to vector<8x128xbf16>
    %c0_26 = arith.constant 0 : index
    %c41 = arith.constant 41 : index
    %c0_27 = arith.constant 0 : index
    %66 = vector.load %arg17[%c0_26, %c41, %c0_27] : memref<2x110x128xbf16, #tpu.memory_space<vmem>>, vector<1x8x128xbf16>
    %67 = vector.shape_cast %66 : vector<1x8x128xbf16> to vector<8x128xbf16>
    %68 = vector.shape_cast %65 : vector<8x128xbf16> to vector<1x8x128xbf16>
    tpu.vector_store %arg17[%c0_26, %c41, %c0_27], %68 {strides = array<i32>} : memref<2x110x128xbf16, #tpu.memory_space<vmem>>, vector<1x8x128xbf16>,
    %69 = vector.extract_strided_slice %16 {offsets = [128, 0], sizes = [16, 128], strides = [1, 1]} : vector<512x128xf32> to vector<16x128xf32>
    %70 = vector.extract_strided_slice %16 {offsets = [144, 0], sizes = [16, 128], strides = [1, 1]} : vector<512x128xf32> to vector<16x128xf32>
    %71 = arith.maximumf %69, %70 : vector<16x128xf32>
    %72 = vector.shape_cast %71 : vector<16x128xf32> to vector<8x2x128xf32>
    %73 = vector.extract_strided_slice %72 {offsets = [0, 0, 0], sizes = [8, 1, 128], strides = [1, 1, 1]} : vector<8x2x128xf32> to vector<8x1x128xf32>
    %74 = vector.shape_cast %73 : vector<8x1x128xf32> to vector<8x128xf32>
    %75 = vector.extract_strided_slice %72 {offsets = [0, 1, 0], sizes = [8, 1, 128], strides = [1, 1, 1]} : vector<8x2x128xf32> to vector<8x1x128xf32>
    %76 = vector.shape_cast %75 : vector<8x1x128xf32> to vector<8x128xf32>
    %77 = arith.maximumf %74, %76 : vector<8x128xf32>
    %78 = arith.truncf %77 : vector<8x128xf32> to vector<8x128xbf16>
    %c0_28 = arith.constant 0 : index
    %c51 = arith.constant 51 : index
    %c0_29 = arith.constant 0 : index
    %79 = vector.load %arg17[%c0_28, %c51, %c0_29] : memref<2x110x128xbf16, #tpu.memory_space<vmem>>, vector<1x8x128xbf16>
    %80 = vector.shape_cast %79 : vector<1x8x128xbf16> to vector<8x128xbf16>
    %81 = vector.shape_cast %78 : vector<8x128xbf16> to vector<1x8x128xbf16>
    tpu.vector_store %arg17[%c0_28, %c51, %c0_29], %81 {strides = array<i32>} : memref<2x110x128xbf16, #tpu.memory_space<vmem>>, vector<1x8x128xbf16>,
    %82 = vector.extract_strided_slice %16 {offsets = [160, 0], sizes = [16, 128], strides = [1, 1]} : vector<512x128xf32> to vector<16x128xf32>
    %83 = vector.extract_strided_slice %16 {offsets = [176, 0], sizes = [16, 128], strides = [1, 1]} : vector<512x128xf32> to vector<16x128xf32>
    %84 = arith.maximumf %82, %83 : vector<16x128xf32>
    %85 = vector.shape_cast %84 : vector<16x128xf32> to vector<8x2x128xf32>
    %86 = vector.extract_strided_slice %85 {offsets = [0, 0, 0], sizes = [8, 1, 128], strides = [1, 1, 1]} : vector<8x2x128xf32> to vector<8x1x128xf32>
    %87 = vector.shape_cast %86 : vector<8x1x128xf32> to vector<8x128xf32>
    %88 = vector.extract_strided_slice %85 {offsets = [0, 1, 0], sizes = [8, 1, 128], strides = [1, 1, 1]} : vector<8x2x128xf32> to vector<8x1x128xf32>
    %89 = vector.shape_cast %88 : vector<8x1x128xf32> to vector<8x128xf32>
    %90 = arith.maximumf %87, %89 : vector<8x128xf32>
    %91 = arith.truncf %90 : vector<8x128xf32> to vector<8x128xbf16>
    %c0_30 = arith.constant 0 : index
    %c61 = arith.constant 61 : index
    %c0_31 = arith.constant 0 : index
    %92 = vector.load %arg17[%c0_30, %c61, %c0_31] : memref<2x110x128xbf16, #tpu.memory_space<vmem>>, vector<1x8x128xbf16>
    %93 = vector.shape_cast %92 : vector<1x8x128xbf16> to vector<8x128xbf16>
    %94 = vector.shape_cast %91 : vector<8x128xbf16> to vector<1x8x128xbf16>
    tpu.vector_store %arg17[%c0_30, %c61, %c0_31], %94 {strides = array<i32>} : memref<2x110x128xbf16, #tpu.memory_space<vmem>>, vector<1x8x128xbf16>,
    %95 = vector.extract_strided_slice %16 {offsets = [192, 0], sizes = [16, 128], strides = [1, 1]} : vector<512x128xf32> to vector<16x128xf32>
    %96 = vector.extract_strided_slice %16 {offsets = [208, 0], sizes = [16, 128], strides = [1, 1]} : vector<512x128xf32> to vector<16x128xf32>
    %97 = arith.maximumf %95, %96 : vector<16x128xf32>
    %98 = vector.shape_cast %97 : vector<16x128xf32> to vector<8x2x128xf32>
    %99 = vector.extract_strided_slice %98 {offsets = [0, 0, 0], sizes = [8, 1, 128], strides = [1, 1, 1]} : vector<8x2x128xf32> to vector<8x1x128xf32>
    %100 = vector.shape_cast %99 : vector<8x1x128xf32> to vector<8x128xf32>
    %101 = vector.extract_strided_slice %98 {offsets = [0, 1, 0], sizes = [8, 1, 128], strides = [1, 1, 1]} : vector<8x2x128xf32> to vector<8x1x128xf32>
    %102 = vector.shape_cast %101 : vector<8x1x128xf32> to vector<8x128xf32>
    %103 = arith.maximumf %100, %102 : vector<8x128xf32>
    %104 = arith.truncf %103 : vector<8x128xf32> to vector<8x128xbf16>
    %c0_32 = arith.constant 0 : index
    %c71 = arith.constant 71 : index
    %c0_33 = arith.constant 0 : index
    %105 = vector.load %arg17[%c0_32, %c71, %c0_33] : memref<2x110x128xbf16, #tpu.memory_space<vmem>>, vector<1x8x128xbf16>
    %106 = vector.shape_cast %105 : vector<1x8x128xbf16> to vector<8x128xbf16>
    %107 = vector.shape_cast %104 : vector<8x128xbf16> to vector<1x8x128xbf16>
    tpu.vector_store %arg17[%c0_32, %c71, %c0_33], %107 {strides = array<i32>} : memref<2x110x128xbf16, #tpu.memory_space<vmem>>, vector<1x8x128xbf16>,
    %108 = vector.extract_strided_slice %16 {offsets = [224, 0], sizes = [16, 128], strides = [1, 1]} : vector<512x128xf32> to vector<16x128xf32>
    %109 = vector.extract_strided_slice %16 {offsets = [240, 0], sizes = [16, 128], strides = [1, 1]} : vector<512x128xf32> to vector<16x128xf32>
    %110 = arith.maximumf %108, %109 : vector<16x128xf32>
    %111 = vector.shape_cast %110 : vector<16x128xf32> to vector<8x2x128xf32>
    %112 = vector.extract_strided_slice %111 {offsets = [0, 0, 0], sizes = [8, 1, 128], strides = [1, 1, 1]} : vector<8x2x128xf32> to vector<8x1x128xf32>
    %113 = vector.shape_cast %112 : vector<8x1x128xf32> to vector<8x128xf32>
    %114 = vector.extract_strided_slice %111 {offsets = [0, 1, 0], sizes = [8, 1, 128], strides = [1, 1, 1]} : vector<8x2x128xf32> to vector<8x1x128xf32>
    %115 = vector.shape_cast %114 : vector<8x1x128xf32> to vector<8x128xf32>
    %116 = arith.maximumf %113, %115 : vector<8x128xf32>
    %117 = arith.truncf %116 : vector<8x128xf32> to vector<8x128xbf16>
    %c0_34 = arith.constant 0 : index
    %c81 = arith.constant 81 : index
    %c0_35 = arith.constant 0 : index
    %118 = vector.load %arg17[%c0_34, %c81, %c0_35] : memref<2x110x128xbf16, #tpu.memory_space<vmem>>, vector<1x8x128xbf16>
    %119 = vector.shape_cast %118 : vector<1x8x128xbf16> to vector<8x128xbf16>
    %120 = vector.shape_cast %117 : vector<8x128xbf16> to vector<1x8x128xbf16>
    tpu.vector_store %arg17[%c0_34, %c81, %c0_35], %120 {strides = array<i32>} : memref<2x110x128xbf16, #tpu.memory_space<vmem>>, vector<1x8x128xbf16>,
    %121 = vector.extract_strided_slice %16 {offsets = [256, 0], sizes = [16, 128], strides = [1, 1]} : vector<512x128xf32> to vector<16x128xf32>
    %122 = vector.extract_strided_slice %16 {offsets = [272, 0], sizes = [16, 128], strides = [1, 1]} : vector<512x128xf32> to vector<16x128xf32>
    %123 = arith.maximumf %121, %122 : vector<16x128xf32>
    %124 = vector.shape_cast %123 : vector<16x128xf32> to vector<8x2x128xf32>
    %125 = vector.extract_strided_slice %124 {offsets = [0, 0, 0], sizes = [8, 1, 128], strides = [1, 1, 1]} : vector<8x2x128xf32> to vector<8x1x128xf32>
    %126 = vector.shape_cast %125 : vector<8x1x128xf32> to vector<8x128xf32>
    %127 = vector.extract_strided_slice %124 {offsets = [0, 1, 0], sizes = [8, 1, 128], strides = [1, 1, 1]} : vector<8x2x128xf32> to vector<8x1x128xf32>
    %128 = vector.shape_cast %127 : vector<8x1x128xf32> to vector<8x128xf32>
    %129 = arith.maximumf %126, %128 : vector<8x128xf32>
    %130 = arith.truncf %129 : vector<8x128xf32> to vector<8x128xbf16>
    %c1 = arith.constant 1 : index
    %c11_36 = arith.constant 11 : index
    %c0_37 = arith.constant 0 : index
    %131 = vector.load %arg17[%c1, %c11_36, %c0_37] : memref<2x110x128xbf16, #tpu.memory_space<vmem>>, vector<1x8x128xbf16>
    %132 = vector.shape_cast %131 : vector<1x8x128xbf16> to vector<8x128xbf16>
    %133 = vector.shape_cast %130 : vector<8x128xbf16> to vector<1x8x128xbf16>
    tpu.vector_store %arg17[%c1, %c11_36, %c0_37], %133 {strides = array<i32>} : memref<2x110x128xbf16, #tpu.memory_space<vmem>>, vector<1x8x128xbf16>,
    %134 = vector.extract_strided_slice %16 {offsets = [288, 0], sizes = [16, 128], strides = [1, 1]} : vector<512x128xf32> to vector<16x128xf32>
    %135 = vector.extract_strided_slice %16 {offsets = [304, 0], sizes = [16, 128], strides = [1, 1]} : vector<512x128xf32> to vector<16x128xf32>
    %136 = arith.maximumf %134, %135 : vector<16x128xf32>
    %137 = vector.shape_cast %136 : vector<16x128xf32> to vector<8x2x128xf32>
    %138 = vector.extract_strided_slice %137 {offsets = [0, 0, 0], sizes = [8, 1, 128], strides = [1, 1, 1]} : vector<8x2x128xf32> to vector<8x1x128xf32>
    %139 = vector.shape_cast %138 : vector<8x1x128xf32> to vector<8x128xf32>
    %140 = vector.extract_strided_slice %137 {offsets = [0, 1, 0], sizes = [8, 1, 128], strides = [1, 1, 1]} : vector<8x2x128xf32> to vector<8x1x128xf32>
    %141 = vector.shape_cast %140 : vector<8x1x128xf32> to vector<8x128xf32>
    %142 = arith.maximumf %139, %141 : vector<8x128xf32>
    %143 = arith.truncf %142 : vector<8x128xf32> to vector<8x128xbf16>
    %c1_38 = arith.constant 1 : index
    %c21_39 = arith.constant 21 : index
    %c0_40 = arith.constant 0 : index
    %144 = vector.load %arg17[%c1_38, %c21_39, %c0_40] : memref<2x110x128xbf16, #tpu.memory_space<vmem>>, vector<1x8x128xbf16>
    %145 = vector.shape_cast %144 : vector<1x8x128xbf16> to vector<8x128xbf16>
    %146 = vector.shape_cast %143 : vector<8x128xbf16> to vector<1x8x128xbf16>
    tpu.vector_store %arg17[%c1_38, %c21_39, %c0_40], %146 {strides = array<i32>} : memref<2x110x128xbf16, #tpu.memory_space<vmem>>, vector<1x8x128xbf16>,
    %147 = vector.extract_strided_slice %16 {offsets = [320, 0], sizes = [16, 128], strides = [1, 1]} : vector<512x128xf32> to vector<16x128xf32>
    %148 = vector.extract_strided_slice %16 {offsets = [336, 0], sizes = [16, 128], strides = [1, 1]} : vector<512x128xf32> to vector<16x128xf32>
    %149 = arith.maximumf %147, %148 : vector<16x128xf32>
    %150 = vector.shape_cast %149 : vector<16x128xf32> to vector<8x2x128xf32>
    %151 = vector.extract_strided_slice %150 {offsets = [0, 0, 0], sizes = [8, 1, 128], strides = [1, 1, 1]} : vector<8x2x128xf32> to vector<8x1x128xf32>
    %152 = vector.shape_cast %151 : vector<8x1x128xf32> to vector<8x128xf32>
    %153 = vector.extract_strided_slice %150 {offsets = [0, 1, 0], sizes = [8, 1, 128], strides = [1, 1, 1]} : vector<8x2x128xf32> to vector<8x1x128xf32>
    %154 = vector.shape_cast %153 : vector<8x1x128xf32> to vector<8x128xf32>
    %155 = arith.maximumf %152, %154 : vector<8x128xf32>
    %156 = arith.truncf %155 : vector<8x128xf32> to vector<8x128xbf16>
    %c1_41 = arith.constant 1 : index
    %c31_42 = arith.constant 31 : index
    %c0_43 = arith.constant 0 : index
    %157 = vector.load %arg17[%c1_41, %c31_42, %c0_43] : memref<2x110x128xbf16, #tpu.memory_space<vmem>>, vector<1x8x128xbf16>
    %158 = vector.shape_cast %157 : vector<1x8x128xbf16> to vector<8x128xbf16>
    %159 = vector.shape_cast %156 : vector<8x128xbf16> to vector<1x8x128xbf16>
    tpu.vector_store %arg17[%c1_41, %c31_42, %c0_43], %159 {strides = array<i32>} : memref<2x110x128xbf16, #tpu.memory_space<vmem>>, vector<1x8x128xbf16>,
    %160 = vector.extract_strided_slice %16 {offsets = [352, 0], sizes = [16, 128], strides = [1, 1]} : vector<512x128xf32> to vector<16x128xf32>
    %161 = vector.extract_strided_slice %16 {offsets = [368, 0], sizes = [16, 128], strides = [1, 1]} : vector<512x128xf32> to vector<16x128xf32>
    %162 = arith.maximumf %160, %161 : vector<16x128xf32>
    %163 = vector.shape_cast %162 : vector<16x128xf32> to vector<8x2x128xf32>
    %164 = vector.extract_strided_slice %163 {offsets = [0, 0, 0], sizes = [8, 1, 128], strides = [1, 1, 1]} : vector<8x2x128xf32> to vector<8x1x128xf32>
    %165 = vector.shape_cast %164 : vector<8x1x128xf32> to vector<8x128xf32>
    %166 = vector.extract_strided_slice %163 {offsets = [0, 1, 0], sizes = [8, 1, 128], strides = [1, 1, 1]} : vector<8x2x128xf32> to vector<8x1x128xf32>
    %167 = vector.shape_cast %166 : vector<8x1x128xf32> to vector<8x128xf32>
    %168 = arith.maximumf %165, %167 : vector<8x128xf32>
    %169 = arith.truncf %168 : vector<8x128xf32> to vector<8x128xbf16>
    %c1_44 = arith.constant 1 : index
    %c41_45 = arith.constant 41 : index
    %c0_46 = arith.constant 0 : index
    %170 = vector.load %arg17[%c1_44, %c41_45, %c0_46] : memref<2x110x128xbf16, #tpu.memory_space<vmem>>, vector<1x8x128xbf16>
    %171 = vector.shape_cast %170 : vector<1x8x128xbf16> to vector<8x128xbf16>
    %172 = vector.shape_cast %169 : vector<8x128xbf16> to vector<1x8x128xbf16>
    tpu.vector_store %arg17[%c1_44, %c41_45, %c0_46], %172 {strides = array<i32>} : memref<2x110x128xbf16, #tpu.memory_space<vmem>>, vector<1x8x128xbf16>,
    %173 = vector.extract_strided_slice %16 {offsets = [384, 0], sizes = [16, 128], strides = [1, 1]} : vector<512x128xf32> to vector<16x128xf32>
    %174 = vector.extract_strided_slice %16 {offsets = [400, 0], sizes = [16, 128], strides = [1, 1]} : vector<512x128xf32> to vector<16x128xf32>
    %175 = arith.maximumf %173, %174 : vector<16x128xf32>
    %176 = vector.shape_cast %175 : vector<16x128xf32> to vector<8x2x128xf32>
    %177 = vector.extract_strided_slice %176 {offsets = [0, 0, 0], sizes = [8, 1, 128], strides = [1, 1, 1]} : vector<8x2x128xf32> to vector<8x1x128xf32>
    %178 = vector.shape_cast %177 : vector<8x1x128xf32> to vector<8x128xf32>
    %179 = vector.extract_strided_slice %176 {offsets = [0, 1, 0], sizes = [8, 1, 128], strides = [1, 1, 1]} : vector<8x2x128xf32> to vector<8x1x128xf32>
    %180 = vector.shape_cast %179 : vector<8x1x128xf32> to vector<8x128xf32>
    %181 = arith.maximumf %178, %180 : vector<8x128xf32>
    %182 = arith.truncf %181 : vector<8x128xf32> to vector<8x128xbf16>
    %c1_47 = arith.constant 1 : index
    %c51_48 = arith.constant 51 : index
    %c0_49 = arith.constant 0 : index
    %183 = vector.load %arg17[%c1_47, %c51_48, %c0_49] : memref<2x110x128xbf16, #tpu.memory_space<vmem>>, vector<1x8x128xbf16>
    %184 = vector.shape_cast %183 : vector<1x8x128xbf16> to vector<8x128xbf16>
    %185 = vector.shape_cast %182 : vector<8x128xbf16> to vector<1x8x128xbf16>
    tpu.vector_store %arg17[%c1_47, %c51_48, %c0_49], %185 {strides = array<i32>} : memref<2x110x128xbf16, #tpu.memory_space<vmem>>, vector<1x8x128xbf16>,
    %186 = vector.extract_strided_slice %16 {offsets = [416, 0], sizes = [16, 128], strides = [1, 1]} : vector<512x128xf32> to vector<16x128xf32>
    %187 = vector.extract_strided_slice %16 {offsets = [432, 0], sizes = [16, 128], strides = [1, 1]} : vector<512x128xf32> to vector<16x128xf32>
    %188 = arith.maximumf %186, %187 : vector<16x128xf32>
    %189 = vector.shape_cast %188 : vector<16x128xf32> to vector<8x2x128xf32>
    %190 = vector.extract_strided_slice %189 {offsets = [0, 0, 0], sizes = [8, 1, 128], strides = [1, 1, 1]} : vector<8x2x128xf32> to vector<8x1x128xf32>
    %191 = vector.shape_cast %190 : vector<8x1x128xf32> to vector<8x128xf32>
    %192 = vector.extract_strided_slice %189 {offsets = [0, 1, 0], sizes = [8, 1, 128], strides = [1, 1, 1]} : vector<8x2x128xf32> to vector<8x1x128xf32>
    %193 = vector.shape_cast %192 : vector<8x1x128xf32> to vector<8x128xf32>
    %194 = arith.maximumf %191, %193 : vector<8x128xf32>
    %195 = arith.truncf %194 : vector<8x128xf32> to vector<8x128xbf16>
    %c1_50 = arith.constant 1 : index
    %c61_51 = arith.constant 61 : index
    %c0_52 = arith.constant 0 : index
    %196 = vector.load %arg17[%c1_50, %c61_51, %c0_52] : memref<2x110x128xbf16, #tpu.memory_space<vmem>>, vector<1x8x128xbf16>
    %197 = vector.shape_cast %196 : vector<1x8x128xbf16> to vector<8x128xbf16>
    %198 = vector.shape_cast %195 : vector<8x128xbf16> to vector<1x8x128xbf16>
    tpu.vector_store %arg17[%c1_50, %c61_51, %c0_52], %198 {strides = array<i32>} : memref<2x110x128xbf16, #tpu.memory_space<vmem>>, vector<1x8x128xbf16>,
    %199 = vector.extract_strided_slice %16 {offsets = [448, 0], sizes = [16, 128], strides = [1, 1]} : vector<512x128xf32> to vector<16x128xf32>
    %200 = vector.extract_strided_slice %16 {offsets = [464, 0], sizes = [16, 128], strides = [1, 1]} : vector<512x128xf32> to vector<16x128xf32>
    %201 = arith.maximumf %199, %200 : vector<16x128xf32>
    %202 = vector.shape_cast %201 : vector<16x128xf32> to vector<8x2x128xf32>
    %203 = vector.extract_strided_slice %202 {offsets = [0, 0, 0], sizes = [8, 1, 128], strides = [1, 1, 1]} : vector<8x2x128xf32> to vector<8x1x128xf32>
    %204 = vector.shape_cast %203 : vector<8x1x128xf32> to vector<8x128xf32>
    %205 = vector.extract_strided_slice %202 {offsets = [0, 1, 0], sizes = [8, 1, 128], strides = [1, 1, 1]} : vector<8x2x128xf32> to vector<8x1x128xf32>
    %206 = vector.shape_cast %205 : vector<8x1x128xf32> to vector<8x128xf32>
    %207 = arith.maximumf %204, %206 : vector<8x128xf32>
    %208 = arith.truncf %207 : vector<8x128xf32> to vector<8x128xbf16>
    %c1_53 = arith.constant 1 : index
    %c71_54 = arith.constant 71 : index
    %c0_55 = arith.constant 0 : index
    %209 = vector.load %arg17[%c1_53, %c71_54, %c0_55] : memref<2x110x128xbf16, #tpu.memory_space<vmem>>, vector<1x8x128xbf16>
    %210 = vector.shape_cast %209 : vector<1x8x128xbf16> to vector<8x128xbf16>
    %211 = vector.shape_cast %208 : vector<8x128xbf16> to vector<1x8x128xbf16>
    tpu.vector_store %arg17[%c1_53, %c71_54, %c0_55], %211 {strides = array<i32>} : memref<2x110x128xbf16, #tpu.memory_space<vmem>>, vector<1x8x128xbf16>,
    %212 = vector.extract_strided_slice %16 {offsets = [480, 0], sizes = [16, 128], strides = [1, 1]} : vector<512x128xf32> to vector<16x128xf32>
    %213 = vector.extract_strided_slice %16 {offsets = [496, 0], sizes = [16, 128], strides = [1, 1]} : vector<512x128xf32> to vector<16x128xf32>
    %214 = arith.maximumf %212, %213 : vector<16x128xf32>
    %215 = vector.shape_cast %214 : vector<16x128xf32> to vector<8x2x128xf32>
    %216 = vector.extract_strided_slice %215 {offsets = [0, 0, 0], sizes = [8, 1, 128], strides = [1, 1, 1]} : vector<8x2x128xf32> to vector<8x1x128xf32>
    %217 = vector.shape_cast %216 : vector<8x1x128xf32> to vector<8x128xf32>
    %218 = vector.extract_strided_slice %215 {offsets = [0, 1, 0], sizes = [8, 1, 128], strides = [1, 1, 1]} : vector<8x2x128xf32> to vector<8x1x128xf32>
    %219 = vector.shape_cast %218 : vector<8x1x128xf32> to vector<8x128xf32>
    %220 = arith.maximumf %217, %219 : vector<8x128xf32>
    %221 = arith.truncf %220 : vector<8x128xf32> to vector<8x128xbf16>
    %c1_56 = arith.constant 1 : index
    %c81_57 = arith.constant 81 : index
    %c0_58 = arith.constant 0 : index
    %222 = vector.load %arg17[%c1_56, %c81_57, %c0_58] : memref<2x110x128xbf16, #tpu.memory_space<vmem>>, vector<1x8x128xbf16>
    %223 = vector.shape_cast %222 : vector<1x8x128xbf16> to vector<8x128xbf16>
    %224 = vector.shape_cast %221 : vector<8x128xbf16> to vector<1x8x128xbf16>
    tpu.vector_store %arg17[%c1_56, %c81_57, %c0_58], %224 {strides = array<i32>} : memref<2x110x128xbf16, #tpu.memory_space<vmem>>, vector<1x8x128xbf16>,
    %c0_59 = arith.constant 0 : index
    %c0_60 = arith.constant 0 : index
    %c0_61 = arith.constant 0 : index
    %225 = vector.load %arg17[%c0_59, %c0_60, %c0_61] : memref<2x110x128xbf16, #tpu.memory_space<vmem>>, vector<1x80x128xbf16>
    %226 = vector.shape_cast %225 : vector<1x80x128xbf16> to vector<80x128xbf16>
    %c1_62 = arith.constant 1 : index
    %c0_63 = arith.constant 0 : index
    %c0_64 = arith.constant 0 : index
    %227 = vector.load %arg17[%c1_62, %c0_63, %c0_64] : memref<2x110x128xbf16, #tpu.memory_space<vmem>>, vector<1x80x128xbf16>
    %228 = vector.shape_cast %227 : vector<1x80x128xbf16> to vector<80x128xbf16>
    %229 = tpu.concatenate %226, %228 in 0 : vector<80x128xbf16>, vector<80x128xbf16> -> vector<160x128xbf16>
    %c0_65 = arith.constant 0 : index
    %c1_66 = arith.constant 1 : index
    %c0_67 = arith.constant 0 : index
    %230 = vector.load %arg17[%c0_65, %c1_66, %c0_67] : memref<2x110x128xbf16, #tpu.memory_space<vmem>>, vector<1x80x128xbf16>
    %231 = vector.shape_cast %230 : vector<1x80x128xbf16> to vector<80x128xbf16>
    %c1_68 = arith.constant 1 : index
    %c1_69 = arith.constant 1 : index
    %c0_70 = arith.constant 0 : index
    %232 = vector.load %arg17[%c1_68, %c1_69, %c0_70] : memref<2x110x128xbf16, #tpu.memory_space<vmem>>, vector<1x80x128xbf16>
    %233 = vector.shape_cast %232 : vector<1x80x128xbf16> to vector<80x128xbf16>
    %234 = tpu.concatenate %231, %233 in 0 : vector<80x128xbf16>, vector<80x128xbf16> -> vector<160x128xbf16>
    %c0_71 = arith.constant 0 : index
    %c2 = arith.constant 2 : index
    %c0_72 = arith.constant 0 : index
    %235 = vector.load %arg17[%c0_71, %c2, %c0_72] : memref<2x110x128xbf16, #tpu.memory_space<vmem>>, vector<1x80x128xbf16>
    %236 = vector.shape_cast %235 : vector<1x80x128xbf16> to vector<80x128xbf16>
    %c1_73 = arith.constant 1 : index
    %c2_74 = arith.constant 2 : index
    %c0_75 = arith.constant 0 : index
    %237 = vector.load %arg17[%c1_73, %c2_74, %c0_75] : memref<2x110x128xbf16, #tpu.memory_space<vmem>>, vector<1x80x128xbf16>
    %238 = vector.shape_cast %237 : vector<1x80x128xbf16> to vector<80x128xbf16>
    %239 = tpu.concatenate %236, %238 in 0 : vector<80x128xbf16>, vector<80x128xbf16> -> vector<160x128xbf16>
    %c0_76 = arith.constant 0 : index
    %c10 = arith.constant 10 : index
    %c0_77 = arith.constant 0 : index
    %240 = vector.load %arg17[%c0_76, %c10, %c0_77] : memref<2x110x128xbf16, #tpu.memory_space<vmem>>, vector<1x80x128xbf16>
    %241 = vector.shape_cast %240 : vector<1x80x128xbf16> to vector<80x128xbf16>
    %c1_78 = arith.constant 1 : index
    %c10_79 = arith.constant 10 : index
    %c0_80 = arith.constant 0 : index
    %242 = vector.load %arg17[%c1_78, %c10_79, %c0_80] : memref<2x110x128xbf16, #tpu.memory_space<vmem>>, vector<1x80x128xbf16>
    %243 = vector.shape_cast %242 : vector<1x80x128xbf16> to vector<80x128xbf16>
    %244 = tpu.concatenate %241, %243 in 0 : vector<80x128xbf16>, vector<80x128xbf16> -> vector<160x128xbf16>
    %c0_81 = arith.constant 0 : index
    %c11_82 = arith.constant 11 : index
    %c0_83 = arith.constant 0 : index
    %245 = vector.load %arg17[%c0_81, %c11_82, %c0_83] : memref<2x110x128xbf16, #tpu.memory_space<vmem>>, vector<1x80x128xbf16>
    %246 = vector.shape_cast %245 : vector<1x80x128xbf16> to vector<80x128xbf16>
    %c1_84 = arith.constant 1 : index
    %c11_85 = arith.constant 11 : index
    %c0_86 = arith.constant 0 : index
    %247 = vector.load %arg17[%c1_84, %c11_85, %c0_86] : memref<2x110x128xbf16, #tpu.memory_space<vmem>>, vector<1x80x128xbf16>
    %248 = vector.shape_cast %247 : vector<1x80x128xbf16> to vector<80x128xbf16>
    %249 = tpu.concatenate %246, %248 in 0 : vector<80x128xbf16>, vector<80x128xbf16> -> vector<160x128xbf16>
    %c0_87 = arith.constant 0 : index
    %c12 = arith.constant 12 : index
    %c0_88 = arith.constant 0 : index
    %250 = vector.load %arg17[%c0_87, %c12, %c0_88] : memref<2x110x128xbf16, #tpu.memory_space<vmem>>, vector<1x80x128xbf16>
    %251 = vector.shape_cast %250 : vector<1x80x128xbf16> to vector<80x128xbf16>
    %c1_89 = arith.constant 1 : index
    %c12_90 = arith.constant 12 : index
    %c0_91 = arith.constant 0 : index
    %252 = vector.load %arg17[%c1_89, %c12_90, %c0_91] : memref<2x110x128xbf16, #tpu.memory_space<vmem>>, vector<1x80x128xbf16>
    %253 = vector.shape_cast %252 : vector<1x80x128xbf16> to vector<80x128xbf16>
    %254 = tpu.concatenate %251, %253 in 0 : vector<80x128xbf16>, vector<80x128xbf16> -> vector<160x128xbf16>
    %c0_92 = arith.constant 0 : index
    %c20 = arith.constant 20 : index
    %c0_93 = arith.constant 0 : index
    %255 = vector.load %arg17[%c0_92, %c20, %c0_93] : memref<2x110x128xbf16, #tpu.memory_space<vmem>>, vector<1x80x128xbf16>
    %256 = vector.shape_cast %255 : vector<1x80x128xbf16> to vector<80x128xbf16>
    %c1_94 = arith.constant 1 : index
    %c20_95 = arith.constant 20 : index
    %c0_96 = arith.constant 0 : index
    %257 = vector.load %arg17[%c1_94, %c20_95, %c0_96] : memref<2x110x128xbf16, #tpu.memory_space<vmem>>, vector<1x80x128xbf16>
    %258 = vector.shape_cast %257 : vector<1x80x128xbf16> to vector<80x128xbf16>
    %259 = tpu.concatenate %256, %258 in 0 : vector<80x128xbf16>, vector<80x128xbf16> -> vector<160x128xbf16>
    %c0_97 = arith.constant 0 : index
    %c21_98 = arith.constant 21 : index
    %c0_99 = arith.constant 0 : index
    %260 = vector.load %arg17[%c0_97, %c21_98, %c0_99] : memref<2x110x128xbf16, #tpu.memory_space<vmem>>, vector<1x80x128xbf16>
    %261 = vector.shape_cast %260 : vector<1x80x128xbf16> to vector<80x128xbf16>
    %c1_100 = arith.constant 1 : index
    %c21_101 = arith.constant 21 : index
    %c0_102 = arith.constant 0 : index
    %262 = vector.load %arg17[%c1_100, %c21_101, %c0_102] : memref<2x110x128xbf16, #tpu.memory_space<vmem>>, vector<1x80x128xbf16>
    %263 = vector.shape_cast %262 : vector<1x80x128xbf16> to vector<80x128xbf16>
    %264 = tpu.concatenate %261, %263 in 0 : vector<80x128xbf16>, vector<80x128xbf16> -> vector<160x128xbf16>
    %c0_103 = arith.constant 0 : index
    %c22 = arith.constant 22 : index
    %c0_104 = arith.constant 0 : index
    %265 = vector.load %arg17[%c0_103, %c22, %c0_104] : memref<2x110x128xbf16, #tpu.memory_space<vmem>>, vector<1x80x128xbf16>
    %266 = vector.shape_cast %265 : vector<1x80x128xbf16> to vector<80x128xbf16>
    %c1_105 = arith.constant 1 : index
    %c22_106 = arith.constant 22 : index
    %c0_107 = arith.constant 0 : index
    %267 = vector.load %arg17[%c1_105, %c22_106, %c0_107] : memref<2x110x128xbf16, #tpu.memory_space<vmem>>, vector<1x80x128xbf16>
    %268 = vector.shape_cast %267 : vector<1x80x128xbf16> to vector<80x128xbf16>
    %269 = tpu.concatenate %266, %268 in 0 : vector<80x128xbf16>, vector<80x128xbf16> -> vector<160x128xbf16>
    %270 = tpu.concatenate %229, %234, %239, %244, %249, %254, %259, %264, %269 in 1 : vector<160x128xbf16>, vector<160x128xbf16>, vector<160x128xbf16>, vector<160x128xbf16>, vector<160x128xbf16>, vector<160x128xbf16>, vector<160x128xbf16>, vector<160x128xbf16>, vector<160x128xbf16> -> vector<160x1152xbf16>
    %c0_108 = arith.constant 0 : index
    %c0_109 = arith.constant 0 : index
    %271 = vector.load %arg5[%c0_108, %c0_109] : memref<1152x128xbf16, #tpu.memory_space<vmem>>, vector<1152x128xbf16>
    %cst_110 = arith.constant dense<0.000000e+00> : vector<160x128xf32>
    %272 = tpu.matmul %270, %271, %cst_110 {dimension_numbers = #tpu.dot_dimension_numbers<[1], [0], [0], [1], [0, 0, 1, 1], [], []>} : vector<160x1152xbf16>, vector<1152x128xbf16>, vector<160x128xf32> -> vector<160x128xf32>
    %c0_111 = arith.constant 0 : index
    %c0_112 = arith.constant 0 : index
    %273 = vector.load %arg6[%c0_111, %c0_112] : memref<1x128xf32, #tpu.memory_space<vmem>>, vector<1x128xf32>
    %274 = vector.broadcast %273 : vector<1x128xf32> to vector<160x128xf32>
    %275 = arith.mulf %272, %274 : vector<160x128xf32>
    %c0_113 = arith.constant 0 : index
    %c0_114 = arith.constant 0 : index
    %276 = vector.load %arg7[%c0_113, %c0_114] : memref<1x128xf32, #tpu.memory_space<vmem>>, vector<1x128xf32>
    %277 = vector.broadcast %276 : vector<1x128xf32> to vector<160x128xf32>
    %278 = arith.addf %275, %277 : vector<160x128xf32>
    %cst_115 = arith.constant 0.000000e+00 : f32
    %279 = vector.broadcast %cst_115 : f32 to vector<160x128xf32>
    %280 = arith.maximumf %278, %279 : vector<160x128xf32>
    %281 = vector.extract_strided_slice %280 {offsets = [0, 0], sizes = [8, 128], strides = [1, 1]} : vector<160x128xf32> to vector<8x128xf32>
    %282 = vector.extract_strided_slice %280 {offsets = [10, 0], sizes = [8, 128], strides = [1, 1]} : vector<160x128xf32> to vector<8x128xf32>
    %283 = arith.maximumf %281, %282 : vector<8x128xf32>
    %284 = vector.shape_cast %283 : vector<8x128xf32> to vector<4x2x128xf32>
    %285 = vector.extract_strided_slice %284 {offsets = [0, 0, 0], sizes = [4, 1, 128], strides = [1, 1, 1]} : vector<4x2x128xf32> to vector<4x1x128xf32>
    %286 = vector.shape_cast %285 : vector<4x1x128xf32> to vector<4x128xf32>
    %287 = vector.extract_strided_slice %284 {offsets = [0, 1, 0], sizes = [4, 1, 128], strides = [1, 1, 1]} : vector<4x2x128xf32> to vector<4x1x128xf32>
    %288 = vector.shape_cast %287 : vector<4x1x128xf32> to vector<4x128xf32>
    %289 = arith.maximumf %286, %288 : vector<4x128xf32>
    %290 = arith.truncf %289 : vector<4x128xf32> to vector<4x128xbf16>
    %c0_116 = arith.constant 0 : index
    %c7 = arith.constant 7 : index
    %c0_117 = arith.constant 0 : index
    %291 = vector.load %arg18[%c0_116, %c7, %c0_117] : memref<2x42x128xbf16, #tpu.memory_space<vmem>>, vector<1x4x128xbf16>
    %292 = vector.shape_cast %291 : vector<1x4x128xbf16> to vector<4x128xbf16>
    %293 = vector.shape_cast %290 : vector<4x128xbf16> to vector<1x4x128xbf16>
    tpu.vector_store %arg18[%c0_116, %c7, %c0_117], %293 {strides = array<i32>} : memref<2x42x128xbf16, #tpu.memory_space<vmem>>, vector<1x4x128xbf16>,
    %294 = vector.extract_strided_slice %280 {offsets = [20, 0], sizes = [8, 128], strides = [1, 1]} : vector<160x128xf32> to vector<8x128xf32>
    %295 = vector.extract_strided_slice %280 {offsets = [30, 0], sizes = [8, 128], strides = [1, 1]} : vector<160x128xf32> to vector<8x128xf32>
    %296 = arith.maximumf %294, %295 : vector<8x128xf32>
    %297 = vector.shape_cast %296 : vector<8x128xf32> to vector<4x2x128xf32>
    %298 = vector.extract_strided_slice %297 {offsets = [0, 0, 0], sizes = [4, 1, 128], strides = [1, 1, 1]} : vector<4x2x128xf32> to vector<4x1x128xf32>
    %299 = vector.shape_cast %298 : vector<4x1x128xf32> to vector<4x128xf32>
    %300 = vector.extract_strided_slice %297 {offsets = [0, 1, 0], sizes = [4, 1, 128], strides = [1, 1, 1]} : vector<4x2x128xf32> to vector<4x1x128xf32>
    %301 = vector.shape_cast %300 : vector<4x1x128xf32> to vector<4x128xf32>
    %302 = arith.maximumf %299, %301 : vector<4x128xf32>
    %303 = arith.truncf %302 : vector<4x128xf32> to vector<4x128xbf16>
    %c0_118 = arith.constant 0 : index
    %c13 = arith.constant 13 : index
    %c0_119 = arith.constant 0 : index
    %304 = vector.load %arg18[%c0_118, %c13, %c0_119] : memref<2x42x128xbf16, #tpu.memory_space<vmem>>, vector<1x4x128xbf16>
    %305 = vector.shape_cast %304 : vector<1x4x128xbf16> to vector<4x128xbf16>
    %306 = vector.shape_cast %303 : vector<4x128xbf16> to vector<1x4x128xbf16>
    tpu.vector_store %arg18[%c0_118, %c13, %c0_119], %306 {strides = array<i32>} : memref<2x42x128xbf16, #tpu.memory_space<vmem>>, vector<1x4x128xbf16>,
    %307 = vector.extract_strided_slice %280 {offsets = [40, 0], sizes = [8, 128], strides = [1, 1]} : vector<160x128xf32> to vector<8x128xf32>
    %308 = vector.extract_strided_slice %280 {offsets = [50, 0], sizes = [8, 128], strides = [1, 1]} : vector<160x128xf32> to vector<8x128xf32>
    %309 = arith.maximumf %307, %308 : vector<8x128xf32>
    %310 = vector.shape_cast %309 : vector<8x128xf32> to vector<4x2x128xf32>
    %311 = vector.extract_strided_slice %310 {offsets = [0, 0, 0], sizes = [4, 1, 128], strides = [1, 1, 1]} : vector<4x2x128xf32> to vector<4x1x128xf32>
    %312 = vector.shape_cast %311 : vector<4x1x128xf32> to vector<4x128xf32>
    %313 = vector.extract_strided_slice %310 {offsets = [0, 1, 0], sizes = [4, 1, 128], strides = [1, 1, 1]} : vector<4x2x128xf32> to vector<4x1x128xf32>
    %314 = vector.shape_cast %313 : vector<4x1x128xf32> to vector<4x128xf32>
    %315 = arith.maximumf %312, %314 : vector<4x128xf32>
    %316 = arith.truncf %315 : vector<4x128xf32> to vector<4x128xbf16>
    %c0_120 = arith.constant 0 : index
    %c19 = arith.constant 19 : index
    %c0_121 = arith.constant 0 : index
    %317 = vector.load %arg18[%c0_120, %c19, %c0_121] : memref<2x42x128xbf16, #tpu.memory_space<vmem>>, vector<1x4x128xbf16>
    %318 = vector.shape_cast %317 : vector<1x4x128xbf16> to vector<4x128xbf16>
    %319 = vector.shape_cast %316 : vector<4x128xbf16> to vector<1x4x128xbf16>
    tpu.vector_store %arg18[%c0_120, %c19, %c0_121], %319 {strides = array<i32>} : memref<2x42x128xbf16, #tpu.memory_space<vmem>>, vector<1x4x128xbf16>,
    %320 = vector.extract_strided_slice %280 {offsets = [60, 0], sizes = [8, 128], strides = [1, 1]} : vector<160x128xf32> to vector<8x128xf32>
    %321 = vector.extract_strided_slice %280 {offsets = [70, 0], sizes = [8, 128], strides = [1, 1]} : vector<160x128xf32> to vector<8x128xf32>
    %322 = arith.maximumf %320, %321 : vector<8x128xf32>
    %323 = vector.shape_cast %322 : vector<8x128xf32> to vector<4x2x128xf32>
    %324 = vector.extract_strided_slice %323 {offsets = [0, 0, 0], sizes = [4, 1, 128], strides = [1, 1, 1]} : vector<4x2x128xf32> to vector<4x1x128xf32>
    %325 = vector.shape_cast %324 : vector<4x1x128xf32> to vector<4x128xf32>
    %326 = vector.extract_strided_slice %323 {offsets = [0, 1, 0], sizes = [4, 1, 128], strides = [1, 1, 1]} : vector<4x2x128xf32> to vector<4x1x128xf32>
    %327 = vector.shape_cast %326 : vector<4x1x128xf32> to vector<4x128xf32>
    %328 = arith.maximumf %325, %327 : vector<4x128xf32>
    %329 = arith.truncf %328 : vector<4x128xf32> to vector<4x128xbf16>
    %c0_122 = arith.constant 0 : index
    %c25 = arith.constant 25 : index
    %c0_123 = arith.constant 0 : index
    %330 = vector.load %arg18[%c0_122, %c25, %c0_123] : memref<2x42x128xbf16, #tpu.memory_space<vmem>>, vector<1x4x128xbf16>
    %331 = vector.shape_cast %330 : vector<1x4x128xbf16> to vector<4x128xbf16>
    %332 = vector.shape_cast %329 : vector<4x128xbf16> to vector<1x4x128xbf16>
    tpu.vector_store %arg18[%c0_122, %c25, %c0_123], %332 {strides = array<i32>} : memref<2x42x128xbf16, #tpu.memory_space<vmem>>, vector<1x4x128xbf16>,
    %333 = vector.extract_strided_slice %280 {offsets = [80, 0], sizes = [8, 128], strides = [1, 1]} : vector<160x128xf32> to vector<8x128xf32>
    %334 = vector.extract_strided_slice %280 {offsets = [90, 0], sizes = [8, 128], strides = [1, 1]} : vector<160x128xf32> to vector<8x128xf32>
    %335 = arith.maximumf %333, %334 : vector<8x128xf32>
    %336 = vector.shape_cast %335 : vector<8x128xf32> to vector<4x2x128xf32>
    %337 = vector.extract_strided_slice %336 {offsets = [0, 0, 0], sizes = [4, 1, 128], strides = [1, 1, 1]} : vector<4x2x128xf32> to vector<4x1x128xf32>
    %338 = vector.shape_cast %337 : vector<4x1x128xf32> to vector<4x128xf32>
    %339 = vector.extract_strided_slice %336 {offsets = [0, 1, 0], sizes = [4, 1, 128], strides = [1, 1, 1]} : vector<4x2x128xf32> to vector<4x1x128xf32>
    %340 = vector.shape_cast %339 : vector<4x1x128xf32> to vector<4x128xf32>
    %341 = arith.maximumf %338, %340 : vector<4x128xf32>
    %342 = arith.truncf %341 : vector<4x128xf32> to vector<4x128xbf16>
    %c1_124 = arith.constant 1 : index
    %c7_125 = arith.constant 7 : index
    %c0_126 = arith.constant 0 : index
    %343 = vector.load %arg18[%c1_124, %c7_125, %c0_126] : memref<2x42x128xbf16, #tpu.memory_space<vmem>>, vector<1x4x128xbf16>
    %344 = vector.shape_cast %343 : vector<1x4x128xbf16> to vector<4x128xbf16>
    %345 = vector.shape_cast %342 : vector<4x128xbf16> to vector<1x4x128xbf16>
    tpu.vector_store %arg18[%c1_124, %c7_125, %c0_126], %345 {strides = array<i32>} : memref<2x42x128xbf16, #tpu.memory_space<vmem>>, vector<1x4x128xbf16>,
    %346 = vector.extract_strided_slice %280 {offsets = [100, 0], sizes = [8, 128], strides = [1, 1]} : vector<160x128xf32> to vector<8x128xf32>
    %347 = vector.extract_strided_slice %280 {offsets = [110, 0], sizes = [8, 128], strides = [1, 1]} : vector<160x128xf32> to vector<8x128xf32>
    %348 = arith.maximumf %346, %347 : vector<8x128xf32>
    %349 = vector.shape_cast %348 : vector<8x128xf32> to vector<4x2x128xf32>
    %350 = vector.extract_strided_slice %349 {offsets = [0, 0, 0], sizes = [4, 1, 128], strides = [1, 1, 1]} : vector<4x2x128xf32> to vector<4x1x128xf32>
    %351 = vector.shape_cast %350 : vector<4x1x128xf32> to vector<4x128xf32>
    %352 = vector.extract_strided_slice %349 {offsets = [0, 1, 0], sizes = [4, 1, 128], strides = [1, 1, 1]} : vector<4x2x128xf32> to vector<4x1x128xf32>
    %353 = vector.shape_cast %352 : vector<4x1x128xf32> to vector<4x128xf32>
    %354 = arith.maximumf %351, %353 : vector<4x128xf32>
    %355 = arith.truncf %354 : vector<4x128xf32> to vector<4x128xbf16>
    %c1_127 = arith.constant 1 : index
    %c13_128 = arith.constant 13 : index
    %c0_129 = arith.constant 0 : index
    %356 = vector.load %arg18[%c1_127, %c13_128, %c0_129] : memref<2x42x128xbf16, #tpu.memory_space<vmem>>, vector<1x4x128xbf16>
    %357 = vector.shape_cast %356 : vector<1x4x128xbf16> to vector<4x128xbf16>
    %358 = vector.shape_cast %355 : vector<4x128xbf16> to vector<1x4x128xbf16>
    tpu.vector_store %arg18[%c1_127, %c13_128, %c0_129], %358 {strides = array<i32>} : memref<2x42x128xbf16, #tpu.memory_space<vmem>>, vector<1x4x128xbf16>,
    %359 = vector.extract_strided_slice %280 {offsets = [120, 0], sizes = [8, 128], strides = [1, 1]} : vector<160x128xf32> to vector<8x128xf32>
    %360 = vector.extract_strided_slice %280 {offsets = [130, 0], sizes = [8, 128], strides = [1, 1]} : vector<160x128xf32> to vector<8x128xf32>
    %361 = arith.maximumf %359, %360 : vector<8x128xf32>
    %362 = vector.shape_cast %361 : vector<8x128xf32> to vector<4x2x128xf32>
    %363 = vector.extract_strided_slice %362 {offsets = [0, 0, 0], sizes = [4, 1, 128], strides = [1, 1, 1]} : vector<4x2x128xf32> to vector<4x1x128xf32>
    %364 = vector.shape_cast %363 : vector<4x1x128xf32> to vector<4x128xf32>
    %365 = vector.extract_strided_slice %362 {offsets = [0, 1, 0], sizes = [4, 1, 128], strides = [1, 1, 1]} : vector<4x2x128xf32> to vector<4x1x128xf32>
    %366 = vector.shape_cast %365 : vector<4x1x128xf32> to vector<4x128xf32>
    %367 = arith.maximumf %364, %366 : vector<4x128xf32>
    %368 = arith.truncf %367 : vector<4x128xf32> to vector<4x128xbf16>
    %c1_130 = arith.constant 1 : index
    %c19_131 = arith.constant 19 : index
    %c0_132 = arith.constant 0 : index
    %369 = vector.load %arg18[%c1_130, %c19_131, %c0_132] : memref<2x42x128xbf16, #tpu.memory_space<vmem>>, vector<1x4x128xbf16>
    %370 = vector.shape_cast %369 : vector<1x4x128xbf16> to vector<4x128xbf16>
    %371 = vector.shape_cast %368 : vector<4x128xbf16> to vector<1x4x128xbf16>
    tpu.vector_store %arg18[%c1_130, %c19_131, %c0_132], %371 {strides = array<i32>} : memref<2x42x128xbf16, #tpu.memory_space<vmem>>, vector<1x4x128xbf16>,
    %372 = vector.extract_strided_slice %280 {offsets = [140, 0], sizes = [8, 128], strides = [1, 1]} : vector<160x128xf32> to vector<8x128xf32>
    %373 = vector.extract_strided_slice %280 {offsets = [150, 0], sizes = [8, 128], strides = [1, 1]} : vector<160x128xf32> to vector<8x128xf32>
    %374 = arith.maximumf %372, %373 : vector<8x128xf32>
    %375 = vector.shape_cast %374 : vector<8x128xf32> to vector<4x2x128xf32>
    %376 = vector.extract_strided_slice %375 {offsets = [0, 0, 0], sizes = [4, 1, 128], strides = [1, 1, 1]} : vector<4x2x128xf32> to vector<4x1x128xf32>
    %377 = vector.shape_cast %376 : vector<4x1x128xf32> to vector<4x128xf32>
    %378 = vector.extract_strided_slice %375 {offsets = [0, 1, 0], sizes = [4, 1, 128], strides = [1, 1, 1]} : vector<4x2x128xf32> to vector<4x1x128xf32>
    %379 = vector.shape_cast %378 : vector<4x1x128xf32> to vector<4x128xf32>
    %380 = arith.maximumf %377, %379 : vector<4x128xf32>
    %381 = arith.truncf %380 : vector<4x128xf32> to vector<4x128xbf16>
    %c1_133 = arith.constant 1 : index
    %c25_134 = arith.constant 25 : index
    %c0_135 = arith.constant 0 : index
    %382 = vector.load %arg18[%c1_133, %c25_134, %c0_135] : memref<2x42x128xbf16, #tpu.memory_space<vmem>>, vector<1x4x128xbf16>
    %383 = vector.shape_cast %382 : vector<1x4x128xbf16> to vector<4x128xbf16>
    %384 = vector.shape_cast %381 : vector<4x128xbf16> to vector<1x4x128xbf16>
    tpu.vector_store %arg18[%c1_133, %c25_134, %c0_135], %384 {strides = array<i32>} : memref<2x42x128xbf16, #tpu.memory_space<vmem>>, vector<1x4x128xbf16>,
    %c0_136 = arith.constant 0 : index
    %c0_137 = arith.constant 0 : index
    %c0_138 = arith.constant 0 : index
    %385 = vector.load %arg18[%c0_136, %c0_137, %c0_138] : memref<2x42x128xbf16, #tpu.memory_space<vmem>>, vector<1x24x128xbf16>
    %386 = vector.shape_cast %385 : vector<1x24x128xbf16> to vector<24x128xbf16>
    %c1_139 = arith.constant 1 : index
    %c0_140 = arith.constant 0 : index
    %c0_141 = arith.constant 0 : index
    %387 = vector.load %arg18[%c1_139, %c0_140, %c0_141] : memref<2x42x128xbf16, #tpu.memory_space<vmem>>, vector<1x24x128xbf16>
    %388 = vector.shape_cast %387 : vector<1x24x128xbf16> to vector<24x128xbf16>
    %389 = tpu.concatenate %386, %388 in 0 : vector<24x128xbf16>, vector<24x128xbf16> -> vector<48x128xbf16>
    %c0_142 = arith.constant 0 : index
    %c1_143 = arith.constant 1 : index
    %c0_144 = arith.constant 0 : index
    %390 = vector.load %arg18[%c0_142, %c1_143, %c0_144] : memref<2x42x128xbf16, #tpu.memory_space<vmem>>, vector<1x24x128xbf16>
    %391 = vector.shape_cast %390 : vector<1x24x128xbf16> to vector<24x128xbf16>
    %c1_145 = arith.constant 1 : index
    %c1_146 = arith.constant 1 : index
    %c0_147 = arith.constant 0 : index
    %392 = vector.load %arg18[%c1_145, %c1_146, %c0_147] : memref<2x42x128xbf16, #tpu.memory_space<vmem>>, vector<1x24x128xbf16>
    %393 = vector.shape_cast %392 : vector<1x24x128xbf16> to vector<24x128xbf16>
    %394 = tpu.concatenate %391, %393 in 0 : vector<24x128xbf16>, vector<24x128xbf16> -> vector<48x128xbf16>
    %c0_148 = arith.constant 0 : index
    %c2_149 = arith.constant 2 : index
    %c0_150 = arith.constant 0 : index
    %395 = vector.load %arg18[%c0_148, %c2_149, %c0_150] : memref<2x42x128xbf16, #tpu.memory_space<vmem>>, vector<1x24x128xbf16>
    %396 = vector.shape_cast %395 : vector<1x24x128xbf16> to vector<24x128xbf16>
    %c1_151 = arith.constant 1 : index
    %c2_152 = arith.constant 2 : index
    %c0_153 = arith.constant 0 : index
    %397 = vector.load %arg18[%c1_151, %c2_152, %c0_153] : memref<2x42x128xbf16, #tpu.memory_space<vmem>>, vector<1x24x128xbf16>
    %398 = vector.shape_cast %397 : vector<1x24x128xbf16> to vector<24x128xbf16>
    %399 = tpu.concatenate %396, %398 in 0 : vector<24x128xbf16>, vector<24x128xbf16> -> vector<48x128xbf16>
    %c0_154 = arith.constant 0 : index
    %c6 = arith.constant 6 : index
    %c0_155 = arith.constant 0 : index
    %400 = vector.load %arg18[%c0_154, %c6, %c0_155] : memref<2x42x128xbf16, #tpu.memory_space<vmem>>, vector<1x24x128xbf16>
    %401 = vector.shape_cast %400 : vector<1x24x128xbf16> to vector<24x128xbf16>
    %c1_156 = arith.constant 1 : index
    %c6_157 = arith.constant 6 : index
    %c0_158 = arith.constant 0 : index
    %402 = vector.load %arg18[%c1_156, %c6_157, %c0_158] : memref<2x42x128xbf16, #tpu.memory_space<vmem>>, vector<1x24x128xbf16>
    %403 = vector.shape_cast %402 : vector<1x24x128xbf16> to vector<24x128xbf16>
    %404 = tpu.concatenate %401, %403 in 0 : vector<24x128xbf16>, vector<24x128xbf16> -> vector<48x128xbf16>
    %c0_159 = arith.constant 0 : index
    %c7_160 = arith.constant 7 : index
    %c0_161 = arith.constant 0 : index
    %405 = vector.load %arg18[%c0_159, %c7_160, %c0_161] : memref<2x42x128xbf16, #tpu.memory_space<vmem>>, vector<1x24x128xbf16>
    %406 = vector.shape_cast %405 : vector<1x24x128xbf16> to vector<24x128xbf16>
    %c1_162 = arith.constant 1 : index
    %c7_163 = arith.constant 7 : index
    %c0_164 = arith.constant 0 : index
    %407 = vector.load %arg18[%c1_162, %c7_163, %c0_164] : memref<2x42x128xbf16, #tpu.memory_space<vmem>>, vector<1x24x128xbf16>
    %408 = vector.shape_cast %407 : vector<1x24x128xbf16> to vector<24x128xbf16>
    %409 = tpu.concatenate %406, %408 in 0 : vector<24x128xbf16>, vector<24x128xbf16> -> vector<48x128xbf16>
    %c0_165 = arith.constant 0 : index
    %c8 = arith.constant 8 : index
    %c0_166 = arith.constant 0 : index
    %410 = vector.load %arg18[%c0_165, %c8, %c0_166] : memref<2x42x128xbf16, #tpu.memory_space<vmem>>, vector<1x24x128xbf16>
    %411 = vector.shape_cast %410 : vector<1x24x128xbf16> to vector<24x128xbf16>
    %c1_167 = arith.constant 1 : index
    %c8_168 = arith.constant 8 : index
    %c0_169 = arith.constant 0 : index
    %412 = vector.load %arg18[%c1_167, %c8_168, %c0_169] : memref<2x42x128xbf16, #tpu.memory_space<vmem>>, vector<1x24x128xbf16>
    %413 = vector.shape_cast %412 : vector<1x24x128xbf16> to vector<24x128xbf16>
    %414 = tpu.concatenate %411, %413 in 0 : vector<24x128xbf16>, vector<24x128xbf16> -> vector<48x128xbf16>
    %c0_170 = arith.constant 0 : index
    %c12_171 = arith.constant 12 : index
    %c0_172 = arith.constant 0 : index
    %415 = vector.load %arg18[%c0_170, %c12_171, %c0_172] : memref<2x42x128xbf16, #tpu.memory_space<vmem>>, vector<1x24x128xbf16>
    %416 = vector.shape_cast %415 : vector<1x24x128xbf16> to vector<24x128xbf16>
    %c1_173 = arith.constant 1 : index
    %c12_174 = arith.constant 12 : index
    %c0_175 = arith.constant 0 : index
    %417 = vector.load %arg18[%c1_173, %c12_174, %c0_175] : memref<2x42x128xbf16, #tpu.memory_space<vmem>>, vector<1x24x128xbf16>
    %418 = vector.shape_cast %417 : vector<1x24x128xbf16> to vector<24x128xbf16>
    %419 = tpu.concatenate %416, %418 in 0 : vector<24x128xbf16>, vector<24x128xbf16> -> vector<48x128xbf16>
    %c0_176 = arith.constant 0 : index
    %c13_177 = arith.constant 13 : index
    %c0_178 = arith.constant 0 : index
    %420 = vector.load %arg18[%c0_176, %c13_177, %c0_178] : memref<2x42x128xbf16, #tpu.memory_space<vmem>>, vector<1x24x128xbf16>
    %421 = vector.shape_cast %420 : vector<1x24x128xbf16> to vector<24x128xbf16>
    %c1_179 = arith.constant 1 : index
    %c13_180 = arith.constant 13 : index
    %c0_181 = arith.constant 0 : index
    %422 = vector.load %arg18[%c1_179, %c13_180, %c0_181] : memref<2x42x128xbf16, #tpu.memory_space<vmem>>, vector<1x24x128xbf16>
    %423 = vector.shape_cast %422 : vector<1x24x128xbf16> to vector<24x128xbf16>
    %424 = tpu.concatenate %421, %423 in 0 : vector<24x128xbf16>, vector<24x128xbf16> -> vector<48x128xbf16>
    %c0_182 = arith.constant 0 : index
    %c14 = arith.constant 14 : index
    %c0_183 = arith.constant 0 : index
    %425 = vector.load %arg18[%c0_182, %c14, %c0_183] : memref<2x42x128xbf16, #tpu.memory_space<vmem>>, vector<1x24x128xbf16>
    %426 = vector.shape_cast %425 : vector<1x24x128xbf16> to vector<24x128xbf16>
    %c1_184 = arith.constant 1 : index
    %c14_185 = arith.constant 14 : index
    %c0_186 = arith.constant 0 : index
    %427 = vector.load %arg18[%c1_184, %c14_185, %c0_186] : memref<2x42x128xbf16, #tpu.memory_space<vmem>>, vector<1x24x128xbf16>
    %428 = vector.shape_cast %427 : vector<1x24x128xbf16> to vector<24x128xbf16>
    %429 = tpu.concatenate %426, %428 in 0 : vector<24x128xbf16>, vector<24x128xbf16> -> vector<48x128xbf16>
    %430 = tpu.concatenate %389, %394, %399, %404, %409, %414, %419, %424, %429 in 1 : vector<48x128xbf16>, vector<48x128xbf16>, vector<48x128xbf16>, vector<48x128xbf16>, vector<48x128xbf16>, vector<48x128xbf16>, vector<48x128xbf16>, vector<48x128xbf16>, vector<48x128xbf16> -> vector<48x1152xbf16>
    %c0_187 = arith.constant 0 : index
    %c0_188 = arith.constant 0 : index
    %431 = vector.load %arg8[%c0_187, %c0_188] : memref<1152x256xbf16, #tpu.memory_space<vmem>>, vector<1152x256xbf16>
    %cst_189 = arith.constant dense<0.000000e+00> : vector<48x256xf32>
    %432 = tpu.matmul %430, %431, %cst_189 {dimension_numbers = #tpu.dot_dimension_numbers<[1], [0], [0], [1], [0, 0, 1, 1], [], []>} : vector<48x1152xbf16>, vector<1152x256xbf16>, vector<48x256xf32> -> vector<48x256xf32>
    %c0_190 = arith.constant 0 : index
    %c0_191 = arith.constant 0 : index
    %433 = vector.load %arg9[%c0_190, %c0_191] : memref<1x256xf32, #tpu.memory_space<vmem>>, vector<1x256xf32>
    %434 = vector.broadcast %433 : vector<1x256xf32> to vector<48x256xf32>
    %435 = arith.mulf %432, %434 : vector<48x256xf32>
    %c0_192 = arith.constant 0 : index
    %c0_193 = arith.constant 0 : index
    %436 = vector.load %arg10[%c0_192, %c0_193] : memref<1x256xf32, #tpu.memory_space<vmem>>, vector<1x256xf32>
    %437 = vector.broadcast %436 : vector<1x256xf32> to vector<48x256xf32>
    %438 = arith.addf %435, %437 : vector<48x256xf32>
    %cst_194 = arith.constant 0.000000e+00 : f32
    %439 = vector.broadcast %cst_194 : f32 to vector<48x256xf32>
    %440 = arith.maximumf %438, %439 : vector<48x256xf32>
    %441 = vector.extract_strided_slice %440 {offsets = [0, 0], sizes = [4, 256], strides = [1, 1]} : vector<48x256xf32> to vector<4x256xf32>
    %442 = vector.extract_strided_slice %440 {offsets = [6, 0], sizes = [4, 256], strides = [1, 1]} : vector<48x256xf32> to vector<4x256xf32>
    %443 = arith.maximumf %441, %442 : vector<4x256xf32>
    %444 = vector.shape_cast %443 : vector<4x256xf32> to vector<2x2x256xf32>
    %445 = vector.extract_strided_slice %444 {offsets = [0, 0, 0], sizes = [2, 1, 256], strides = [1, 1, 1]} : vector<2x2x256xf32> to vector<2x1x256xf32>
    %446 = vector.shape_cast %445 : vector<2x1x256xf32> to vector<2x256xf32>
    %447 = vector.extract_strided_slice %444 {offsets = [0, 1, 0], sizes = [2, 1, 256], strides = [1, 1, 1]} : vector<2x2x256xf32> to vector<2x1x256xf32>
    %448 = vector.shape_cast %447 : vector<2x1x256xf32> to vector<2x256xf32>
    %449 = arith.maximumf %446, %448 : vector<2x256xf32>
    %450 = arith.truncf %449 : vector<2x256xf32> to vector<2x256xbf16>
    %c0_195 = arith.constant 0 : index
    %c5 = arith.constant 5 : index
    %c0_196 = arith.constant 0 : index
    %451 = vector.load %arg19[%c0_195, %c5, %c0_196] : memref<2x20x256xbf16, #tpu.memory_space<vmem>>, vector<1x2x256xbf16>
    %452 = vector.shape_cast %451 : vector<1x2x256xbf16> to vector<2x256xbf16>
    %453 = vector.shape_cast %450 : vector<2x256xbf16> to vector<1x2x256xbf16>
    tpu.vector_store %arg19[%c0_195, %c5, %c0_196], %453 {strides = array<i32>} : memref<2x20x256xbf16, #tpu.memory_space<vmem>>, vector<1x2x256xbf16>,
    %454 = vector.extract_strided_slice %440 {offsets = [12, 0], sizes = [4, 256], strides = [1, 1]} : vector<48x256xf32> to vector<4x256xf32>
    %455 = vector.extract_strided_slice %440 {offsets = [18, 0], sizes = [4, 256], strides = [1, 1]} : vector<48x256xf32> to vector<4x256xf32>
    %456 = arith.maximumf %454, %455 : vector<4x256xf32>
    %457 = vector.shape_cast %456 : vector<4x256xf32> to vector<2x2x256xf32>
    %458 = vector.extract_strided_slice %457 {offsets = [0, 0, 0], sizes = [2, 1, 256], strides = [1, 1, 1]} : vector<2x2x256xf32> to vector<2x1x256xf32>
    %459 = vector.shape_cast %458 : vector<2x1x256xf32> to vector<2x256xf32>
    %460 = vector.extract_strided_slice %457 {offsets = [0, 1, 0], sizes = [2, 1, 256], strides = [1, 1, 1]} : vector<2x2x256xf32> to vector<2x1x256xf32>
    %461 = vector.shape_cast %460 : vector<2x1x256xf32> to vector<2x256xf32>
    %462 = arith.maximumf %459, %461 : vector<2x256xf32>
    %463 = arith.truncf %462 : vector<2x256xf32> to vector<2x256xbf16>
    %c0_197 = arith.constant 0 : index
    %c9 = arith.constant 9 : index
    %c0_198 = arith.constant 0 : index
    %464 = vector.load %arg19[%c0_197, %c9, %c0_198] : memref<2x20x256xbf16, #tpu.memory_space<vmem>>, vector<1x2x256xbf16>
    %465 = vector.shape_cast %464 : vector<1x2x256xbf16> to vector<2x256xbf16>
    %466 = vector.shape_cast %463 : vector<2x256xbf16> to vector<1x2x256xbf16>
    tpu.vector_store %arg19[%c0_197, %c9, %c0_198], %466 {strides = array<i32>} : memref<2x20x256xbf16, #tpu.memory_space<vmem>>, vector<1x2x256xbf16>,
    %467 = vector.extract_strided_slice %440 {offsets = [24, 0], sizes = [4, 256], strides = [1, 1]} : vector<48x256xf32> to vector<4x256xf32>
    %468 = vector.extract_strided_slice %440 {offsets = [30, 0], sizes = [4, 256], strides = [1, 1]} : vector<48x256xf32> to vector<4x256xf32>
    %469 = arith.maximumf %467, %468 : vector<4x256xf32>
    %470 = vector.shape_cast %469 : vector<4x256xf32> to vector<2x2x256xf32>
    %471 = vector.extract_strided_slice %470 {offsets = [0, 0, 0], sizes = [2, 1, 256], strides = [1, 1, 1]} : vector<2x2x256xf32> to vector<2x1x256xf32>
    %472 = vector.shape_cast %471 : vector<2x1x256xf32> to vector<2x256xf32>
    %473 = vector.extract_strided_slice %470 {offsets = [0, 1, 0], sizes = [2, 1, 256], strides = [1, 1, 1]} : vector<2x2x256xf32> to vector<2x1x256xf32>
    %474 = vector.shape_cast %473 : vector<2x1x256xf32> to vector<2x256xf32>
    %475 = arith.maximumf %472, %474 : vector<2x256xf32>
    %476 = arith.truncf %475 : vector<2x256xf32> to vector<2x256xbf16>
    %c1_199 = arith.constant 1 : index
    %c5_200 = arith.constant 5 : index
    %c0_201 = arith.constant 0 : index
    %477 = vector.load %arg19[%c1_199, %c5_200, %c0_201] : memref<2x20x256xbf16, #tpu.memory_space<vmem>>, vector<1x2x256xbf16>
    %478 = vector.shape_cast %477 : vector<1x2x256xbf16> to vector<2x256xbf16>
    %479 = vector.shape_cast %476 : vector<2x256xbf16> to vector<1x2x256xbf16>
    tpu.vector_store %arg19[%c1_199, %c5_200, %c0_201], %479 {strides = array<i32>} : memref<2x20x256xbf16, #tpu.memory_space<vmem>>, vector<1x2x256xbf16>,
    %480 = vector.extract_strided_slice %440 {offsets = [36, 0], sizes = [4, 256], strides = [1, 1]} : vector<48x256xf32> to vector<4x256xf32>
    %481 = vector.extract_strided_slice %440 {offsets = [42, 0], sizes = [4, 256], strides = [1, 1]} : vector<48x256xf32> to vector<4x256xf32>
    %482 = arith.maximumf %480, %481 : vector<4x256xf32>
    %483 = vector.shape_cast %482 : vector<4x256xf32> to vector<2x2x256xf32>
    %484 = vector.extract_strided_slice %483 {offsets = [0, 0, 0], sizes = [2, 1, 256], strides = [1, 1, 1]} : vector<2x2x256xf32> to vector<2x1x256xf32>
    %485 = vector.shape_cast %484 : vector<2x1x256xf32> to vector<2x256xf32>
    %486 = vector.extract_strided_slice %483 {offsets = [0, 1, 0], sizes = [2, 1, 256], strides = [1, 1, 1]} : vector<2x2x256xf32> to vector<2x1x256xf32>
    %487 = vector.shape_cast %486 : vector<2x1x256xf32> to vector<2x256xf32>
    %488 = arith.maximumf %485, %487 : vector<2x256xf32>
    %489 = arith.truncf %488 : vector<2x256xf32> to vector<2x256xbf16>
    %c1_202 = arith.constant 1 : index
    %c9_203 = arith.constant 9 : index
    %c0_204 = arith.constant 0 : index
    %490 = vector.load %arg19[%c1_202, %c9_203, %c0_204] : memref<2x20x256xbf16, #tpu.memory_space<vmem>>, vector<1x2x256xbf16>
    %491 = vector.shape_cast %490 : vector<1x2x256xbf16> to vector<2x256xbf16>
    %492 = vector.shape_cast %489 : vector<2x256xbf16> to vector<1x2x256xbf16>
    tpu.vector_store %arg19[%c1_202, %c9_203, %c0_204], %492 {strides = array<i32>} : memref<2x20x256xbf16, #tpu.memory_space<vmem>>, vector<1x2x256xbf16>,
    %c0_205 = arith.constant 0 : index
    %c0_206 = arith.constant 0 : index
    %c0_207 = arith.constant 0 : index
    %493 = vector.load %arg19[%c0_205, %c0_206, %c0_207] : memref<2x20x256xbf16, #tpu.memory_space<vmem>>, vector<1x8x256xbf16>
    %494 = vector.shape_cast %493 : vector<1x8x256xbf16> to vector<8x256xbf16>
    %c1_208 = arith.constant 1 : index
    %c0_209 = arith.constant 0 : index
    %c0_210 = arith.constant 0 : index
    %495 = vector.load %arg19[%c1_208, %c0_209, %c0_210] : memref<2x20x256xbf16, #tpu.memory_space<vmem>>, vector<1x8x256xbf16>
    %496 = vector.shape_cast %495 : vector<1x8x256xbf16> to vector<8x256xbf16>
    %497 = tpu.concatenate %494, %496 in 0 : vector<8x256xbf16>, vector<8x256xbf16> -> vector<16x256xbf16>
    %c0_211 = arith.constant 0 : index
    %c1_212 = arith.constant 1 : index
    %c0_213 = arith.constant 0 : index
    %498 = vector.load %arg19[%c0_211, %c1_212, %c0_213] : memref<2x20x256xbf16, #tpu.memory_space<vmem>>, vector<1x8x256xbf16>
    %499 = vector.shape_cast %498 : vector<1x8x256xbf16> to vector<8x256xbf16>
    %c1_214 = arith.constant 1 : index
    %c1_215 = arith.constant 1 : index
    %c0_216 = arith.constant 0 : index
    %500 = vector.load %arg19[%c1_214, %c1_215, %c0_216] : memref<2x20x256xbf16, #tpu.memory_space<vmem>>, vector<1x8x256xbf16>
    %501 = vector.shape_cast %500 : vector<1x8x256xbf16> to vector<8x256xbf16>
    %502 = tpu.concatenate %499, %501 in 0 : vector<8x256xbf16>, vector<8x256xbf16> -> vector<16x256xbf16>
    %c0_217 = arith.constant 0 : index
    %c2_218 = arith.constant 2 : index
    %c0_219 = arith.constant 0 : index
    %503 = vector.load %arg19[%c0_217, %c2_218, %c0_219] : memref<2x20x256xbf16, #tpu.memory_space<vmem>>, vector<1x8x256xbf16>
    %504 = vector.shape_cast %503 : vector<1x8x256xbf16> to vector<8x256xbf16>
    %c1_220 = arith.constant 1 : index
    %c2_221 = arith.constant 2 : index
    %c0_222 = arith.constant 0 : index
    %505 = vector.load %arg19[%c1_220, %c2_221, %c0_222] : memref<2x20x256xbf16, #tpu.memory_space<vmem>>, vector<1x8x256xbf16>
    %506 = vector.shape_cast %505 : vector<1x8x256xbf16> to vector<8x256xbf16>
    %507 = tpu.concatenate %504, %506 in 0 : vector<8x256xbf16>, vector<8x256xbf16> -> vector<16x256xbf16>
    %c0_223 = arith.constant 0 : index
    %c4 = arith.constant 4 : index
    %c0_224 = arith.constant 0 : index
    %508 = vector.load %arg19[%c0_223, %c4, %c0_224] : memref<2x20x256xbf16, #tpu.memory_space<vmem>>, vector<1x8x256xbf16>
    %509 = vector.shape_cast %508 : vector<1x8x256xbf16> to vector<8x256xbf16>
    %c1_225 = arith.constant 1 : index
    %c4_226 = arith.constant 4 : index
    %c0_227 = arith.constant 0 : index
    %510 = vector.load %arg19[%c1_225, %c4_226, %c0_227] : memref<2x20x256xbf16, #tpu.memory_space<vmem>>, vector<1x8x256xbf16>
    %511 = vector.shape_cast %510 : vector<1x8x256xbf16> to vector<8x256xbf16>
    %512 = tpu.concatenate %509, %511 in 0 : vector<8x256xbf16>, vector<8x256xbf16> -> vector<16x256xbf16>
    %c0_228 = arith.constant 0 : index
    %c5_229 = arith.constant 5 : index
    %c0_230 = arith.constant 0 : index
    %513 = vector.load %arg19[%c0_228, %c5_229, %c0_230] : memref<2x20x256xbf16, #tpu.memory_space<vmem>>, vector<1x8x256xbf16>
    %514 = vector.shape_cast %513 : vector<1x8x256xbf16> to vector<8x256xbf16>
    %c1_231 = arith.constant 1 : index
    %c5_232 = arith.constant 5 : index
    %c0_233 = arith.constant 0 : index
    %515 = vector.load %arg19[%c1_231, %c5_232, %c0_233] : memref<2x20x256xbf16, #tpu.memory_space<vmem>>, vector<1x8x256xbf16>
    %516 = vector.shape_cast %515 : vector<1x8x256xbf16> to vector<8x256xbf16>
    %517 = tpu.concatenate %514, %516 in 0 : vector<8x256xbf16>, vector<8x256xbf16> -> vector<16x256xbf16>
    %c0_234 = arith.constant 0 : index
    %c6_235 = arith.constant 6 : index
    %c0_236 = arith.constant 0 : index
    %518 = vector.load %arg19[%c0_234, %c6_235, %c0_236] : memref<2x20x256xbf16, #tpu.memory_space<vmem>>, vector<1x8x256xbf16>
    %519 = vector.shape_cast %518 : vector<1x8x256xbf16> to vector<8x256xbf16>
    %c1_237 = arith.constant 1 : index
    %c6_238 = arith.constant 6 : index
    %c0_239 = arith.constant 0 : index
    %520 = vector.load %arg19[%c1_237, %c6_238, %c0_239] : memref<2x20x256xbf16, #tpu.memory_space<vmem>>, vector<1x8x256xbf16>
    %521 = vector.shape_cast %520 : vector<1x8x256xbf16> to vector<8x256xbf16>
    %522 = tpu.concatenate %519, %521 in 0 : vector<8x256xbf16>, vector<8x256xbf16> -> vector<16x256xbf16>
    %c0_240 = arith.constant 0 : index
    %c8_241 = arith.constant 8 : index
    %c0_242 = arith.constant 0 : index
    %523 = vector.load %arg19[%c0_240, %c8_241, %c0_242] : memref<2x20x256xbf16, #tpu.memory_space<vmem>>, vector<1x8x256xbf16>
    %524 = vector.shape_cast %523 : vector<1x8x256xbf16> to vector<8x256xbf16>
    %c1_243 = arith.constant 1 : index
    %c8_244 = arith.constant 8 : index
    %c0_245 = arith.constant 0 : index
    %525 = vector.load %arg19[%c1_243, %c8_244, %c0_245] : memref<2x20x256xbf16, #tpu.memory_space<vmem>>, vector<1x8x256xbf16>
    %526 = vector.shape_cast %525 : vector<1x8x256xbf16> to vector<8x256xbf16>
    %527 = tpu.concatenate %524, %526 in 0 : vector<8x256xbf16>, vector<8x256xbf16> -> vector<16x256xbf16>
    %c0_246 = arith.constant 0 : index
    %c9_247 = arith.constant 9 : index
    %c0_248 = arith.constant 0 : index
    %528 = vector.load %arg19[%c0_246, %c9_247, %c0_248] : memref<2x20x256xbf16, #tpu.memory_space<vmem>>, vector<1x8x256xbf16>
    %529 = vector.shape_cast %528 : vector<1x8x256xbf16> to vector<8x256xbf16>
    %c1_249 = arith.constant 1 : index
    %c9_250 = arith.constant 9 : index
    %c0_251 = arith.constant 0 : index
    %530 = vector.load %arg19[%c1_249, %c9_250, %c0_251] : memref<2x20x256xbf16, #tpu.memory_space<vmem>>, vector<1x8x256xbf16>
    %531 = vector.shape_cast %530 : vector<1x8x256xbf16> to vector<8x256xbf16>
    %532 = tpu.concatenate %529, %531 in 0 : vector<8x256xbf16>, vector<8x256xbf16> -> vector<16x256xbf16>
    %c0_252 = arith.constant 0 : index
    %c10_253 = arith.constant 10 : index
    %c0_254 = arith.constant 0 : index
    %533 = vector.load %arg19[%c0_252, %c10_253, %c0_254] : memref<2x20x256xbf16, #tpu.memory_space<vmem>>, vector<1x8x256xbf16>
    %534 = vector.shape_cast %533 : vector<1x8x256xbf16> to vector<8x256xbf16>
    %c1_255 = arith.constant 1 : index
    %c10_256 = arith.constant 10 : index
    %c0_257 = arith.constant 0 : index
    %535 = vector.load %arg19[%c1_255, %c10_256, %c0_257] : memref<2x20x256xbf16, #tpu.memory_space<vmem>>, vector<1x8x256xbf16>
    %536 = vector.shape_cast %535 : vector<1x8x256xbf16> to vector<8x256xbf16>
    %537 = tpu.concatenate %534, %536 in 0 : vector<8x256xbf16>, vector<8x256xbf16> -> vector<16x256xbf16>
    %538 = tpu.concatenate %497, %502, %507, %512, %517, %522, %527, %532, %537 in 1 : vector<16x256xbf16>, vector<16x256xbf16>, vector<16x256xbf16>, vector<16x256xbf16>, vector<16x256xbf16>, vector<16x256xbf16>, vector<16x256xbf16>, vector<16x256xbf16>, vector<16x256xbf16> -> vector<16x2304xbf16>
    %c0_258 = arith.constant 0 : index
    %c0_259 = arith.constant 0 : index
    %539 = vector.load %arg11[%c0_258, %c0_259] : memref<2304x512xbf16, #tpu.memory_space<vmem>>, vector<2304x512xbf16>
    %cst_260 = arith.constant dense<0.000000e+00> : vector<16x512xf32>
    %540 = tpu.matmul %538, %539, %cst_260 {dimension_numbers = #tpu.dot_dimension_numbers<[1], [0], [0], [1], [0, 0, 1, 1], [], []>} : vector<16x2304xbf16>, vector<2304x512xbf16>, vector<16x512xf32> -> vector<16x512xf32>
    %c0_261 = arith.constant 0 : index
    %c0_262 = arith.constant 0 : index
    %541 = vector.load %arg12[%c0_261, %c0_262] : memref<1x512xf32, #tpu.memory_space<vmem>>, vector<1x512xf32>
    %542 = vector.broadcast %541 : vector<1x512xf32> to vector<16x512xf32>
    %543 = arith.mulf %540, %542 : vector<16x512xf32>
    %c0_263 = arith.constant 0 : index
    %c0_264 = arith.constant 0 : index
    %544 = vector.load %arg13[%c0_263, %c0_264] : memref<1x512xf32, #tpu.memory_space<vmem>>, vector<1x512xf32>
    %545 = vector.broadcast %544 : vector<1x512xf32> to vector<16x512xf32>
    %546 = arith.addf %543, %545 : vector<16x512xf32>
    %cst_265 = arith.constant 0.000000e+00 : f32
    %547 = vector.broadcast %cst_265 : f32 to vector<16x512xf32>
    %548 = arith.maximumf %546, %547 : vector<16x512xf32>
    %549 = vector.extract_strided_slice %548 {offsets = [0, 0], sizes = [2, 512], strides = [1, 1]} : vector<16x512xf32> to vector<2x512xf32>
    %550 = vector.extract_strided_slice %548 {offsets = [4, 0], sizes = [2, 512], strides = [1, 1]} : vector<16x512xf32> to vector<2x512xf32>
    %551 = arith.maximumf %549, %550 : vector<2x512xf32>
    %552 = vector.shape_cast %551 : vector<2x512xf32> to vector<1x2x512xf32>
    %553 = vector.extract_strided_slice %552 {offsets = [0, 0, 0], sizes = [1, 1, 512], strides = [1, 1, 1]} : vector<1x2x512xf32> to vector<1x1x512xf32>
    %554 = vector.shape_cast %553 : vector<1x1x512xf32> to vector<1x512xf32>
    %555 = vector.extract_strided_slice %552 {offsets = [0, 1, 0], sizes = [1, 1, 512], strides = [1, 1, 1]} : vector<1x2x512xf32> to vector<1x1x512xf32>
    %556 = vector.shape_cast %555 : vector<1x1x512xf32> to vector<1x512xf32>
    %557 = arith.maximumf %554, %556 : vector<1x512xf32>
    %558 = vector.extract_strided_slice %548 {offsets = [8, 0], sizes = [2, 512], strides = [1, 1]} : vector<16x512xf32> to vector<2x512xf32>
    %559 = vector.extract_strided_slice %548 {offsets = [12, 0], sizes = [2, 512], strides = [1, 1]} : vector<16x512xf32> to vector<2x512xf32>
    %560 = arith.maximumf %558, %559 : vector<2x512xf32>
    %561 = vector.shape_cast %560 : vector<2x512xf32> to vector<1x2x512xf32>
    %562 = vector.extract_strided_slice %561 {offsets = [0, 0, 0], sizes = [1, 1, 512], strides = [1, 1, 1]} : vector<1x2x512xf32> to vector<1x1x512xf32>
    %563 = vector.shape_cast %562 : vector<1x1x512xf32> to vector<1x512xf32>
    %564 = vector.extract_strided_slice %561 {offsets = [0, 1, 0], sizes = [1, 1, 512], strides = [1, 1, 1]} : vector<1x2x512xf32> to vector<1x1x512xf32>
    %565 = vector.shape_cast %564 : vector<1x1x512xf32> to vector<1x512xf32>
    %566 = arith.maximumf %563, %565 : vector<1x512xf32>
    %cst_266 = arith.constant 0.000000e+00 : f32
    %567 = vector.broadcast %cst_266 : f32 to vector<1x12xf32>
    %568 = arith.truncf %557 : vector<1x512xf32> to vector<1x512xbf16>
    %c0_267 = arith.constant 0 : index
    %c0_268 = arith.constant 0 : index
    %569 = vector.load %arg14[%c0_267, %c0_268] : memref<512x12xbf16, #tpu.memory_space<vmem>>, vector<512x12xbf16>
    %cst_269 = arith.constant dense<0.000000e+00> : vector<1x12xf32>
    %570 = tpu.matmul %568, %569, %cst_269 {dimension_numbers = #tpu.dot_dimension_numbers<[1], [0], [0], [1], [0, 0, 1, 1], [], []>} : vector<1x512xbf16>, vector<512x12xbf16>, vector<1x12xf32> -> vector<1x12xf32>
    %571 = arith.addf %567, %570 : vector<1x12xf32>
    %cst_270 = arith.constant 0.000000e+00 : f32
    %572 = vector.broadcast %cst_270 : f32 to vector<1x12xf32>
    %573 = arith.truncf %566 : vector<1x512xf32> to vector<1x512xbf16>
    %c0_271 = arith.constant 0 : index
    %c0_272 = arith.constant 0 : index
    %574 = vector.load %arg14[%c0_271, %c0_272] : memref<512x12xbf16, #tpu.memory_space<vmem>>, vector<512x12xbf16>
    %cst_273 = arith.constant dense<0.000000e+00> : vector<1x12xf32>
    %575 = tpu.matmul %573, %574, %cst_273 {dimension_numbers = #tpu.dot_dimension_numbers<[1], [0], [0], [1], [0, 0, 1, 1], [], []>} : vector<1x512xbf16>, vector<512x12xbf16>, vector<1x12xf32> -> vector<1x12xf32>
    %576 = arith.addf %572, %575 : vector<1x12xf32>
    %577 = tpu.concatenate %571, %576 in 0 : vector<1x12xf32>, vector<1x12xf32> -> vector<2x12xf32>
    %c0_274 = arith.constant 0 : index
    %c0_275 = arith.constant 0 : index
    %578 = vector.load %arg15[%c0_274, %c0_275] : memref<1x12xf32, #tpu.memory_space<vmem>>, vector<1x12xf32>
    %579 = vector.broadcast %578 : vector<1x12xf32> to vector<2x12xf32>
    %580 = arith.addf %577, %579 : vector<2x12xf32>
    %c0_276 = arith.constant 0 : index
    %c0_277 = arith.constant 0 : index
    %581 = vector.load %arg16[%c0_276, %c0_277] : memref<2x12xf32, #tpu.memory_space<vmem>>, vector<2x12xf32>
    tpu.vector_store %arg16[%c0_276, %c0_277], %580 {strides = array<i32>} : memref<2x12xf32, #tpu.memory_space<vmem>>, vector<2x12xf32>,
    return
  }
  func.func @transform_0(%arg0: i32) -> (i32, i32) {
    %c0_i32 = arith.constant 0 : i32
    %c0_i32_0 = arith.constant 0 : i32
    %c0_i32_1 = arith.constant 0 : i32
    return %c0_i32, %c0_i32_0 : i32, i32
  }
  func.func @transform_1(%arg0: i32) -> (i32, i32) {
    %c0_i32 = arith.constant 0 : i32
    %c0_i32_0 = arith.constant 0 : i32
    %c0_i32_1 = arith.constant 0 : i32
    return %c0_i32, %c0_i32_0 : i32, i32
  }
  func.func @transform_2(%arg0: i32) -> (i32, i32) {
    %c0_i32 = arith.constant 0 : i32
    %c0_i32_0 = arith.constant 0 : i32
    %c0_i32_1 = arith.constant 0 : i32
    return %c0_i32, %c0_i32_0 : i32, i32
  }
  func.func @transform_3(%arg0: i32) -> (i32, i32) {
    %c0_i32 = arith.constant 0 : i32
    %c0_i32_0 = arith.constant 0 : i32
    %c0_i32_1 = arith.constant 0 : i32
    return %c0_i32, %c0_i32_0 : i32, i32
  }
  func.func @transform_4(%arg0: i32) -> (i32, i32) {
    %c0_i32 = arith.constant 0 : i32
    %c0_i32_0 = arith.constant 0 : i32
    %c0_i32_1 = arith.constant 0 : i32
    return %c0_i32, %c0_i32_0 : i32, i32
  }
  func.func @transform_5(%arg0: i32) -> (i32, i32) {
    %c0_i32 = arith.constant 0 : i32
    %c0_i32_0 = arith.constant 0 : i32
    %c0_i32_1 = arith.constant 0 : i32
    return %c0_i32, %c0_i32_0 : i32, i32
  }
  func.func @transform_6(%arg0: i32) -> (i32, i32) {
    %c0_i32 = arith.constant 0 : i32
    %c0_i32_0 = arith.constant 0 : i32
    %c0_i32_1 = arith.constant 0 : i32
    return %c0_i32, %c0_i32_0 : i32, i32
  }
  func.func @transform_7(%arg0: i32) -> (i32, i32) {
    %c0_i32 = arith.constant 0 : i32
    %c0_i32_0 = arith.constant 0 : i32
    %c0_i32_1 = arith.constant 0 : i32
    return %c0_i32, %c0_i32_0 : i32, i32
  }
  func.func @transform_8(%arg0: i32) -> (i32, i32) {
    %c0_i32 = arith.constant 0 : i32
    %c0_i32_0 = arith.constant 0 : i32
    %c0_i32_1 = arith.constant 0 : i32
    return %c0_i32, %c0_i32_0 : i32, i32
  }
  func.func @transform_9(%arg0: i32) -> (i32, i32) {
    %c0_i32 = arith.constant 0 : i32
    %c0_i32_0 = arith.constant 0 : i32
    %c0_i32_1 = arith.constant 0 : i32
    return %c0_i32, %c0_i32_0 : i32, i32
  }
  func.func @transform_10(%arg0: i32) -> (i32, i32) {
    %c0_i32 = arith.constant 0 : i32
    %c0_i32_0 = arith.constant 0 : i32
    %c0_i32_1 = arith.constant 0 : i32
    return %c0_i32, %c0_i32_0 : i32, i32
  }
  func.func @transform_11(%arg0: i32) -> (i32, i32) {
    %c0_i32 = arith.constant 0 : i32
    %c0_i32_0 = arith.constant 0 : i32
    %c0_i32_1 = arith.constant 0 : i32
    return %c0_i32, %c0_i32_0 : i32, i32
  }
  func.func @transform_12(%arg0: i32) -> (i32, i32) {
    %c0_i32 = arith.constant 0 : i32
    %c0_i32_0 = arith.constant 0 : i32
    %c0_i32_1 = arith.constant 0 : i32
    return %c0_i32, %c0_i32_0 : i32, i32
  }
  func.func @transform_13(%arg0: i32) -> (i32, i32) {
    %c0_i32 = arith.constant 0 : i32
    %c0_i32_0 = arith.constant 0 : i32
    %c0_i32_1 = arith.constant 0 : i32
    return %c0_i32, %c0_i32_0 : i32, i32
  }
  func.func @transform_14(%arg0: i32) -> (i32, i32) {
    %c0_i32 = arith.constant 0 : i32
    %c0_i32_0 = arith.constant 0 : i32
    %c0_i32_1 = arith.constant 0 : i32
    return %c0_i32, %c0_i32_0 : i32, i32
  }
  func.func @transform_15(%arg0: i32) -> (i32, i32) {
    %c0_i32 = arith.constant 0 : i32
    %c0_i32_0 = arith.constant 0 : i32
    %c0_i32_1 = arith.constant 0 : i32
    return %c0_i32, %c0_i32_0 : i32, i32
  }
}

</mosaic_0001>

<bundles_post_ra>
// kernel: teacher_net5_forward.1
= control target key start
LH: loop header
LB: loop body
LE: loop exit
PB: predicated region body
PF: predicated region fallthrough
CT: control target
= control target key end

     0   :  { %20 = vsyncpa [#allocation6], 0  ;;  %s19302_s0 = inlined_call_operand.vmem [shape: bf16[512,32], index: 0, kind: input, shape index: {}]   ;;  %s19303_s1 = inlined_call_operand.hbm [shape: bf16[32,128], index: 1, kind: input, shape index: {}]   ;;  %s19304_s2 = inlined_call_operand.hbm [shape: f32[1,128], index: 2, kind: input, shape index: {}]   ;;  %s19305_s3 = inlined_call_operand.hbm [shape: f32[1,128], index: 3, kind: input, shape index: {}]   ;;  %s19306_s4 = inlined_call_operand.hbm [shape: bf16[1152,128], index: 4, kind: input, shape index: {}]   ;;  %s19307_s5 = inlined_call_operand.hbm [shape: f32[1,128], index: 5, kind: input, shape index: {}]   ;;  %s19308_s6 = inlined_call_operand.hbm [shape: f32[1,128], index: 6, kind: input, shape index: {}]   ;;  %s19309_s7 = inlined_call_operand.hbm [shape: bf16[1152,256], index: 7, kind: input, shape index: {}]   ;;  %s19310_s8 = inlined_call_operand.hbm [shape: f32[1,256], index: 8, kind: input, shape index: {}]   ;;  %s19311_s9 = inlined_call_operand.hbm [shape: f32[1,256], index: 9, kind: input, shape index: {}]   ;;  %s19312_s10 = inlined_call_operand.hbm [shape: bf16[2304,512], index: 10, kind: input, shape index: {}]   ;;  %s19313_s11 = inlined_call_operand.hbm [shape: f32[1,512], index: 11, kind: input, shape index: {}]   ;;  %s19314_s12 = inlined_call_operand.hbm [shape: f32[1,512], index: 12, kind: input, shape index: {}]   ;;  %s19315_s13 = inlined_call_operand.vmem [shape: bf16[512,12], index: 13, kind: input, shape index: {}]   ;;  %s19316_s14 = inlined_call_operand.hbm [shape: f32[1,12], index: 14, kind: input, shape index: {}]   ;;  %s19317_s15 = inlined_call_operand.hbm [shape: f32[2,12], index: 15, kind: output, shape index: {}]  }
   0x1   :  { %21 = vsyncpa [#allocation9], 0 }
   0x2   :  { %22 = vsyncpa [#allocation12], 0 }
   0x3   :  { %23 = vsyncpa [#allocation15], 0 }
   0x4   :  { %24 = vsyncpa [#allocation18], 0 }
   0x5   :  { %25 = vsyncpa [#allocation21], 0 }
   0x6   :  { %26 = vsyncpa [#allocation24], 0 }
   0x7   :  { %27 = vsyncpa [#allocation7], 0  ;;  %s16715_s18 = smov [#allocation8]   ;;  %s16391_s22 = scalar_lea.hbm %s19304_s2, 16 }
   0x8   :  { %s48_s19 = sshll.u32 %s16715_s18, 4  ;;  %p16392_p0 = scmp.ne.s32.totalorder %s19304_s2, %s16391_s22  ;;  %s49_s19 = int_to_ptr.vmem [resolvable:$true] %s48_s19 }
   0x9   :  { %p16395_p1 = scmp.lt.u32.totalorder %s16391_s22, %s19304_s2 }
   0xb   :  { %p16397_p2 = pnand %p16395_p1, %p16392_p0 }
   0xd   :  { %16400 = shalt.err (!%p16397_p2)
}
   0xe   :  { %s16401_s27 = scalar_lea.vmem %s49_s19, 16  ;;  %s16405_s28 = scalar_lea.vmem %s49_s19, 32 }
   0xf   :  { %p16402_p3 = scmp.ne.s32.totalorder %s49_s19, %s16401_s27  ;;  %p16406_p4 = scmp.lt.s32.totalorder %s49_s19, %s49_s19 }
  0x10   :  { %p16407_p5 = scmp.lt.s32.totalorder %s16405_s28, %s16401_s27 }
  0x12   :  { %p16408_p6 = por %p16407_p5, %p16406_p4 }
  0x14   :  { %p16409_p7 = pnand %p16408_p6, %p16402_p3 }
  0x16   :  { %16412 = shalt.err (!%p16409_p7)
}
  0x17   :  { %51 = dma.hbm_to_vmem [thread:$0]  %s19304_s2, 16, %s49_s19, [#allocation9]  }
  0x18   :  { %s16716_s16 = smov [#allocation11]   ;;  %s16717_s18 = smov [#allocation14]  }
  0x19   :  { %s67_s17 = sshll.u32 %s16716_s16, 4  ;;  %s90_s20 = sshll.u32 %s16717_s18, 4  ;;  %s68_s17 = int_to_ptr.vmem [resolvable:$true] %s67_s17  ;;  %s91_s20 = int_to_ptr.vmem [resolvable:$true] %s90_s20 }
  0x1a   :  { %s16413_s23 = scalar_lea.hbm %s19306_s4, 9216 }
  0x1b   :  { %p16414_p8 = scmp.ne.s32.totalorder %s19306_s4, %s16413_s23  ;;  %p16417_p9 = scmp.lt.u32.totalorder %s16413_s23, %s19306_s4 }
  0x1d   :  { %p16419_p10 = pnand %p16417_p9, %p16414_p8 }
  0x1f   :  { %16422 = shalt.err (!%p16419_p10)
}
  0x20   :  { %s16423_s2 = scalar_lea.vmem %s68_s17, 9216  ;;  %p16428_p12 = scmp.lt.s32.totalorder %s68_s17, %s68_s17 }
  0x21   :  { %p16424_p11 = scmp.ne.s32.totalorder %s68_s17, %s16423_s2  ;;  %p16429_p13 = scmp.lt.s32.totalorder %s16423_s2, %s16423_s2 }
  0x23   :  { %p16430_p0 = por %p16429_p13, %p16428_p12 }
  0x25   :  { %p16431_p1 = pnand %p16430_p0, %p16424_p11 }
  0x27   :  { %16434 = shalt.err (!%p16431_p1)
}
  0x28   :  { %s16718_s19 = smov 64   ;;  %s16719_s28 = smov 4  }
  0x29   :  { %73 = dma.hbm_to_vmem [thread:$0]  %s19306_s4, 9216, %s68_s17, [#allocation12], %s16718_s19, %s16718_s19, %s16719_s28  }
  0x2a   :  { %s16435_s21 = scalar_lea.hbm %s19308_s6, 16 }
  0x2b   :  { %p16436_p2 = scmp.ne.s32.totalorder %s19308_s6, %s16435_s21  ;;  %p16439_p3 = scmp.lt.u32.totalorder %s16435_s21, %s19308_s6 }
  0x2d   :  { %p16441_p4 = pnand %p16439_p3, %p16436_p2 }
  0x2f   :  { %16444 = shalt.err (!%p16441_p4)
}
  0x30   :  { %s16445_s26 = scalar_lea.vmem %s91_s20, 16  ;;  %s16449_s27 = scalar_lea.vmem %s91_s20, 32 }
  0x31   :  { %p16446_p5 = scmp.ne.s32.totalorder %s91_s20, %s16445_s26  ;;  %p16450_p6 = scmp.lt.s32.totalorder %s91_s20, %s91_s20 }
  0x32   :  { %p16451_p7 = scmp.lt.s32.totalorder %s16449_s27, %s16445_s26 }
  0x34   :  { %p16452_p8 = por %p16451_p7, %p16450_p6 }
  0x36   :  { %p16453_p9 = pnand %p16452_p8, %p16446_p5 }
  0x38   :  { %16456 = shalt.err (!%p16453_p9)
}
  0x39   :  { %93 = dma.hbm_to_vmem [thread:$0]  %s19308_s6, 16, %s91_s20, [#allocation15]  }
  0x3a   :  { %s16720_s2 = smov [#allocation17]   ;;  %s16721_s30 = smov [#allocation20]  }
  0x3b   :  { %s112_s29 = sshll.u32 %s16720_s2, 4  ;;  %s131_s16 = sshll.u32 %s16721_s30, 4  ;;  %s113_s29 = int_to_ptr.vmem [resolvable:$true] %s112_s29  ;;  %s132_s16 = int_to_ptr.vmem [resolvable:$true] %s131_s16 }
  0x3c   :  { %s16457_s22 = scalar_lea.hbm %s19310_s8, 32 }
  0x3d   :  { %p16458_p10 = scmp.ne.s32.totalorder %s19310_s8, %s16457_s22  ;;  %p16461_p11 = scmp.lt.u32.totalorder %s16457_s22, %s19310_s8 }
  0x3f   :  { %p16463_p12 = pnand %p16461_p11, %p16458_p10 }
  0x41   :  { %16466 = shalt.err (!%p16463_p12)
}
  0x42   :  { %s16467_s6 = scalar_lea.vmem %s113_s29, 32  ;;  %p16472_p0 = scmp.lt.s32.totalorder %s113_s29, %s113_s29 }
  0x43   :  { %p16468_p13 = scmp.ne.s32.totalorder %s113_s29, %s16467_s6  ;;  %p16473_p1 = scmp.lt.s32.totalorder %s16467_s6, %s16467_s6 }
  0x45   :  { %p16474_p2 = por %p16473_p1, %p16472_p0 }
  0x47   :  { %p16475_p3 = pnand %p16474_p2, %p16468_p13 }
  0x49   :  { %16478 = shalt.err (!%p16475_p3)
}
  0x4a   :  { %115 = dma.hbm_to_vmem [thread:$0]  %s19310_s8, 32, %s113_s29, [#allocation18]  }
  0x4b   :  { %s16479_s2 = scalar_lea.hbm %s19312_s10, 73728 }
  0x4c   :  { %p16480_p4 = scmp.ne.s32.totalorder %s19312_s10, %s16479_s2  ;;  %p16483_p5 = scmp.lt.u32.totalorder %s16479_s2, %s19312_s10 }
  0x4e   :  { %p16485_p6 = pnand %p16483_p5, %p16480_p4 }
  0x50   :  { %16488 = shalt.err (!%p16485_p6)
}
  0x51   :  { %s16489_s23 = scalar_lea.vmem %s132_s16, 73728  ;;  %p16494_p8 = scmp.lt.s32.totalorder %s132_s16, %s132_s16 }
  0x52   :  { %p16490_p7 = scmp.ne.s32.totalorder %s132_s16, %s16489_s23  ;;  %p16495_p9 = scmp.lt.s32.totalorder %s16489_s23, %s16489_s23 }
  0x54   :  { %p16496_p10 = por %p16495_p9, %p16494_p8 }
  0x56   :  { %p16497_p11 = pnand %p16496_p10, %p16490_p7 }
  0x58   :  { %16500 = shalt.err (!%p16497_p11)
}
  0x59   :  { %s16722_s8 = smov 256   ;;  %s16723_s29 = smov 16  }
  0x5a   :  { %137 = dma.hbm_to_vmem [thread:$0]  %s19312_s10, 73728, %s132_s16, [#allocation21], %s16722_s8, %s16722_s8, %s16723_s29  }
  0x5b   :  { %s16724_s26 = smov [#allocation23]   ;;  %s16725_s20 = smov [#allocation5]  }
  0x5c   :  { %s154_s6 = sshll.u32 %s16724_s26, 4  ;;  %s35_s27 = sshll.u32 %s16725_s20, 4  ;;  %s155_s6 = int_to_ptr.vmem [resolvable:$true] %s154_s6  ;;  %s36_s27 = int_to_ptr.vmem [resolvable:$true] %s35_s27 }
  0x5d   :  { %s16501_s2 = scalar_lea.hbm %s19314_s12, 64 }
  0x5e   :  { %p16502_p12 = scmp.ne.s32.totalorder %s19314_s12, %s16501_s2  ;;  %p16505_p13 = scmp.lt.u32.totalorder %s16501_s2, %s19314_s12 }
  0x60   :  { %p16507_p0 = pnand %p16505_p13, %p16502_p12 }
  0x62   :  { %16510 = shalt.err (!%p16507_p0)
}
  0x63   :  { %s16511_s10 = scalar_lea.vmem %s155_s6, 64  ;;  %p16516_p2 = scmp.lt.s32.totalorder %s155_s6, %s155_s6 }
  0x64   :  { %p16512_p1 = scmp.ne.s32.totalorder %s155_s6, %s16511_s10  ;;  %p16517_p3 = scmp.lt.s32.totalorder %s16511_s10, %s16511_s10 }
  0x66   :  { %p16518_p4 = por %p16517_p3, %p16516_p2 }
  0x68   :  { %p16519_p5 = pnand %p16518_p4, %p16512_p1 }
  0x6a   :  { %16522 = shalt.err (!%p16519_p5)
}
  0x6b   :  { %157 = dma.hbm_to_vmem [thread:$0]  %s19314_s12, 64, %s155_s6, [#allocation24]  }
  0x6c   :  { %s16523_s24 = scalar_lea.hbm %s19303_s1, 256 }
  0x6d   :  { %p16524_p6 = scmp.ne.s32.totalorder %s19303_s1, %s16523_s24  ;;  %p16527_p7 = scmp.lt.u32.totalorder %s16523_s24, %s19303_s1 }
  0x6f   :  { %p16529_p8 = pnand %p16527_p7, %p16524_p6 }
  0x71   :  { %16532 = shalt.err (!%p16529_p8)
}
  0x72   :  { %s16533_s17 = scalar_lea.vmem %s36_s27, 256  ;;  %p16538_p10 = scmp.lt.s32.totalorder %s36_s27, %s36_s27 }
  0x73   :  { %p16534_p9 = scmp.ne.s32.totalorder %s36_s27, %s16533_s17  ;;  %p16539_p11 = scmp.lt.s32.totalorder %s16533_s17, %s16533_s17 }
  0x75   :  { %p16540_p12 = por %p16539_p11, %p16538_p10 }
  0x77   :  { %p16541_p13 = pnand %p16540_p12, %p16534_p9 }
  0x79   :  { %16544 = shalt.err (!%p16541_p13)
}
  0x7a   :  { %41 = dma.hbm_to_vmem [thread:$0]  %s19303_s1, 256, %s36_s27, [#allocation6], %s16718_s19, %s16718_s19, %s16719_s28  }
  0x7b   :  { %s16726_s2 = smov [#allocation10]   ;;  %s16727_s18 = smov [#allocation13]  }
  0x7c   :  { %s58_s30 = sshll.u32 %s16726_s2, 4  ;;  %s80_s21 = sshll.u32 %s16727_s18, 4  ;;  %s59_s30 = int_to_ptr.vmem [resolvable:$true] %s58_s30  ;;  %s81_s21 = int_to_ptr.vmem [resolvable:$true] %s80_s21 }
  0x7d   :  { %s16545_s16 = scalar_lea.hbm %s19305_s3, 16 }
  0x7e   :  { %p16546_p0 = scmp.ne.s32.totalorder %s19305_s3, %s16545_s16  ;;  %p16549_p1 = scmp.lt.u32.totalorder %s16545_s16, %s19305_s3 }
  0x80   :  { %p16551_p2 = pnand %p16549_p1, %p16546_p0 }
  0x82   :  { %16554 = shalt.err (!%p16551_p2)
}
  0x83   :  { %s16555_s1 = scalar_lea.vmem %s59_s30, 16  ;;  %s16559_s19 = scalar_lea.vmem %s59_s30, 32 }
  0x84   :  { %p16556_p3 = scmp.ne.s32.totalorder %s59_s30, %s16555_s1  ;;  %p16560_p4 = scmp.lt.s32.totalorder %s59_s30, %s59_s30 }
  0x85   :  { %p16561_p5 = scmp.lt.s32.totalorder %s16559_s19, %s16555_s1 }
  0x87   :  { %p16562_p6 = por %p16561_p5, %p16560_p4 }
  0x89   :  { %p16563_p7 = pnand %p16562_p6, %p16556_p3 }
  0x8b   :  { %16566 = shalt.err (!%p16563_p7)
}
  0x8c   :  { %61 = dma.hbm_to_vmem [thread:$0]  %s19305_s3, 16, %s59_s30, [#allocation9]  }
  0x8d   :  { %s16567_s20 = scalar_lea.hbm %s19307_s5, 16 }
  0x8e   :  { %p16568_p8 = scmp.ne.s32.totalorder %s19307_s5, %s16567_s20  ;;  %p16571_p9 = scmp.lt.u32.totalorder %s16567_s20, %s19307_s5 }
  0x90   :  { %p16573_p10 = pnand %p16571_p9, %p16568_p8 }
  0x92   :  { %16576 = shalt.err (!%p16573_p10)
}
  0x93   :  { %s16577_s2 = scalar_lea.vmem %s81_s21, 16  ;;  %s16581_s18 = scalar_lea.vmem %s81_s21, 32 }
  0x94   :  { %p16578_p11 = scmp.ne.s32.totalorder %s81_s21, %s16577_s2  ;;  %p16582_p12 = scmp.lt.s32.totalorder %s81_s21, %s81_s21 }
  0x95   :  { %p16583_p13 = scmp.lt.s32.totalorder %s16581_s18, %s16577_s2 }
  0x97   :  { %p16584_p0 = por %p16583_p13, %p16582_p12 }
  0x99   :  { %p16585_p1 = pnand %p16584_p0, %p16578_p11 }
  0x9b   :  { %16588 = shalt.err (!%p16585_p1)
}
  0x9c   :  { %83 = dma.hbm_to_vmem [thread:$0]  %s19307_s5, 16, %s81_s21, [#allocation12]  }
  0x9d   :  { %s16728_s22 = smov [#allocation16]   ;;  %s16589_s8 = scalar_lea.hbm %s19309_s7, 18432 }
  0x9e   :  { %s99_s10 = sshll.u32 %s16728_s22, 4  ;;  %p16590_p2 = scmp.ne.s32.totalorder %s19309_s7, %s16589_s8  ;;  %s100_s10 = int_to_ptr.vmem [resolvable:$true] %s99_s10 }
  0x9f   :  { %p16593_p3 = scmp.lt.u32.totalorder %s16589_s8, %s19309_s7 }
  0xa1   :  { %p16595_p4 = pnand %p16593_p3, %p16590_p2 }
  0xa3   :  { %16598 = shalt.err (!%p16595_p4)
}
  0xa4   :  { %s16599_s28 = scalar_lea.vmem %s100_s10, 18432  ;;  %p16604_p6 = scmp.lt.s32.totalorder %s100_s10, %s100_s10 }
  0xa5   :  { %p16600_p5 = scmp.ne.s32.totalorder %s100_s10, %s16599_s28  ;;  %p16605_p7 = scmp.lt.s32.totalorder %s16599_s28, %s16599_s28 }
  0xa7   :  { %p16606_p8 = por %p16605_p7, %p16604_p6 }
  0xa9   :  { %p16607_p9 = pnand %p16606_p8, %p16600_p5 }
  0xab   :  { %16610 = shalt.err (!%p16607_p9)
}
  0xac   :  { %s16729_s5 = smov 128   ;;  %s16730_s21 = smov 8  }
  0xad   :  { %105 = dma.hbm_to_vmem [thread:$0]  %s19309_s7, 18432, %s100_s10, [#allocation15], %s16729_s5, %s16729_s5, %s16730_s21  }
  0xae   :  { %s16731_s26 = smov [#allocation19]   ;;  %s16732_s4 = smov [#allocation22]  }
  0xaf   :  { %s122_s20 = sshll.u32 %s16731_s26, 4  ;;  %s144_s17 = sshll.u32 %s16732_s4, 4  ;;  %s123_s20 = int_to_ptr.vmem [resolvable:$true] %s122_s20  ;;  %s145_s17 = int_to_ptr.vmem [resolvable:$true] %s144_s17 }
  0xb0   :  { %s16611_s2 = scalar_lea.hbm %s19311_s9, 32 }
  0xb1   :  { %p16612_p10 = scmp.ne.s32.totalorder %s19311_s9, %s16611_s2  ;;  %p16615_p11 = scmp.lt.u32.totalorder %s16611_s2, %s19311_s9 }
  0xb3   :  { %p16617_p12 = pnand %p16615_p11, %p16612_p10 }
  0xb5   :  { %16620 = shalt.err (!%p16617_p12)
}
  0xb6   :  { %s16621_s7 = scalar_lea.vmem %s123_s20, 32  ;;  %p16626_p0 = scmp.lt.s32.totalorder %s123_s20, %s123_s20 }
  0xb7   :  { %p16622_p13 = scmp.ne.s32.totalorder %s123_s20, %s16621_s7  ;;  %p16627_p1 = scmp.lt.s32.totalorder %s16621_s7, %s16621_s7 }
  0xb9   :  { %p16628_p2 = por %p16627_p1, %p16626_p0 }
  0xbb   :  { %p16629_p3 = pnand %p16628_p2, %p16622_p13 }
  0xbd   :  { %16632 = shalt.err (!%p16629_p3)
}
  0xbe   :  { %125 = dma.hbm_to_vmem [thread:$0]  %s19311_s9, 32, %s123_s20, [#allocation18]  }
  0xbf   :  { %s16633_s29 = scalar_lea.hbm %s19313_s11, 64 }
  0xc0   :  { %p16634_p4 = scmp.ne.s32.totalorder %s19313_s11, %s16633_s29  ;;  %p16637_p5 = scmp.lt.u32.totalorder %s16633_s29, %s19313_s11 }
  0xc2   :  { %p16639_p6 = pnand %p16637_p5, %p16634_p4 }
  0xc4   :  { %16642 = shalt.err (!%p16639_p6)
}
  0xc5   :  { %s16643_s5 = scalar_lea.vmem %s145_s17, 64  ;;  %p16648_p8 = scmp.lt.s32.totalorder %s145_s17, %s145_s17 }
  0xc6   :  { %p16644_p7 = scmp.ne.s32.totalorder %s145_s17, %s16643_s5  ;;  %p16649_p9 = scmp.lt.s32.totalorder %s16643_s5, %s16643_s5 }
  0xc8   :  { %p16650_p10 = por %p16649_p9, %p16648_p8 }
  0xca   :  { %p16651_p11 = pnand %p16650_p10, %p16644_p7 }
  0xcc   :  { %16654 = shalt.err (!%p16651_p11)
}
  0xcd   :  { %147 = dma.hbm_to_vmem [thread:$0]  %s19313_s11, 64, %s145_s17, [#allocation21]  }
  0xce   :  { %s16733_s27 = smov [#allocation25]   ;;  %s16655_s4 = scalar_lea.hbm %s19316_s14, 16 }
  0xcf   :  { %s166_s25 = sshll.u32 %s16733_s27, 4  ;;  %p16656_p12 = scmp.ne.s32.totalorder %s19316_s14, %s16655_s4  ;;  %s167_s25 = int_to_ptr.vmem [resolvable:$true] %s166_s25 }
  0xd0   :  { %p16659_p13 = scmp.lt.u32.totalorder %s16655_s4, %s19316_s14 }
  0xd2   :  { %p16661_p0 = pnand %p16659_p13, %p16656_p12 }
  0xd4   :  { %16664 = shalt.err (!%p16661_p0)
}
  0xd5   :  { %s16665_s3 = scalar_lea.vmem %s167_s25, 16  ;;  %s16669_s11 = scalar_lea.vmem %s167_s25, 32 }
  0xd6   :  { %p16666_p1 = scmp.ne.s32.totalorder %s167_s25, %s16665_s3  ;;  %p16670_p2 = scmp.lt.s32.totalorder %s167_s25, %s167_s25 }
  0xd7   :  { %p16671_p3 = scmp.lt.s32.totalorder %s16669_s11, %s16665_s3 }
  0xd9   :  { %p16672_p4 = por %p16671_p3, %p16670_p2 }
  0xdb   :  { %p16673_p5 = pnand %p16672_p4, %p16666_p1 }
  0xdd   :  { %16676 = shalt.err (!%p16673_p5)
}
  0xde   :  { %169 = dma.hbm_to_vmem [thread:$0]  %s19316_s14, 16, %s167_s25, [#allocation24]  }
  0xdf   :  { %16699 = dma.done.wait [#allocation6], 256  }
  0xe0   :  { %16700 = vsyncadd [#allocation6], 4294967040 }
  0xe1   :  { %16701 = dma.done.wait [#allocation9], 32  }
  0xe2   :  { %16702 = vsyncadd [#allocation9], 4294967264 }
  0xe3   :  { %16703 = dma.done.wait [#allocation12], 9232  }
  0xe4   :  { %16704 = vsyncadd [#allocation12], 4294958064 }
  0xe5   :  { %16705 = dma.done.wait [#allocation15], 18448  }
  0xe6   :  { %16706 = vsyncadd [#allocation15], 4294948848 }
  0xe7   :  { %16707 = dma.done.wait [#allocation18], 64  }
  0xe8   :  { %16708 = vsyncadd [#allocation18], 4294967232 }
  0xe9   :  { %16709 = dma.done.wait [#allocation21], 73792  }
  0xea   :  { %16710 = vsyncadd [#allocation21], 4294893504 }
  0xeb   :  { %16711 = dma.done.wait [#allocation24], 80  }
  0xec   :  { %16712 = vsyncadd [#allocation24], 4294967216  ;;  %v16734_v0 = vmov 0   ;;  %v15058_v1 = vld [vmem:[#allocation5] sm:$0xff]   ;;  %v15059_v2 = vld [vmem:[#allocation5 + $0x8] sm:$0xff]   ;;  %vm496_vm0 = vcmask 261120  }
  0xed   :  { %210 = vst [vmem:[#allocation2] sm:$0xf] %v16734_v0  ;;  %211 = vst [vmem:[#allocation2 + $0x4] sm:$0xf] %v16734_v0  ;;  %14820 = vmatprep.subr.bf16.mxu0 %v15058_v1  ;;  %v15060_v3 = vld [vmem:[%s19302_s0] sm:$0xff]   ;;  %v15061_v4 = vld [vmem:[%s19302_s0 + $0x8] sm:$0xff]  }
  0xee   :  { %212 = vst [vmem:[#allocation2 + $0x8] sm:$0xf] %v16734_v0  ;;  %213 = vst [vmem:[#allocation2 + $0xc] sm:$0xf] %v16734_v0  ;;  %14821 = vmatpush3.bf16.msra.mxu0 %v15058_v1  ;;  %14824 = vmatprep.mubr.msk.bf16.mxu0 %vm496_vm0, %v15060_v3  ;;  %v15062_v5 = vld [vmem:[%s19302_s0 + $0x10] sm:$0xff]   ;;  %v15063_v6 = vld [vmem:[%s19302_s0 + $0x18] sm:$0xff]   ;;  %v1096_v3 = vlaneseq }
  0xef   :  { %214 = vst [vmem:[#allocation2 + $0x10] sm:$0xf] %v16734_v0  ;;  %215 = vst [vmem:[#allocation2 + $0x14] sm:$0xf] %v16734_v0  ;;  %14822 = vmatprep.subr.bf16.mxu0 %v15059_v2  ;;  %v15064_v7 = vld [vmem:[%s19302_s0 + $0x20] sm:$0xff]   ;;  %v15065_v8 = vld [vmem:[%s19302_s0 + $0x28] sm:$0xff]  }
  0xf0   :  { %216 = vst [vmem:[#allocation2 + $0x18] sm:$0xf] %v16734_v0  ;;  %217 = vst [vmem:[#allocation2 + $0x1c] sm:$0xf] %v16734_v0  ;;  %v15066_v9 = vld [vmem:[%s19302_s0 + $0x30] sm:$0xff]   ;;  %v15067_v10 = vld [vmem:[%s19302_s0 + $0x38] sm:$0xff]  }
  0xf1   :  { %218 = vst [vmem:[#allocation2 + $0x20] sm:$0xf] %v16734_v0  ;;  %219 = vst [vmem:[#allocation2 + $0x24] sm:$0xf] %v16734_v0  ;;  %v15068_v11 = vld [vmem:[%s19302_s0 + $0x40] sm:$0xff]   ;;  %v15069_v14 = vld [vmem:[%s19302_s0 + $0x48] sm:$0xff]  }
  0xf2   :  { %220 = vst [vmem:[#allocation2 + $0x28] sm:$0xf] %v16734_v0  ;;  %221 = vst [vmem:[#allocation2 + $0x2c] sm:$0xf] %v16734_v0  ;;  %14823 = vmatpush3.bf16.msra.mxu0 %v15059_v2  ;;  %v15092_v12 = vld [vmem:[#allocation11 + $0x40] sm:$0xff]   ;;  %v15094_v15 = vld [vmem:[#allocation11 + $0x48] sm:$0xff]  }
  0xf3   :  { %222 = vst [vmem:[#allocation2 + $0x30] sm:$0xf] %v16734_v0  ;;  %224 = vst [vmem:[#allocation2 + $0x38] sm:$0xf] %v16734_v0  ;;  %v15093_v13 = vld [vmem:[#allocation11] sm:$0xff]   ;;  %14410 = vmatprep.subr.bf16.mxu0 %v15092_v12  ;;  %v15070_v16 = vld [vmem:[%s19302_s0 + $0x50] sm:$0xff]  }
  0xf4   :  { %225 = vst [vmem:[#allocation2 + $0x3c] sm:$0xf] %v16734_v0  ;;  %226 = vst [vmem:[#allocation2 + $0x40] sm:$0xf] %v16734_v0  ;;  %v15095_v17 = vld [vmem:[#allocation11 + $0x8] sm:$0xff]   ;;  %v15071_v18 = vld [vmem:[%s19302_s0 + $0x58] sm:$0xff]  }
  0xf5   :  { %227 = vst [vmem:[#allocation2 + $0x44] sm:$0xf] %v16734_v0  ;;  %228 = vst [vmem:[#allocation2 + $0x48] sm:$0xf] %v16734_v0  ;;  %14825 = vmatmul.mubr.msk.bf16.vlgmr.msra.gmra.mrb[0].mxu0 %vm496_vm0, %v15061_v4  ;;  %v15072_v19 = vld [vmem:[%s19302_s0 + $0x60] sm:$0xff]   ;;  %v15073_v20 = vld [vmem:[%s19302_s0 + $0x68] sm:$0xff]  }
  0xf6   :  { %229 = vst [vmem:[#allocation2 + $0x4c] sm:$0xf] %v16734_v0  ;;  %230 = vst [vmem:[#allocation2 + $0x50] sm:$0xf] %v16734_v0  ;;  %14828 = vmatprep.mubr.msk.bf16.mxu0 %vm496_vm0, %v15062_v5  ;;  %14411 = vmatpush3.bf16.msra.mxu0 %v15093_v13  ;;  %v15074_v21 = vld [vmem:[%s19302_s0 + $0x70] sm:$0xff]   ;;  %v15075_v22 = vld [vmem:[%s19302_s0 + $0x78] sm:$0xff]  }
  0xf7   :  { %231 = vst [vmem:[#allocation2 + $0x54] sm:$0xf] %v16734_v0  ;;  %232 = vst [vmem:[#allocation2 + $0x58] sm:$0xf] %v16734_v0  ;;  %14412 = vmatprep.subr.bf16.mxu0 %v15094_v15  ;;  %v15076_v23 = vld [vmem:[%s19302_s0 + $0x80] sm:$0xff]   ;;  %v15077_v24 = vld [vmem:[%s19302_s0 + $0x88] sm:$0xff]  }
  0xf8   :  { %233 = vst [vmem:[#allocation2 + $0x5c] sm:$0xf] %v16734_v0  ;;  %234 = vst [vmem:[#allocation2 + $0x60] sm:$0xf] %v16734_v0  ;;  %v15078_v25 = vld [vmem:[%s19302_s0 + $0x90] sm:$0xff]   ;;  %v15079_v26 = vld [vmem:[%s19302_s0 + $0x98] sm:$0xff]  }
  0xf9   :  { %235 = vst [vmem:[#allocation2 + $0x64] sm:$0xf] %v16734_v0  ;;  %236 = vst [vmem:[#allocation2 + $0x68] sm:$0xf] %v16734_v0  ;;  %v15080_v27 = vld [vmem:[%s19302_s0 + $0xa0] sm:$0xff]   ;;  %v15081_v28 = vld [vmem:[%s19302_s0 + $0xa8] sm:$0xff]  }
  0xfa   :  { %238 = vst [vmem:[#allocation3] sm:$0xf] %v16734_v0  ;;  %239 = vst [vmem:[#allocation3 + $0x4] sm:$0xf] %v16734_v0  ;;  %14413 = vmatpush3.bf16.msra.mxu0 %v15095_v17  ;;  %v15082_v29 = vld [vmem:[%s19302_s0 + $0xb0] sm:$0xff]   ;;  %v15083_v30 = vld [vmem:[%s19302_s0 + $0xb8] sm:$0xff]  }
  0xfb   :  { %240 = vst [vmem:[#allocation3 + $0x8] sm:$0xf] %v16734_v0  ;;  %241 = vst [vmem:[#allocation3 + $0xc] sm:$0xf] %v16734_v0  ;;  %v15084_v31 = vld [vmem:[%s19302_s0 + $0xc0] sm:$0xff]   ;;  %v15085_v32 = vld [vmem:[%s19302_s0 + $0xc8] sm:$0xff]  }
  0xfc   :  { %242 = vst [vmem:[#allocation3 + $0x10] sm:$0xf] %v16734_v0  ;;  %244 = vst [vmem:[#allocation3 + $0x18] sm:$0xf] %v16734_v0  ;;  %v15086_v33 = vld [vmem:[%s19302_s0 + $0xd0] sm:$0xff]   ;;  %v15087_v34 = vld [vmem:[%s19302_s0 + $0xd8] sm:$0xff]  }
  0xfd   :  { %245 = vst [vmem:[#allocation3 + $0x1c] sm:$0xf] %v16734_v0  ;;  %246 = vst [vmem:[#allocation3 + $0x20] sm:$0xf] %v16734_v0  ;;  %14829 = vmatmul.mubr.msk.bf16.gmra.mrb[4].mxu0 %vm496_vm0, %v15063_v6  ;;  %v15088_v35 = vld [vmem:[%s19302_s0 + $0xe0] sm:$0xff]   ;;  %v15089_v36 = vld [vmem:[%s19302_s0 + $0xe8] sm:$0xff]  }
  0xfe   :  { %247 = vst [vmem:[#allocation3 + $0x24] sm:$0xf] %v16734_v0  ;;  %248 = vst [vmem:[#allocation3 + $0x28] sm:$0xf] %v16734_v0  ;;  %14832 = vmatprep.mubr.msk.bf16.mxu0 %vm496_vm0, %v15064_v7  ;;  %v15090_v37 = vld [vmem:[%s19302_s0 + $0xf0] sm:$0xff]   ;;  %v15091_v40 = vld [vmem:[%s19302_s0 + $0xf8] sm:$0xff]  }
  0xff   :  { %250 = vst [vmem:[#allocation4] sm:$0xff] %v16734_v0  ;;  %251 = vst [vmem:[#allocation4 + $0x8] sm:$0xff] %v16734_v0  ;;  %v15096_v38 = vld [vmem:[#allocation11 + $0x50] sm:$0xff]   ;;  %v15098_v41 = vld [vmem:[#allocation11 + $0x58] sm:$0xff]   ;;  %v16735_v1 = vmov 1983009808  }
 0x100   :  { %252 = vst [vmem:[#allocation4 + $0x10] sm:$0x33] %v16734_v0  ;;  %253 = vst [vmem:[#allocation4 + $0x18] sm:$0xff] %v16734_v0  ;;  %v15097_v39 = vld [vmem:[#allocation11 + $0x10] sm:$0xff]   ;;  %14414 = vmatprep.subr.bf16.mxu0 %v15096_v38  ;;  %v15099_v42 = vld [vmem:[#allocation11 + $0x18] sm:$0xff]   ;;  %v1094_v2 = vunpack.c.l.s4 %v16735_v1  ;;  %vm19321_vm1 = vcmask 1043457  }
 0x101   :  { %254 = vst [vmem:[#allocation4 + $0x20] sm:$0xff] %v16734_v0  ;;  %255 = vst [vmem:[#allocation4 + $0x28] sm:$0x33] %v16734_v0  ;;  %14415 = vmatpush3.bf16.msra.mxu0 %v15097_v39  ;;  %v15100_v43 = vld [vmem:[#allocation11 + $0xc0] sm:$0xff]   ;;  %v15104_v45 = vld [vmem:[#allocation11 + $0xc8] sm:$0xff]   ;;  %vm19320_vm3 = vcmask 1041408  }
 0x102   :  { %14416 = vmatprep.subr.bf16.mxu0 %v15098_v41  ;;  %14486 = vmatprep.subr.bf16.mxu1 %v15100_v43  ;;  %v15102_v44 = vld [vmem:[#allocation11 + $0x80] sm:$0xff]   ;;  %v15105_v46 = vld [vmem:[#allocation11 + $0x88] sm:$0xff]   ;;  %v15106_v48 = vld [vmem:[#allocation11 + $0xd0] sm:$0xff]   ;;  %vm1230_vm2 = vsmask.f32 7942  ;;  %vm1208_vm5 = vcmask 1044484  }
 0x103   :  { %14487 = vmatpush3.bf16.msra.mxu1 %v15102_v44  ;;  %v15101_v47 = vld [vmem:[#allocation11 + $0x60] sm:$0xff]   ;;  %v15107_v50 = vld [vmem:[#allocation11 + $0x90] sm:$0xff]   ;;  %v15108_v51 = vld [vmem:[#allocation11 + $0xd8] sm:$0xff]   ;;  %vm19319_vm4 = vsmask.f32 1280  ;;  %vm1211_vm6 = vcmask 1045509  }
 0x104   :  { %14488 = vmatprep.subr.bf16.mxu1 %v15104_v45  ;;  %v15103_v49 = vld [vmem:[#allocation11 + $0x20] sm:$0xff]   ;;  %v15109_v52 = vld [vmem:[#allocation11 + $0x68] sm:$0xff]   ;;  %v15110_v53 = vld [vmem:[#allocation11 + $0x98] sm:$0xff]   ;;  %vm1214_vm7 = vcmask 1046534   ;;  %vm19329_vm8 = vcmask 1047559   ;;  %vm19323_vm9 = vcmask 1041409  }
 0x105   :  { %14833 = vmatmul.mubr.msk.bf16.gmra.mrb[8].mxu0 %vm496_vm0, %v15065_v8  ;;  %v15111_v54 = vld [vmem:[#allocation11 + $0x28] sm:$0xff]   ;;  %v15112_v55 = vld [vmem:[#allocation11 + $0xe0] sm:$0xff]   ;;  %v15113_v56 = vld [vmem:[#allocation11 + $0x70] sm:$0xff]   ;;  %v1095_v8 = vunpack.c.0.s8 %v1094_v2  ;;  %vm1223_vm10 = vcmask 1042434   ;;  %vm19318_vm13 = vcmask 1043458  }
 0x106   :  { %14836 = vmatprep.mubr.msk.bf16.mxu0 %vm496_vm0, %v15066_v9  ;;  %14417 = vmatpush3.bf16.msra.mxu0 %v15099_v42  ;;  %v15114_v57 = vld [vmem:[#allocation11 + $0xa0] sm:$0xff]   ;;  %v15115_v58 = vld [vmem:[#allocation11 + $0x30] sm:$0xff]   ;;  %v15116_v59 = vld [vmem:[#allocation11 + $0xe8] sm:$0xff]   ;;  %v17113_v9 = vshrl.u32 %v1096_v3, 7  ;;  %vm1378_vm14 = vsmask.f32 7946 }
 0x107   :  { %14489 = vmatpush3.bf16.msra.mxu1 %v15105_v46  ;;  %14418 = vmatprep.subr.bf16.mxu0 %v15101_v47  ;;  %v15117_v60 = vld [vmem:[#allocation11 + $0x78] sm:$0xff]   ;;  %v15118_v61 = vld [vmem:[#allocation11 + $0xa8] sm:$0xff]   ;;  %vm17149_vm11 = vmand %vm19321_vm1, %vm1230_vm2  ;;  %vm1525_vm2 = vsmask.f32 7950 }
 0x108   :  { %14490 = vmatprep.subr.bf16.mxu1 %v15106_v48  ;;  %v15119_v62 = vld [vmem:[#allocation11 + $0x38] sm:$0xff]   ;;  %19350 = vst [vmem:[#allocation35_spill] sm:$0xff] %v17113_v9  ;;  %vm17157_vm12 = vmand %vm19320_vm3, %vm19319_vm4  ;;  %vm19324_vm4 = vcmask 1040384   ;;  %vm19327_vm3 = vsmask.f32 256 }
 0x109   :  { %v17107_v63 = vld [vmem:[#allocation8] ss:$0 sm:$0xff]  ;;  %v17109_v0 = vld [vmem:[#allocation10] ss:$0 sm:$0xff]  ;;  %vm17209_vm15 = vmand %vm19318_vm13, %vm1378_vm14  ;;  %vm19322_vm13 = vsmask.f32 3328 }
 0x10a   :  { %14419 = vmatpush3.bf16.msra.mxu0 %v15103_v49 }
 0x10b   :  { %14491 = vmatpush3.bf16.msra.mxu1 %v15107_v50  ;;  %14420 = vmatprep.subr.bf16.mxu0 %v15109_v52 }
 0x10c   :  { %14492 = vmatprep.subr.bf16.mxu1 %v15108_v51  ;;  %v15122_v51 = vld [vmem:[#allocation11 + $0xf0] sm:$0xff]  }
 0x10d   :  { %14837 = vmatmul.mubr.msk.bf16.gmra.mrb[12].mxu0 %vm496_vm0, %v15067_v10 }
 0x10e   :  { %14840 = vmatprep.mubr.msk.bf16.mxu0 %vm496_vm0, %v15068_v11  ;;  %14421 = vmatpush3.bf16.msra.mxu0 %v15111_v54 }
 0x10f   :  { %14493 = vmatpush3.bf16.msra.mxu1 %v15110_v53  ;;  %14422 = vmatprep.subr.bf16.mxu0 %v15113_v56 }
 0x110   :  { %14494 = vmatprep.subr.bf16.mxu1 %v15112_v55 }
 0x112   :  { %14423 = vmatpush3.bf16.msra.mxu0 %v15115_v58 }
 0x113   :  { %14495 = vmatpush3.bf16.msra.mxu1 %v15114_v57  ;;  %14424 = vmatprep.subr.bf16.mxu0 %v15117_v60  ;;  %v15123_v57 = vld [vmem:[#allocation11 + $0xb0] sm:$0xff]  }
 0x114   :  { %14496 = vmatprep.subr.bf16.mxu1 %v15116_v59 }
 0x115   :  { %14841 = vmatmul.mubr.msk.bf16.gmra.mrb[16].mxu0 %vm496_vm0, %v15069_v14 }
 0x116   :  { %14844 = vmatprep.mubr.msk.bf16.mxu0 %vm496_vm0, %v15070_v16  ;;  %14425 = vmatpush3.bf16.msra.mxu0 %v15119_v62 }
 0x117   :  { %14497 = vmatpush3.bf16.msra.mxu1 %v15118_v61 }
 0x118   :  { %14498 = vmatprep.subr.bf16.mxu1 %v15122_v51 }
 0x11b   :  { %14499 = vmatpush3.bf16.msra.mxu1 %v15123_v57 }
 0x11d   :  { %14845 = vmatmul.mubr.msk.bf16.gmra.mrb[20].mxu0 %vm496_vm0, %v15071_v18 }
 0x11e   :  { %14848 = vmatprep.mubr.msk.bf16.mxu0 %vm496_vm0, %v15072_v19  ;;  %v17121_v19 = vsub.s32 %v1095_v8, %v17113_v9 }
 0x125   :  { %14849 = vmatmul.mubr.msk.bf16.gmra.mrb[24].mxu0 %vm496_vm0, %v15073_v20 }
 0x126   :  { %14852 = vmatprep.mubr.msk.bf16.mxu0 %vm496_vm0, %v15074_v21 }
 0x12d   :  { %14853 = vmatmul.mubr.msk.bf16.gmra.mrb[28].mxu0 %vm496_vm0, %v15075_v22 }
 0x12e   :  { %14856 = vmatprep.mubr.msk.bf16.mxu0 %vm496_vm0, %v15076_v23 }
 0x135   :  { %14857 = vmatmul.mubr.msk.bf16.gmra.mrb[32].mxu0 %vm496_vm0, %v15077_v24 }
 0x136   :  { %14860 = vmatprep.mubr.msk.bf16.mxu0 %vm496_vm0, %v15078_v25 }
 0x13d   :  { %14861 = vmatmul.mubr.msk.bf16.gmra.mrb[36].mxu0 %vm496_vm0, %v15079_v26 }
 0x13e   :  { %14864 = vmatprep.mubr.msk.bf16.mxu0 %vm496_vm0, %v15080_v27 }
 0x145   :  { %14865 = vmatmul.mubr.msk.bf16.gmra.mrb[40].mxu0 %vm496_vm0, %v15081_v28 }
 0x146   :  { %14868 = vmatprep.mubr.msk.bf16.mxu0 %vm496_vm0, %v15082_v29 }
 0x14d   :  { %14869 = vmatmul.mubr.msk.bf16.gmra.mrb[44].mxu0 %vm496_vm0, %v15083_v30 }
 0x14e   :  { %14872 = vmatprep.mubr.msk.bf16.mxu0 %vm496_vm0, %v15084_v31 }
 0x155   :  { %14873 = vmatmul.mubr.msk.bf16.gmra.mrb[48].mxu0 %vm496_vm0, %v15085_v32 }
 0x156   :  { %14876 = vmatprep.mubr.msk.bf16.mxu0 %vm496_vm0, %v15086_v33 }
 0x15d   :  { %14877 = vmatmul.mubr.msk.bf16.gmra.mrb[52].mxu0 %vm496_vm0, %v15087_v34 }
 0x15e   :  { %14880 = vmatprep.mubr.msk.bf16.mxu0 %vm496_vm0, %v15088_v35 }
 0x165   :  { %14881 = vmatmul.mubr.msk.bf16.gmra.mrb[56].mxu0 %vm496_vm0, %v15089_v36 }
 0x166   :  { %14884 = vmatprep.mubr.msk.bf16.mxu0 %vm496_vm0, %v15090_v37 }
 0x16d   :  { %14885 = vmatmul.mubr.msk.bf16.gmra.mrb[60].mxu0 %vm496_vm0, %v15091_v40  ;;  %vm1369_vm0 = vcmask 1043459  }
 0x16e   :  { %vm17239_vm14 = vmand %vm1369_vm0, %vm1525_vm2  ;;  %vm19328_vm2 = vcmask 1043456  }
 0x16f   :  { %vm17289_vm1 = vmand %vm19328_vm2, %vm19322_vm13 }
 0x170   :  { %vm17310_vm13 = vmand %vm19324_vm4, %vm19327_vm3  ;;  %vm1384_vm3 = vsmask.f32 2304 }
 0x1c8   :  { %v14826_v4 = vpop.f32.mrb[0].mxu0 }
 0x1c9   :  { %v891_v5 = vmul.f32 %v14826_v4, %v17107_v63  ;;  %v627_v6 = vpop.f32.mrb[1].mxu0 }
 0x1ca   :  { %v889_v7 = vmul.f32 %v17107_v63, %v627_v6  ;;  %v14827_v10 = vpop.f32.mrb[2].mxu0 }
 0x1cb   :  { %v962_v11 = vadd.f32 %v17109_v0, %v891_v5  ;;  %v892_v12 = vmul.f32 %v14827_v10, %v17107_v63  ;;  %v630_v13 = vpop.f32.mrb[3].mxu0 }
 0x1cc   :  { %v960_v14 = vadd.f32 %v17109_v0, %v889_v7  ;;  %v890_v15 = vmul.f32 %v17107_v63, %v630_v13  ;;  %v15124_v13 = vld [vmem:[#allocation11 + $0xf8] sm:$0xff]  }
 0x1cd   :  { %v1026_v16 = vmax.f32 %v962_v11, 0.0  ;;  %v963_v17 = vadd.f32 %v17109_v0, %v892_v12  ;;  %14500 = vmatprep.subr.bf16.mxu1 %v15124_v13 }
 0x1ce   :  { %v1024_v18 = vmax.f32 %v960_v14, 0.0  ;;  %v961_v20 = vadd.f32 %v17109_v0, %v890_v15 }
 0x1cf   :  { %v1027_v21 = vmax.f32 %v963_v17, 0.0 }
 0x1d0   :  { %v1088_v22 = vmax.f32 %v1024_v18, %v1026_v16  ;;  %v1025_v23 = vmax.f32 %v961_v20, 0.0  ;;  %v14830_v24 = vpop.f32.mrb[4].mxu0  ;;  %v15125_v18 = vld [vmem:[#allocation11 + $0xb8] sm:$0xff]  }
 0x1d1   :  { %v895_v25 = vmul.f32 %v14830_v24, %v17107_v63  ;;  %v643_v26 = vpop.f32.mrb[5].mxu0  ;;  %v19353_v24 = vmov 0  ;;  %14501 = vmatpush3.bf16.msra.mxu1 %v15125_v18 }
 0x1d2   :  { %v1092_v27 = vcombine.high %v1088_v22, %v1088_v22  ;;  %v1099_v28 = vrot.slane %v1088_v22, %v17121_v19  ;;  %v1089_v29 = vmax.f32 %v1025_v23, %v1027_v21  ;;  %v893_v30 = vmul.f32 %v17107_v63, %v643_v26  ;;  %v14831_v31 = vpop.f32.mrb[6].mxu0 }
 0x1d3   :  { %v17128_v32 = vadd.f32 %v17109_v0, %v895_v25  ;;  %v896_v33 = vmul.f32 %v14831_v31, %v17107_v63  ;;  %v17131_v34 = vpop.f32.mrb[7].mxu0  ;;  %v19354_v24 = vsel %vm17157_vm12, 4294967295, %v19353_v24 }
 0x1d4   :  { %v1106_v35 = vrot.slane %v1092_v27, %v17121_v19  ;;  %v1107_v36 = vcombine.high %v1099_v28, %v1099_v28  ;;  %v12931_v37 = vrot.slane %v1099_v28, 9  ;;  %v1109_v38 = vcombine.high %v1089_v29, %v1089_v29  ;;  %19355 = vst [vmem:[#allocation36_spill] sm:$0xff] %v19354_v24 }
 0x1d5   :  { %v1116_v39 = vrot.slane %v1089_v29, %v17121_v19  ;;  %v1030_v40 = vmax.f32 %v17128_v32, 0.0  ;;  %v964_v41 = vadd.f32 %v17109_v0, %v893_v30  ;;  %v17138_v42 = vadd.f32 %v17109_v0, %v896_v33 }
 0x1d6   :  { %v1108_v43 = vcombine.high %v1106_v35, %v1106_v35  ;;  %v12932_v44 = vrot.slane %v1107_v36, 9  ;;  %v12933_v45 = vrot.slane %v1106_v35, 9  ;;  %v1158_v46 = vmax.f32 %v1099_v28, %v12931_v37 }
 0x1d7   :  { %v1123_v47 = vrot.slane %v1109_v38, %v17121_v19  ;;  %v1124_v48 = vcombine.high %v1116_v39, %v1116_v39  ;;  %v12935_v49 = vrot.slane %v1116_v39, 9  ;;  %v1028_v50 = vmax.f32 %v964_v41, 0.0 }
 0x1d8   :  { %v12934_v52 = vrot.slane %v1108_v43, 9  ;;  %v1159_v53 = vmax.f32 %v1107_v36, %v12932_v44  ;;  %v1160_v54 = vmax.f32 %v1106_v35, %v12933_v45  ;;  %v14202_v55 = vpack.c.bf16 %v1158_v46, %v1158_v46  ;;  %v17141_v56 = vpop.f32.mrb[8].mxu0  ;;  %v1232_v44 = vld [vmem:[#allocation2 + $0x4] sm:$0xe] }
 0x1d9   :  { %v1125_v58 = vcombine.high %v1123_v47, %v1123_v47  ;;  %v12936_v59 = vrot.slane %v1124_v48, 9  ;;  %v12937_v60 = vrot.slane %v1123_v47, 9  ;;  %v1162_v61 = vmax.f32 %v1116_v39, %v12935_v49  ;;  %v17143_v62 = vpop.f32.mrb[9].mxu0 }
 0x1da   :  { %v1161_v1 = vmax.f32 %v1108_v43, %v12934_v52  ;;  %v14203_v2 = vpack.c.bf16 %v1159_v53, %v1159_v53  ;;  %v14204_v3 = vpack.c.bf16 %v1160_v54, %v1160_v54  ;;  %v1198_v4 = vunpack.c.l.b16 %v14202_v55  ;;  %v17145_v5 = vpop.f32.mrb[10].mxu0  ;;  %v1238_v54 = vld [vmem:[#allocation2 + $0x8] sm:$0x3] }
 0x1db   :  { %v12938_v6 = vrot.slane %v1125_v58, 9  ;;  %v1163_v7 = vmax.f32 %v1124_v48, %v12936_v59  ;;  %v1164_v8 = vmax.f32 %v1123_v47, %v12937_v60  ;;  %v14206_v10 = vpack.c.bf16 %v1162_v61, %v1162_v61  ;;  %v17153_v12 = vpop.f32.mrb[11].mxu0 }
 0x1dc   :  { %v14205_v14 = vpack.c.bf16 %v1161_v1, %v1161_v1  ;;  %v1199_v15 = vunpack.c.l.b16 %v14203_v2  ;;  %v1200_v16 = vunpack.c.l.b16 %v14204_v3  ;;  %v1206_v17 = vrot.slane %v1198_v4, 5 }
 0x1dd   :  { %v1165_v20 = vmax.f32 %v1125_v58, %v12938_v6  ;;  %v14207_v21 = vpack.c.bf16 %v1163_v7, %v1163_v7  ;;  %v14208_v22 = vpack.c.bf16 %v1164_v8, %v1164_v8  ;;  %v1202_v23 = vunpack.c.l.b16 %v14206_v10 }
 0x1de   :  { %v1201_v25 = vunpack.c.l.b16 %v14205_v14  ;;  %v1207_v26 = vrot.slane %v1199_v15, 4  ;;  %v1210_v27 = vrot.slane %v1200_v16, 3  ;;  %v1241_v28 = vmax.f32 %v1028_v50, %v1030_v40 }
 0x1df   :  { %v14209_v29 = vpack.c.bf16 %v1165_v20, %v1165_v20  ;;  %v1203_v30 = vunpack.c.l.b16 %v14207_v21  ;;  %v1204_v31 = vunpack.c.l.b16 %v14208_v22  ;;  %v1216_v32 = vrot.slane %v1202_v23, 1 }
 0x1e0   :  { %v1209_v33 = vsel %vm1208_vm5, %v1207_v26, %v1206_v17  ;;  %v1213_v35 = vrot.slane %v1201_v25, 2  ;;  %v1245_v36 = vcombine.high %v1241_v28, %v1241_v28  ;;  %v1252_v37 = vrot.slane %v1241_v28, %v17121_v19  ;;  %v17163_v38 = vpop.f32.mrb[12].mxu0 }
 0x1e1   :  { %v1212_v39 = vsel %vm1211_vm6, %v1210_v27, %v1209_v33  ;;  %v1205_v41 = vunpack.c.l.b16 %v14209_v29  ;;  %v1219_v43 = vrot.slane %v1204_v31, 7  ;;  %v1031_v40 = vmax.f32 %v17138_v42, 0.0  ;;  %v17167_v45 = vpop.f32.mrb[13].mxu0 }
 0x1e2   :  { %v1215_v46 = vsel %vm1214_vm7, %v1213_v35, %v1212_v39  ;;  %v1259_v47 = vrot.slane %v1245_v36, %v17121_v19  ;;  %v1260_v48 = vcombine.high %v1252_v37, %v1252_v37  ;;  %v12947_v49 = vrot.slane %v1252_v37, 9  ;;  %v17171_v50 = vpop.f32.mrb[14].mxu0 }
 0x1e3   :  { %v1218_v51 = vsel %vm19329_vm8, %v1216_v32, %v1215_v46  ;;  %v1221_v52 = vsel %vm19323_vm9, %v1219_v43, %v1203_v30  ;;  %v1222_v53 = vrot.slane %v1205_v41, 6  ;;  %v894_v42 = vmul.f32 %v17107_v63, %v17131_v34  ;;  %v17177_v55 = vpop.f32.mrb[15].mxu0 }
 0x1e4   :  { %v1225_v57 = vpack.c.b16 %v1218_v51, %v1218_v51  ;;  %v1261_v58 = vcombine.high %v1259_v47, %v1259_v47  ;;  %v12948_v59 = vrot.slane %v1260_v48, 9  ;;  %v12949_v60 = vrot.slane %v1259_v47, 9 }
 0x1e5   :  { %v1224_v61 = vsel %vm1223_vm10, %v1222_v53, %v1221_v52  ;;  %v1311_v1 = vmax.f32 %v1252_v37, %v12947_v49  ;;  %v965_v2 = vadd.f32 %v17109_v0, %v894_v42  ;;  %v899_v3 = vmul.f32 %v17141_v56, %v17107_v63 }
 0x1e6   :  { %v1226_v4 = vpack.c.b16 %v1224_v61, %v1224_v61  ;;  %v1233_v6 = vsel %vm17149_vm11, %v1225_v57, %v1232_v44  ;;  %v12950_v7 = vrot.slane %v1261_v58, 9  ;;  %v1312_v34 = vmax.f32 %v1260_v48, %v12948_v59  ;;  %v1380_v48 = vld [vmem:[#allocation2 + $0x8] sm:$0xc] }
 0x1e7   :  { %1234 = vst [vmem:[#allocation2 + $0x4] sm:$0xe] %v1233_v6  ;;  %v1313_v8 = vmax.f32 %v1259_v47, %v12949_v60  ;;  %v14210_v10 = vpack.c.bf16 %v1311_v1, %v1311_v1  ;;  %v1029_v13 = vmax.f32 %v965_v2, 0.0  ;;  %v970_v14 = vadd.f32 %v17109_v0, %v899_v3 }
 0x1e8   :  { %v1239_v15 = vsel %vm17157_vm12, %v1226_v4, %v1238_v54  ;;  %v1314_v16 = vmax.f32 %v1261_v58, %v12950_v7  ;;  %v14211_v17 = vpack.c.bf16 %v1312_v34, %v1312_v34  ;;  %v897_v56 = vmul.f32 %v17107_v63, %v17143_v62  ;;  %v17190_v18 = vpop.f32.mrb[16].mxu0 }
 0x1e9   :  { %1240 = vst [vmem:[#allocation2 + $0x8] sm:$0x3] %v1239_v15  ;;  %v14212_v20 = vpack.c.bf16 %v1313_v8, %v1313_v8  ;;  %v1351_v21 = vunpack.c.l.b16 %v14210_v10  ;;  %v1242_v22 = vmax.f32 %v1029_v13, %v1031_v40  ;;  %v1034_v23 = vmax.f32 %v970_v14, 0.0  ;;  %v17192_v25 = vpop.f32.mrb[17].mxu0 }
 0x1ea   :  { %v14213_v26 = vpack.c.bf16 %v1314_v16, %v1314_v16  ;;  %v1352_v27 = vunpack.c.l.b16 %v14211_v17  ;;  %v968_v28 = vadd.f32 %v17109_v0, %v897_v56  ;;  %v900_v29 = vmul.f32 %v17145_v5, %v17107_v63  ;;  %v17197_v30 = vpop.f32.mrb[18].mxu0 }
 0x1eb   :  { %v1353_v31 = vunpack.c.l.b16 %v14212_v20  ;;  %v1359_v62 = vrot.slane %v1351_v21, 3  ;;  %v1262_v32 = vcombine.high %v1242_v22, %v1242_v22  ;;  %v1269_v33 = vrot.slane %v1242_v22, %v17121_v19  ;;  %v17200_v35 = vpop.f32.mrb[19].mxu0 }
 0x1ec   :  { %v1354_v36 = vunpack.c.l.b16 %v14213_v26  ;;  %v1360_v37 = vrot.slane %v1352_v27, 2  ;;  %v1032_v39 = vmax.f32 %v968_v28, 0.0  ;;  %v17203_v41 = vadd.f32 %v17109_v0, %v900_v29 }
 0x1ed   :  { %v1362_v43 = vrot.slane %v1353_v31, 1  ;;  %v1276_v44 = vrot.slane %v1262_v32, %v17121_v19  ;;  %v1277_v40 = vcombine.high %v1269_v33, %v1269_v33  ;;  %v12951_v5 = vrot.slane %v1269_v33, 9 }
 0x1ee   :  { %v1361_v46 = vsel %vm1214_vm7, %v1360_v37, %v1359_v62  ;;  %v19356_v47 = vmov 0  ;;  %v1389_v49 = vmax.f32 %v1032_v39, %v1034_v23  ;;  %v1035_v51 = vmax.f32 %v17203_v41, 0.0 }
 0x1ef   :  { %v19357_v47 = vsel %vm17209_vm15, 4294967295, %v19356_v47  ;;  %v898_v52 = vmul.f32 %v17107_v63, %v17153_v12  ;;  %v1363_v53 = vsel %vm19329_vm8, %v1362_v43, %v1361_v46  ;;  %v1278_v54 = vcombine.high %v1276_v44, %v1276_v44 }
 0x1f0   :  { %19358 = vst [vmem:[#allocation37_spill] sm:$0xff] %v19357_v47  ;;  %v12952_v42 = vrot.slane %v1277_v40, 9  ;;  %v12953_v57 = vrot.slane %v1276_v44, 9  ;;  %v1373_v58 = vpack.c.b16 %v1363_v53, %v1363_v53  ;;  %v1315_v59 = vmax.f32 %v1269_v33, %v12951_v5  ;;  %v17218_v1 = vpop.f32.mrb[20].mxu0 }
 0x1f1   :  { %v1393_v60 = vcombine.high %v1389_v49, %v1389_v49  ;;  %v1400_v61 = vrot.slane %v1389_v49, %v17121_v19  ;;  %v12954_v2 = vrot.slane %v1278_v54, 9  ;;  %v969_v6 = vadd.f32 %v17109_v0, %v898_v52  ;;  %v17221_v12 = vpop.f32.mrb[21].mxu0 }
 0x1f2   :  { %v1316_v3 = vmax.f32 %v1277_v40, %v12952_v42  ;;  %v1317_v4 = vmax.f32 %v1276_v44, %v12953_v57  ;;  %v1381_v7 = vsel %vm17209_vm15, %v1373_v58, %v1380_v48  ;;  %v14214_v34 = vpack.c.bf16 %v1315_v59, %v1315_v59  ;;  %v17226_v13 = vpop.f32.mrb[22].mxu0 }
 0x1f3   :  { %v1407_v8 = vrot.slane %v1393_v60, %v17121_v19  ;;  %v1408_v10 = vcombine.high %v1400_v61, %v1400_v61  ;;  %1382 = vst [vmem:[#allocation2 + $0x8] sm:$0xc] %v1381_v7  ;;  %v1318_v14 = vmax.f32 %v1278_v54, %v12954_v2  ;;  %v12963_v17 = vrot.slane %v1400_v61, 9  ;;  %v17228_v56 = vpop.f32.mrb[23].mxu0  ;;  %v1527_v2 = vld [vmem:[#allocation2 + $0xc] sm:$0x8] }
 0x1f4   :  { %v14215_v15 = vpack.c.bf16 %v1316_v3, %v1316_v3  ;;  %v14216_v16 = vpack.c.bf16 %v1317_v4, %v1317_v4  ;;  %v1355_v20 = vunpack.c.l.b16 %v14214_v34  ;;  %v1033_v42 = vmax.f32 %v969_v6, 0.0 }
 0x1f5   :  { %v1409_v21 = vcombine.high %v1407_v8, %v1407_v8  ;;  %v12964_v22 = vrot.slane %v1408_v10, 9  ;;  %v12965_v23 = vrot.slane %v1407_v8, 9  ;;  %v14217_v26 = vpack.c.bf16 %v1318_v14, %v1318_v14 }
 0x1f6   :  { %v1356_v27 = vunpack.c.l.b16 %v14215_v15  ;;  %v1357_v28 = vunpack.c.l.b16 %v14216_v16  ;;  %v1459_v29 = vmax.f32 %v1400_v61, %v12963_v17  ;;  %v1364_v31 = vrot.slane %v1355_v20, 7 }
 0x1f7   :  { %v12966_v62 = vrot.slane %v1409_v21, 9  ;;  %v1460_v32 = vmax.f32 %v1408_v10, %v12964_v22  ;;  %v1461_v33 = vmax.f32 %v1407_v8, %v12965_v23  ;;  %v1358_v37 = vunpack.c.l.b16 %v14217_v26 }
 0x1f8   :  { %v1366_v39 = vrot.slane %v1356_v27, 6  ;;  %v1368_v43 = vrot.slane %v1357_v28, 5  ;;  %v14218_v44 = vpack.c.bf16 %v1459_v29, %v1459_v29  ;;  %v1365_v40 = vsel %vm19323_vm9, %v1364_v31, %v1354_v36  ;;  %v17231_v49 = vpop.f32.mrb[24].mxu0 }
 0x1f9   :  { %v1462_v5 = vmax.f32 %v1409_v21, %v12966_v62  ;;  %v14219_v46 = vpack.c.bf16 %v1460_v32, %v1460_v32  ;;  %v14220_v48 = vpack.c.bf16 %v1461_v33, %v1461_v33  ;;  %v1371_v53 = vrot.slane %v1358_v37, 4  ;;  %v17234_v57 = vpop.f32.mrb[25].mxu0 }
 0x1fa   :  { %v1367_v52 = vsel %vm1223_vm10, %v1366_v39, %v1365_v40  ;;  %v1499_v54 = vunpack.c.l.b16 %v14218_v44  ;;  %v17243_v3 = vpop.f32.mrb[26].mxu0  ;;  %v1390_v7 = vmax.f32 %v1033_v42, %v1035_v51  ;;  %v903_v34 = vmul.f32 %v17163_v38, %v17107_v63 }
 0x1fb   :  { %v1370_v58 = vsel %vm1369_vm0, %v1368_v43, %v1367_v52  ;;  %v14221_v59 = vpack.c.bf16 %v1462_v5, %v1462_v5  ;;  %v1500_v60 = vunpack.c.l.b16 %v14219_v46  ;;  %v1501_v61 = vunpack.c.l.b16 %v14220_v48  ;;  %v17252_v8 = vpop.f32.mrb[27].mxu0 }
 0x1fc   :  { %v17246_v4 = vsel %vm1208_vm5, %v1371_v53, %v1370_v58  ;;  %v1507_v6 = vrot.slane %v1499_v54, 1  ;;  %v901_v16 = vmul.f32 %v17107_v63, %v17167_v45  ;;  %v1410_v20 = vcombine.high %v1390_v7, %v1390_v7 }
 0x1fd   :  { %v1502_v14 = vunpack.c.l.b16 %v14221_v59  ;;  %v1508_v15 = vrot.slane %v1501_v61, 7  ;;  %v1417_v21 = vrot.slane %v1390_v7, %v17121_v19  ;;  %v974_v41 = vadd.f32 %v17109_v0, %v903_v34 }
 0x1fe   :  { %v1520_v17 = vpack.c.b16 %v1507_v6, %v1507_v6  ;;  %v972_v22 = vadd.f32 %v17109_v0, %v901_v16  ;;  %v904_v23 = vmul.f32 %v17171_v50, %v17107_v63  ;;  %v1424_v45 = vrot.slane %v1410_v20, %v17121_v19 }
 0x1ff   :  { %v1509_v38 = vsel %vm19323_vm9, %v1508_v15, %v1500_v60  ;;  %v1510_v51 = vrot.slane %v1502_v14, 6  ;;  %v1425_v27 = vcombine.high %v1417_v21, %v1417_v21  ;;  %v12967_v28 = vrot.slane %v1417_v21, 9 }
 0x200   :  { %v1528_v26 = vsel %vm17239_vm14, %v1520_v17, %v1527_v2  ;;  %v1038_v31 = vmax.f32 %v974_v41, 0.0  ;;  %v1036_v62 = vmax.f32 %v972_v22, 0.0  ;;  %v975_v32 = vadd.f32 %v17109_v0, %v904_v23  ;;  %v17269_v33 = vpop.f32.mrb[28].mxu0 }
 0x201   :  { %1529 = vst [vmem:[#allocation2 + $0xc] sm:$0x8] %v1528_v26  ;;  %v1511_v29 = vsel %vm1223_vm10, %v1510_v51, %v1509_v38  ;;  %v1426_v37 = vcombine.high %v1424_v45, %v1424_v45  ;;  %v12968_v39 = vrot.slane %v1425_v27, 9  ;;  %v12969_v43 = vrot.slane %v1424_v45, 9  ;;  %v17271_v44 = vpop.f32.mrb[29].mxu0 }
 0x202   :  { %v1463_v50 = vmax.f32 %v1417_v21, %v12967_v28  ;;  %v1536_v40 = vmax.f32 %v1036_v62, %v1038_v31  ;;  %v1039_v5 = vmax.f32 %v975_v32, 0.0  ;;  %v902_v46 = vmul.f32 %v17107_v63, %v17177_v55  ;;  %v17277_v52 = vpop.f32.mrb[30].mxu0 }
 0x203   :  { %v907_v48 = vmul.f32 %v17190_v18, %v17107_v63  ;;  %v12970_v53 = vrot.slane %v1426_v37, 9  ;;  %v1464_v54 = vmax.f32 %v1425_v27, %v12968_v39  ;;  %v1465_v42 = vmax.f32 %v1424_v45, %v12969_v43  ;;  %v17279_v59 = vpop.f32.mrb[31].mxu0 }
 0x204   :  { %v14222_v58 = vpack.c.bf16 %v1463_v50, %v1463_v50  ;;  %v1540_v60 = vcombine.high %v1536_v40, %v1536_v40  ;;  %v1547_v61 = vrot.slane %v1536_v40, %v17121_v19  ;;  %v973_v2 = vadd.f32 %v17109_v0, %v902_v46 }
 0x205   :  { %v17284_v55 = vadd.f32 %v17109_v0, %v907_v48  ;;  %v1466_v6 = vmax.f32 %v1426_v37, %v12970_v53  ;;  %v14223_v63 = vpack.c.bf16 %v1464_v54, %v1464_v54  ;;  %v14224_v18 = vpack.c.bf16 %v1465_v42, %v1465_v42  ;;  %v1533_v48 = vld [vmem:[#allocation2 + $0x10] sm:$0xf] }
 0x206   :  { %v1503_v7 = vunpack.c.l.b16 %v14222_v58  ;;  %v1554_v34 = vrot.slane %v1540_v60, %v17121_v19  ;;  %v1555_v14 = vcombine.high %v1547_v61, %v1547_v61  ;;  %v12979_v15 = vrot.slane %v1547_v61, 9 }
 0x207   :  { %v1037_v16 = vmax.f32 %v973_v2, 0.0  ;;  %v14225_v17 = vpack.c.bf16 %v1466_v6, %v1466_v6  ;;  %v1504_v20 = vunpack.c.l.b16 %v14223_v63  ;;  %v1505_v21 = vunpack.c.l.b16 %v14224_v18 }
 0x208   :  { %v1512_v41 = vrot.slane %v1503_v7, 5  ;;  %v1556_v0 = vcombine.high %v1554_v34, %v1554_v34  ;;  %v12980_v51 = vrot.slane %v1555_v14, 9  ;;  %v12981_v22 = vrot.slane %v1554_v34, 9  ;;  %v17293_v26 = vpop.f32.mrb[32].mxu0 }
 0x209   :  { %v1606_v23 = vmax.f32 %v1547_v61, %v12979_v15  ;;  %v1506_v45 = vunpack.c.l.b16 %v14225_v17  ;;  %v1514_v28 = vrot.slane %v1504_v20, 4  ;;  %v1516_v31 = vrot.slane %v1505_v21, 3  ;;  %v17296_v62 = vpop.f32.mrb[33].mxu0 }
 0x20a   :  { %v1513_v27 = vsel %vm1369_vm0, %v1512_v41, %v1511_v29  ;;  %v12982_v32 = vrot.slane %v1556_v0, 9  ;;  %v1607_v37 = vmax.f32 %v1555_v14, %v12980_v51  ;;  %v1608_v39 = vmax.f32 %v1554_v34, %v12981_v22  ;;  %v17298_v50 = vpop.f32.mrb[34].mxu0 }
 0x20b   :  { %v14226_v43 = vpack.c.bf16 %v1606_v23, %v1606_v23  ;;  %v1515_v40 = vsel %vm1208_vm5, %v1514_v28, %v1513_v27  ;;  %v1518_v46 = vrot.slane %v1506_v45, 2  ;;  %v1537_v53 = vmax.f32 %v1037_v16, %v1039_v5  ;;  %v17302_v42 = vpop.f32.mrb[35].mxu0 }
 0x20c   :  { %v1042_v54 = vmax.f32 %v17284_v55, 0.0  ;;  %v1517_v29 = vsel %vm1211_vm6, %v1516_v31, %v1515_v40  ;;  %v1609_v58 = vmax.f32 %v1556_v0, %v12982_v32  ;;  %v14227_v60 = vpack.c.bf16 %v1607_v37, %v1607_v37 }
 0x20d   :  { %v14228_v61 = vpack.c.bf16 %v1608_v39, %v1608_v39  ;;  %v1519_v2 = vsel %vm1214_vm7, %v1518_v46, %v1517_v29  ;;  %v1646_v6 = vunpack.c.l.b16 %v14226_v43  ;;  %v1557_v63 = vcombine.high %v1537_v53, %v1537_v53  ;;  %v17321_v39 = vld [vmem:[#allocation8] ss:$0 sm:$0xff] }
 0x20e   :  { %v1564_v18 = vrot.slane %v1537_v53, %v17121_v19  ;;  %v1521_v7 = vpack.c.b16 %v1519_v2, %v1519_v2  ;;  %v14229_v34 = vpack.c.bf16 %v1609_v58, %v1609_v58  ;;  %v1647_v14 = vunpack.c.l.b16 %v14227_v60 }
 0x20f   :  { %v1648_v15 = vunpack.c.l.b16 %v14228_v61  ;;  %v1654_v5 = vrot.slane %v1646_v6, 7  ;;  %v1571_v55 = vrot.slane %v1557_v63, %v17121_v19  ;;  %vm1671_vm9 = vsmask.f32 7938  ;;  %v1679_v6 = vld [vmem:[#allocation2 + $0x18] sm:$0x1] }
 0x210   :  { %v1572_v16 = vcombine.high %v1564_v18, %v1564_v18  ;;  %v12983_v17 = vrot.slane %v1564_v18, 9  ;;  %v1534_v21 = vsel %vm17289_vm1, %v1521_v7, %v1533_v48  ;;  %v1649_v41 = vunpack.c.l.b16 %v14229_v34  ;;  %v17316_v22 = vpop.f32.mrb[36].mxu0  ;;  %v17333_v63 = vld [vmem:[#allocation10] ss:$0 sm:$0xff]  ;;  %vm17369_vm4 = vmand %vm19328_vm2, %vm1671_vm9 }
 0x211   :  { %v1655_v0 = vrot.slane %v1647_v14, 6  ;;  %v1657_v51 = vrot.slane %v1648_v15, 5  ;;  %1535 = vst [vmem:[#allocation2 + $0x10] sm:$0xf] %v1534_v21  ;;  %v1573_v23 = vcombine.high %v1571_v55, %v1571_v55  ;;  %v12985_v27 = vrot.slane %v1571_v55, 9  ;;  %v17318_v31 = vpop.f32.mrb[37].mxu0 }
 0x212   :  { %v12984_v45 = vrot.slane %v1572_v16, 9  ;;  %v1610_v28 = vmax.f32 %v1564_v18, %v12983_v17  ;;  %v1659_v37 = vrot.slane %v1649_v41, 4  ;;  %v905_v43 = vmul.f32 %v17321_v39, %v17192_v25  ;;  %v17327_v46 = vpop.f32.mrb[38].mxu0 }
 0x213   :  { %v1656_v32 = vsel %vm1223_vm10, %v1655_v0, %v1654_v5  ;;  %v908_v40 = vmul.f32 %v17321_v39, %v17197_v30  ;;  %v12986_v53 = vrot.slane %v1573_v23, 9  ;;  %v1612_v58 = vmax.f32 %v1571_v55, %v12985_v27  ;;  %v17330_v60 = vpop.f32.mrb[39].mxu0 }
 0x214   :  { %v1658_v48 = vsel %vm1369_vm0, %v1657_v51, %v1656_v32  ;;  %v1611_v29 = vmax.f32 %v1572_v16, %v12984_v45  ;;  %v14230_v61 = vpack.c.bf16 %v1610_v28, %v1610_v28  ;;  %v976_v25 = vadd.f32 %v17333_v63, %v905_v43 }
 0x215   :  { %v1660_v2 = vsel %vm1208_vm5, %v1659_v37, %v1658_v48  ;;  %v979_v18 = vadd.f32 %v17333_v63, %v908_v40  ;;  %v1613_v30 = vmax.f32 %v1573_v23, %v12986_v53  ;;  %v14232_v34 = vpack.c.bf16 %v1612_v58, %v1612_v58  ;;  %v1673_v48 = vld [vmem:[#allocation2 + $0x14] sm:$0xf] }
 0x216   :  { %v14231_v7 = vpack.c.bf16 %v1611_v29, %v1611_v29  ;;  %v906_v14 = vmul.f32 %v17321_v39, %v17200_v35  ;;  %v1650_v15 = vunpack.c.l.b16 %v14230_v61  ;;  %v1040_v5 = vmax.f32 %v976_v25, 0.0 }
 0x217   :  { %v1043_v55 = vmax.f32 %v979_v18, 0.0  ;;  %v911_v16 = vmul.f32 %v17321_v39, %v17218_v1  ;;  %v1652_v21 = vunpack.c.l.b16 %v14232_v34  ;;  %v14234_v41 = vpack.c.bf16 %v1613_v30, %v1613_v30 }
 0x218   :  { %v1651_v17 = vunpack.c.l.b16 %v14231_v7  ;;  %v977_v0 = vadd.f32 %v17333_v63, %v906_v14  ;;  %v1661_v51 = vrot.slane %v1650_v15, 3  ;;  %v1682_v45 = vmax.f32 %v1040_v5, %v1042_v54  ;;  %v17347_v35 = vpop.f32.mrb[40].mxu0 }
 0x219   :  { %v17343_v23 = vadd.f32 %v17333_v63, %v911_v16  ;;  %v909_v27 = vmul.f32 %v17321_v39, %v17221_v12  ;;  %v1665_v32 = vrot.slane %v1652_v21, 1  ;;  %v1680_v1 = vsel %vm17310_vm13, %v14234_v41, %v1679_v6  ;;  %v17351_v43 = vpop.f32.mrb[41].mxu0 }
 0x21a   :  { %v1663_v28 = vrot.slane %v1651_v17, 2  ;;  %v1041_v37 = vmax.f32 %v977_v0, 0.0  ;;  %v1662_v40 = vsel %vm1211_vm6, %v1661_v51, %v1660_v2  ;;  %1681 = vst [vmem:[#allocation2 + $0x18] sm:$0x1] %v1680_v1  ;;  %v1686_v54 = vcombine.high %v1682_v45, %v1682_v45  ;;  %v17356_v12 = vpop.f32.mrb[42].mxu0 }
 0x21b   :  { %v1693_v53 = vrot.slane %v1682_v45, %v17121_v19  ;;  %v1046_v29 = vmax.f32 %v17343_v23, 0.0  ;;  %v980_v25 = vadd.f32 %v17333_v63, %v909_v27  ;;  %v17362_v6 = vmul.f32 %v17321_v39, %v17226_v13  ;;  %v17364_v18 = vpop.f32.mrb[43].mxu0 }
 0x21c   :  { %v1664_v58 = vsel %vm1214_vm7, %v1663_v28, %v1662_v40  ;;  %v1683_v61 = vmax.f32 %v1041_v37, %v1043_v55  ;;  %19365 = vst [vmem:[#allocation38_spill] sm:$0xff] %v17364_v18  ;;  %v1700_v7 = vrot.slane %v1686_v54, %v17121_v19  ;;  %vm19368_vm9 = vcmask 1041409  }
 0x21d   :  { %v1666_v2 = vsel %vm19329_vm8, %v1665_v32, %v1664_v58  ;;  %v1701_v34 = vcombine.high %v1693_v53, %v1693_v53  ;;  %v12996_v14 = vrot.slane %v1693_v53, 9  ;;  %v1044_v13 = vmax.f32 %v980_v25, 0.0 }
 0x21e   :  { %v1667_v15 = vpack.c.b16 %v1666_v2, %v1666_v2  ;;  %v1703_v5 = vcombine.high %v1683_v61, %v1683_v61  ;;  %v1710_v55 = vrot.slane %v1683_v61, %v17121_v19  ;;  %v1702_v16 = vcombine.high %v1700_v7, %v1700_v7 }
 0x21f   :  { %v12997_v17 = vrot.slane %v1701_v34, 9  ;;  %v12998_v21 = vrot.slane %v1700_v7, 9  ;;  %v1752_v41 = vmax.f32 %v1693_v53, %v12996_v14  ;;  %vm19373_vm2 = vcmask 1041409  }
 0x220   :  { %v1674_v0 = vsel %vm17369_vm4, %v1667_v15, %v1673_v48  ;;  %v1717_v51 = vrot.slane %v1703_v5, %v17121_v19  ;;  %v1718_v45 = vcombine.high %v1710_v55, %v1710_v55  ;;  %v13000_v23 = vrot.slane %v1710_v55, 9  ;;  %v17378_v5 = vpop.f32.mrb[44].mxu0 }
 0x221   :  { %1675 = vst [vmem:[#allocation2 + $0x14] sm:$0xf] %v1674_v0  ;;  %v12999_v27 = vrot.slane %v1702_v16, 9  ;;  %v1753_v28 = vmax.f32 %v1701_v34, %v12997_v17  ;;  %v1754_v32 = vmax.f32 %v1700_v7, %v12998_v21  ;;  %v14235_v1 = vpack.c.bf16 %v1752_v41, %v1752_v41  ;;  %v17380_v7 = vpop.f32.mrb[45].mxu0 }
 0x222   :  { %v1719_v37 = vcombine.high %v1717_v51, %v1717_v51  ;;  %v13001_v40 = vrot.slane %v1718_v45, 9  ;;  %v13002_v54 = vrot.slane %v1717_v51, 9  ;;  %v1756_v58 = vmax.f32 %v1710_v55, %v13000_v23 }
 0x223   :  { %v1755_v61 = vmax.f32 %v1702_v16, %v12999_v27  ;;  %v14236_v25 = vpack.c.bf16 %v1753_v28, %v1753_v28  ;;  %v14237_v2 = vpack.c.bf16 %v1754_v32, %v1754_v32  ;;  %v1792_v53 = vunpack.c.l.b16 %v14235_v1  ;;  %v17382_v16 = vpop.f32.mrb[46].mxu0 }
 0x224   :  { %v13003_v14 = vrot.slane %v1719_v37, 9  ;;  %v1757_v10 = vmax.f32 %v1718_v45, %v13001_v40  ;;  %v1758_v48 = vmax.f32 %v1717_v51, %v13002_v54  ;;  %v14239_v15 = vpack.c.bf16 %v1756_v58, %v1756_v58  ;;  %v17384_v51 = vpop.f32.mrb[47].mxu0 }
 0x225   :  { %v14238_v9 = vpack.c.bf16 %v1755_v61, %v1755_v61  ;;  %v1793_v0 = vunpack.c.l.b16 %v14236_v25  ;;  %v1794_v18 = vunpack.c.l.b16 %v14237_v2  ;;  %v1800_v34 = vrot.slane %v1792_v53, 5 }
 0x226   :  { %v1759_v17 = vmax.f32 %v1719_v37, %v13003_v14  ;;  %v14240_v21 = vpack.c.bf16 %v1757_v10, %v1757_v10  ;;  %v14241_v41 = vpack.c.bf16 %v1758_v48, %v1758_v48  ;;  %v1796_v55 = vunpack.c.l.b16 %v14239_v15 }
 0x227   :  { %v1795_v23 = vunpack.c.l.b16 %v14238_v9  ;;  %v1801_v27 = vrot.slane %v1793_v0, 4  ;;  %v1803_v28 = vrot.slane %v1794_v18, 3  ;;  %v1823_v45 = vmax.f32 %v1044_v13, %v1046_v29  ;;  %v1817_v9 = vld [vmem:[#allocation2 + $0x18] sm:$0xe] }
 0x228   :  { %v14242_v32 = vpack.c.bf16 %v1759_v17, %v1759_v17  ;;  %v1797_v1 = vunpack.c.l.b16 %v14240_v21  ;;  %v1798_v40 = vunpack.c.l.b16 %v14241_v41  ;;  %v1807_v54 = vrot.slane %v1796_v55, 1  ;;  %v1820_v17 = vld [vmem:[#allocation2 + $0x1c] sm:$0x3]  ;;  %v17395_v41 = vpop.f32.mrb[48].mxu0 }
 0x229   :  { %v1802_v58 = vsel %vm1208_vm5, %v1801_v27, %v1800_v34  ;;  %v1805_v61 = vrot.slane %v1795_v23, 2  ;;  %v1827_v25 = vcombine.high %v1823_v45, %v1823_v45  ;;  %v1834_v10 = vrot.slane %v1823_v45, %v17121_v19  ;;  %19369 = vst [vmem:[#allocation39_spill] sm:$0xff] %v17395_v41 }
 0x22a   :  { %v1804_v37 = vsel %vm1211_vm6, %v1803_v28, %v1802_v58  ;;  %v1799_v2 = vunpack.c.l.b16 %v14242_v32  ;;  %v1809_v53 = vrot.slane %v1798_v40, 7  ;;  %v983_v29 = vadd.f32 %v17333_v63, %v17362_v6  ;;  %v17397_v6 = vpop.f32.mrb[49].mxu0 }
 0x22b   :  { %v1806_v18 = vsel %vm1214_vm7, %v1805_v61, %v1804_v37  ;;  %v1841_v13 = vrot.slane %v1827_v25, %v17121_v19  ;;  %v1842_v14 = vcombine.high %v1834_v10, %v1834_v10  ;;  %v13012_v48 = vrot.slane %v1834_v10, 9  ;;  %19370 = vst [vmem:[#allocation40_spill] sm:$0xff] %v17397_v6 }
 0x22c   :  { %v1808_v15 = vsel %vm19329_vm8, %v1807_v54, %v1806_v18  ;;  %v1810_v0 = vsel %vm19368_vm9, %v1809_v53, %v1797_v1  ;;  %v1811_v34 = vrot.slane %v1799_v2, 6  ;;  %v1047_v21 = vmax.f32 %v983_v29, 0.0 }
 0x22d   :  { %v1813_v55 = vpack.c.b16 %v1808_v15, %v1808_v15  ;;  %v1843_v23 = vcombine.high %v1841_v13, %v1841_v13  ;;  %v13013_v27 = vrot.slane %v1842_v14, 9  ;;  %v13014_v28 = vrot.slane %v1841_v13, 9 }
 0x22e   :  { %v1812_v45 = vsel %vm1223_vm10, %v1811_v34, %v1810_v0  ;;  %v1893_v32 = vmax.f32 %v1834_v10, %v13012_v48  ;;  %v910_v40 = vmul.f32 %v17321_v39, %v17228_v56  ;;  %v915_v1 = vmul.f32 %v17321_v39, %v17231_v49 }
 0x22f   :  { %v1814_v54 = vpack.c.b16 %v1812_v45, %v1812_v45  ;;  %v1818_v58 = vsel %vm17149_vm11, %v1813_v55, %v1817_v9  ;;  %v13015_v61 = vrot.slane %v1843_v23, 9  ;;  %v1894_v25 = vmax.f32 %v1842_v14, %v13013_v27 }
 0x230   :  { %1819 = vst [vmem:[#allocation2 + $0x18] sm:$0xe] %v1818_v58  ;;  %v1895_v37 = vmax.f32 %v1841_v13, %v13014_v28  ;;  %v14243_v2 = vpack.c.bf16 %v1893_v32, %v1893_v32  ;;  %v981_v53 = vadd.f32 %v17333_v63, %v910_v40  ;;  %v986_v29 = vadd.f32 %v17333_v63, %v915_v1 }
 0x231   :  { %v1821_v10 = vsel %vm17157_vm12, %v1814_v54, %v1820_v17  ;;  %v1896_v56 = vmax.f32 %v1843_v23, %v13015_v61  ;;  %v14244_v18 = vpack.c.bf16 %v1894_v25, %v1894_v25  ;;  %v913_v49 = vmul.f32 %v17321_v39, %v17234_v57  ;;  %v1958_v25 = vld [vmem:[#allocation2 + $0x1c] sm:$0xc] }
 0x232   :  { %1822 = vst [vmem:[#allocation2 + $0x1c] sm:$0x3] %v1821_v10  ;;  %v14245_v48 = vpack.c.bf16 %v1895_v37, %v1895_v37  ;;  %v1933_v9 = vunpack.c.l.b16 %v14243_v2  ;;  %v1045_v15 = vmax.f32 %v981_v53, 0.0  ;;  %v1050_v14 = vmax.f32 %v986_v29, 0.0 }
 0x233   :  { %v14246_v0 = vpack.c.bf16 %v1896_v56, %v1896_v56  ;;  %v1934_v13 = vunpack.c.l.b16 %v14244_v18  ;;  %v984_v34 = vadd.f32 %v17333_v63, %v913_v49  ;;  %v916_v55 = vmul.f32 %v17321_v39, %v17243_v3  ;;  %v17430_v56 = vpop.f32.mrb[50].mxu0 }
 0x234   :  { %v1935_v27 = vunpack.c.l.b16 %v14245_v48  ;;  %v1941_v28 = vrot.slane %v1933_v9, 3  ;;  %v1824_v17 = vmax.f32 %v1045_v15, %v1047_v21  ;;  %v914_v23 = vmul.f32 %v17321_v39, %v17252_v8  ;;  %19371 = vst [vmem:[#allocation41_spill] sm:$0xff] %v17430_v56  ;;  %v17434_v15 = vpop.f32.mrb[51].mxu0 }
 0x235   :  { %v1936_v45 = vunpack.c.l.b16 %v14246_v0  ;;  %v1942_v57 = vrot.slane %v1934_v13, 2  ;;  %v1048_v32 = vmax.f32 %v984_v34, 0.0  ;;  %v17418_v40 = vadd.f32 %v17333_v63, %v916_v55  ;;  %19372 = vst [vmem:[#allocation42_spill] sm:$0xff] %v17434_v15 }
 0x236   :  { %v1944_v1 = vrot.slane %v1935_v27, 1  ;;  %v1844_v54 = vcombine.high %v1824_v17, %v1824_v17  ;;  %v1851_v58 = vrot.slane %v1824_v17, %v17121_v19  ;;  %v17422_v61 = vadd.f32 %v17333_v63, %v914_v23 }
 0x237   :  { %v1943_v3 = vsel %vm1214_vm7, %v1942_v57, %v1941_v28  ;;  %v1964_v21 = vmax.f32 %v1048_v32, %v1050_v14  ;;  %v1051_v37 = vmax.f32 %v17418_v40, 0.0  ;;  %v919_v8 = vmul.f32 %v17321_v39, %v17269_v33 }
 0x238   :  { %vm19330_vm9 = vcmask 1042432   ;;  %v1945_v2 = vsel %vm19329_vm8, %v1944_v1, %v1943_v3  ;;  %v1858_v53 = vrot.slane %v1844_v54, %v17121_v19  ;;  %v1859_v29 = vcombine.high %v1851_v58, %v1851_v58 }
 0x239   :  { %v13016_v10 = vrot.slane %v1851_v58, 9  ;;  %v1954_v18 = vpack.c.b16 %v1945_v2, %v1945_v2  ;;  %v1968_v49 = vcombine.high %v1964_v21, %v1964_v21  ;;  %v1975_v48 = vrot.slane %v1964_v21, %v17121_v19  ;;  %vm17442_vm8 = vmand %vm19330_vm9, %vm1384_vm3 }
 0x23a   :  { %v1049_v9 = vmax.f32 %v17422_v61, 0.0  ;;  %v1860_v14 = vcombine.high %v1858_v53, %v1858_v53  ;;  %v13017_v33 = vrot.slane %v1859_v29, 9  ;;  %v13018_v0 = vrot.slane %v1858_v53, 9  ;;  %vm19376_vm3 = vmmov %vm19373_vm2 }
 0x23b   :  { %v1897_v13 = vmax.f32 %v1851_v58, %v13016_v10  ;;  %v1959_v34 = vsel %vm17209_vm15, %v1954_v18, %v1958_v25  ;;  %v1982_v55 = vrot.slane %v1968_v49, %v17121_v19  ;;  %v1983_v27 = vcombine.high %v1975_v48, %v1975_v48 }
 0x23c   :  { %v13028_v28 = vrot.slane %v1975_v48, 9  ;;  %1960 = vst [vmem:[#allocation2 + $0x1c] sm:$0xc] %v1959_v34  ;;  %v13019_v17 = vrot.slane %v1860_v14, 9  ;;  %v1898_v23 = vmax.f32 %v1859_v29, %v13017_v33  ;;  %v1899_v57 = vmax.f32 %v1858_v53, %v13018_v0 }
 0x23d   :  { %v14247_v32 = vpack.c.bf16 %v1897_v13, %v1897_v13  ;;  %v1984_v40 = vcombine.high %v1982_v55, %v1982_v55  ;;  %v13029_v1 = vrot.slane %v1983_v27, 9  ;;  %v13030_v54 = vrot.slane %v1982_v55, 9 }
 0x23e   :  { %v2034_v61 = vmax.f32 %v1975_v48, %v13028_v28  ;;  %v1900_v3 = vmax.f32 %v1860_v14, %v13019_v17  ;;  %v14248_v21 = vpack.c.bf16 %v1898_v23, %v1898_v23  ;;  %v14249_v2 = vpack.c.bf16 %v1899_v57, %v1899_v57 }
 0x23f   :  { %v1937_v58 = vunpack.c.l.b16 %v14247_v32  ;;  %v13031_v10 = vrot.slane %v1984_v40, 9  ;;  %v2035_v15 = vmax.f32 %v1983_v27, %v13029_v1  ;;  %v2036_v25 = vmax.f32 %v1982_v55, %v13030_v54  ;;  %v15133_v55 = vld [vmem:[#allocation11 + $0x140] sm:$0xff]   ;;  %v2099_v32 = vld [vmem:[#allocation2 + $0x20] sm:$0x8] }
 0x240   :  { %v14251_v18 = vpack.c.bf16 %v2034_v61, %v2034_v61  ;;  %v14250_v49 = vpack.c.bf16 %v1900_v3, %v1900_v3  ;;  %v1938_v56 = vunpack.c.l.b16 %v14248_v21  ;;  %v1939_v6 = vunpack.c.l.b16 %v14249_v2  ;;  %14562 = vmatprep.subr.bf16.mxu0 %v15133_v55 }
 0x241   :  { %v1946_v34 = vrot.slane %v1937_v58, 7  ;;  %v2037_v41 = vmax.f32 %v1984_v40, %v13031_v10  ;;  %v14252_v29 = vpack.c.bf16 %v2035_v15, %v2035_v15  ;;  %v14253_v53 = vpack.c.bf16 %v2036_v25, %v2036_v25  ;;  %v1386_v15 = vld [vmem:[#allocation2 + $0xc] sm:$0x7] }
 0x242   :  { %v2074_v33 = vunpack.c.l.b16 %v14251_v18  ;;  %v1940_v0 = vunpack.c.l.b16 %v14250_v49  ;;  %v1948_v48 = vrot.slane %v1938_v56, 6  ;;  %v1950_v14 = vrot.slane %v1939_v6, 5  ;;  %v3375_v6 = vld [vmem:[#allocation2] sm:$0xf]  ;;  %v17448_v56 = vld [vmem:[#allocation2 + $0x4] sm:$0xf] }
 0x243   :  { %v1947_v13 = vsel %vm19373_vm2, %v1946_v34, %v1936_v45  ;;  %v14254_v27 = vpack.c.bf16 %v2037_v41, %v2037_v41  ;;  %v2075_v17 = vunpack.c.l.b16 %v14252_v29  ;;  %v2076_v23 = vunpack.c.l.b16 %v14253_v53 }
 0x244   :  { %v2082_v57 = vrot.slane %v2074_v33, 1  ;;  %v1949_v40 = vsel %vm1223_vm10, %v1948_v48, %v1947_v13  ;;  %v1952_v1 = vrot.slane %v1940_v0, 4  ;;  %v1965_v54 = vmax.f32 %v1049_v9, %v1051_v37 }
 0x245   :  { %v990_v45 = vadd.f32 %v17333_v63, %v919_v8  ;;  %v1951_v61 = vsel %vm1369_vm0, %v1950_v14, %v1949_v40  ;;  %v2077_v3 = vunpack.c.l.b16 %v14254_v27  ;;  %v2083_v21 = vrot.slane %v2076_v23, 7 }
 0x246   :  { %v2095_v41 = vpack.c.b16 %v2082_v57, %v2082_v57  ;;  %v17452_v2 = vsel %vm1208_vm5, %v1952_v1, %v1951_v61  ;;  %v1985_v58 = vcombine.high %v1965_v54, %v1965_v54  ;;  %v1992_v10 = vrot.slane %v1965_v54, %v17121_v19  ;;  %v17474_v57 = vpop.f32.mrb[52].mxu0 }
 0x247   :  { %v2084_v25 = vsel %vm19376_vm3, %v2083_v21, %v2075_v17  ;;  %v2085_v37 = vrot.slane %v2077_v3, 6  ;;  %v19377_v34 = vpack.c.b16 %v17246_v4, %v17246_v4  ;;  %v1054_v53 = vmax.f32 %v990_v45, 0.0 }
 0x248   :  { %v2100_v8 = vsel %vm17239_vm14, %v2095_v41, %v2099_v32  ;;  %v1999_v9 = vrot.slane %v1985_v58, %v17121_v19  ;;  %v2000_v18 = vcombine.high %v1992_v10, %v1992_v10  ;;  %v13032_v49 = vrot.slane %v1992_v10, 9 }
 0x249   :  { %2101 = vst [vmem:[#allocation2 + $0x20] sm:$0x8] %v2100_v8  ;;  %v1387_v29 = vsel %vm17442_vm8, %v19377_v34, %v1386_v15  ;;  %v17465_v33 = vcombine.low %v3375_v6, %v17448_v56  ;;  %v917_v0 = vmul.f32 %v17321_v39, %v17271_v44  ;;  %v2086_v27 = vsel %vm1223_vm10, %v2085_v37, %v2084_v25 }
 0x24a   :  { %1388 = vst [vmem:[#allocation2 + $0xc] sm:$0x7] %v1387_v29  ;;  %v2001_v13 = vcombine.high %v1999_v9, %v1999_v9  ;;  %v13033_v48 = vrot.slane %v2000_v18, 9  ;;  %v13034_v14 = vrot.slane %v1999_v9, 9  ;;  %v2038_v55 = vmax.f32 %v1992_v10, %v13032_v49 }
 0x24b   :  { %v3464_v17 = vshll.u32 %v17465_v33, 16  ;;  %v988_v4 = vadd.f32 %v17333_v63, %v917_v0  ;;  %v920_v23 = vmul.f32 %v17321_v39, %v17277_v52  ;;  %vm19336_vm2 = vsmask.f32 7424  ;;  %v17480_v52 = vld [vmem:[#allocation2 + $0x8] sm:$0xf] }
 0x24c   :  { %v13035_v32 = vrot.slane %v2001_v13, 9  ;;  %v2039_v15 = vmax.f32 %v2000_v18, %v13033_v48  ;;  %v2040_v40 = vmax.f32 %v1999_v9, %v13034_v14  ;;  %v14255_v1 = vpack.c.bf16 %v2038_v55, %v2038_v55 }
 0x24d   :  { %v3462_v44 = vshrl.u32 %v17465_v33, 16  ;;  %v1052_v54 = vmax.f32 %v988_v4, 0.0  ;;  %v991_v45 = vadd.f32 %v17333_v63, %v920_v23  ;;  %v918_v6 = vmul.f32 %v17321_v39, %v17279_v59 }
 0x24e   :  { %v2041_v61 = vmax.f32 %v2001_v13, %v13035_v32  ;;  %v14256_v3 = vpack.c.bf16 %v2039_v15, %v2039_v15  ;;  %v14257_v21 = vpack.c.bf16 %v2040_v40, %v2040_v40  ;;  %v2078_v41 = vunpack.c.l.b16 %v14255_v1  ;;  %v2102_v40 = vld [vmem:[#allocation2 + $0x24] sm:$0xf] }
 0x24f   :  { %v3466_v58 = vrot.slane %v3464_v17, 1  ;;  %v2105_v10 = vmax.f32 %v1052_v54, %v1054_v53  ;;  %v1055_v25 = vmax.f32 %v991_v45, 0.0  ;;  %v989_v37 = vadd.f32 %v17333_v63, %v918_v6  ;;  %v17491_v63 = vpop.f32.mrb[53].mxu0  ;;  %v17496_v45 = vld [vmem:[#allocation2 + $0x14] sm:$0xf] }
 0x250   :  { %v14258_v8 = vpack.c.bf16 %v2041_v61, %v2041_v61  ;;  %v2079_v9 = vunpack.c.l.b16 %v14256_v3  ;;  %v2080_v18 = vunpack.c.l.b16 %v14257_v21  ;;  %v2087_v49 = vrot.slane %v2078_v41, 5  ;;  %19378 = vst [vmem:[#allocation43_spill] sm:$0xff] %v17491_v63  ;;  %v15134_v21 = vld [vmem:[#allocation11 + $0x100] sm:$0xff]   ;;  %v17501_v41 = vpop.f32.mrb[54].mxu0 }
 0x251   :  { %v17483_v34 = vld [vmem:[#allocation2 + $0xc] sm:$0xf]  ;;  %v2109_v39 = vcombine.high %v2105_v10, %v2105_v10  ;;  %v2116_v29 = vrot.slane %v2105_v10, %v17121_v19  ;;  %v1053_v0 = vmax.f32 %v989_v37, 0.0  ;;  %v3467_v1 = vor.u32 %v3466_v58, %v3462_v44  ;;  %19379 = vst [vmem:[#allocation44_spill] sm:$0xff] %v17501_v41 }
 0x252   :  { %v17487_v59 = vcombine.low %v17480_v52, %v17483_v34  ;;  %v2081_v13 = vunpack.c.l.b16 %v14258_v8  ;;  %v2088_v53 = vsel %vm1369_vm0, %v2087_v49, %v2086_v27  ;;  %v2089_v48 = vrot.slane %v2079_v9, 4  ;;  %v17504_v49 = vpop.f32.mrb[55].mxu0 }
 0x253   :  { %v2091_v14 = vrot.slane %v2080_v18, 3  ;;  %v2123_v17 = vrot.slane %v2109_v39, %v17121_v19  ;;  %v2124_v4 = vcombine.high %v2116_v29, %v2116_v29  ;;  %v13044_v23 = vrot.slane %v2116_v29, 9  ;;  %v3379_v18 = vld [vmem:[#allocation2 + $0x10] sm:$0xf]  ;;  %19380 = vst [vmem:[#allocation45_spill] sm:$0xff] %v17504_v49 }
 0x254   :  { %v3469_v55 = vshll.u32 %v17487_v59, 16  ;;  %v2090_v32 = vsel %vm1208_vm5, %v2089_v48, %v2088_v53  ;;  %v2093_v15 = vrot.slane %v2081_v13, 2  ;;  %v2106_v54 = vmax.f32 %v1053_v0, %v1055_v25 }
 0x255   :  { %v2092_v27 = vsel %vm1211_vm6, %v2091_v14, %v2090_v32  ;;  %v2125_v61 = vcombine.high %v2123_v17, %v2123_v17  ;;  %v13045_v3 = vrot.slane %v2124_v4, 9  ;;  %v13046_v37 = vrot.slane %v2123_v17, 9 }
 0x256   :  { %v17499_v6 = vrot.slane %v3469_v55, 1  ;;  %v2094_v10 = vsel %vm1214_vm7, %v2093_v15, %v2092_v27  ;;  %v2175_v8 = vmax.f32 %v2116_v29, %v13044_v23  ;;  %v2126_v9 = vcombine.high %v2106_v54, %v2106_v54 }
 0x257   :  { %v2096_v44 = vpack.c.b16 %v2094_v10, %v2094_v10  ;;  %v13047_v25 = vrot.slane %v2125_v61, 9  ;;  %v2176_v39 = vmax.f32 %v2124_v4, %v13045_v3  ;;  %v2177_v0 = vmax.f32 %v2123_v17, %v13046_v37  ;;  %v3603_v10 = vld [vmem:[#allocation2 + $0x4] sm:$0xe] }
 0x258   :  { %v3472_v58 = vsel %vm19336_vm2, %v3467_v1, %v17499_v6  ;;  %v14259_v13 = vpack.c.bf16 %v2175_v8, %v2175_v8  ;;  %v2133_v53 = vrot.slane %v2106_v54, %v17121_v19  ;;  %v2140_v48 = vrot.slane %v2126_v9, %v17121_v19 }
 0x259   :  { %4631 = vmatprep.mubr.bf16.mxu0 %v3472_v58  ;;  %v2103_v29 = vsel %vm17289_vm1, %v2096_v44, %v2102_v40  ;;  %v2178_v14 = vmax.f32 %v2125_v61, %v13047_v25  ;;  %v14260_v55 = vpack.c.bf16 %v2176_v39, %v2176_v39  ;;  %v17514_v23 = vcombine.low %v3379_v18, %v17496_v45  ;;  %v17516_v40 = vpop.f32.mrb[56].mxu0 }
 0x25a   :  { %4632 = vmatmul.mubr.bf16.vlgmr.msra.gmra.mrb[64].mxu0 %v17465_v33  ;;  %2104 = vst [vmem:[#allocation2 + $0x24] sm:$0xf] %v2103_v29  ;;  %v14261_v32 = vpack.c.bf16 %v2177_v0, %v2177_v0  ;;  %v2215_v4 = vunpack.c.l.b16 %v14259_v13  ;;  %v2141_v15 = vcombine.high %v2133_v53, %v2133_v53  ;;  %v2142_v17 = vcombine.high %v2140_v48, %v2140_v48  ;;  %v17518_v9 = vpop.f32.mrb[57].mxu0 }
 0x25b   :  { %14563 = vmatpush3.bf16.msra.mxu0 %v15134_v21  ;;  %v14262_v1 = vpack.c.bf16 %v2178_v14, %v2178_v14  ;;  %v2216_v54 = vunpack.c.l.b16 %v14260_v55  ;;  %v13048_v27 = vrot.slane %v2133_v53, 9  ;;  %v13050_v3 = vrot.slane %v2140_v48, 9  ;;  %19381 = vst [vmem:[#allocation46_spill] sm:$0xff] %v17516_v40  ;;  %19382 = vst [vmem:[#allocation47_spill] sm:$0xff] %v17518_v9  ;;  %v17520_v0 = vpop.f32.mrb[58].mxu0 }
 0x25c   :  { %vm3567_vm3 = vcmask 1046528   ;;  %v2217_v61 = vunpack.c.l.b16 %v14261_v32  ;;  %v2223_v37 = vrot.slane %v2215_v4, 7  ;;  %v13049_v33 = vrot.slane %v2141_v15, 9  ;;  %19383 = vst [vmem:[#allocation48_spill] sm:$0xff] %v17520_v0  ;;  %v3562_v55 = vld [vmem:[#allocation2] sm:$0xe] }
 0x25d   :  { %v13051_v8 = vrot.slane %v2142_v17, 9  ;;  %v2218_v44 = vunpack.c.l.b16 %v14262_v1  ;;  %v2224_v58 = vrot.slane %v2216_v54, 6  ;;  %v2179_v25 = vmax.f32 %v2133_v53, %v13048_v27  ;;  %v17525_v40 = vpop.f32.mrb[59].mxu0  ;;  %v2243_v1 = vld [vmem:[#allocation2 + $0x2c] sm:$0x1] }
 0x25e   :  { %v2181_v39 = vmax.f32 %v2140_v48, %v13050_v3  ;;  %v2226_v21 = vrot.slane %v2217_v61, 5  ;;  %v2180_v13 = vmax.f32 %v2141_v15, %v13049_v33  ;;  %v17523_v14 = vcombine.low %v3603_v10, %v17480_v52  ;;  %19385 = vst [vmem:[#allocation50_spill] sm:$0xff] %v17525_v40  ;;  %v17537_v33 = vld [vmem:[#allocation8] ss:$0 sm:$0xff] }
 0x25f   :  { %v2182_v29 = vmax.f32 %v2142_v17, %v13051_v8  ;;  %v2225_v32 = vsel %vm1223_vm10, %v2224_v58, %v2223_v37  ;;  %v2228_v4 = vrot.slane %v2218_v44, 4  ;;  %v14263_v49 = vpack.c.bf16 %v2179_v25, %v2179_v25  ;;  %v15140_v58 = vld [vmem:[#allocation11 + $0x108] sm:$0xff]   ;;  %v17543_v25 = vpop.f32.mrb[60].mxu0 }
 0x260   :  { %19384 = vst [vmem:[#allocation49_spill] sm:$0xff] %v17523_v14  ;;  %v14265_v9 = vpack.c.bf16 %v2181_v39, %v2181_v39  ;;  %v2227_v53 = vsel %vm1369_vm0, %v2226_v21, %v2225_v32  ;;  %v14264_v48 = vpack.c.bf16 %v2180_v13, %v2180_v13  ;;  %v17530_v27 = vcombine.low %v17483_v34, %v3379_v18  ;;  %v17548_v13 = vld [vmem:[#allocation10] ss:$0 sm:$0xff] }
 0x261   :  { %v14267_v54 = vpack.c.bf16 %v2182_v29, %v2182_v29  ;;  %v2219_v15 = vunpack.c.l.b16 %v14263_v49  ;;  %v2229_v52 = vsel %vm1208_vm5, %v2228_v4, %v2227_v53  ;;  %v3621_v3 = vrot.slane %v17523_v14, 1  ;;  %19386 = vst [vmem:[#allocation51_spill] sm:$0xff] %v17543_v25 }
 0x262   :  { %v2221_v17 = vunpack.c.l.b16 %v14265_v9  ;;  %v2220_v10 = vunpack.c.l.b16 %v14264_v48  ;;  %v19333_v37 = vrot.slane %v17530_v27, 1  ;;  %v923_v8 = vmul.f32 %v17537_v33, %v17293_v26  ;;  %v15139_v9 = vld [vmem:[#allocation11 + $0x148] sm:$0xff]  }
 0x263   :  { %v2244_v61 = vsel %vm17310_vm13, %v14267_v54, %v2243_v1  ;;  %v2230_v44 = vrot.slane %v2219_v15, 3  ;;  %v13203_v18 = vcombine.low %v3562_v55, %v17448_v56  ;;  %v19332_v49 = vrot.slane %v17487_v59, 1  ;;  %v2240_v55 = vld [vmem:[#allocation2 + $0x28] sm:$0xf]  ;;  %14564 = vmatprep.subr.bf16.mxu0 %v15139_v9 }
 0x264   :  { %v2234_v34 = vrot.slane %v2221_v17, 1  ;;  %2245 = vst [vmem:[#allocation2 + $0x2c] sm:$0x1] %v2244_v61  ;;  %v2232_v39 = vrot.slane %v2220_v10, 2  ;;  %v3623_v21 = vsel %vm3567_vm3, %v3621_v3, %v19333_v37  ;;  %v994_v26 = vadd.f32 %v17548_v13, %v923_v8  ;;  %14565 = vmatpush3.bf16.msra.mxu0 %v15140_v58 }
 0x265   :  { %v921_v29 = vmul.f32 %v17537_v33, %v17296_v62  ;;  %v2231_v56 = vsel %vm1211_vm6, %v2230_v44, %v2229_v52  ;;  %4744 = vmatprep.mubr.bf16.mxu1 %v3623_v21  ;;  %v3568_v32 = vrot.slane %v13203_v18, 1  ;;  %v924_v4 = vmul.f32 %v17537_v33, %v17298_v50  ;;  %v17568_v52 = vld [vmem:[#allocation2 + $0x1c] sm:$0xf]  ;;  %v19406_v11 = vld [vmem:[#allocation50_spill] sm:$0xff] }
 0x266   :  { %v922_v1 = vmul.f32 %v17537_v33, %v17302_v42  ;;  %v2233_v53 = vsel %vm1214_vm7, %v2232_v39, %v2231_v56  ;;  %v1058_v48 = vmax.f32 %v994_v26, 0.0  ;;  %v927_v62 = vmul.f32 %v17537_v33, %v17316_v22 }
 0x267   :  { %v992_v54 = vadd.f32 %v17548_v13, %v921_v29  ;;  %vm19387_vm9 = vcmask 1047559   ;;  %v3570_v17 = vsel %vm3567_vm3, %v3568_v32, %v19332_v49  ;;  %v995_v50 = vadd.f32 %v17548_v13, %v924_v4  ;;  %v17585_v4 = vld [vmem:[#allocation2 + $0x18] sm:$0xf] }
 0x268   :  { %v2235_v15 = vsel %vm19387_vm9, %v2234_v34, %v2233_v53  ;;  %v993_v42 = vadd.f32 %v17548_v13, %v922_v1  ;;  %4745 = vmatmul.mubr.bf16.vlgmr.msra.gmra.mrb[0].mxu1 %v3570_v17  ;;  %v998_v61 = vadd.f32 %v17548_v13, %v927_v62  ;;  %v3473_v22 = vshrl.u32 %v17487_v59, 16 }
 0x269   :  { %v2236_v3 = vpack.c.b16 %v2235_v15, %v2235_v15  ;;  %v1056_v10 = vmax.f32 %v992_v54, 0.0  ;;  %v1059_v8 = vmax.f32 %v995_v50, 0.0  ;;  %v19331_v34 = vshll.u32 %v17514_v23, 16 }
 0x26a   :  { %v1057_v44 = vmax.f32 %v993_v42, 0.0  ;;  %v925_v18 = vmul.f32 %v17537_v33, %v17318_v31  ;;  %v1062_v39 = vmax.f32 %v998_v61, 0.0  ;;  %v3475_v21 = vor.u32 %v3473_v22, %v17499_v6 }
 0x26b   :  { %v2241_v9 = vsel %vm17369_vm4, %v2236_v3, %v2240_v55  ;;  %v2246_v58 = vmax.f32 %v1056_v10, %v1058_v48  ;;  %v17580_v29 = vrot.slane %v19331_v34, 1  ;;  %v928_v32 = vmul.f32 %v17537_v33, %v17327_v46 }
 0x26c   :  { %2242 = vst [vmem:[#allocation2 + $0x28] sm:$0xf] %v2241_v9  ;;  %v2247_v26 = vmax.f32 %v1057_v44, %v1059_v8  ;;  %v996_v56 = vadd.f32 %v17548_v13, %v925_v18  ;;  %v926_v1 = vmul.f32 %v17537_v33, %v17330_v60  ;;  %v17592_v6 = vcombine.low %v17585_v4, %v17568_v52 }
 0x26d   :  { %v2250_v31 = vcombine.high %v2246_v58, %v2246_v58  ;;  %v2257_v55 = vrot.slane %v2246_v58, %v17121_v19  ;;  %v3480_v54 = vsel %vm19336_vm2, %v3475_v21, %v17580_v29  ;;  %v17599_v50 = vadd.f32 %v17548_v13, %v928_v32 }
 0x26e   :  { %v2267_v53 = vcombine.high %v2247_v26, %v2247_v26  ;;  %v2274_v48 = vrot.slane %v2247_v26, %v17121_v19  ;;  %v1060_v62 = vmax.f32 %v996_v56, 0.0  ;;  %4639 = vmatprep.mubr.bf16.mxu0 %v3480_v54  ;;  %vm19388_vm9 = vcmask 1041409  }
 0x26f   :  { %v2264_v46 = vrot.slane %v2250_v31, %v17121_v19  ;;  %v2265_v15 = vcombine.high %v2257_v55, %v2257_v55  ;;  %v13061_v17 = vrot.slane %v2257_v55, 9  ;;  %4640 = vmatmul.mubr.bf16.gmra.mrb[68].mxu0 %v17487_v59  ;;  %vm19389_vm2 = vcmask 1047559  }
 0x270   :  { %v2281_v60 = vrot.slane %v2267_v53, %v17121_v19  ;;  %v2282_v42 = vcombine.high %v2274_v48, %v2274_v48  ;;  %v13065_v3 = vrot.slane %v2274_v48, 9  ;;  %v2388_v10 = vmax.f32 %v1060_v62, %v1062_v39 }
 0x271   :  { %v2266_v61 = vcombine.high %v2264_v46, %v2264_v46  ;;  %v13062_v22 = vrot.slane %v2265_v15, 9  ;;  %v13063_v8 = vrot.slane %v2264_v46, 9  ;;  %v2316_v44 = vmax.f32 %v2257_v55, %v13061_v17 }
 0x272   :  { %v2283_v18 = vcombine.high %v2281_v60, %v2281_v60  ;;  %v13066_v9 = vrot.slane %v2282_v42, 9  ;;  %v13067_v58 = vrot.slane %v2281_v60, 9  ;;  %v2320_v21 = vmax.f32 %v2274_v48, %v13065_v3 }
 0x273   :  { %v13064_v26 = vrot.slane %v2266_v61, 9  ;;  %v2317_v56 = vmax.f32 %v2265_v15, %v13062_v22  ;;  %v2318_v31 = vmax.f32 %v2264_v46, %v13063_v8  ;;  %v14268_v32 = vpack.c.bf16 %v2316_v44, %v2316_v44 }
 0x274   :  { %v13068_v54 = vrot.slane %v2283_v18, 9  ;;  %v2321_v34 = vmax.f32 %v2282_v42, %v13066_v9  ;;  %v2322_v53 = vmax.f32 %v2281_v60, %v13067_v58  ;;  %v14272_v49 = vpack.c.bf16 %v2320_v21, %v2320_v21 }
 0x275   :  { %v2319_v37 = vmax.f32 %v2266_v61, %v13064_v26  ;;  %v14269_v39 = vpack.c.bf16 %v2317_v56, %v2317_v56  ;;  %v14270_v62 = vpack.c.bf16 %v2318_v31, %v2318_v31  ;;  %v2356_v14 = vunpack.c.l.b16 %v14268_v32 }
 0x276   :  { %v2323_v25 = vmax.f32 %v2283_v18, %v13068_v54  ;;  %v14273_v40 = vpack.c.bf16 %v2321_v34, %v2321_v34  ;;  %v14274_v0 = vpack.c.bf16 %v2322_v53, %v2322_v53  ;;  %v2360_v55 = vunpack.c.l.b16 %v14272_v49  ;;  %v17605_v18 = vpop.f32.mrb[61].mxu0 }
 0x277   :  { %v14271_v17 = vpack.c.bf16 %v2319_v37, %v2319_v37  ;;  %v2357_v41 = vunpack.c.l.b16 %v14269_v39  ;;  %v2358_v63 = vunpack.c.l.b16 %v14270_v62  ;;  %v2364_v48 = vrot.slane %v2356_v14, 5  ;;  %v2382_v39 = vld [vmem:[#allocation2 + $0x3c] sm:$0xe]  ;;  %v2385_v62 = vld [vmem:[#allocation2 + $0x40] sm:$0x3] }
 0x278   :  { %v14275_v3 = vpack.c.bf16 %v2323_v25, %v2323_v25  ;;  %v2361_v15 = vunpack.c.l.b16 %v14273_v40  ;;  %v2362_v46 = vunpack.c.l.b16 %v14274_v0  ;;  %v2371_v22 = vrot.slane %v2360_v55, 1  ;;  %v15141_v0 = vld [vmem:[#allocation11 + $0x150] sm:$0xff]  }
 0x279   :  { %v2359_v8 = vunpack.c.l.b16 %v14271_v17  ;;  %v2365_v42 = vrot.slane %v2357_v41, 4  ;;  %v2367_v60 = vrot.slane %v2358_v63, 3  ;;  %v2392_v44 = vcombine.high %v2388_v10, %v2388_v10  ;;  %v15142_v25 = vld [vmem:[#allocation11 + $0x110] sm:$0xff]   ;;  %v17610_v41 = vpop.f32.mrb[62].mxu0  ;;  %14566 = vmatprep.subr.bf16.mxu0 %v15141_v0 }
 0x27a   :  { %v2363_v61 = vunpack.c.l.b16 %v14275_v3  ;;  %v2373_v9 = vrot.slane %v2362_v46, 7  ;;  %v2399_v58 = vrot.slane %v2388_v10, %v17121_v19  ;;  %v1063_v34 = vmax.f32 %v17599_v50, 0.0  ;;  %v17614_v50 = vpop.f32.mrb[63].mxu0  ;;  %14567 = vmatpush3.bf16.msra.mxu0 %v15142_v25 }
 0x27b   :  { %v2366_v37 = vsel %vm1208_vm5, %v2365_v42, %v2364_v48  ;;  %v2369_v49 = vrot.slane %v2359_v8, 2  ;;  %v2406_v14 = vrot.slane %v2392_v44, %v17121_v19  ;;  %v997_v40 = vadd.f32 %v17548_v13, %v926_v1 }
 0x27c   :  { %v2368_v63 = vsel %vm1211_vm6, %v2367_v60, %v2366_v37  ;;  %v2374_v21 = vsel %vm19388_vm9, %v2373_v9, %v2361_v15  ;;  %v2375_v10 = vrot.slane %v2363_v61, 6  ;;  %v2407_v26 = vcombine.high %v2399_v58, %v2399_v58 }
 0x27d   :  { %v2370_v56 = vsel %vm1214_vm7, %v2369_v49, %v2368_v63  ;;  %v2408_v31 = vcombine.high %v2406_v14, %v2406_v14  ;;  %v13077_v32 = vrot.slane %v2399_v58, 9  ;;  %v13079_v54 = vrot.slane %v2406_v14, 9 }
 0x27e   :  { %v2372_v1 = vsel %vm19389_vm2, %v2371_v22, %v2370_v56  ;;  %v2376_v53 = vsel %vm1223_vm10, %v2375_v10, %v2374_v21  ;;  %v13078_v55 = vrot.slane %v2407_v26, 9  ;;  %v1061_v17 = vmax.f32 %v997_v40, 0.0 }
 0x27f   :  { %v2377_v48 = vpack.c.b16 %v2372_v1, %v2372_v1  ;;  %v2378_v3 = vpack.c.b16 %v2376_v53, %v2376_v53  ;;  %v13080_v15 = vrot.slane %v2408_v31, 9  ;;  %v2458_v46 = vmax.f32 %v2399_v58, %v13077_v32 }
 0x280   :  { %v2459_v8 = vmax.f32 %v2407_v26, %v13078_v55  ;;  %v2460_v42 = vmax.f32 %v2406_v14, %v13079_v54  ;;  %v2389_v60 = vmax.f32 %v1061_v17, %v1063_v34  ;;  %v17621_v44 = vcombine.low %v17496_v45, %v17585_v4 }
 0x281   :  { %v2383_v22 = vsel %vm17149_vm11, %v2377_v48, %v2382_v39  ;;  %v2386_v61 = vsel %vm17157_vm12, %v2378_v3, %v2385_v62  ;;  %v2461_v9 = vmax.f32 %v2408_v31, %v13080_v15  ;;  %v14276_v37 = vpack.c.bf16 %v2458_v46, %v2458_v46 }
 0x282   :  { %2384 = vst [vmem:[#allocation2 + $0x3c] sm:$0xe] %v2383_v22  ;;  %2387 = vst [vmem:[#allocation2 + $0x40] sm:$0x3] %v2386_v61  ;;  %v14277_v49 = vpack.c.bf16 %v2459_v8, %v2459_v8  ;;  %v14278_v40 = vpack.c.bf16 %v2460_v42, %v2460_v42  ;;  %v2409_v58 = vcombine.high %v2389_v60, %v2389_v60  ;;  %v3624_v45 = vrot.slane %v17621_v44, 1 }
 0x283   :  { %v2416_v14 = vrot.slane %v2389_v60, %v17121_v19  ;;  %v14279_v34 = vpack.c.bf16 %v2461_v9, %v2461_v9  ;;  %v2498_v0 = vunpack.c.l.b16 %v14276_v37  ;;  %v3571_v4 = vrot.slane %v17514_v23, 1  ;;  %v2523_v61 = vld [vmem:[#allocation2 + $0x40] sm:$0xc] }
 0x284   :  { %v2499_v25 = vunpack.c.l.b16 %v14277_v49  ;;  %v2500_v63 = vunpack.c.l.b16 %v14278_v40  ;;  %v2423_v21 = vrot.slane %v2409_v58, %v17121_v19  ;;  %v19390_v32 = vrot.slane %v17530_v27, 1 }
 0x285   :  { %v2424_v10 = vcombine.high %v2416_v14, %v2416_v14  ;;  %v2501_v26 = vunpack.c.l.b16 %v14279_v34  ;;  %v2506_v56 = vrot.slane %v2498_v0, 3  ;;  %v13081_v31 = vrot.slane %v2416_v14, 9 }
 0x286   :  { %v3625_v54 = vsel %vm3567_vm3, %v19390_v32, %v3624_v45  ;;  %v2507_v1 = vrot.slane %v2499_v25, 2  ;;  %v2509_v53 = vrot.slane %v2500_v63, 1  ;;  %v2425_v39 = vcombine.high %v2423_v21, %v2423_v21 }
 0x287   :  { %v13082_v62 = vrot.slane %v2424_v10, 9  ;;  %4752 = vmatprep.mubr.bf16.mxu1 %v3625_v54  ;;  %v13083_v55 = vrot.slane %v2423_v21, 9  ;;  %v2462_v17 = vmax.f32 %v2416_v14, %v13081_v31  ;;  %v19391_v48 = vrot.slane %v17487_v59, 1  ;;  %v19392_v54 = vld [vmem:[#allocation38_spill] sm:$0xff] }
 0x288   :  { %v931_v15 = vmul.f32 %v17537_v33, %v17347_v35  ;;  %v2508_v46 = vsel %vm1214_vm7, %v2507_v1, %v2506_v56  ;;  %v13084_v8 = vrot.slane %v2425_v39, 9  ;;  %v929_v60 = vmul.f32 %v17537_v33, %v17351_v43 }
 0x289   :  { %v3572_v3 = vsel %vm3567_vm3, %v19391_v48, %v3571_v4  ;;  %v2463_v42 = vmax.f32 %v2424_v10, %v13082_v62  ;;  %v2510_v22 = vsel %vm19389_vm2, %v2509_v53, %v2508_v46  ;;  %v2464_v9 = vmax.f32 %v2423_v21, %v13083_v55  ;;  %v15148_v53 = vld [vmem:[#allocation11 + $0x158] sm:$0xff]   ;;  %v15151_v48 = vld [vmem:[#allocation11 + $0x160] sm:$0xff]  }
 0x28a   :  { %4753 = vmatmul.mubr.bf16.gmra.mrb[4].mxu1 %v3572_v3  ;;  %v14280_v37 = vpack.c.bf16 %v2462_v17, %v2462_v17  ;;  %v1002_v59 = vadd.f32 %v17548_v13, %v931_v15  ;;  %v2519_v49 = vpack.c.b16 %v2510_v22, %v2510_v22  ;;  %v2465_v40 = vmax.f32 %v2425_v39, %v13084_v8  ;;  %v15150_v39 = vld [vmem:[#allocation11 + $0x118] sm:$0xff]  }
 0x28b   :  { %v14281_v58 = vpack.c.bf16 %v2463_v42, %v2463_v42  ;;  %v1000_v35 = vadd.f32 %v17548_v13, %v929_v60  ;;  %v14282_v14 = vpack.c.bf16 %v2464_v9, %v2464_v9  ;;  %v932_v25 = vmul.f32 %v17537_v33, %v17356_v12  ;;  %14568 = vmatprep.subr.bf16.mxu0 %v15148_v53  ;;  %v1961_v9 = vld [vmem:[#allocation2 + $0x20] sm:$0x7] }
 0x28c   :  { %v2502_v34 = vunpack.c.l.b16 %v14280_v37  ;;  %v1066_v0 = vmax.f32 %v1002_v59, 0.0  ;;  %v2524_v43 = vsel %vm17209_vm15, %v2519_v49, %v2523_v61  ;;  %v14283_v63 = vpack.c.bf16 %v2465_v40, %v2465_v40  ;;  %14569 = vmatpush3.bf16.msra.mxu0 %v15150_v39  ;;  %v15155_v40 = vld [vmem:[#allocation11 + $0x168] sm:$0xff]  }
 0x28d   :  { %v2503_v10 = vunpack.c.l.b16 %v14281_v58  ;;  %v1064_v21 = vmax.f32 %v1000_v35, 0.0  ;;  %2525 = vst [vmem:[#allocation2 + $0x40] sm:$0xc] %v2524_v43  ;;  %v2504_v56 = vunpack.c.l.b16 %v14282_v14  ;;  %v1003_v32 = vadd.f32 %v17548_v13, %v932_v25  ;;  %14570 = vmatprep.subr.bf16.mxu0 %v15151_v48 }
 0x28e   :  { %v2511_v31 = vrot.slane %v2502_v34, 7  ;;  %v930_v1 = vmul.f32 %v17537_v33, %v19392_v54  ;;  %v1955_v62 = vpack.c.b16 %v17452_v2, %v17452_v2  ;;  %v2505_v12 = vunpack.c.l.b16 %v14283_v63  ;;  %v15152_v2 = vld [vmem:[#allocation11 + $0x120] sm:$0xff]  }
 0x28f   :  { %v2513_v55 = vrot.slane %v2503_v10, 6  ;;  %v2529_v17 = vmax.f32 %v1064_v21, %v1066_v0  ;;  %v2515_v15 = vrot.slane %v2504_v56, 5  ;;  %v1067_v46 = vmax.f32 %v1003_v32, 0.0  ;;  %v15156_v32 = vld [vmem:[#allocation11 + $0x128] sm:$0xff]  }
 0x290   :  { %v2512_v3 = vsel %vm19388_vm9, %v2511_v31, %v2501_v26  ;;  %v1001_v8 = vadd.f32 %v17548_v13, %v930_v1  ;;  %v2517_v60 = vrot.slane %v2505_v12, 4  ;;  %v3481_v49 = vshrl.u32 %v17514_v23, 16  ;;  %14571 = vmatpush3.bf16.msra.mxu0 %v15152_v2  ;;  %v15162_v2 = vld [vmem:[#allocation11 + $0x170] sm:$0xff]  }
 0x291   :  { %v2514_v42 = vsel %vm1223_vm10, %v2513_v55, %v2512_v3  ;;  %v2533_v22 = vcombine.high %v2529_v17, %v2529_v17  ;;  %v2540_v61 = vrot.slane %v2529_v17, %v17121_v19  ;;  %v3485_v26 = vshll.u32 %v17592_v6, 16  ;;  %14572 = vmatprep.subr.bf16.mxu0 %v15155_v40 }
 0x292   :  { %v2516_v37 = vsel %vm1369_vm0, %v2515_v15, %v2514_v42  ;;  %v1065_v59 = vmax.f32 %v1001_v8, 0.0  ;;  %v3483_v25 = vor.u32 %v3481_v49, %v17580_v29  ;;  %v1962_v63 = vsel %vm17442_vm8, %v1955_v62, %v1961_v9  ;;  %v15159_v8 = vld [vmem:[#allocation11 + $0x180] sm:$0xff]   ;;  %v15160_v42 = vld [vmem:[#allocation11 + $0x1c8] sm:$0xff]  }
 0x293   :  { %v17666_v58 = vsel %vm1208_vm5, %v2517_v60, %v2516_v37  ;;  %v2547_v35 = vrot.slane %v2533_v22, %v17121_v19  ;;  %v2548_v14 = vcombine.high %v2540_v61, %v2540_v61  ;;  %v13093_v34 = vrot.slane %v2540_v61, 9  ;;  %1963 = vst [vmem:[#allocation2 + $0x20] sm:$0x7] %v1962_v63  ;;  %v15163_v37 = vld [vmem:[#allocation11 + $0x130] sm:$0xff]  }
 0x294   :  { %v2530_v0 = vmax.f32 %v1065_v59, %v1067_v46  ;;  %v17674_v43 = vrot.slane %v3485_v26, 1  ;;  %vm19393_vm2 = vsmask.f32 7424  ;;  %v3573_v53 = vrot.slane %v17592_v6, 1  ;;  %v15158_v46 = vld [vmem:[#allocation11 + $0x1c0] sm:$0xff]   ;;  %14573 = vmatpush3.bf16.msra.mxu0 %v15156_v32 }
 0x295   :  { %v2549_v10 = vcombine.high %v2547_v35, %v2547_v35  ;;  %v13094_v21 = vrot.slane %v2548_v14, 9  ;;  %v13095_v56 = vrot.slane %v2547_v35, 9  ;;  %v2599_v31 = vmax.f32 %v2540_v61, %v13093_v34  ;;  %v17691_v34 = vld [vmem:[#allocation2 + $0x24] sm:$0xf]  ;;  %14638 = vmatprep.subr.bf16.mxu1 %v15158_v46  ;;  %14574 = vmatprep.subr.bf16.mxu0 %v15162_v2 }
 0x296   :  { %v2550_v54 = vcombine.high %v2530_v0, %v2530_v0  ;;  %v2557_v1 = vrot.slane %v2530_v0, %v17121_v19  ;;  %v3488_v29 = vsel %vm19393_vm2, %v3483_v25, %v17674_v43  ;;  %v17689_v15 = vsel %vm3567_vm3, %v3571_v4, %v3573_v53  ;;  %14639 = vmatpush3.bf16.msra.mxu1 %v15159_v8 }
 0x297   :  { %v13096_v39 = vrot.slane %v2549_v10, 9  ;;  %v2600_v12 = vmax.f32 %v2548_v14, %v13094_v21  ;;  %v2601_v55 = vmax.f32 %v2547_v35, %v13095_v56  ;;  %v14284_v62 = vpack.c.bf16 %v2599_v31, %v2599_v31  ;;  %4647 = vmatprep.mubr.bf16.mxu0 %v3488_v29  ;;  %v15161_v21 = vld [vmem:[#allocation11 + $0x188] sm:$0xff]   ;;  %14640 = vmatprep.subr.bf16.mxu1 %v15160_v42  ;;  %v15165_v42 = vld [vmem:[#allocation11 + $0x190] sm:$0xff]  }
 0x298   :  { %v2564_v17 = vrot.slane %v2550_v54, %v17121_v19  ;;  %v2565_v48 = vcombine.high %v2557_v1, %v2557_v1  ;;  %v13097_v3 = vrot.slane %v2557_v1, 9  ;;  %4648 = vmatmul.mubr.bf16.gmra.mrb[72].mxu0 %v17514_v23 }
 0x299   :  { %v2602_v60 = vmax.f32 %v2549_v10, %v13096_v39  ;;  %v14285_v22 = vpack.c.bf16 %v2600_v12, %v2600_v12  ;;  %v14286_v61 = vpack.c.bf16 %v2601_v55, %v2601_v55  ;;  %v2639_v9 = vunpack.c.l.b16 %v14284_v62  ;;  %v2664_v10 = vld [vmem:[#allocation2 + $0x44] sm:$0x8]  ;;  %v15164_v39 = vld [vmem:[#allocation11 + $0x1d0] sm:$0xff]   ;;  %14575 = vmatpush3.bf16.msra.mxu0 %v15163_v37 }
 0x29a   :  { %v2566_v59 = vcombine.high %v2564_v17, %v2564_v17  ;;  %v13098_v40 = vrot.slane %v2565_v48, 9  ;;  %v13099_v35 = vrot.slane %v2564_v17, 9  ;;  %v2603_v14 = vmax.f32 %v2557_v1, %v13097_v3  ;;  %v3383_v29 = vld [vmem:[#allocation2 + $0x20] sm:$0xf]  ;;  %14641 = vmatpush3.bf16.msra.mxu1 %v15161_v21 }
 0x29b   :  { %v14287_v0 = vpack.c.bf16 %v2602_v60, %v2602_v60  ;;  %v2640_v4 = vunpack.c.l.b16 %v14285_v22  ;;  %v2641_v25 = vunpack.c.l.b16 %v14286_v61  ;;  %v2647_v63 = vrot.slane %v2639_v9, 1  ;;  %14642 = vmatprep.subr.bf16.mxu1 %v15164_v39 }
 0x29c   :  { %v13100_v56 = vrot.slane %v2566_v59, 9  ;;  %v2604_v31 = vmax.f32 %v2565_v48, %v13098_v40  ;;  %v2605_v32 = vmax.f32 %v2564_v17, %v13099_v35  ;;  %v14288_v54 = vpack.c.bf16 %v2603_v14, %v2603_v14  ;;  %v15170_v35 = vld [vmem:[#allocation11 + $0x178] sm:$0xff]  }
 0x29d   :  { %v2642_v12 = vunpack.c.l.b16 %v14287_v0  ;;  %v2648_v1 = vrot.slane %v2641_v25, 7  ;;  %v2660_v55 = vpack.c.b16 %v2647_v63, %v2647_v63  ;;  %v17694_v62 = vcombine.low %v3383_v29, %v17691_v34  ;;  %v15174_v25 = vld [vmem:[#allocation11 + $0x138] sm:$0xff]   ;;  %14576 = vmatprep.subr.bf16.mxu0 %v15170_v35 }
 0x29e   :  { %v2606_v3 = vmax.f32 %v2566_v59, %v13100_v56  ;;  %v14289_v46 = vpack.c.bf16 %v2604_v31, %v2604_v31  ;;  %v14290_v8 = vpack.c.bf16 %v2605_v32, %v2605_v32  ;;  %v2643_v60 = vunpack.c.l.b16 %v14288_v54  ;;  %v15166_v59 = vld [vmem:[#allocation11 + $0x1d8] sm:$0xff]   ;;  %14643 = vmatpush3.bf16.msra.mxu1 %v15165_v42  ;;  %14577 = vmatpush3.bf16.msra.mxu0 %v15174_v25 }
 0x29f   :  { %v2649_v22 = vsel %vm19388_vm9, %v2648_v1, %v2640_v4  ;;  %v2650_v61 = vrot.slane %v2642_v12, 6  ;;  %v2665_v17 = vsel %vm17239_vm14, %v2660_v55, %v2664_v10  ;;  %v17700_v48 = vcombine.low %v17568_v52, %v3383_v29  ;;  %v15167_v54 = vld [vmem:[#allocation11 + $0x198] sm:$0xff]   ;;  %14644 = vmatprep.subr.bf16.mxu1 %v15166_v59 }
 0x2a0   :  { %2666 = vst [vmem:[#allocation2 + $0x44] sm:$0x8] %v2665_v17  ;;  %v14291_v9 = vpack.c.bf16 %v2606_v3, %v2606_v3  ;;  %v2644_v2 = vunpack.c.l.b16 %v14289_v46  ;;  %v2645_v40 = vunpack.c.l.b16 %v14290_v8  ;;  %v2652_v37 = vrot.slane %v2643_v60, 5  ;;  %v19394_v1 = vld [vmem:[#allocation39_spill] sm:$0xff]  ;;  %v19395_v17 = vld [vmem:[#allocation40_spill] sm:$0xff] }
 0x2a1   :  { %v2651_v14 = vsel %vm1223_vm10, %v2650_v61, %v2649_v22  ;;  %v3626_v0 = vrot.slane %v17700_v48, 1  ;;  %v935_v4 = vmul.f32 %v17537_v33, %v17378_v5  ;;  %v933_v52 = vmul.f32 %v17537_v33, %v17380_v7  ;;  %v2667_v22 = vld [vmem:[#allocation2 + $0x48] sm:$0xf] }
 0x2a2   :  { %v2646_v63 = vunpack.c.l.b16 %v14291_v9  ;;  %v2653_v21 = vsel %vm1369_vm0, %v2652_v37, %v2651_v14  ;;  %v2654_v10 = vrot.slane %v2644_v2, 4  ;;  %v2656_v56 = vrot.slane %v2645_v40, 3  ;;  %14645 = vmatpush3.bf16.msra.mxu1 %v15167_v54  ;;  %v15175_v37 = vld [vmem:[#allocation11 + $0x1a0] sm:$0xff]  }
 0x2a3   :  { %v3627_v31 = vsel %vm3567_vm3, %v3624_v45, %v3626_v0  ;;  %v1006_v32 = vadd.f32 %v17548_v13, %v935_v4  ;;  %v1004_v5 = vadd.f32 %v17548_v13, %v933_v52  ;;  %v936_v7 = vmul.f32 %v17537_v33, %v17382_v16  ;;  %v15171_v45 = vld [vmem:[#allocation11 + $0x1e0] sm:$0xff]   ;;  %v15177_v52 = vld [vmem:[#allocation11 + $0x1e8] sm:$0xff]  }
 0x2a4   :  { %v2655_v29 = vsel %vm1208_vm5, %v2654_v10, %v2653_v21  ;;  %v2658_v39 = vrot.slane %v2646_v63, 2  ;;  %4760 = vmatprep.mubr.bf16.mxu1 %v3627_v31  ;;  %v934_v12 = vmul.f32 %v17537_v33, %v17384_v51  ;;  %v939_v55 = vmul.f32 %v17537_v33, %v19394_v1  ;;  %14646 = vmatprep.subr.bf16.mxu1 %v15171_v45  ;;  %v19397_v1 = vld [vmem:[#allocation42_spill] sm:$0xff] }
 0x2a5   :  { %v2657_v3 = vsel %vm1211_vm6, %v2656_v56, %v2655_v29  ;;  %4761 = vmatmul.mubr.bf16.gmra.mrb[8].mxu1 %v17689_v15  ;;  %v1070_v46 = vmax.f32 %v1006_v32, 0.0  ;;  %v1068_v16 = vmax.f32 %v1004_v5, 0.0  ;;  %v1007_v8 = vadd.f32 %v17548_v13, %v936_v7  ;;  %v15182_v56 = vld [vmem:[#allocation11 + $0x200] sm:$0xff]  }
 0x2a6   :  { %v2659_v60 = vsel %vm1214_vm7, %v2658_v39, %v2657_v3  ;;  %v1005_v61 = vadd.f32 %v17548_v13, %v934_v12  ;;  %v1010_v51 = vadd.f32 %v17548_v13, %v939_v55  ;;  %v937_v42 = vmul.f32 %v17537_v33, %v19395_v17  ;;  %v19396_v7 = vld [vmem:[#allocation41_spill] sm:$0xff]  ;;  %14647 = vmatpush3.bf16.msra.mxu1 %v15175_v37 }
 0x2a7   :  { %v2661_v9 = vpack.c.b16 %v2659_v60, %v2659_v60  ;;  %v2670_v2 = vmax.f32 %v1068_v16, %v1070_v46  ;;  %v1071_v40 = vmax.f32 %v1007_v8, 0.0  ;;  %v3489_v15 = vshrl.u32 %v17592_v6, 16  ;;  %14888 = vmatprep.subr.bf16.mxu0 %v15182_v56  ;;  %14648 = vmatprep.subr.bf16.mxu1 %v15177_v52  ;;  %v15179_v8 = vld [vmem:[#allocation11 + $0x1f0] sm:$0xff]  }
 0x2a8   :  { %v1069_v59 = vmax.f32 %v1005_v61, 0.0  ;;  %v1074_v35 = vmax.f32 %v1010_v51, 0.0  ;;  %v1008_v14 = vadd.f32 %v17548_v13, %v937_v42  ;;  %v19337_v4 = vshll.u32 %v17694_v62, 16 }
 0x2a9   :  { %v2668_v25 = vsel %vm17289_vm1, %v2661_v9, %v2667_v22  ;;  %v2674_v63 = vcombine.high %v2670_v2, %v2670_v2  ;;  %v2681_v21 = vrot.slane %v2670_v2, %v17121_v19  ;;  %v3491_v10 = vor.u32 %v3489_v15, %v17674_v43  ;;  %v15178_v43 = vld [vmem:[#allocation11 + $0x1a8] sm:$0xff]  }
 0x2aa   :  { %2669 = vst [vmem:[#allocation2 + $0x48] sm:$0xf] %v2668_v25  ;;  %v2671_v31 = vmax.f32 %v1069_v59, %v1071_v40  ;;  %v1072_v32 = vmax.f32 %v1008_v14, 0.0  ;;  %v17742_v5 = vrot.slane %v19337_v4, 1  ;;  %v17746_v54 = vmul.f32 %v17537_v33, %v19396_v7  ;;  %14649 = vmatpush3.bf16.msra.mxu1 %v15178_v43  ;;  %v15184_v43 = vld [vmem:[#allocation11 + $0x1b8] sm:$0xff]  }
 0x2ab   :  { %v2688_v29 = vrot.slane %v2674_v63, %v17121_v19  ;;  %v2689_v39 = vcombine.high %v2681_v21, %v2681_v21  ;;  %v13109_v12 = vrot.slane %v2681_v21, 9  ;;  %v17751_v55 = vmul.f32 %v17537_v33, %v19397_v1  ;;  %14650 = vmatprep.subr.bf16.mxu1 %v15179_v8 }
 0x2ac   :  { %v2691_v45 = vcombine.high %v2671_v31, %v2671_v31  ;;  %v2698_v3 = vrot.slane %v2671_v31, %v17121_v19  ;;  %v2811_v46 = vmax.f32 %v1072_v32, %v1074_v35  ;;  %v3496_v16 = vsel %vm19393_vm2, %v3491_v10, %v17742_v5  ;;  %v15180_v35 = vld [vmem:[#allocation11 + $0x1b0] sm:$0xff]  }
 0x2ad   :  { %v2690_v60 = vcombine.high %v2688_v29, %v2688_v29  ;;  %v13110_v22 = vrot.slane %v2689_v39, 9  ;;  %v13111_v61 = vrot.slane %v2688_v29, 9  ;;  %v2740_v51 = vmax.f32 %v2681_v21, %v13109_v12  ;;  %4655 = vmatprep.mubr.bf16.mxu0 %v3496_v16  ;;  %v15183_v21 = vld [vmem:[#allocation11 + $0x1f8] sm:$0xff]  }
 0x2ae   :  { %v2705_v33 = vrot.slane %v2691_v45, %v17121_v19  ;;  %v2706_v17 = vcombine.high %v2698_v3, %v2698_v3  ;;  %v13113_v42 = vrot.slane %v2698_v3, 9  ;;  %v2815_v9 = vcombine.high %v2811_v46, %v2811_v46  ;;  %4656 = vmatmul.mubr.bf16.gmra.mrb[76].mxu0 %v17592_v6  ;;  %14651 = vmatpush3.bf16.msra.mxu1 %v15180_v35 }
 0x2af   :  { %v13112_v2 = vrot.slane %v2690_v60, 9  ;;  %v2741_v40 = vmax.f32 %v2689_v39, %v13110_v22  ;;  %v2742_v37 = vmax.f32 %v2688_v29, %v13111_v61  ;;  %v14292_v59 = vpack.c.bf16 %v2740_v51, %v2740_v51  ;;  %14652 = vmatprep.subr.bf16.mxu1 %v15183_v21 }
 0x2b0   :  { %v2707_v14 = vcombine.high %v2705_v33, %v2705_v33  ;;  %v13114_v52 = vrot.slane %v2706_v17, 9  ;;  %v13115_v25 = vrot.slane %v2705_v33, 9  ;;  %v2744_v63 = vmax.f32 %v2698_v3, %v13113_v42 }
 0x2b1   :  { %v2743_v10 = vmax.f32 %v2690_v60, %v13112_v2  ;;  %v14293_v56 = vpack.c.bf16 %v2741_v40, %v2741_v40  ;;  %v14294_v31 = vpack.c.bf16 %v2742_v37, %v2742_v37  ;;  %v2780_v32 = vunpack.c.l.b16 %v14292_v59  ;;  %v2808_v2 = vld [vmem:[#allocation2 + $0x50] sm:$0x1] }
 0x2b2   :  { %v13116_v7 = vrot.slane %v2707_v14, 9  ;;  %v2745_v12 = vmax.f32 %v2706_v17, %v13114_v52  ;;  %v2746_v1 = vmax.f32 %v2705_v33, %v13115_v25  ;;  %v14296_v45 = vpack.c.bf16 %v2744_v63, %v2744_v63  ;;  %14653 = vmatpush3.bf16.msra.mxu1 %v15184_v43 }
 0x2b3   :  { %v14295_v16 = vpack.c.bf16 %v2743_v10, %v2743_v10  ;;  %v2781_v39 = vunpack.c.l.b16 %v14293_v56  ;;  %v2782_v29 = vunpack.c.l.b16 %v14294_v31  ;;  %v2788_v22 = vrot.slane %v2780_v32, 7 }
 0x2b4   :  { %v2747_v61 = vmax.f32 %v2707_v14, %v13116_v7  ;;  %v14297_v51 = vpack.c.bf16 %v2745_v12, %v2745_v12  ;;  %v14298_v4 = vpack.c.bf16 %v2746_v1, %v2746_v1  ;;  %v2784_v3 = vunpack.c.l.b16 %v14296_v45 }
 0x2b5   :  { %v2783_v8 = vunpack.c.l.b16 %v14295_v16  ;;  %v2789_v60 = vrot.slane %v2781_v39, 6  ;;  %v2791_v42 = vrot.slane %v2782_v29, 5  ;;  %v2822_v40 = vrot.slane %v2811_v46, %v17121_v19 }
 0x2b6   :  { %v2785_v17 = vunpack.c.l.b16 %v14297_v51  ;;  %v2786_v33 = vunpack.c.l.b16 %v14298_v4  ;;  %v2795_v37 = vrot.slane %v2784_v3, 3  ;;  %v14300_v59 = vpack.c.bf16 %v2747_v61, %v2747_v61  ;;  %v2805_v61 = vld [vmem:[#allocation2 + $0x4c] sm:$0xf] }
 0x2b7   :  { %v2790_v52 = vsel %vm1223_vm10, %v2789_v60, %v2788_v22  ;;  %v2793_v25 = vrot.slane %v2783_v8, 4  ;;  %v2829_v35 = vrot.slane %v2815_v9, %v17121_v19  ;;  %v2830_v14 = vcombine.high %v2822_v40, %v2822_v40  ;;  %v17771_v22 = vld [vmem:[#allocation2 + $0x28] sm:$0xf] }
 0x2b8   :  { %v2792_v63 = vsel %vm1369_vm0, %v2791_v42, %v2790_v52  ;;  %v2797_v21 = vrot.slane %v2785_v17, 2  ;;  %v2799_v10 = vrot.slane %v2786_v33, 1  ;;  %v2809_v56 = vsel %vm17310_vm13, %v14300_v59, %v2808_v2 }
 0x2b9   :  { %v2794_v46 = vsel %vm1208_vm5, %v2793_v25, %v2792_v63  ;;  %2810 = vst [vmem:[#allocation2 + $0x50] sm:$0x1] %v2809_v56  ;;  %v2831_v4 = vcombine.high %v2829_v35, %v2829_v35  ;;  %v13126_v31 = vrot.slane %v2822_v40, 9  ;;  %v13127_v32 = vrot.slane %v2830_v14, 9 }
 0x2ba   :  { %v2796_v7 = vsel %vm1211_vm6, %v2795_v37, %v2794_v46  ;;  %v13128_v12 = vrot.slane %v2829_v35, 9  ;;  %v1011_v9 = vadd.f32 %v17548_v13, %v17746_v54  ;;  %v1009_v1 = vadd.f32 %v17548_v13, %v17751_v55 }
 0x2bb   :  { %v2798_v45 = vsel %vm1214_vm7, %v2797_v21, %v2796_v7  ;;  %v13129_v16 = vrot.slane %v2831_v4, 9  ;;  %v2881_v39 = vmax.f32 %v2822_v40, %v13126_v31  ;;  %v2882_v29 = vmax.f32 %v2830_v14, %v13127_v32  ;;  %v15137_v7 = vld [vmem:[#allocation2 + $0x28] ss:$0 sps:$4 sm:$0x11]  }
 0x2bc   :  { %vm19398_vm9 = vcmask 1047559   ;;  %v2883_v51 = vmax.f32 %v2829_v35, %v13128_v12  ;;  %v1075_v3 = vmax.f32 %v1011_v9, 0.0  ;;  %v1073_v8 = vmax.f32 %v1009_v1, 0.0 }
 0x2bd   :  { %v2800_v43 = vsel %vm19398_vm9, %v2799_v10, %v2798_v45  ;;  %v2884_v42 = vmax.f32 %v2831_v4, %v13129_v16  ;;  %v14301_v2 = vpack.c.bf16 %v2881_v39, %v2881_v39  ;;  %v14302_v54 = vpack.c.bf16 %v2882_v29, %v2882_v29  ;;  %v15138_v16 = vld [vmem:[#allocation2 + $0x2c] ss:$0 sps:$4 sm:$0x11]  }
 0x2be   :  { %v2801_v60 = vpack.c.b16 %v2800_v43, %v2800_v43  ;;  %v2520_v13 = vpack.c.b16 %v17666_v58, %v17666_v58  ;;  %v14303_v55 = vpack.c.bf16 %v2883_v51, %v2883_v51  ;;  %v2812_v17 = vmax.f32 %v1073_v8, %v1075_v3  ;;  %v17797_v8 = vld [vmem:[#allocation8] ss:$0 sm:$0xff] }
 0x2bf   :  { %v17778_v40 = vcombine.low %v17691_v34, %v17771_v22  ;;  %v14304_v37 = vpack.c.bf16 %v2884_v42, %v2884_v42  ;;  %v2921_v59 = vunpack.c.l.b16 %v14301_v2  ;;  %v2922_v52 = vunpack.c.l.b16 %v14302_v54 }
 0x2c0   :  { %v2806_v33 = vsel %vm17369_vm4, %v2801_v60, %v2805_v61  ;;  %v2923_v25 = vunpack.c.l.b16 %v14303_v55  ;;  %v2832_v35 = vcombine.high %v2812_v17, %v2812_v17  ;;  %v2839_v14 = vrot.slane %v2812_v17, %v17121_v19  ;;  %v17802_v17 = vld [vmem:[#allocation10] ss:$0 sm:$0xff] }
 0x2c1   :  { %2807 = vst [vmem:[#allocation2 + $0x4c] sm:$0xf] %v2806_v33  ;;  %v3628_v63 = vrot.slane %v17778_v40, 1  ;;  %v2924_v21 = vunpack.c.l.b16 %v14304_v37  ;;  %v2929_v10 = vrot.slane %v2921_v59, 5  ;;  %v2930_v56 = vrot.slane %v2922_v52, 4 }
 0x2c2   :  { %v3575_v46 = vrot.slane %v17694_v62, 1  ;;  %v2932_v34 = vrot.slane %v2923_v25, 3  ;;  %v2846_v4 = vrot.slane %v2832_v35, %v17121_v19  ;;  %v2847_v31 = vcombine.high %v2839_v14, %v2839_v14 }
 0x2c3   :  { %v13130_v32 = vrot.slane %v2839_v14, 9  ;;  %v2931_v12 = vsel %vm1208_vm5, %v2930_v56, %v2929_v10  ;;  %v2934_v9 = vrot.slane %v2924_v21, 2  ;;  %v3629_v1 = vsel %vm3567_vm3, %v3626_v0, %v3628_v63  ;;  %v19399_v56 = vld [vmem:[#allocation43_spill] sm:$0xff] }
 0x2c4   :  { %v3576_v45 = vsel %vm3567_vm3, %v3573_v53, %v3575_v46  ;;  %v2933_v39 = vsel %vm1211_vm6, %v2932_v34, %v2931_v12  ;;  %v2848_v29 = vcombine.high %v2846_v4, %v2846_v4  ;;  %v13131_v43 = vrot.slane %v2847_v31, 9  ;;  %4768 = vmatprep.mubr.bf16.mxu1 %v3629_v1  ;;  %v19400_v1 = vld [vmem:[#allocation44_spill] sm:$0xff] }
 0x2c5   :  { %v13132_v61 = vrot.slane %v2846_v4, 9  ;;  %v2885_v51 = vmax.f32 %v2839_v14, %v13130_v32  ;;  %v2935_v3 = vsel %vm1214_vm7, %v2934_v9, %v2933_v39  ;;  %4769 = vmatmul.mubr.bf16.gmra.mrb[12].mxu1 %v3576_v45  ;;  %v943_v0 = vmul.f32 %v17797_v8, %v17474_v57 }
 0x2c6   :  { %v3497_v60 = vshrl.u32 %v17694_v62, 16  ;;  %v13133_v42 = vrot.slane %v2848_v29, 9  ;;  %v2886_v53 = vmax.f32 %v2847_v31, %v13131_v43  ;;  %v3501_v54 = vshll.u32 %v15137_v7, 16 }
 0x2c7   :  { %v2887_v2 = vmax.f32 %v2846_v4, %v13132_v61  ;;  %v14305_v55 = vpack.c.bf16 %v2885_v51, %v2885_v51  ;;  %v1014_v33 = vadd.f32 %v17802_v17, %v943_v0  ;;  %v3630_v59 = vrot.slane %v15138_v16, 1  ;;  %v19401_v16 = vld [vmem:[#allocation45_spill] sm:$0xff]  ;;  %v19402_v61 = vld [vmem:[#allocation46_spill] sm:$0xff] }
 0x2c8   :  { %v3499_v37 = vor.u32 %v3497_v60, %v17742_v5  ;;  %v2888_v52 = vmax.f32 %v2848_v29, %v13133_v42  ;;  %v14306_v25 = vpack.c.bf16 %v2886_v53, %v2886_v53  ;;  %v3503_v57 = vrot.slane %v3501_v54, 1  ;;  %v2946_v42 = vld [vmem:[#allocation2 + $0x50] sm:$0xe] }
 0x2c9   :  { %v14307_v35 = vpack.c.bf16 %v2887_v2, %v2887_v2  ;;  %v2925_v14 = vunpack.c.l.b16 %v14305_v55  ;;  %v1078_v21 = vmax.f32 %v1014_v33, 0.0  ;;  %v3631_v10 = vsel %vm3567_vm3, %v3628_v63, %v3630_v59 }
 0x2ca   :  { %v941_v34 = vmul.f32 %v17797_v8, %v19399_v56  ;;  %v14308_v4 = vpack.c.bf16 %v2888_v52, %v2888_v52  ;;  %v2926_v31 = vunpack.c.l.b16 %v14306_v25  ;;  %v3504_v12 = vsel %vm19393_vm2, %v3499_v37, %v3503_v57  ;;  %4776 = vmatprep.mubr.bf16.mxu1 %v3631_v10  ;;  %v19404_v10 = vld [vmem:[#allocation47_spill] sm:$0xff] }
 0x2cb   :  { %v2927_v32 = vunpack.c.l.b16 %v14307_v35  ;;  %v2936_v9 = vrot.slane %v2925_v14, 1  ;;  %4663 = vmatprep.mubr.bf16.mxu0 %v3504_v12  ;;  %v944_v45 = vmul.f32 %v17797_v8, %v19400_v1  ;;  %v942_v39 = vmul.f32 %v17797_v8, %v19401_v16  ;;  %v2949_v14 = vld [vmem:[#allocation2 + $0x54] sm:$0x3] }
 0x2cc   :  { %v1012_v5 = vadd.f32 %v17802_v17, %v941_v34  ;;  %v2928_v63 = vunpack.c.l.b16 %v14308_v4  ;;  %4664 = vmatmul.mubr.bf16.gmra.mrb[80].mxu0 %v17694_v62  ;;  %v3577_v43 = vrot.slane %v15137_v7, 1  ;;  %v947_v51 = vmul.f32 %v17797_v8, %v19402_v61  ;;  %v19405_v34 = vld [vmem:[#allocation48_spill] sm:$0xff] }
 0x2cd   :  { %v2938_v29 = vrot.slane %v2927_v32, 7  ;;  %v2937_v0 = vsel %vm19398_vm9, %v2936_v9, %v2935_v3  ;;  %v1015_v2 = vadd.f32 %v17802_v17, %v944_v45  ;;  %v1013_v54 = vadd.f32 %v17802_v17, %v942_v39 }
 0x2ce   :  { %v1076_v53 = vmax.f32 %v1012_v5, 0.0  ;;  %vm19403_vm2 = vcmask 1041409   ;;  %v2940_v33 = vrot.slane %v2928_v63, 6  ;;  %v2942_v37 = vpack.c.b16 %v2937_v0, %v2937_v0 }
 0x2cf   :  { %v2939_v55 = vsel %vm19403_vm2, %v2938_v29, %v2926_v31  ;;  %v3578_v59 = vsel %vm3567_vm3, %v3575_v46, %v3577_v43  ;;  %v1079_v52 = vmax.f32 %v1015_v2, 0.0  ;;  %v1077_v25 = vmax.f32 %v1013_v54, 0.0 }
 0x2d0   :  { %v2952_v7 = vmax.f32 %v1076_v53, %v1078_v21  ;;  %4777 = vmatmul.mubr.bf16.gmra.mrb[16].mxu1 %v3578_v59  ;;  %v1018_v3 = vadd.f32 %v17802_v17, %v947_v51  ;;  %v2941_v35 = vsel %vm1223_vm10, %v2940_v33, %v2939_v55  ;;  %v2947_v57 = vsel %vm17149_vm11, %v2942_v37, %v2946_v42  ;;  %vm19407_vm11 = vmmov %vm19398_vm9 }
 0x2d1   :  { %v945_v56 = vmul.f32 %v17797_v8, %v19404_v10  ;;  %v948_v4 = vmul.f32 %v17797_v8, %v19405_v34  ;;  %v2943_v31 = vpack.c.b16 %v2941_v35, %v2941_v35  ;;  %2948 = vst [vmem:[#allocation2 + $0x50] sm:$0xe] %v2947_v57  ;;  %v2953_v32 = vmax.f32 %v1077_v25, %v1079_v52  ;;  %vm19408_vm9 = vmmov %vm19403_vm2 }
 0x2d2   :  { %v2956_v46 = vcombine.high %v2952_v7, %v2952_v7  ;;  %v2963_v21 = vrot.slane %v2952_v7, %v17121_v19  ;;  %v1082_v12 = vmax.f32 %v1018_v3, 0.0  ;;  %v946_v1 = vmul.f32 %v17797_v8, %v19406_v11 }
 0x2d3   :  { %v1016_v9 = vadd.f32 %v17802_v17, %v945_v56  ;;  %v17838_v5 = vadd.f32 %v17802_v17, %v948_v4  ;;  %v2950_v45 = vsel %vm17157_vm12, %v2943_v31, %v2949_v14  ;;  %v2973_v29 = vcombine.high %v2953_v32, %v2953_v32 }
 0x2d4   :  { %v2970_v16 = vrot.slane %v2956_v46, %v17121_v19  ;;  %v2971_v39 = vcombine.high %v2963_v21, %v2963_v21  ;;  %v13142_v63 = vrot.slane %v2963_v21, 9  ;;  %2951 = vst [vmem:[#allocation2 + $0x54] sm:$0x3] %v2950_v45  ;;  %v2980_v43 = vrot.slane %v2953_v32, %v17121_v19 }
 0x2d5   :  { %v1080_v61 = vmax.f32 %v1016_v9, 0.0  ;;  %v1083_v51 = vmax.f32 %v17838_v5, 0.0  ;;  %v2987_v54 = vrot.slane %v2973_v29, %v17121_v19 }
 0x2d6   :  { %v2972_v0 = vcombine.high %v2970_v16, %v2970_v16  ;;  %v13143_v42 = vrot.slane %v2971_v39, 9  ;;  %v13144_v53 = vrot.slane %v2970_v16, 9  ;;  %v3022_v2 = vmax.f32 %v2963_v21, %v13142_v63 }
 0x2d7   :  { %v2988_v55 = vcombine.high %v2980_v43, %v2980_v43  ;;  %v13146_v33 = vrot.slane %v2980_v43, 9  ;;  %v3093_v37 = vmax.f32 %v1080_v61, %v1082_v12  ;;  %v2989_v3 = vcombine.high %v2987_v54, %v2987_v54 }
 0x2d8   :  { %v13145_v59 = vrot.slane %v2972_v0, 9  ;;  %v3023_v7 = vmax.f32 %v2971_v39, %v13143_v42  ;;  %v3024_v52 = vmax.f32 %v2970_v16, %v13144_v53  ;;  %v14309_v25 = vpack.c.bf16 %v3022_v2, %v3022_v2 }
 0x2d9   :  { %v13147_v35 = vrot.slane %v2988_v55, 9  ;;  %v13148_v57 = vrot.slane %v2987_v54, 9  ;;  %v3026_v14 = vmax.f32 %v2980_v43, %v13146_v33  ;;  %v13149_v31 = vrot.slane %v2989_v3, 9 }
 0x2da   :  { %v3025_v10 = vmax.f32 %v2972_v0, %v13145_v59  ;;  %v14310_v56 = vpack.c.bf16 %v3023_v7, %v3023_v7  ;;  %v14311_v34 = vpack.c.bf16 %v3024_v52, %v3024_v52  ;;  %v3062_v4 = vunpack.c.l.b16 %v14309_v25 }
 0x2db   :  { %v3027_v46 = vmax.f32 %v2988_v55, %v13147_v35  ;;  %v3028_v21 = vmax.f32 %v2987_v54, %v13148_v57  ;;  %v14313_v32 = vpack.c.bf16 %v3026_v14, %v3026_v14  ;;  %v3029_v63 = vmax.f32 %v2989_v3, %v13149_v31  ;;  %v3087_v3 = vld [vmem:[#allocation2 + $0x54] sm:$0xc] }
 0x2dc   :  { %v14312_v9 = vpack.c.bf16 %v3025_v10, %v3025_v10  ;;  %v3063_v11 = vunpack.c.l.b16 %v14310_v56  ;;  %v3064_v45 = vunpack.c.l.b16 %v14311_v34  ;;  %v3070_v12 = vrot.slane %v3062_v4, 3 }
 0x2dd   :  { %v14314_v39 = vpack.c.bf16 %v3027_v46, %v3027_v46  ;;  %v14315_v16 = vpack.c.bf16 %v3028_v21, %v3028_v21  ;;  %v3066_v29 = vunpack.c.l.b16 %v14313_v32  ;;  %v3097_v43 = vcombine.high %v3093_v37, %v3093_v37 }
 0x2de   :  { %v3065_v61 = vunpack.c.l.b16 %v14312_v9  ;;  %v3071_v42 = vrot.slane %v3063_v11, 2  ;;  %v3073_v53 = vrot.slane %v3064_v45, 1  ;;  %v14316_v0 = vpack.c.bf16 %v3029_v63, %v3029_v63  ;;  %v2526_v45 = vld [vmem:[#allocation2 + $0x44] sm:$0x7] }
 0x2df   :  { %v3067_v2 = vunpack.c.l.b16 %v14314_v39  ;;  %v3068_v33 = vunpack.c.l.b16 %v14315_v16  ;;  %v3075_v59 = vrot.slane %v3066_v29, 7  ;;  %v3104_v54 = vrot.slane %v3093_v37, %v17121_v19  ;;  %v3385_v29 = vld [vmem:[#allocation2 + $0x38] sm:$0xf] }
 0x2e0   :  { %v3072_v55 = vsel %vm1214_vm7, %v3071_v42, %v3070_v12  ;;  %v3111_v7 = vrot.slane %v3097_v43, %v17121_v19  ;;  %v1017_v52 = vadd.f32 %v17802_v17, %v946_v1  ;;  %v3069_v35 = vunpack.c.l.b16 %v14316_v0  ;;  %v19409_v0 = vld [vmem:[#allocation51_spill] sm:$0xff] }
 0x2e1   :  { %v3074_v25 = vsel %vm19407_vm11, %v3073_v53, %v3072_v55  ;;  %v3076_v57 = vsel %vm19408_vm9, %v3075_v59, %v3065_v61  ;;  %v3077_v14 = vrot.slane %v3067_v2, 6  ;;  %v3079_v56 = vrot.slane %v3068_v33, 5  ;;  %v17861_v61 = vld [vmem:[#allocation2 + $0x3c] sm:$0xf] }
 0x2e2   :  { %v3083_v10 = vpack.c.b16 %v3074_v25, %v3074_v25  ;;  %v3112_v34 = vcombine.high %v3104_v54, %v3104_v54  ;;  %v3113_v4 = vcombine.high %v3111_v7, %v3111_v7  ;;  %v3081_v46 = vrot.slane %v3069_v35, 4 }
 0x2e3   :  { %v3078_v31 = vsel %vm1223_vm10, %v3077_v14, %v3076_v57  ;;  %v13158_v21 = vrot.slane %v3104_v54, 9  ;;  %v13160_v37 = vrot.slane %v3111_v7, 9  ;;  %v1081_v16 = vmax.f32 %v1017_v52, 0.0 }
 0x2e4   :  { %v3088_v32 = vsel %vm17209_vm15, %v3083_v10, %v3087_v3  ;;  %v3080_v1 = vsel %vm1369_vm0, %v3079_v56, %v3078_v31  ;;  %v13159_v9 = vrot.slane %v3112_v34, 9  ;;  %v13161_v11 = vrot.slane %v3113_v4, 9 }
 0x2e5   :  { %3089 = vst [vmem:[#allocation2 + $0x54] sm:$0xc] %v3088_v32  ;;  %v17859_v12 = vsel %vm1208_vm5, %v3081_v46, %v3080_v1  ;;  %v3163_v63 = vmax.f32 %v3104_v54, %v13158_v21  ;;  %v3165_v39 = vmax.f32 %v3111_v7, %v13160_v37  ;;  %v951_v2 = vmul.f32 %v17797_v8, %v19409_v0  ;;  %v3228_v21 = vld [vmem:[#allocation2 + $0x58] sm:$0x8] }
 0x2e6   :  { %v3084_v42 = vpack.c.b16 %v17859_v12, %v17859_v12  ;;  %v3164_v53 = vmax.f32 %v3112_v34, %v13159_v9  ;;  %v3166_v43 = vmax.f32 %v3113_v4, %v13161_v11  ;;  %v3094_v55 = vmax.f32 %v1081_v16, %v1083_v51 }
 0x2e7   :  { %v14317_v33 = vpack.c.bf16 %v3163_v63, %v3163_v63  ;;  %v14319_v59 = vpack.c.bf16 %v3165_v39, %v3165_v39  ;;  %v2527_v54 = vsel %vm17442_vm8, %v2520_v13, %v2526_v45  ;;  %v1022_v25 = vadd.f32 %v17802_v17, %v951_v2 }
 0x2e8   :  { %v14318_v7 = vpack.c.bf16 %v3164_v53, %v3164_v53  ;;  %v14320_v52 = vpack.c.bf16 %v3166_v43, %v3166_v43  ;;  %2528 = vst [vmem:[#allocation2 + $0x44] sm:$0x7] %v2527_v54  ;;  %v17876_v3 = vcombine.low %v3385_v29, %v17861_v61  ;;  %v3114_v14 = vcombine.high %v3094_v55, %v3094_v55 }
 0x2e9   :  { %v3203_v35 = vunpack.c.l.b16 %v14317_v33  ;;  %v3205_v57 = vunpack.c.l.b16 %v14319_v59  ;;  %v3121_v5 = vrot.slane %v3094_v55, %v17121_v19  ;;  %v1086_v56 = vmax.f32 %v1022_v25, 0.0  ;;  %v17888_v33 = vld [vmem:[#allocation2 + $0x40] sm:$0xf] }
 0x2ea   :  { %v3204_v51 = vunpack.c.l.b16 %v14318_v7  ;;  %v3206_v10 = vunpack.c.l.b16 %v14320_v52  ;;  %v3514_v58 = vshrl.u32 %v17876_v3, 16  ;;  %v3128_v4 = vrot.slane %v3114_v14, %v17121_v19 }
 0x2eb   :  { %v3211_v34 = vrot.slane %v3203_v35, 1  ;;  %v3212_v13 = vrot.slane %v3205_v57, 7  ;;  %v3129_v31 = vcombine.high %v3121_v5, %v3121_v5  ;;  %v13162_v37 = vrot.slane %v3121_v5, 9 }
 0x2ec   :  { %v3214_v46 = vrot.slane %v3206_v10, 6  ;;  %v3516_v32 = vshll.u32 %v17876_v3, 16  ;;  %v949_v1 = vmul.f32 %v17797_v8, %v17605_v18  ;;  %v3130_v45 = vcombine.high %v3128_v4, %v3128_v4 }
 0x2ed   :  { %v3213_v9 = vsel %vm19403_vm2, %v3212_v13, %v3204_v51  ;;  %v3224_v11 = vpack.c.b16 %v3211_v34, %v3211_v34  ;;  %v13163_v63 = vrot.slane %v3129_v31, 9  ;;  %v13164_v39 = vrot.slane %v3128_v4, 9 }
 0x2ee   :  { %v3167_v16 = vmax.f32 %v3121_v5, %v13162_v37  ;;  %v3215_v29 = vsel %vm1223_vm10, %v3214_v46, %v3213_v9  ;;  %v3518_v53 = vrot.slane %v3516_v32, 1  ;;  %v13165_v0 = vrot.slane %v3130_v45, 9 }
 0x2ef   :  { %v3229_v43 = vsel %vm17239_vm14, %v3224_v11, %v3228_v21  ;;  %v3168_v2 = vmax.f32 %v3129_v31, %v13163_v63  ;;  %v17890_v59 = vld [vmem:[#allocation2 + $0x44] sm:$0xf]  ;;  %v1020_v18 = vadd.f32 %v17802_v17, %v949_v1  ;;  %v3169_v55 = vmax.f32 %v3128_v4, %v13164_v39 }
 0x2f0   :  { %3230 = vst [vmem:[#allocation2 + $0x58] sm:$0x8] %v3229_v43  ;;  %v14321_v54 = vpack.c.bf16 %v3167_v16, %v3167_v16  ;;  %v17895_v7 = vcombine.low %v17888_v33, %v17890_v59  ;;  %v3519_v52 = vor.u32 %v3518_v53, %v3514_v58  ;;  %v3170_v25 = vmax.f32 %v3130_v45, %v13165_v0  ;;  %v17907_v45 = vld [vmem:[#allocation2 + $0x4c] sm:$0xf]  ;;  %v3389_v43 = vld [vmem:[#allocation2 + $0x48] sm:$0xf] }
 0x2f1   :  { %v14322_v35 = vpack.c.bf16 %v3168_v2, %v3168_v2  ;;  %v1084_v57 = vmax.f32 %v1020_v18, 0.0  ;;  %v952_v14 = vmul.f32 %v17797_v8, %v17610_v41  ;;  %v14323_v5 = vpack.c.bf16 %v3169_v55, %v3169_v55 }
 0x2f2   :  { %v3207_v51 = vunpack.c.l.b16 %v14321_v54  ;;  %v3521_v10 = vshll.u32 %v17895_v7, 16  ;;  %v950_v34 = vmul.f32 %v17797_v8, %v17614_v50  ;;  %v14324_v13 = vpack.c.bf16 %v3170_v25, %v3170_v25  ;;  %v3231_v54 = vld [vmem:[#allocation2 + $0x5c] sm:$0xf] }
 0x2f3   :  { %v3208_v4 = vunpack.c.l.b16 %v14322_v35  ;;  %v3234_v31 = vmax.f32 %v1084_v57, %v1086_v56  ;;  %v1023_v46 = vadd.f32 %v17802_v17, %v952_v14  ;;  %v3209_v21 = vunpack.c.l.b16 %v14323_v5  ;;  %v3606_v57 = vld [vmem:[#allocation2 + $0x3c] sm:$0xe] }
 0x2f4   :  { %v3216_v58 = vrot.slane %v3207_v51, 5  ;;  %v17903_v37 = vrot.slane %v3521_v10, 1  ;;  %v1021_v32 = vadd.f32 %v17802_v17, %v950_v34  ;;  %v3210_v1 = vunpack.c.l.b16 %v14324_v13 }
 0x2f5   :  { %v3218_v41 = vrot.slane %v3208_v4, 4  ;;  %v3238_v9 = vcombine.high %v3234_v31, %v3234_v31  ;;  %v3245_v11 = vrot.slane %v3234_v31, %v17121_v19  ;;  %v3220_v8 = vrot.slane %v3209_v21, 3 }
 0x2f6   :  { %v3217_v50 = vsel %vm1369_vm0, %v3216_v58, %v3215_v29  ;;  %vm19410_vm11 = vsmask.f32 7424  ;;  %v1087_v63 = vmax.f32 %v1023_v46, 0.0  ;;  %v3222_v16 = vrot.slane %v3210_v1, 2 }
 0x2f7   :  { %v3524_v56 = vsel %vm19410_vm11, %v3519_v52, %v17903_v37  ;;  %v3219_v39 = vsel %vm1208_vm5, %v3218_v41, %v3217_v50  ;;  %v3252_v17 = vrot.slane %v3238_v9, %v17121_v19  ;;  %v3253_v53 = vcombine.high %v3245_v11, %v3245_v11  ;;  %vm19412_vm9 = vmmov %vm19410_vm11 }
 0x2f8   :  { %4671 = vmatprep.mubr.bf16.mxu0 %v3524_v56  ;;  %v3221_v0 = vsel %vm1211_vm6, %v3220_v8, %v3219_v39  ;;  %v13174_v2 = vrot.slane %v3245_v11, 9  ;;  %v1085_v18 = vmax.f32 %v1021_v32, 0.0  ;;  %v17917_v29 = vcombine.low %v3389_v43, %v17907_v45 }
 0x2f9   :  { %4672 = vmatmul.mubr.bf16.gmra.mrb[84].mxu0 %v17876_v3  ;;  %v3223_v55 = vsel %vm1214_vm7, %v3222_v16, %v3221_v0  ;;  %v3254_v52 = vcombine.high %v3252_v17, %v3252_v17  ;;  %v13175_v25 = vrot.slane %v3253_v53, 9  ;;  %v13176_v35 = vrot.slane %v3252_v17, 9 }
 0x2fa   :  { %v3225_v14 = vpack.c.b16 %v3223_v55, %v3223_v55  ;;  %v3304_v5 = vmax.f32 %v3245_v11, %v13174_v2  ;;  %v3235_v51 = vmax.f32 %v1085_v18, %v1087_v63  ;;  %v17921_v10 = vcombine.low %v3606_v57, %v17888_v33  ;;  %v3563_v2 = vld [vmem:[#allocation2 + $0x38] sm:$0xe] }
 0x2fb   :  { %v13177_v34 = vrot.slane %v3254_v52, 9  ;;  %v3305_v13 = vmax.f32 %v3253_v53, %v13175_v25  ;;  %v3306_v3 = vmax.f32 %v3252_v17, %v13176_v35  ;;  %v17924_v4 = vcombine.low %v17890_v59, %v3389_v43 }
 0x2fc   :  { %v3232_v31 = vsel %vm17289_vm1, %v3225_v14, %v3231_v54  ;;  %v14325_v46 = vpack.c.bf16 %v3304_v5, %v3304_v5  ;;  %v3255_v21 = vcombine.high %v3235_v51, %v3235_v51  ;;  %v3262_v58 = vrot.slane %v3235_v51, %v17121_v19 }
 0x2fd   :  { %3233 = vst [vmem:[#allocation2 + $0x5c] sm:$0xf] %v3232_v31  ;;  %v3307_v32 = vmax.f32 %v3254_v52, %v13177_v34  ;;  %v14326_v1 = vpack.c.bf16 %v3305_v13, %v3305_v13  ;;  %v14327_v41 = vpack.c.bf16 %v3306_v3, %v3306_v3  ;;  %v3649_v9 = vrot.slane %v17921_v10, 1 }
 0x2fe   :  { %v3344_v11 = vunpack.c.l.b16 %v14325_v46  ;;  %v3269_v50 = vrot.slane %v3255_v21, %v17121_v19  ;;  %v3270_v8 = vcombine.high %v3262_v58, %v3262_v58  ;;  %v13178_v56 = vrot.slane %v3262_v58, 9 }
 0x2ff   :  { %v14328_v63 = vpack.c.bf16 %v3307_v32, %v3307_v32  ;;  %v3345_v39 = vunpack.c.l.b16 %v14326_v1  ;;  %v3346_v16 = vunpack.c.l.b16 %v14327_v41  ;;  %v3650_v38 = vrot.slane %v17924_v4, 1  ;;  %v3372_v41 = vld [vmem:[#allocation2 + $0x64] sm:$0x1] }
 0x300   :  { %v3352_v17 = vrot.slane %v3344_v11, 7  ;;  %v3271_v53 = vcombine.high %v3269_v50, %v3269_v50  ;;  %v13179_v43 = vrot.slane %v3270_v8, 9  ;;  %v13180_v0 = vrot.slane %v3269_v50, 9 }
 0x301   :  { %v3347_v18 = vunpack.c.l.b16 %v14328_v63  ;;  %v3353_v55 = vrot.slane %v3345_v39, 6  ;;  %v3355_v54 = vrot.slane %v3346_v16, 5  ;;  %v3308_v52 = vmax.f32 %v3262_v58, %v13178_v56  ;;  %v3392_v58 = vld [vmem:[#allocation2 + $0x54] sm:$0xf]  ;;  %v3391_v39 = vld [vmem:[#allocation2 + $0x50] sm:$0xf] }
 0x302   :  { %v13181_v25 = vrot.slane %v3271_v53, 9  ;;  %v3309_v35 = vmax.f32 %v3270_v8, %v13179_v43  ;;  %v3310_v57 = vmax.f32 %v3269_v50, %v13180_v0  ;;  %v3651_v14 = vsel %vm3567_vm3, %v3649_v9, %v3650_v38  ;;  %v3090_v43 = vld [vmem:[#allocation2 + $0x58] sm:$0x7] }
 0x303   :  { %v3354_v5 = vsel %vm1223_vm10, %v3353_v55, %v3352_v17  ;;  %v3357_v51 = vrot.slane %v3347_v18, 4  ;;  %v14329_v34 = vpack.c.bf16 %v3308_v52, %v3308_v52  ;;  %4784 = vmatprep.mubr.bf16.mxu1 %v3651_v14  ;;  %v13204_v13 = vcombine.low %v3563_v2, %v17861_v61 }
 0x304   :  { %v3356_v3 = vsel %vm1369_vm0, %v3355_v54, %v3354_v5  ;;  %v3311_v31 = vmax.f32 %v3271_v53, %v13181_v25  ;;  %v14330_v46 = vpack.c.bf16 %v3309_v35, %v3309_v35  ;;  %v14331_v21 = vpack.c.bf16 %v3310_v57, %v3310_v57 }
 0x305   :  { %v3348_v32 = vunpack.c.l.b16 %v14329_v34  ;;  %v3358_v1 = vsel %vm1208_vm5, %v3357_v51, %v3356_v3  ;;  %v3587_v11 = vrot.slane %v13204_v13, 1  ;;  %v3588_v9 = vrot.slane %v17895_v7, 1  ;;  %v3369_v51 = vld [vmem:[#allocation2 + $0x60] sm:$0xf] }
 0x306   :  { %v3349_v50 = vunpack.c.l.b16 %v14330_v46  ;;  %v3350_v8 = vunpack.c.l.b16 %v14331_v21  ;;  %v14333_v56 = vpack.c.bf16 %v3311_v31, %v3311_v31  ;;  %v3525_v63 = vshrl.u32 %v17895_v7, 16 }
 0x307   :  { %v3359_v61 = vrot.slane %v3348_v32, 3  ;;  %v3589_v16 = vsel %vm3567_vm3, %v3587_v11, %v3588_v9  ;;  %v3529_v17 = vshll.u32 %v17917_v29, 16  ;;  %v17943_v53 = vcombine.low %v3391_v39, %v3392_v58  ;;  %v3394_v32 = vld [vmem:[#allocation2 + $0x5c] sm:$0xf] }
 0x308   :  { %v3361_v0 = vrot.slane %v3349_v50, 2  ;;  %v3363_v2 = vrot.slane %v3350_v8, 1  ;;  %v3373_v18 = vsel %vm17310_vm13, %v14333_v56, %v3372_v41  ;;  %4785 = vmatmul.mubr.bf16.gmra.mrb[20].mxu1 %v3589_v16  ;;  %v3527_v54 = vor.u32 %v3525_v63, %v17903_v37  ;;  %v3831_v8 = vld [vmem:[#allocation2 + $0x8] sm:$0xc]  ;;  %v17989_v56 = vld [vmem:[#allocation2 + $0xc] sm:$0xf] }
 0x309   :  { %v3360_v55 = vsel %vm1211_vm6, %v3359_v61, %v3358_v1  ;;  %3374 = vst [vmem:[#allocation2 + $0x64] sm:$0x1] %v3373_v18  ;;  %v3531_v52 = vrot.slane %v3529_v17, 1  ;;  %v17952_v25 = vcombine.low %v17907_v45, %v3391_v39  ;;  %v3533_v57 = vshrl.u32 %v17917_v29, 16  ;;  %v16383_v18 = vld [vmem:[#allocation2 + $0x8] sm:$0xf] }
 0x30a   :  { %v3362_v35 = vsel %vm1214_vm7, %v3361_v0, %v3360_v55  ;;  %v3537_v14 = vshll.u32 %v17943_v53, 16  ;;  %v3091_v5 = vsel %vm17442_vm8, %v3084_v42, %v3090_v43  ;;  %vm19411_vm1 = vcmask 1047559   ;;  %vm19413_vm8 = vmmov %vm19412_vm9  ;;  %v3790_v0 = vld [vmem:[#allocation2 + $0x4] sm:$0xc] }
 0x30b   :  { %v3364_v37 = vsel %vm19411_vm1, %v3363_v2, %v3362_v35  ;;  %v3532_v34 = vsel %vm19412_vm9, %v3527_v54, %v3531_v52  ;;  %v3652_v45 = vrot.slane %v17952_v25, 1  ;;  %v3590_v13 = vrot.slane %v17917_v29, 1  ;;  %3092 = vst [vmem:[#allocation2 + $0x58] sm:$0x7] %v3091_v5 }
 0x30c   :  { %v3365_v3 = vpack.c.b16 %v3364_v37, %v3364_v37  ;;  %4679 = vmatprep.mubr.bf16.mxu0 %v3532_v34  ;;  %v3535_v31 = vor.u32 %v3533_v57, %v3531_v52  ;;  %v3539_v12 = vrot.slane %v3537_v14, 1  ;;  %v3592_v11 = vrot.slane %v17943_v53, 1 }
 0x30d   :  { %4680 = vmatmul.mubr.bf16.gmra.mrb[88].mxu0 %v17895_v7  ;;  %v3653_v28 = vsel %vm3567_vm3, %v3650_v38, %v3652_v45  ;;  %v3591_v21 = vsel %vm3567_vm3, %v3588_v9, %v3590_v13  ;;  %v3541_v38 = vshrl.u32 %v17943_v53, 16  ;;  %v17992_v63 = vcombine.low %v3831_v8, %v17989_v56 }
 0x30e   :  { %v3370_v42 = vsel %vm17369_vm4, %v3365_v3, %v3369_v51  ;;  %4792 = vmatprep.mubr.bf16.mxu1 %v3653_v28  ;;  %v3540_v46 = vsel %vm19413_vm8, %v3535_v31, %v3539_v12  ;;  %v3593_v2 = vsel %vm3567_vm3, %v3590_v13, %v3592_v11  ;;  %v13219_v55 = vcombine.low %v3790_v0, %v16383_v18  ;;  %vm19414_vm4 = vmmov %vm19413_vm8  ;;  %v3832_v13 = vld [vmem:[#allocation2 + $0x2c] sm:$0xf] }
 0x30f   :  { %3371 = vst [vmem:[#allocation2 + $0x60] sm:$0xf] %v3370_v42  ;;  %4687 = vmatprep.mubr.bf16.mxu0 %v3540_v46  ;;  %v3543_v39 = vor.u32 %v3541_v38, %v3539_v12  ;;  %v3894_v51 = vshrl.u32 %v17992_v63, 16  ;;  %v3897_v34 = vshll.u32 %v17992_v63, 16  ;;  %v3683_v28 = vshll.u32 %v17530_v27, 16  ;;  %vm19416_vm11 = vmmov %vm19414_vm4 }
 0x310   :  { %4793 = vmatmul.mubr.bf16.gmra.mrb[24].mxu1 %v3591_v21  ;;  %v15173_v37 = vld [vmem:[#allocation2 + $0x64] ss:$0 sps:$4 sm:$0x11]   ;;  %v18017_v42 = vcombine.low %v17771_v22, %v3832_v13  ;;  %vm3795_vm2 = vcmask 1045504   ;;  %v19415_v21 = vld [vmem:[#allocation49_spill] sm:$0xff]  ;;  %v3797_v8 = vrot.slane %v17530_v27, 2 }
 0x311   :  { %vm19348_vm1 = vsmask.f32 5376  ;;  %v3901_v22 = vrot.slane %v3481_v49, 2  ;;  %v3899_v18 = vrot.slane %v3897_v34, 3  ;;  %v3905_v49 = vrot.slane %v3489_v15, 2 }
 0x312   :  { %v3393_v1 = vld [vmem:[#allocation2 + $0x58] sm:$0xf]  ;;  %v3791_v34 = vld [vmem:[#allocation2 + $0x3c] sm:$0xc]  ;;  %vm3670_vm9 = vsmask.f32 6400 }
 0x313   :  { %v17978_v41 = vcombine.low %v3393_v1, %v3394_v32  ;;  %v17980_v7 = vcombine.low %v3392_v58, %v3393_v1  ;;  %vm19349_vm8 = vcmask 1044480  }
 0x315   :  { %4688 = vmatmul.mubr.bf16.gmra.mrb[92].mxu0 %v17917_v29  ;;  %v3654_v30 = vrot.slane %v17980_v7, 1  ;;  %v3545_v50 = vshll.u32 %v17978_v41, 16  ;;  %v3549_v35 = vshrl.u32 %v17978_v41, 16  ;;  %v3594_v46 = vrot.slane %v17978_v41, 1 }
 0x316   :  { %v17987_v9 = vld [vmem:[#allocation2 + $0x60] sm:$0xf] }
 0x317   :  { %v3655_v58 = vsel %vm3567_vm3, %v3652_v45, %v3654_v30  ;;  %v3547_v61 = vrot.slane %v3545_v50, 1  ;;  %v18000_v16 = vcombine.low %v3394_v32, %v17987_v9  ;;  %v18002_v43 = vld [vmem:[#allocation2 + $0x60] ss:$0 sps:$4 sm:$0x11]   ;;  %v3680_v45 = vshrl.u32 %v17530_v27, 16 }
 0x318   :  { %4800 = vmatprep.mubr.bf16.mxu1 %v3655_v58  ;;  %v3553_v5 = vshll.u32 %v18002_v43, 16  ;;  %v3672_v32 = vshrl.u32 %v19415_v21, 16  ;;  %v3675_v58 = vshll.u32 %v19415_v21, 16  ;;  %v3595_v13 = vsel %vm3567_vm3, %v3592_v11, %v3594_v46 }
 0x319   :  { %4801 = vmatmul.mubr.bf16.gmra.mrb[28].mxu1 %v3593_v2  ;;  %v3548_v54 = vsel %vm19414_vm4, %v3543_v39, %v3547_v61  ;;  %v3656_v52 = vrot.slane %v18000_v16, 1  ;;  %v3551_v31 = vor.u32 %v3549_v35, %v3547_v61  ;;  %v3658_v39 = vrot.slane %v15173_v37, 1 }
 0x31a   :  { %4695 = vmatprep.mubr.bf16.mxu0 %v3548_v54  ;;  %v3555_v12 = vrot.slane %v3553_v5, 1  ;;  %v19417_v61 = vshll.u32 %v17514_v23, 16  ;;  %v3896_v2 = vrot.slane %v3894_v51, 2  ;;  %v3682_v54 = vrot.slane %v3680_v45, 1 }
 0x31b   :  { %v3657_v3 = vsel %vm3567_vm3, %v3654_v30, %v3656_v52  ;;  %v3796_v30 = vrot.slane %v13219_v55, 2  ;;  %v3685_v5 = vrot.slane %v3683_v28, 2  ;;  %v3674_v55 = vrot.slane %v3672_v32, 1 }
 0x31c   :  { %4808 = vmatprep.mubr.bf16.mxu1 %v3657_v3  ;;  %v3556_v1 = vsel %vm19416_vm11, %v3551_v31, %v3555_v12  ;;  %v3902_v0 = vrot.slane %v19417_v61, 3  ;;  %v3689_v27 = vshrl.u32 %v17621_v44, 16  ;;  %v3692_v3 = vshll.u32 %v17621_v44, 16  ;;  %v3835_v61 = vld [vmem:[#allocation2 + $0x64] sm:$0xf] }
 0x31d   :  { %4696 = vmatmul.mubr.bf16.gmra.mrb[96].mxu0 %v17943_v53  ;;  %v3659_v37 = vsel %vm3567_vm3, %v3656_v52, %v3658_v39  ;;  %v3677_v31 = vrot.slane %v3675_v58, 2  ;;  %v3906_v51 = vrot.slane %v3485_v26, 3  ;;  %v3798_v45 = vsel %vm3795_vm2, %v3796_v30, %v3797_v8 }
 0x31e   :  { %4703 = vmatprep.mubr.bf16.mxu0 %v3556_v1  ;;  %v3903_v11 = vor.u32 %v3902_v0, %v3901_v22  ;;  %v13220_v12 = vcombine.low %v3791_v34, %v17888_v33  ;;  %v3596_v28 = vrot.slane %v18002_v43, 1  ;;  %v3686_v21 = vor.u32 %v3685_v5, %v3682_v54 }
 0x31f   :  { %v3799_v52 = vrot.slane %v17621_v44, 2  ;;  %v3847_v32 = vrot.slane %v17514_v23, 2  ;;  %v3691_v1 = vrot.slane %v3689_v27, 1  ;;  %v3694_v15 = vrot.slane %v3692_v3, 2 }
 0x320   :  { %v3909_v26 = vrot.slane %v3497_v60, 2  ;;  %v19418_v58 = vshll.u32 %v17694_v62, 16  ;;  %v3900_v30 = vor.u32 %v3899_v18, %v3896_v2  ;;  %v3678_v22 = vor.u32 %v3677_v31, %v3674_v55 }
 0x321   :  { %4809 = vmatmul.mubr.bf16.gmra.mrb[32].mxu1 %v3595_v13  ;;  %v3907_v33 = vor.u32 %v3906_v51, %v3905_v49  ;;  %v19341_v43 = vrot.slane %v17700_v48, 2  ;;  %v3846_v44 = vrot.slane %v17992_v63, 2  ;;  %v19339_v0 = vrot.slane %v17592_v6, 2 }
 0x322   :  { %4816 = vmatprep.mubr.bf16.mxu1 %v3659_v37  ;;  %v3910_v39 = vrot.slane %v19418_v58, 3  ;;  %v3698_v54 = vshrl.u32 %v17700_v48, 16  ;;  %v3701_v60 = vshll.u32 %v17700_v48, 16  ;;  %v18053_v5 = vcombine.low %v17987_v9, %v3835_v61 }
 0x323   :  { %v3597_v13 = vsel %vm3567_vm3, %v3594_v46, %v3596_v28  ;;  %v3904_v2 = vsel %vm19348_vm1, %v3900_v30, %v3903_v11  ;;  %v3800_v18 = vsel %vm3795_vm2, %v3797_v8, %v3799_v52  ;;  %v3687_v55 = vsel %vm3670_vm9, %v3678_v22, %v3686_v21  ;;  %v16384_v22 = vld [vmem:[#allocation11 + $0x200] sm:$0xff]  }
 0x324   :  { %v3848_v27 = vsel %vm3795_vm2, %v3846_v44, %v3847_v32  ;;  %v18060_v63 = vor.u32 %v3694_v15, %v3691_v1  ;;  %v18062_v3 = vor.u32 %v3910_v39, %v3909_v26  ;;  %v3908_v37 = vsel %vm19348_vm1, %v3903_v11, %v3907_v33  ;;  %v15186_v44 = vld [vmem:[#allocation11 + $0x210] sm:$0xff]  }
 0x325   :  { %4704 = vmatmul.mubr.bf16.gmra.mrb[100].mxu0 %v17978_v41  ;;  %v18068_v9 = vsel %vm3795_vm2, %v3799_v52, %v19341_v43  ;;  %v3815_v46 = vrot.slane %v13220_v12, 2  ;;  %v3816_v31 = vrot.slane %v17924_v4, 2  ;;  %v18074_v8 = vsel %vm3795_vm2, %v3847_v32, %v19339_v0 }
 0x326   :  { %4857 = vmatprep.mubr.bf16.mxu0 %v3798_v45  ;;  %v3700_v49 = vrot.slane %v3698_v54, 1  ;;  %v3703_v51 = vrot.slane %v3701_v60, 2  ;;  %v19343_v34 = vrot.slane %v17778_v40, 2  ;;  %v15185_v45 = vld [vmem:[#allocation11 + $0x208] sm:$0xff]   ;;  %v3914_v28 = vshrl.u32 %v18017_v42, 16 }
 0x327   :  { %v18080_v52 = vsel %vm3795_vm2, %v3815_v46, %v3816_v31  ;;  %v3947_v12 = vrot.slane %v3533_v57, 2  ;;  %v3696_v1 = vsel %vm3670_vm9, %v3686_v21, %v18060_v63  ;;  %v18088_v32 = vsel %vm19348_vm1, %v3907_v33, %v18062_v3 }
 0x328   :  { %v3917_v15 = vshll.u32 %v18017_v42, 16  ;;  %v3948_v26 = vrot.slane %v3529_v17, 3  ;;  %v3707_v58 = vshrl.u32 %v17778_v40, 16  ;;  %v3733_v39 = vshrl.u32 %v17921_v10, 16 }
 0x329   :  { %4817 = vmatmul.mubr.bf16.gmra.mrb[36].mxu1 %v3597_v13  ;;  %v3736_v30 = vshll.u32 %v17921_v10, 16  ;;  %v3741_v57 = vshrl.u32 %v17924_v4, 16  ;;  %v18097_v21 = vor.u32 %v3703_v51, %v3700_v49  ;;  %v3744_v61 = vshll.u32 %v17924_v4, 16 }
 0x32a   :  { %4970 = vmatprep.mubr.bf16.mxu1 %v3904_v2  ;;  %v18099_v33 = vor.u32 %v3948_v26, %v3947_v12  ;;  %v3818_v17 = vrot.slane %v17952_v25, 2  ;;  %v18103_v54 = vrot.slane %v3914_v28, 2  ;;  %v3735_v60 = vrot.slane %v3733_v39, 1 }
 0x32b   :  { %v3738_v13 = vrot.slane %v3736_v30, 2  ;;  %v3743_v10 = vrot.slane %v3741_v57, 1  ;;  %v3746_v46 = vrot.slane %v3744_v61, 2  ;;  %v18115_v51 = vrot.slane %v3707_v58, 1  ;;  %v15188_v57 = vld [vmem:[#allocation11 + $0x218] sm:$0xff]  }
 0x32c   :  { %v18111_v49 = vsel %vm3795_vm2, %v3816_v31, %v3818_v17  ;;  %v19338_v28 = vrot.slane %v17917_v29, 2  ;;  %v3951_v12 = vrot.slane %v3541_v38, 2  ;;  %v3750_v30 = vshrl.u32 %v17952_v25, 16 }
 0x32d   :  { %4858 = vmatmul.mubr.bf16.vlgmr.msra.gmra.mrb[104].mxu0 %v3687_v55  ;;  %v18105_v2 = vpop.f32.mrb[64].mxu0  ;;  %v18107_v55 = vrot.slane %v3917_v15, 3  ;;  %v3952_v15 = vrot.slane %v3537_v14, 3  ;;  %v3739_v39 = vor.u32 %v3738_v13, %v3735_v60  ;;  %v3747_v31 = vor.u32 %v3746_v46, %v3743_v10 }
 0x32e   :  { %14889 = vmatpush3.bf16.msra.mxu0 %v16384_v22  ;;  %4865 = vmatprep.mubr.bf16.mxu0 %v3800_v18  ;;  %v3710_v18 = vshll.u32 %v17778_v40, 16  ;;  %v18113_v4 = vpop.f32.mrb[65].mxu0  ;;  %v3820_v38 = vrot.slane %v17980_v7, 2  ;;  %v3874_v61 = vrot.slane %v17943_v53, 2  ;;  %v3955_v14 = vrot.slane %v3549_v35, 2 }
 0x32f   :  { %14890 = vmatprep.subr.bf16.mxu0 %v15185_v45  ;;  %v18122_v26 = vpop.f32.mrb[66].mxu0  ;;  %v3953_v22 = vor.u32 %v3952_v15, %v3951_v12  ;;  %v3759_v46 = vshrl.u32 %v17980_v7, 16  ;;  %v18151_v12 = vld [vmem:[#allocation2 + $0x30] ss:$0 sps:$4 sm:$0x77]   ;;  %v3762_v15 = vshll.u32 %v17980_v7, 16 }
 0x330   :  { %v18126_v58 = vpop.f32.mrb[67].mxu0  ;;  %v18142_v10 = vsel %vm3795_vm2, %v3818_v17, %v3820_v38  ;;  %v18147_v35 = vsel %vm3795_vm2, %v19338_v28, %v3874_v61  ;;  %v15193_v17 = vld [vmem:[#allocation11 + $0x220] sm:$0xff]   ;;  %v3960_v28 = vshrl.u32 %v18053_v5, 16  ;;  %v3963_v0 = vshll.u32 %v18053_v5, 16 }
 0x331   :  { %4971 = vmatmul.mubr.bf16.vlgmr.msra.gmra.mrb[40].mxu1 %v3848_v27  ;;  %v3753_v27 = vshll.u32 %v17952_v25, 16  ;;  %v3956_v25 = vrot.slane %v3545_v50, 3  ;;  %v18139_v13 = vsel %vm19348_vm1, %v18099_v33, %v3953_v22  ;;  %v3926_v43 = vshll.u32 %v18151_v12, 16 }
 0x332   :  { %4978 = vmatprep.mubr.bf16.mxu1 %v3908_v37  ;;  %14891 = vmatpush3.bf16.msra.mxu0 %v15185_v45  ;;  %v18133_v37 = vsel %vm3670_vm9, %v3739_v39, %v3747_v31  ;;  %v3752_v45 = vrot.slane %v3750_v30, 1  ;;  %v19340_v39 = vrot.slane %v18000_v16, 2  ;;  %v3761_v30 = vrot.slane %v3759_v46, 1 }
 0x333   :  { %14892 = vmatprep.subr.bf16.mxu0 %v15186_v44  ;;  %v3755_v60 = vrot.slane %v3753_v27, 2  ;;  %v3876_v27 = vrot.slane %v17978_v41, 2  ;;  %v3768_v46 = vshrl.u32 %v18000_v16, 16  ;;  %vm19427_vm4 = vcmask 1041409  }
 0x334   :  { %v18167_v7 = vsel %vm3795_vm2, %v3820_v38, %v19340_v39  ;;  %v3771_v39 = vshll.u32 %v18000_v16, 16  ;;  %vm5476_vm11 = vsmask.f32 3334 }
 0x335   :  { %4866 = vmatmul.mubr.bf16.gmra.mrb[108].mxu0 %v3696_v1  ;;  %v3756_v50 = vor.u32 %v3755_v60, %v3752_v45  ;;  %v3957_v1 = vor.u32 %v3956_v25, %v3955_v14  ;;  %v3764_v14 = vrot.slane %v3762_v15, 2  ;;  %v18171_v45 = vsel %vm3795_vm2, %v3874_v61, %v3876_v27  ;;  %v15194_v61 = vld [vmem:[#allocation11 + $0x228] sm:$0xff]  }
 0x336   :  { %4873 = vmatprep.mubr.bf16.mxu0 %v18068_v9  ;;  %14893 = vmatpush3.bf16.msra.mxu0 %v15186_v44  ;;  %v3962_v60 = vrot.slane %v3960_v28, 2  ;;  %v3965_v25 = vrot.slane %v3963_v0, 3  ;;  %v3923_v15 = vshrl.u32 %v18151_v12, 16  ;;  %v3705_v0 = vsel %vm3670_vm9, %v18060_v63, %v18097_v21 }
 0x337   :  { %14894 = vmatprep.subr.bf16.mxu0 %v15188_v57  ;;  %v18159_v9 = vsel %vm3670_vm9, %v3747_v31, %v3756_v50  ;;  %v18162_v44 = vsel %vm19348_vm1, %v3953_v22, %v3957_v1  ;;  %v18174_v31 = vld [vmem:[#allocation2 + $0x64] ss:$0 sps:$4 sm:$0x33]   ;;  %v18177_v22 = vld [vmem:[#allocation2 + $0x2c] ss:$0 sps:$4 sm:$0x33]   ;;  %v3765_v38 = vor.u32 %v3764_v14, %v3761_v30 }
 0x338   :  { %v3712_v28 = vrot.slane %v3710_v18, 2  ;;  %v3770_v11 = vrot.slane %v3768_v46, 1  ;;  %v3773_v30 = vrot.slane %v3771_v39, 2  ;;  %v19419_v63 = vrot.slane %v17700_v48, 2 }
 0x339   :  { %4979 = vmatmul.mubr.bf16.gmra.mrb[44].mxu1 %v18074_v8  ;;  %v19342_v8 = vrot.slane %v18053_v5, 2  ;;  %v3777_v39 = vshrl.u32 %v18174_v31, 16 }
 0x33a   :  { %4986 = vmatprep.mubr.bf16.mxu1 %v18088_v32  ;;  %14895 = vmatpush3.bf16.msra.mxu0 %v15188_v57  ;;  %v18187_v32 = vor.u32 %v3965_v25, %v3962_v60  ;;  %v18191_v57 = vsel %vm3670_vm9, %v3756_v50, %v3765_v38  ;;  %v3804_v18 = vsel %vm3795_vm2, %v19419_v63, %v19343_v34  ;;  %v3834_v25 = vld [vmem:[#allocation2 + $0x40] sm:$0xc]  ;;  %v15195_v34 = vld [vmem:[#allocation11 + $0x230] sm:$0xff]  }
 0x33b   :  { %14896 = vmatprep.subr.bf16.mxu0 %v15193_v17  ;;  %v18196_v14 = vsel %vm3795_vm2, %v3876_v27, %v19342_v8  ;;  %v18205_v60 = vor.u32 %v18107_v55, %v18103_v54  ;;  %v3716_v27 = vshrl.u32 %v18177_v22, 16  ;;  %v18214_v46 = vcombine.low %v3834_v25, %v17890_v59  ;;  %v14502_v63 = vpop.f32.mrb[0].mxu1 }
 0x33c   :  { %v18209_v50 = vsel %vm19348_vm1, %v3957_v1, %v18187_v32  ;;  %v3774_v48 = vor.u32 %v3773_v30, %v3770_v11  ;;  %v19420_v54 = vrot.slane %v17694_v62, 2  ;;  %v19421_v55 = vrot.slane %v17592_v6, 2  ;;  %v14503_v25 = vpop.f32.mrb[1].mxu1 }
 0x33d   :  { %4874 = vmatmul.mubr.bf16.gmra.mrb[112].mxu0 %v3705_v0  ;;  %v3780_v0 = vshll.u32 %v18174_v31, 16  ;;  %v18223_v8 = vor.u32 %v3712_v28, %v18115_v51  ;;  %v3779_v59 = vrot.slane %v3777_v39, 1  ;;  %v3928_v11 = vrot.slane %v3926_v43, 3  ;;  %v14505_v24 = vpop.f32.mrb[2].mxu1 }
 0x33e   :  { %4881 = vmatprep.mubr.bf16.mxu0 %v3804_v18  ;;  %14897 = vmatpush3.bf16.msra.mxu0 %v15193_v17  ;;  %v3852_v1 = vsel %vm3795_vm2, %v19421_v55, %v19420_v54  ;;  %v3805_v18 = vrot.slane %v18177_v22, 2  ;;  %v3925_v17 = vrot.slane %v3923_v15, 2  ;;  %v18227_v30 = vsel %vm3670_vm9, %v3765_v38, %v3774_v48  ;;  %v14506_v15 = vpop.f32.mrb[3].mxu1 }
 0x33f   :  { %14898 = vmatprep.subr.bf16.mxu0 %v15194_v61  ;;  %v3782_v47 = vrot.slane %v3780_v0, 2  ;;  %v3921_v54 = vsel %vm19348_vm1, %v18062_v3, %v18205_v60  ;;  %v19422_v51 = vrot.slane %v17778_v40, 2  ;;  %v3853_v55 = vrot.slane %v18017_v42, 2  ;;  %v15197_v40 = vld [vmem:[#allocation11 + $0x238] sm:$0xff]  }
 0x340   :  { %v3995_v39 = vrot.slane %v18017_v42, 3  ;;  %v3718_v43 = vrot.slane %v3716_v27, 1  ;;  %v3719_v38 = vshll.u32 %v18177_v22, 16  ;;  %v3714_v3 = vsel %vm3670_vm9, %v18097_v21, %v18223_v8 }
 0x341   :  { %4987 = vmatmul.mubr.bf16.gmra.mrb[48].mxu1 %v3852_v1  ;;  %v3806_v28 = vsel %vm3795_vm2, %v19422_v51, %v3805_v18  ;;  %v3783_v0 = vor.u32 %v3782_v47, %v3779_v59  ;;  %v3997_v1 = vrot.slane %v18151_v12, 3  ;;  %v14428_v18 = vadd.f32 %v18113_v4, %v18105_v2 }
 0x342   :  { %4994 = vmatprep.mubr.bf16.mxu1 %v3921_v54  ;;  %14899 = vmatpush3.bf16.msra.mxu0 %v15194_v61  ;;  %v14431_v54 = vadd.f32 %v18126_v58, %v18122_v26  ;;  %v3929_v27 = vor.u32 %v3928_v11, %v3925_v17  ;;  %v4008_v21 = vrot.slane %v17917_v29, 3  ;;  %v4010_v12 = vrot.slane %v17943_v53, 3  ;;  %v14432_v4 = vpop.f32.mrb[68].mxu0 }
 0x343   :  { %14900 = vmatprep.subr.bf16.mxu0 %v15195_v34  ;;  %v18247_v22 = vsel %vm3670_vm9, %v3774_v48, %v3783_v0  ;;  %v18252_v47 = vsel %vm19349_vm8, %v3995_v39, %v3997_v1  ;;  %v14504_v61 = vadd.f32 %v14503_v25, %v14502_v63  ;;  %v14507_v59 = vadd.f32 %v14506_v15, %v14505_v24  ;;  %v14433_v11 = vpop.f32.mrb[69].mxu0 }
 0x344   :  { %v4012_v2 = vrot.slane %v17978_v41, 3  ;;  %v3721_v26 = vrot.slane %v3719_v38, 2  ;;  %v3940_v58 = vshrl.u32 %v18214_v46, 16  ;;  %v3943_v48 = vshll.u32 %v18214_v46, 16  ;;  %v14435_v25 = vpop.f32.mrb[70].mxu0 }
 0x345   :  { %4882 = vmatmul.mubr.bf16.gmra.mrb[116].mxu0 %v3714_v3  ;;  %v4014_v17 = vrot.slane %v18053_v5, 3  ;;  %v18263_v53 = vsel %vm19349_vm8, %v4008_v21, %v4010_v12  ;;  %v18265_v24 = vadd.f32 %v14504_v61, %v14428_v18  ;;  %v18267_v41 = vadd.f32 %v14507_v59, %v14431_v54  ;;  %v14436_v0 = vpop.f32.mrb[71].mxu0 }
 0x346   :  { %4889 = vmatprep.mubr.bf16.mxu0 %v3806_v28  ;;  %14901 = vmatpush3.bf16.msra.mxu0 %v15195_v34  ;;  %v18270_v63 = vsel %vm19349_vm8, %v4010_v12, %v4012_v2  ;;  %v19423_v51 = vrot.slane %v17694_v62, 2  ;;  %v15191_v28 = vld [vmem:[#allocation2 + $0x30] ss:$0 sps:$4 sm:$0x33]   ;;  %v14434_v38 = vadd.f32 %v14433_v11, %v14432_v4  ;;  %v3930_v1 = vsel %vm19348_vm1, %v18205_v60, %v3929_v27 }
 0x347   :  { %14902 = vmatprep.subr.bf16.mxu0 %v15197_v40  ;;  %v18278_v15 = vsel %vm19349_vm8, %v4012_v2, %v4014_v17  ;;  %v14437_v3 = vadd.f32 %v14436_v0, %v14435_v25  ;;  %v3722_v18 = vor.u32 %v3721_v26, %v3718_v43  ;;  %v3942_v54 = vrot.slane %v3940_v58, 2  ;;  %v15200_v0 = vld [vmem:[#allocation2 + $0x68] ss:$0 sps:$4 sm:$0x33]  }
 0x348   :  { %v3854_v34 = vsel %vm3795_vm2, %v19423_v51, %v3853_v55  ;;  %v3945_v12 = vrot.slane %v3943_v48, 3  ;;  %v3855_v59 = vrot.slane %v15191_v28, 2  ;;  %v3871_v43 = vrot.slane %v18214_v46, 2 }
 0x349   :  { %4995 = vmatmul.mubr.bf16.gmra.mrb[52].mxu1 %v3854_v34  ;;  %v3723_v61 = vsel %vm3670_vm9, %v18223_v8, %v3722_v18  ;;  %v19424_v8 = vrot.slane %v17917_v29, 2  ;;  %v3824_v48 = vrot.slane %v18174_v31, 2  ;;  %v3982_v34 = vld [vmem:[#allocation2 + $0x8] sm:$0x8]  ;;  %vm19429_vm9 = vcmask 1047559  }
 0x34a   :  { %5002 = vmatprep.mubr.bf16.mxu1 %v3930_v1  ;;  %14903 = vmatpush3.bf16.msra.mxu0 %v15197_v40  ;;  %v3946_v2 = vor.u32 %v3945_v12, %v3942_v54  ;;  %v3856_v4 = vsel %vm3795_vm2, %v3853_v55, %v3855_v59  ;;  %v3880_v1 = vrot.slane %v15200_v0, 2  ;;  %v3991_v54 = vrot.slane %v17592_v6, 3  ;;  %v15202_v0 = vld [vmem:[#allocation16] ss:$8 sps:$4 sm:$0xff]  }
 0x34b   :  { %v3873_v40 = vsel %vm3795_vm2, %v3871_v43, %v19424_v8 }
 0x34c   :  { %v3950_v60 = vsel %vm19348_vm1, %v3946_v2, %v18099_v33 }
 0x34d   :  { %4890 = vmatmul.mubr.bf16.gmra.mrb[120].mxu0 %v3723_v61 }
 0x34e   :  { %4897 = vmatprep.mubr.bf16.mxu0 %v18080_v52 }
 0x351   :  { %5003 = vmatmul.mubr.bf16.gmra.mrb[56].mxu1 %v3856_v4 }
 0x352   :  { %5010 = vmatprep.mubr.bf16.mxu1 %v3950_v60 }
 0x355   :  { %4898 = vmatmul.mubr.bf16.gmra.mrb[124].mxu0 %v18133_v37 }
 0x356   :  { %4905 = vmatprep.mubr.bf16.mxu0 %v18111_v49  ;;  %v18298_v49 = vld [vmem:[#allocation2 + $0x68] ss:$0 sps:$4 sm:$0x77]  }
 0x357   :  { %v4016_v42 = vrot.slane %v18298_v49, 3 }
 0x359   :  { %5011 = vmatmul.mubr.bf16.gmra.mrb[60].mxu1 %v3873_v40 }
 0x35a   :  { %5018 = vmatprep.mubr.bf16.mxu1 %v18139_v13  ;;  %v3969_v13 = vshrl.u32 %v18298_v49, 16 }
 0x35d   :  { %4906 = vmatmul.mubr.bf16.gmra.mrb[128].mxu0 %v18159_v9  ;;  %v14508_v52 = vpop.f32.mrb[4].mxu1 }
 0x35e   :  { %4913 = vmatprep.mubr.bf16.mxu0 %v18142_v10  ;;  %v14509_v33 = vpop.f32.mrb[5].mxu1  ;;  %v3972_v10 = vshll.u32 %v18298_v49, 16 }
 0x35f   :  { %v14510_v55 = vadd.f32 %v14509_v33, %v14508_v52  ;;  %v14511_v27 = vpop.f32.mrb[6].mxu1  ;;  %v3983_v33 = vld [vmem:[#allocation2 + $0x40] sm:$0x8] }
 0x360   :  { %v14512_v37 = vpop.f32.mrb[7].mxu1  ;;  %v3974_v9 = vrot.slane %v3972_v10, 3 }
 0x361   :  { %5019 = vmatmul.mubr.bf16.gmra.mrb[64].mxu1 %v18147_v35  ;;  %v18300_v46 = vadd.f32 %v14510_v55, %v14434_v38  ;;  %v14513_v26 = vadd.f32 %v14512_v37, %v14511_v27  ;;  %v3971_v35 = vrot.slane %v3969_v13, 2  ;;  %v16385_v27 = vld [vmem:[#allocation2 + $0x44] sm:$0xf] }
 0x362   :  { %5026 = vmatprep.mubr.bf16.mxu1 %v18162_v44  ;;  %v19425_v44 = vrot.slane %v18000_v16, 2  ;;  %v3989_v16 = vrot.slane %v17514_v23, 3  ;;  %v13230_v37 = vcombine.low %v3983_v33, %v16385_v27 }
 0x363   :  { %v18303_v58 = vadd.f32 %v14513_v26, %v14437_v3  ;;  %v3975_v25 = vor.u32 %v3974_v9, %v3971_v35 }
 0x364   :  { %v3992_v59 = vsel %vm19349_vm8, %v3989_v16, %v3991_v54  ;;  %v4007_v13 = vrot.slane %v13230_v37, 3 }
 0x365   :  { %4914 = vmatmul.mubr.bf16.gmra.mrb[132].mxu0 %v18191_v57  ;;  %v3825_v57 = vsel %vm3795_vm2, %v19425_v44, %v3824_v48  ;;  %v3976_v31 = vsel %vm19348_vm1, %v18187_v32, %v3975_v25  ;;  %v4017_v48 = vsel %vm19349_vm8, %v4014_v17, %v4016_v42 }
 0x366   :  { %4921 = vmatprep.mubr.bf16.mxu0 %v18167_v7  ;;  %v4009_v10 = vsel %vm19349_vm8, %v4007_v13, %v4008_v21 }
 0x369   :  { %5027 = vmatmul.mubr.bf16.gmra.mrb[68].mxu1 %v18171_v45  ;;  %v13229_v45 = vcombine.low %v3982_v34, %v17989_v56  ;;  %v19426_v56 = vrot.slane %v18053_v5, 2 }
 0x36a   :  { %5034 = vmatprep.mubr.bf16.mxu1 %v18209_v50 }
 0x36b   :  { %v14438_v11 = vpop.f32.mrb[72].mxu0  ;;  %v3881_v18 = vsel %vm3795_vm2, %v19426_v56, %v3880_v1  ;;  %v15205_v56 = vld [vmem:[#allocation16 + $0x10] ss:$8 sps:$4 sm:$0xff]  }
 0x36c   :  { %v14439_v51 = vpop.f32.mrb[73].mxu0 }
 0x36d   :  { %4922 = vmatmul.mubr.bf16.gmra.mrb[136].mxu0 %v18227_v30  ;;  %v14440_v7 = vadd.f32 %v14439_v51, %v14438_v11  ;;  %v14441_v28 = vpop.f32.mrb[74].mxu0  ;;  %v3988_v30 = vrot.slane %v13229_v45, 3 }
 0x36e   :  { %4929 = vmatprep.mubr.bf16.mxu0 %v3825_v57  ;;  %v14442_v38 = vpop.f32.mrb[75].mxu0 }
 0x36f   :  { %v14443_v50 = vadd.f32 %v14442_v38, %v14441_v28  ;;  %v3990_v3 = vsel %vm19349_vm8, %v3988_v30, %v3989_v16 }
 0x371   :  { %5035 = vmatmul.mubr.bf16.gmra.mrb[72].mxu1 %v18196_v14  ;;  %v3993_v14 = vrot.slane %v17694_v62, 3 }
 0x372   :  { %5042 = vmatprep.mubr.bf16.mxu1 %v3976_v31 }
 0x373   :  { %v3996_v62 = vsel %vm19349_vm8, %v3993_v14, %v3995_v39 }
 0x375   :  { %4930 = vmatmul.mubr.bf16.gmra.mrb[140].mxu0 %v18247_v22  ;;  %v3994_v22 = vsel %vm19349_vm8, %v3991_v54, %v3993_v14  ;;  %v15208_v14 = vld [vmem:[#allocation16 + $0x20] ss:$8 sps:$4 sm:$0xff]   ;;  %vm19437_vm8 = vcmask 1041409  }
 0x376   :  { %14904 = vmatprep.mubr.bf16.mxu0 %v3990_v3 }
 0x378   :  { %v14514_v32 = vpop.f32.mrb[8].mxu1 }
 0x379   :  { %5043 = vmatmul.mubr.bf16.gmra.mrb[76].mxu1 %v3881_v18  ;;  %v14515_v12 = vpop.f32.mrb[9].mxu1  ;;  %v15207_v18 = vld [vmem:[#allocation16 + $0x14] ss:$8 sps:$4 sm:$0xff]  }
 0x37a   :  { %v14516_v23 = vadd.f32 %v14515_v12, %v14514_v32  ;;  %v14517_v61 = vpop.f32.mrb[10].mxu1  ;;  %v15210_v32 = vld [vmem:[#allocation16 + $0x24] ss:$8 sps:$4 sm:$0xff]  }
 0x37b   :  { %v14518_v2 = vpop.f32.mrb[11].mxu1 }
 0x37c   :  { %v18330_v4 = vadd.f32 %v14516_v23, %v14440_v7  ;;  %v14519_v60 = vadd.f32 %v14518_v2, %v14517_v61 }
 0x37d   :  { %14905 = vmatmul.mubr.bf16.vlgmr.msra.gmra.mrb[144].mxu0 %v3992_v59 }
 0x37e   :  { %14908 = vmatprep.mubr.bf16.mxu0 %v3994_v22  ;;  %v18332_v43 = vadd.f32 %v14519_v60, %v14443_v50  ;;  %v15204_v50 = vld [vmem:[#allocation16 + $0x4] ss:$8 sps:$4 sm:$0xff]  }
 0x37f   :  { %7024 = vmatprep.subr.bf16.mxu1 %v15204_v50 }
 0x380   :  { %7025 = vmatpush1.bf16.msra.mxu1 %v15202_v0 }
 0x381   :  { %v14444_v6 = vpop.f32.mrb[76].mxu0  ;;  %7026 = vmatprep.subr.bf16.mxu1 %v15207_v18 }
 0x382   :  { %v14445_v8 = vpop.f32.mrb[77].mxu0 }
 0x383   :  { %v14446_v40 = vadd.f32 %v14445_v8, %v14444_v6  ;;  %v14447_v52 = vpop.f32.mrb[78].mxu0 }
 0x384   :  { %v14448_v55 = vpop.f32.mrb[79].mxu0  ;;  %7027 = vmatpush1.bf16.msra.mxu1 %v15205_v56 }
 0x385   :  { %14909 = vmatmul.mubr.bf16.gmra.mrb[148].mxu0 %v3996_v62  ;;  %v14449_v26 = vadd.f32 %v14448_v55, %v14447_v52  ;;  %7028 = vmatprep.subr.bf16.mxu1 %v15210_v32 }
 0x386   :  { %14912 = vmatprep.mubr.bf16.mxu0 %v18252_v47 }
 0x388   :  { %7029 = vmatpush1.bf16.msra.mxu1 %v15208_v14 }
 0x38d   :  { %14913 = vmatmul.mubr.bf16.gmra.mrb[152].mxu0 %v4009_v10 }
 0x38e   :  { %14916 = vmatprep.mubr.bf16.mxu0 %v18263_v53 }
 0x395   :  { %14917 = vmatmul.mubr.bf16.gmra.mrb[156].mxu0 %v18270_v63 }
 0x396   :  { %14920 = vmatprep.mubr.bf16.mxu0 %v18278_v15 }
 0x398   :  { %v14520_v39 = vpop.f32.mrb[12].mxu1 }
 0x399   :  { %v14521_v35 = vpop.f32.mrb[13].mxu1 }
 0x39a   :  { %v14522_v47 = vadd.f32 %v14521_v35, %v14520_v39  ;;  %v14523_v9 = vpop.f32.mrb[14].mxu1 }
 0x39b   :  { %v14524_v29 = vpop.f32.mrb[15].mxu1 }
 0x39c   :  { %v18348_v21 = vadd.f32 %v14522_v47, %v14446_v40  ;;  %v14525_v11 = vadd.f32 %v14524_v29, %v14523_v9 }
 0x39d   :  { %14921 = vmatmul.mubr.bf16.gmra.mrb[160].mxu0 %v4017_v48 }
 0x39e   :  { %v18350_v53 = vadd.f32 %v14525_v11, %v14449_v26 }
 0x39f   :  { %v14450_v63 = vpop.f32.mrb[80].mxu0 }
 0x3a0   :  { %v14451_v44 = vpop.f32.mrb[81].mxu0 }
 0x3a1   :  { %v14452_v15 = vadd.f32 %v14451_v44, %v14450_v63  ;;  %v14453_v57 = vpop.f32.mrb[82].mxu0 }
 0x3a2   :  { %v14454_v49 = vpop.f32.mrb[83].mxu0 }
 0x3a3   :  { %v14526_v25 = vpop.f32.mrb[16].mxu1  ;;  %v14455_v51 = vadd.f32 %v14454_v49, %v14453_v57 }
 0x3a4   :  { %v14527_v34 = vpop.f32.mrb[17].mxu1 }
 0x3a5   :  { %v14528_v7 = vadd.f32 %v14527_v34, %v14526_v25  ;;  %v14529_v28 = vpop.f32.mrb[18].mxu1 }
 0x3a6   :  { %v14530_v5 = vpop.f32.mrb[19].mxu1 }
 0x3a7   :  { %v18352_v45 = vadd.f32 %v14528_v7, %v14452_v15  ;;  %v14531_v17 = vadd.f32 %v14530_v5, %v14529_v28 }
 0x3a9   :  { %v18354_v38 = vadd.f32 %v14531_v17, %v14455_v51 }
 0x3cc   :  { %v14456_v31 = vpop.f32.mrb[84].mxu0 }
 0x3cd   :  { %v14457_v16 = vpop.f32.mrb[85].mxu0 }
 0x3ce   :  { %v14458_v30 = vadd.f32 %v14457_v16, %v14456_v31  ;;  %v14459_v1 = vpop.f32.mrb[86].mxu0 }
 0x3cf   :  { %v14460_v3 = vpop.f32.mrb[87].mxu0 }
 0x3d0   :  { %v14461_v54 = vadd.f32 %v14460_v3, %v14459_v1  ;;  %v15211_v1 = vld [vmem:[#allocation16 + $0x30] ss:$8 sps:$4 sm:$0xff]   ;;  %v15213_v3 = vld [vmem:[#allocation16 + $0x34] ss:$8 sps:$4 sm:$0xff]  }
 0x3d1   :  { %7030 = vmatprep.subr.bf16.mxu1 %v15213_v3 }
 0x3d2   :  { %7031 = vmatpush1.bf16.msra.mxu1 %v15211_v1 }
 0x3db   :  { %v14532_v12 = vpop.f32.mrb[20].mxu1 }
 0x3dc   :  { %v14533_v23 = vpop.f32.mrb[21].mxu1 }
 0x3dd   :  { %v14534_v61 = vadd.f32 %v14533_v23, %v14532_v12  ;;  %v14535_v59 = vpop.f32.mrb[22].mxu1 }
 0x3de   :  { %v14536_v2 = vpop.f32.mrb[23].mxu1 }
 0x3df   :  { %v18356_v22 = vadd.f32 %v14534_v61, %v14458_v30  ;;  %v14537_v60 = vadd.f32 %v14536_v2, %v14535_v59 }
 0x3e0   :  { %v14462_v6 = vpop.f32.mrb[88].mxu0 }
 0x3e1   :  { %v18358_v8 = vadd.f32 %v14537_v60, %v14461_v54  ;;  %v14463_v62 = vpop.f32.mrb[89].mxu0 }
 0x3e2   :  { %v14464_v40 = vadd.f32 %v14463_v62, %v14462_v6  ;;  %v14465_v52 = vpop.f32.mrb[90].mxu0 }
 0x3e3   :  { %v14466_v33 = vpop.f32.mrb[91].mxu0  ;;  %v14538_v55 = vpop.f32.mrb[24].mxu1 }
 0x3e4   :  { %v14467_v27 = vadd.f32 %v14466_v33, %v14465_v52  ;;  %v14539_v37 = vpop.f32.mrb[25].mxu1  ;;  %v15214_v52 = vld [vmem:[#allocation16 + $0x40] ss:$8 sps:$4 sm:$0xff]  }
 0x3e5   :  { %v14540_v26 = vadd.f32 %v14539_v37, %v14538_v55  ;;  %v14541_v13 = vpop.f32.mrb[26].mxu1 }
 0x3e6   :  { %v14542_v10 = vpop.f32.mrb[27].mxu1 }
 0x3e7   :  { %v18360_v42 = vadd.f32 %v14540_v26, %v14464_v40  ;;  %v14543_v39 = vadd.f32 %v14542_v10, %v14541_v13 }
 0x3e8   :  { %v14468_v35 = vpop.f32.mrb[92].mxu0 }
 0x3e9   :  { %v18362_v47 = vadd.f32 %v14543_v39, %v14467_v27  ;;  %v14469_v9 = vpop.f32.mrb[93].mxu0  ;;  %v15216_v27 = vld [vmem:[#allocation16 + $0x44] ss:$8 sps:$4 sm:$0xff]  }
 0x3ea   :  { %v14470_v48 = vadd.f32 %v14469_v9, %v14468_v35  ;;  %v14471_v29 = vpop.f32.mrb[94].mxu0  ;;  %7032 = vmatprep.subr.bf16.mxu1 %v15216_v27 }
 0x3eb   :  { %v14472_v11 = vpop.f32.mrb[95].mxu0  ;;  %7033 = vmatpush1.bf16.msra.mxu1 %v15214_v52 }
 0x3ec   :  { %v14544_v63 = vpop.f32.mrb[28].mxu1  ;;  %v14473_v44 = vadd.f32 %v14472_v11, %v14471_v29  ;;  %v15217_v11 = vld [vmem:[#allocation16 + $0x50] ss:$8 sps:$4 sm:$0xff]  }
 0x3ed   :  { %v14545_v15 = vpop.f32.mrb[29].mxu1 }
 0x3ee   :  { %v14546_v57 = vadd.f32 %v14545_v15, %v14544_v63  ;;  %v14547_v49 = vpop.f32.mrb[30].mxu1  ;;  %v15219_v63 = vld [vmem:[#allocation16 + $0x54] ss:$8 sps:$4 sm:$0xff]  }
 0x3ef   :  { %v14548_v25 = vpop.f32.mrb[31].mxu1  ;;  %7034 = vmatprep.subr.bf16.mxu1 %v15219_v63 }
 0x3f0   :  { %v18364_v51 = vadd.f32 %v14546_v57, %v14470_v48  ;;  %v14549_v34 = vadd.f32 %v14548_v25, %v14547_v49  ;;  %v14474_v7 = vpop.f32.mrb[96].mxu0  ;;  %7035 = vmatpush1.bf16.msra.mxu1 %v15217_v11 }
 0x3f1   :  { %v14475_v28 = vpop.f32.mrb[97].mxu0 }
 0x3f2   :  { %v18366_v5 = vadd.f32 %v14549_v34, %v14473_v44  ;;  %v14476_v17 = vadd.f32 %v14475_v28, %v14474_v7  ;;  %v14477_v0 = vpop.f32.mrb[98].mxu0 }
 0x3f3   :  { %v14478_v50 = vpop.f32.mrb[99].mxu0 }
 0x3f4   :  { %v14479_v31 = vadd.f32 %v14478_v50, %v14477_v0  ;;  %v14550_v16 = vpop.f32.mrb[32].mxu1 }
 0x3f5   :  { %v14551_v30 = vpop.f32.mrb[33].mxu1 }
 0x3f6   :  { %v14552_v56 = vadd.f32 %v14551_v30, %v14550_v16  ;;  %v14553_v18 = vpop.f32.mrb[34].mxu1 }
 0x3f7   :  { %v14554_v54 = vpop.f32.mrb[35].mxu1 }
 0x3f8   :  { %v18368_v14 = vadd.f32 %v14552_v56, %v14476_v17  ;;  %v14480_v32 = vpop.f32.mrb[100].mxu0  ;;  %v14555_v12 = vadd.f32 %v14554_v54, %v14553_v18 }
 0x3f9   :  { %v14481_v23 = vpop.f32.mrb[101].mxu0 }
 0x3fa   :  { %v18370_v61 = vadd.f32 %v14555_v12, %v14479_v31  ;;  %v14482_v59 = vadd.f32 %v14481_v23, %v14480_v32  ;;  %v14483_v2 = vpop.f32.mrb[102].mxu0 }
 0x3fb   :  { %v14484_v60 = vpop.f32.mrb[103].mxu0 }
 0x3fc   :  { %v14485_v6 = vadd.f32 %v14484_v60, %v14483_v2  ;;  %v14556_v62 = vpop.f32.mrb[36].mxu1 }
 0x3fd   :  { %v14557_v40 = vpop.f32.mrb[37].mxu1 }
 0x3fe   :  { %v14558_v33 = vadd.f32 %v14557_v40, %v14556_v62  ;;  %v14559_v55 = vpop.f32.mrb[38].mxu1 }
 0x3ff   :  { %v14560_v37 = vpop.f32.mrb[39].mxu1 }
 0x400   :  { %v18372_v26 = vadd.f32 %v14558_v33, %v14482_v59  ;;  %v14561_v13 = vadd.f32 %v14560_v37, %v14559_v55  ;;  %v14578_v10 = vpop.f32.mrb[104].mxu0 }
 0x401   :  { %v14579_v39 = vpop.f32.mrb[105].mxu0 }
 0x402   :  { %v18374_v35 = vadd.f32 %v14561_v13, %v14485_v6  ;;  %v14580_v9 = vadd.f32 %v14579_v39, %v14578_v10  ;;  %v14581_v48 = vpop.f32.mrb[106].mxu0 }
 0x403   :  { %v14582_v29 = vpop.f32.mrb[107].mxu0 }
 0x404   :  { %v4860_v44 = vadd.f32 %v14580_v9, %v18265_v24  ;;  %v14583_v15 = vadd.f32 %v14582_v29, %v14581_v48  ;;  %v14654_v57 = vpop.f32.mrb[40].mxu1 }
 0x405   :  { %v14655_v49 = vpop.f32.mrb[41].mxu1 }
 0x406   :  { %v4863_v25 = vadd.f32 %v14583_v15, %v18267_v41  ;;  %v14656_v34 = vadd.f32 %v14655_v49, %v14654_v57  ;;  %v14657_v7 = vpop.f32.mrb[42].mxu1  ;;  %v15220_v57 = vld [vmem:[#allocation16 + $0x60] ss:$8 sps:$4 sm:$0xff]   ;;  %v15222_v49 = vld [vmem:[#allocation16 + $0x64] ss:$8 sps:$4 sm:$0xff]  }
 0x407   :  { %v14658_v28 = vpop.f32.mrb[43].mxu1  ;;  %7036 = vmatprep.subr.bf16.mxu1 %v15222_v49 }
 0x408   :  { %v14584_v17 = vpop.f32.mrb[108].mxu0  ;;  %v14659_v0 = vadd.f32 %v14658_v28, %v14657_v7  ;;  %v18378_v50 = vadd.f32 %v14656_v34, %v4860_v44  ;;  %7037 = vmatpush1.bf16.msra.mxu1 %v15220_v57 }
 0x409   :  { %v14585_v31 = vpop.f32.mrb[109].mxu0 }
 0x40a   :  { %v14586_v16 = vadd.f32 %v14585_v31, %v14584_v17  ;;  %v14587_v30 = vpop.f32.mrb[110].mxu0  ;;  %v18380_v1 = vadd.f32 %v14659_v0, %v4863_v25  ;;  %v15223_v17 = vld [vmem:[#allocation16 + $0x70] ss:$8 sps:$4 sm:$0xff]  }
 0x40b   :  { %v14588_v24 = vpop.f32.mrb[111].mxu0 }
 0x40c   :  { %v4868_v3 = vadd.f32 %v14586_v16, %v18300_v46  ;;  %v14589_v56 = vadd.f32 %v14588_v24, %v14587_v30  ;;  %v14660_v18 = vpop.f32.mrb[44].mxu1 }
 0x40d   :  { %v14661_v54 = vpop.f32.mrb[45].mxu1 }
 0x40e   :  { %v4871_v41 = vadd.f32 %v14589_v56, %v18303_v58  ;;  %v14662_v32 = vadd.f32 %v14661_v54, %v14660_v18  ;;  %v14663_v12 = vpop.f32.mrb[46].mxu1 }
 0x40f   :  { %v14664_v23 = vpop.f32.mrb[47].mxu1 }
 0x410   :  { %v14590_v59 = vpop.f32.mrb[112].mxu0  ;;  %v14665_v2 = vadd.f32 %v14664_v23, %v14663_v12  ;;  %v18384_v60 = vadd.f32 %v14662_v32, %v4868_v3  ;;  %v15226_v32 = vld [vmem:[#allocation16 + $0x80] ss:$8 sps:$4 sm:$0xff]   ;;  %v15228_v23 = vld [vmem:[#allocation16 + $0x84] ss:$8 sps:$4 sm:$0xff]  }
 0x411   :  { %v14591_v6 = vpop.f32.mrb[113].mxu0 }
 0x412   :  { %v14592_v62 = vadd.f32 %v14591_v6, %v14590_v59  ;;  %v14593_v40 = vpop.f32.mrb[114].mxu0  ;;  %v18386_v52 = vadd.f32 %v14665_v2, %v4871_v41 }
 0x413   :  { %v14594_v33 = vpop.f32.mrb[115].mxu0 }
 0x414   :  { %v4876_v46 = vadd.f32 %v14592_v62, %v18330_v4  ;;  %v14595_v55 = vadd.f32 %v14594_v33, %v14593_v40  ;;  %v14666_v27 = vpop.f32.mrb[48].mxu1 }
 0x415   :  { %v14667_v37 = vpop.f32.mrb[49].mxu1 }
 0x416   :  { %v4879_v58 = vadd.f32 %v14595_v55, %v18332_v43  ;;  %v14668_v13 = vadd.f32 %v14667_v37, %v14666_v27  ;;  %v14669_v10 = vpop.f32.mrb[50].mxu1  ;;  %v15225_v43 = vld [vmem:[#allocation16 + $0x74] ss:$8 sps:$4 sm:$0xff]  }
 0x417   :  { %v14670_v39 = vpop.f32.mrb[51].mxu1  ;;  %7038 = vmatprep.subr.bf16.mxu1 %v15225_v43 }
 0x418   :  { %v14596_v9 = vpop.f32.mrb[116].mxu0  ;;  %v14671_v48 = vadd.f32 %v14670_v39, %v14669_v10  ;;  %v18390_v29 = vadd.f32 %v14668_v13, %v4876_v46  ;;  %7039 = vmatpush1.bf16.msra.mxu1 %v15223_v17 }
 0x419   :  { %v14597_v11 = vpop.f32.mrb[117].mxu0  ;;  %7040 = vmatprep.subr.bf16.mxu1 %v15228_v23 }
 0x41a   :  { %v14598_v63 = vadd.f32 %v14597_v11, %v14596_v9  ;;  %v14599_v44 = vpop.f32.mrb[118].mxu0  ;;  %v18392_v15 = vadd.f32 %v14671_v48, %v4879_v58 }
 0x41b   :  { %v14600_v4 = vpop.f32.mrb[119].mxu0 }
 0x41c   :  { %v4884_v25 = vadd.f32 %v14598_v63, %v18348_v21  ;;  %v14601_v34 = vadd.f32 %v14600_v4, %v14599_v44  ;;  %v14672_v7 = vpop.f32.mrb[52].mxu1  ;;  %7041 = vmatpush1.bf16.msra.mxu1 %v15226_v32 }
 0x41d   :  { %v14673_v28 = vpop.f32.mrb[53].mxu1 }
 0x41e   :  { %v4887_v0 = vadd.f32 %v14601_v34, %v18350_v53  ;;  %v14674_v31 = vadd.f32 %v14673_v28, %v14672_v7  ;;  %v14675_v16 = vpop.f32.mrb[54].mxu1 }
 0x41f   :  { %v14676_v30 = vpop.f32.mrb[55].mxu1 }
 0x420   :  { %v14602_v24 = vpop.f32.mrb[120].mxu0  ;;  %v14677_v3 = vadd.f32 %v14676_v30, %v14675_v16  ;;  %v18396_v56 = vadd.f32 %v14674_v31, %v4884_v25 }
 0x421   :  { %v14603_v18 = vpop.f32.mrb[121].mxu0 }
 0x422   :  { %v14604_v21 = vadd.f32 %v14603_v18, %v14602_v24  ;;  %v14605_v54 = vpop.f32.mrb[122].mxu0  ;;  %v18398_v41 = vadd.f32 %v14677_v3, %v4887_v0 }
 0x423   :  { %v14606_v12 = vpop.f32.mrb[123].mxu0 }
 0x424   :  { %v4892_v59 = vadd.f32 %v14604_v21, %v18352_v45  ;;  %v14607_v53 = vadd.f32 %v14606_v12, %v14605_v54  ;;  %v14678_v2 = vpop.f32.mrb[56].mxu1 }
 0x425   :  { %v14679_v6 = vpop.f32.mrb[57].mxu1 }
 0x426   :  { %v4895_v62 = vadd.f32 %v14607_v53, %v18354_v38  ;;  %v14680_v40 = vadd.f32 %v14679_v6, %v14678_v2  ;;  %v14681_v33 = vpop.f32.mrb[58].mxu1 }
 0x427   :  { %v14682_v46 = vpop.f32.mrb[59].mxu1 }
 0x428   :  { %v14608_v55 = vpop.f32.mrb[124].mxu0  ;;  %v14683_v27 = vadd.f32 %v14682_v46, %v14681_v33  ;;  %v18402_v37 = vadd.f32 %v14680_v40, %v4892_v59  ;;  %v15229_v33 = vld [vmem:[#allocation16 + $0x90] ss:$8 sps:$4 sm:$0xff]  }
 0x429   :  { %v14609_v58 = vpop.f32.mrb[125].mxu0 }
 0x42a   :  { %v14610_v13 = vadd.f32 %v14609_v58, %v14608_v55  ;;  %v14611_v10 = vpop.f32.mrb[126].mxu0  ;;  %v18404_v39 = vadd.f32 %v14683_v27, %v4895_v62  ;;  %v15231_v27 = vld [vmem:[#allocation16 + $0x94] ss:$8 sps:$4 sm:$0xff]  }
 0x42b   :  { %v14612_v45 = vpop.f32.mrb[127].mxu0  ;;  %7042 = vmatprep.subr.bf16.mxu1 %v15231_v27  ;;  %v18432_v27 = vld [vmem:[#allocation13] ss:$0 sm:$0xff] }
 0x42c   :  { %v4900_v9 = vadd.f32 %v14610_v13, %v18356_v22  ;;  %v14613_v48 = vadd.f32 %v14612_v45, %v14611_v10  ;;  %v14684_v11 = vpop.f32.mrb[60].mxu1  ;;  %v15234_v13 = vld [vmem:[#allocation16 + $0xa4] ss:$8 sps:$4 sm:$0xff]   ;;  %7043 = vmatpush1.bf16.msra.mxu1 %v15229_v33 }
 0x42d   :  { %v14685_v63 = vpop.f32.mrb[61].mxu1  ;;  %7044 = vmatprep.subr.bf16.mxu1 %v15234_v13  ;;  %v15246_v33 = vld [vmem:[#allocation16 + $0xe4] ss:$8 sps:$4 sm:$0xff]  }
 0x42e   :  { %v4903_v38 = vadd.f32 %v14613_v48, %v18358_v8  ;;  %v14686_v44 = vadd.f32 %v14685_v63, %v14684_v11  ;;  %v14687_v57 = vpop.f32.mrb[62].mxu1  ;;  %v15232_v11 = vld [vmem:[#allocation16 + $0xa0] ss:$8 sps:$4 sm:$0xff]  }
 0x42f   :  { %v14688_v49 = vpop.f32.mrb[63].mxu1 }
 0x430   :  { %v14614_v4 = vpop.f32.mrb[128].mxu0  ;;  %v14689_v25 = vadd.f32 %v14688_v49, %v14687_v57  ;;  %v18408_v34 = vadd.f32 %v14686_v44, %v4900_v9  ;;  %v15237_v44 = vld [vmem:[#allocation16 + $0xb4] ss:$8 sps:$4 sm:$0xff]   ;;  %7045 = vmatpush1.bf16.msra.mxu1 %v15232_v11 }
 0x431   :  { %v14615_v7 = vpop.f32.mrb[129].mxu0  ;;  %7046 = vmatprep.subr.bf16.mxu1 %v15237_v44 }
 0x432   :  { %v14616_v43 = vadd.f32 %v14615_v7, %v14614_v4  ;;  %v14617_v28 = vpop.f32.mrb[130].mxu0  ;;  %v18410_v17 = vadd.f32 %v14689_v25, %v4903_v38  ;;  %v15235_v7 = vld [vmem:[#allocation16 + $0xb0] ss:$8 sps:$4 sm:$0xff]  }
 0x433   :  { %v14618_v0 = vpop.f32.mrb[131].mxu0 }
 0x434   :  { %v4908_v22 = vadd.f32 %v14616_v43, %v18360_v42  ;;  %v14619_v31 = vadd.f32 %v14618_v0, %v14617_v28  ;;  %v14690_v16 = vpop.f32.mrb[64].mxu1  ;;  %7047 = vmatpush1.bf16.msra.mxu1 %v15235_v7  ;;  %v15254_v7 = vld [vmem:[#allocation16 + $0x104] ss:$8 sps:$4 sm:$0xff]  }
 0x435   :  { %v14691_v30 = vpop.f32.mrb[65].mxu1 }
 0x436   :  { %v4911_v8 = vadd.f32 %v14619_v31, %v18362_v47  ;;  %v14692_v24 = vadd.f32 %v14691_v30, %v14690_v16  ;;  %v14693_v3 = vpop.f32.mrb[66].mxu1 }
 0x437   :  { %v14694_v18 = vpop.f32.mrb[67].mxu1 }
 0x438   :  { %v14620_v21 = vpop.f32.mrb[132].mxu0  ;;  %v14695_v54 = vadd.f32 %v14694_v18, %v14693_v3  ;;  %v18414_v32 = vadd.f32 %v14692_v24, %v4908_v22  ;;  %v15240_v22 = vld [vmem:[#allocation16 + $0xc4] ss:$8 sps:$4 sm:$0xff]   ;;  %v15238_v3 = vld [vmem:[#allocation16 + $0xc0] ss:$8 sps:$4 sm:$0xff]  }
 0x439   :  { %v14621_v12 = vpop.f32.mrb[133].mxu0  ;;  %7048 = vmatprep.subr.bf16.mxu1 %v15240_v22 }
 0x43a   :  { %v14622_v23 = vadd.f32 %v14621_v12, %v14620_v21  ;;  %v14623_v59 = vpop.f32.mrb[134].mxu0  ;;  %v18416_v53 = vadd.f32 %v14695_v54, %v4911_v8  ;;  %v15243_v54 = vld [vmem:[#allocation16 + $0xd4] ss:$8 sps:$4 sm:$0xff]   ;;  %7049 = vmatpush1.bf16.msra.mxu1 %v15238_v3 }
 0x43b   :  { %v14624_v2 = vpop.f32.mrb[135].mxu0  ;;  %7050 = vmatprep.subr.bf16.mxu1 %v15243_v54 }
 0x43c   :  { %v4916_v42 = vadd.f32 %v14622_v23, %v18364_v51  ;;  %v14625_v6 = vadd.f32 %v14624_v2, %v14623_v59  ;;  %v14696_v62 = vpop.f32.mrb[68].mxu1 }
 0x43d   :  { %v14697_v40 = vpop.f32.mrb[69].mxu1 }
 0x43e   :  { %v4919_v47 = vadd.f32 %v14625_v6, %v18366_v5  ;;  %v14698_v46 = vadd.f32 %v14697_v40, %v14696_v62  ;;  %v14699_v55 = vpop.f32.mrb[70].mxu1 }
 0x43f   :  { %v14700_v58 = vpop.f32.mrb[71].mxu1 }
 0x440   :  { %v14626_v10 = vpop.f32.mrb[136].mxu0  ;;  %v14701_v45 = vadd.f32 %v14700_v58, %v14699_v55  ;;  %v18420_v9 = vadd.f32 %v14698_v46, %v4916_v42  ;;  %v15241_v42 = vld [vmem:[#allocation16 + $0xd0] ss:$8 sps:$4 sm:$0xff]  }
 0x441   :  { %v14627_v48 = vpop.f32.mrb[137].mxu0  ;;  %7051 = vmatpush1.bf16.msra.mxu1 %v15241_v42 }
 0x442   :  { %v14628_v51 = vadd.f32 %v14627_v48, %v14626_v10  ;;  %v14629_v63 = vpop.f32.mrb[138].mxu0  ;;  %v18422_v38 = vadd.f32 %v14701_v45, %v4919_v47  ;;  %v15244_v10 = vld [vmem:[#allocation16 + $0xe0] ss:$8 sps:$4 sm:$0xff]   ;;  %v18437_v45 = vld [vmem:[#allocation14] ss:$0 sm:$0xff]  ;;  %7052 = vmatprep.subr.bf16.mxu1 %v15246_v33 }
 0x443   :  { %v14630_v5 = vpop.f32.mrb[139].mxu0 }
 0x444   :  { %v4924_v57 = vadd.f32 %v14628_v51, %v18368_v14  ;;  %v14631_v49 = vadd.f32 %v14630_v5, %v14629_v63  ;;  %v14702_v4 = vpop.f32.mrb[72].mxu1  ;;  %v15249_v51 = vld [vmem:[#allocation16 + $0xf4] ss:$8 sps:$4 sm:$0xff]  }
 0x445   :  { %v14703_v25 = vpop.f32.mrb[73].mxu1  ;;  %7053 = vmatpush1.bf16.msra.mxu1 %v15244_v10 }
 0x446   :  { %v4927_v43 = vadd.f32 %v14631_v49, %v18370_v61  ;;  %v14704_v28 = vadd.f32 %v14703_v25, %v14702_v4  ;;  %v14705_v0 = vpop.f32.mrb[74].mxu1  ;;  %7054 = vmatprep.subr.bf16.mxu1 %v15249_v51 }
 0x447   :  { %v14706_v31 = vpop.f32.mrb[75].mxu1 }
 0x448   :  { %v14632_v16 = vpop.f32.mrb[140].mxu0  ;;  %v14707_v30 = vadd.f32 %v14706_v31, %v14705_v0  ;;  %v18426_v8 = vadd.f32 %v14704_v28, %v4924_v57 }
 0x449   :  { %v14633_v24 = vpop.f32.mrb[141].mxu0 }
 0x44a   :  { %v14634_v14 = vadd.f32 %v14633_v24, %v14632_v16  ;;  %v14635_v18 = vpop.f32.mrb[142].mxu0  ;;  %v18428_v21 = vadd.f32 %v14707_v30, %v4927_v43 }
 0x44b   :  { %v14636_v12 = vpop.f32.mrb[143].mxu0 }
 0x44c   :  { %v4932_v61 = vadd.f32 %v14634_v14, %v18372_v26  ;;  %v14637_v23 = vadd.f32 %v14636_v12, %v14635_v18  ;;  %v14708_v59 = vpop.f32.mrb[76].mxu1 }
 0x44d   :  { %v14709_v2 = vpop.f32.mrb[77].mxu1 }
 0x44e   :  { %v4935_v6 = vadd.f32 %v14637_v23, %v18374_v35  ;;  %v14710_v62 = vadd.f32 %v14709_v2, %v14708_v59  ;;  %v14711_v40 = vpop.f32.mrb[78].mxu1 }
 0x44f   :  { %v14712_v47 = vpop.f32.mrb[79].mxu1 }
 0x450   :  { %v14713_v46 = vadd.f32 %v14712_v47, %v14711_v40  ;;  %v14906_v55 = vpop.f32.mrb[144].mxu0  ;;  %v18434_v58 = vadd.f32 %v14710_v62, %v4932_v61 }
 0x451   :  { %v5094_v26 = vadd.f32 %v14906_v55, %v18384_v60  ;;  %v5085_v13 = vpop.f32.mrb[145].mxu0 }
 0x452   :  { %v5086_v35 = vadd.f32 %v5085_v13, %v18378_v50  ;;  %v14907_v48 = vpop.f32.mrb[146].mxu0  ;;  %v18440_v11 = vadd.f32 %v14713_v46, %v4935_v6  ;;  %v15247_v50 = vld [vmem:[#allocation16 + $0xf0] ss:$8 sps:$4 sm:$0xff]  }
 0x453   :  { %v5173_v63 = vmul.f32 %v18432_v27, %v5094_v26  ;;  %v5097_v44 = vadd.f32 %v14907_v48, %v18386_v52  ;;  %v5088_v5 = vpop.f32.mrb[147].mxu0  ;;  %7055 = vmatpush1.bf16.msra.mxu1 %v15247_v50 }
 0x454   :  { %v5089_v57 = vadd.f32 %v5088_v5, %v18380_v1  ;;  %v5171_v49 = vmul.f32 %v18432_v27, %v5086_v35  ;;  %7087 = vmatprep.subr.bf16.mxu1 %v15254_v7 }
 0x455   :  { %v5200_v60 = vadd.f32 %v18437_v45, %v5173_v63  ;;  %v5174_v4 = vmul.f32 %v18432_v27, %v5097_v44 }
 0x456   :  { %v5172_v25 = vmul.f32 %v18432_v27, %v5089_v57  ;;  %v5198_v52 = vadd.f32 %v18437_v45, %v5171_v49 }
 0x457   :  { %v5220_v43 = vmax.f32 %v5200_v60, 0.0  ;;  %v5201_v1 = vadd.f32 %v18437_v45, %v5174_v4 }
 0x458   :  { %v5199_v28 = vadd.f32 %v18437_v45, %v5172_v25  ;;  %v14910_v0 = vpop.f32.mrb[148].mxu0  ;;  %v5218_v59 = vmax.f32 %v5198_v52, 0.0 }
 0x459   :  { %v5110_v22 = vadd.f32 %v14910_v0, %v18396_v56  ;;  %v5101_v31 = vpop.f32.mrb[149].mxu0  ;;  %v5242_v54 = vrot.slane %v5220_v43, 2  ;;  %v5221_v56 = vmax.f32 %v5201_v1, 0.0 }
 0x45a   :  { %v5219_v16 = vmax.f32 %v5199_v28, 0.0  ;;  %v5102_v30 = vadd.f32 %v5101_v31, %v18390_v29  ;;  %v14911_v24 = vpop.f32.mrb[150].mxu0 }
 0x45b   :  { %v5177_v3 = vmul.f32 %v18432_v27, %v5110_v22  ;;  %v5113_v14 = vadd.f32 %v14911_v24, %v18398_v41  ;;  %v5104_v18 = vpop.f32.mrb[151].mxu0 }
 0x45c   :  { %v5241_v12 = vrot.slane %v5219_v16, 2  ;;  %v5175_v61 = vmul.f32 %v18432_v27, %v5102_v30  ;;  %v5105_v23 = vadd.f32 %v5104_v18, %v18392_v15  ;;  %v5321_v15 = vrot.slane %v5221_v56, 2 }
 0x45d   :  { %v5204_v2 = vadd.f32 %v18437_v45, %v5177_v3  ;;  %v5178_v42 = vmul.f32 %v18432_v27, %v5113_v14 }
 0x45e   :  { %v5243_v29 = vsel %vm3795_vm2, %v5241_v12, %v5242_v54  ;;  %v5202_v6 = vadd.f32 %v18437_v45, %v5175_v61  ;;  %v5176_v62 = vmul.f32 %v18432_v27, %v5105_v23 }
 0x45f   :  { %v5245_v41 = vmax.f32 %v5218_v59, %v5243_v29  ;;  %v18464_v40 = vadd.f32 %v18437_v45, %v5178_v42  ;;  %v5224_v33 = vmax.f32 %v5204_v2, 0.0 }
 0x460   :  { %v5222_v47 = vmax.f32 %v5202_v6, 0.0  ;;  %v14914_v46 = vpop.f32.mrb[152].mxu0  ;;  %v5203_v48 = vadd.f32 %v18437_v45, %v5176_v62 }
 0x461   :  { %v5247_v55 = vcombine.high %v5245_v41, %v5245_v41  ;;  %v5254_v26 = vrot.slane %v5245_v41, %v17121_v19  ;;  %v5225_v13 = vmax.f32 %v18464_v40, 0.0  ;;  %v5117_v10 = vpop.f32.mrb[153].mxu0  ;;  %v5126_v51 = vadd.f32 %v14914_v46, %v18408_v34 }
 0x462   :  { %v5322_v35 = vrot.slane %v5222_v47, 2  ;;  %v18471_v63 = vadd.f32 %v5117_v10, %v18402_v37  ;;  %v18473_v44 = vpop.f32.mrb[154].mxu0  ;;  %v5404_v50 = vrot.slane %v5224_v33, 2  ;;  %v5223_v22 = vmax.f32 %v5203_v48, 0.0  ;;  %v5313_v10 = vld [vmem:[#allocation3] sm:$0x8] }
 0x463   :  { %v5261_v5 = vrot.slane %v5247_v55, %v17121_v19  ;;  %v5262_v57 = vcombine.high %v5254_v26, %v5254_v26  ;;  %v13305_v60 = vrot.slane %v5254_v26, 9  ;;  %v5405_v49 = vrot.slane %v5225_v13, 2  ;;  %v18478_v4 = vpop.f32.mrb[155].mxu0 }
 0x464   :  { %v5323_v25 = vsel %vm3795_vm2, %v5321_v15, %v5322_v35  ;;  %v5327_v7 = vmax.f32 %v5221_v56, %v5322_v35  ;;  %v18489_v62 = vmul.f32 %v18432_v27, %v5126_v51 }
 0x465   :  { %v5263_v28 = vcombine.high %v5261_v5, %v5261_v5  ;;  %v13306_v34 = vrot.slane %v5262_v57, 9  ;;  %v13307_v0 = vrot.slane %v5261_v5, 9  ;;  %v5280_v37 = vmax.f32 %v5254_v26, %v13305_v60 }
 0x466   :  { %v5326_v52 = vmax.f32 %v5220_v43, %v5323_v25  ;;  %v5345_v1 = vrot.slane %v5327_v7, %v17121_v19  ;;  %v5406_v31 = vsel %vm3795_vm2, %v5404_v50, %v5405_v49  ;;  %v5399_v50 = vld [vmem:[#allocation3 + $0x8] sm:$0x1] }
 0x467   :  { %v13308_v16 = vrot.slane %v5263_v28, 9  ;;  %v5281_v30 = vmax.f32 %v5262_v57, %v13306_v34  ;;  %v5282_v24 = vmax.f32 %v5261_v5, %v13307_v0  ;;  %v14334_v3 = vpack.c.bf16 %v5280_v37, %v5280_v37 }
 0x468   :  { %v5330_v14 = vcombine.high %v5326_v52, %v5326_v52  ;;  %v5346_v18 = vcombine.high %v5345_v1, %v5345_v1  ;;  %v13315_v54 = vrot.slane %v5345_v1, 9  ;;  %v5408_v12 = vmax.f32 %v5223_v22, %v5406_v31  ;;  %v18483_v61 = vpop.f32.mrb[156].mxu0 }
 0x469   :  { %v5283_v23 = vmax.f32 %v5263_v28, %v13308_v16  ;;  %v14335_v59 = vpack.c.bf16 %v5281_v30, %v5281_v30  ;;  %v14336_v56 = vpack.c.bf16 %v5282_v24, %v5282_v24  ;;  %v5300_v2 = vunpack.c.l.b16 %v14334_v3  ;;  %v18485_v43 = vpop.f32.mrb[157].mxu0 }
 0x46a   :  { %v5337_v42 = vrot.slane %v5330_v14, %v17121_v19  ;;  %v13316_v29 = vrot.slane %v5346_v18, 9  ;;  %v5365_v6 = vmax.f32 %v5345_v1, %v13315_v54  ;;  %v18491_v41 = vpop.f32.mrb[158].mxu0  ;;  %v5410_v15 = vcombine.high %v5408_v12, %v5408_v12  ;;  %v5316_v14 = vld [vmem:[#allocation3 + $0x4] sm:$0x3] }
 0x46b   :  { %v14337_v33 = vpack.c.bf16 %v5283_v23, %v5283_v23  ;;  %v5302_v47 = vunpack.c.l.b16 %v14336_v56  ;;  %v5304_v46 = vrot.slane %v5300_v2, 1  ;;  %v18493_v55 = vpop.f32.mrb[159].mxu0  ;;  %v5301_v26 = vunpack.c.l.b16 %v14335_v59 }
 0x46c   :  { %v5338_v35 = vcombine.high %v5337_v42, %v5337_v42  ;;  %v13313_v48 = vrot.slane %v5337_v42, 9  ;;  %v5366_v5 = vmax.f32 %v5346_v18, %v13316_v29  ;;  %v5417_v51 = vrot.slane %v5408_v12, %v17121_v19 }
 0x46d   :  { %v5303_v57 = vunpack.c.l.b16 %v14337_v33  ;;  %v5305_v60 = vrot.slane %v5302_v47, 7  ;;  %v5309_v49 = vpack.c.b16 %v5304_v46, %v5304_v46  ;;  %v14340_v28 = vpack.c.bf16 %v5365_v6, %v5365_v6 }
 0x46e   :  { %v13314_v25 = vrot.slane %v5338_v35, 9  ;;  %v5363_v7 = vmax.f32 %v5337_v42, %v13313_v48  ;;  %v14342_v34 = vpack.c.bf16 %v5366_v5, %v5366_v5  ;;  %v5424_v1 = vrot.slane %v5410_v15, %v17121_v19 }
 0x46f   :  { %v5306_v0 = vsel %vm19427_vm4, %v5305_v60, %v5301_v26  ;;  %v5307_v37 = vrot.slane %v5303_v57, 6  ;;  %v5314_v52 = vsel %vm17239_vm14, %v5309_v49, %v5313_v10  ;;  %v5179_v30 = vmul.f32 %v18432_v27, %v18471_v63 }
 0x470   :  { %5315 = vst [vmem:[#allocation3] sm:$0x8] %v5314_v52  ;;  %v5364_v22 = vmax.f32 %v5338_v35, %v13314_v25  ;;  %v14338_v31 = vpack.c.bf16 %v5363_v7, %v5363_v7  ;;  %v5400_v16 = vsel %vm17310_vm13, %v14342_v34, %v5399_v50  ;;  %v18504_v24 = vpop.f32.mrb[160].mxu0  ;;  %v5425_v18 = vcombine.high %v5417_v51, %v5417_v51 }
 0x471   :  { %v5308_v3 = vsel %vm1223_vm10, %v5307_v37, %v5306_v0  ;;  %5401 = vst [vmem:[#allocation3 + $0x8] sm:$0x1] %v5400_v16  ;;  %v5426_v54 = vcombine.high %v5424_v1, %v5424_v1  ;;  %v13322_v12 = vrot.slane %v5417_v51, 9  ;;  %v18507_v23 = vpop.f32.mrb[161].mxu0  ;;  %v13324_v42 = vrot.slane %v5424_v1, 9 }
 0x472   :  { %v5310_v59 = vpack.c.b16 %v5308_v3, %v5308_v3  ;;  %v14339_v56 = vpack.c.bf16 %v5364_v22, %v5364_v22  ;;  %v5383_v2 = vunpack.c.l.b16 %v14338_v31  ;;  %v18509_v29 = vpop.f32.mrb[162].mxu0  ;;  %v5385_v6 = vunpack.c.l.b16 %v14340_v28 }
 0x473   :  { %v13323_v33 = vrot.slane %v5425_v18, 9  ;;  %v13325_v63 = vrot.slane %v5426_v54, 9  ;;  %v5443_v47 = vmax.f32 %v5417_v51, %v13322_v12  ;;  %v18511_v46 = vpop.f32.mrb[163].mxu0  ;;  %v5445_v48 = vmax.f32 %v5424_v1, %v13324_v42 }
 0x474   :  { %v5317_v26 = vsel %vm17157_vm12, %v5310_v59, %v5316_v14  ;;  %v5384_v10 = vunpack.c.l.b16 %v14339_v56  ;;  %v5387_v35 = vrot.slane %v5383_v2, 3  ;;  %v5206_v49 = vadd.f32 %v18437_v45, %v5179_v30  ;;  %v5396_v30 = vld [vmem:[#allocation3 + $0x4] sm:$0xc] }
 0x475   :  { %5318 = vst [vmem:[#allocation3 + $0x4] sm:$0x3] %v5317_v26  ;;  %v5444_v5 = vmax.f32 %v5425_v18, %v13323_v33  ;;  %v5446_v57 = vmax.f32 %v5426_v54, %v13325_v63  ;;  %v14343_v60 = vpack.c.bf16 %v5443_v47, %v5443_v47  ;;  %v14345_v25 = vpack.c.bf16 %v5445_v48, %v5445_v48 }
 0x476   :  { %v5388_v50 = vrot.slane %v5384_v10, 2  ;;  %v5129_v51 = vadd.f32 %v18473_v44, %v18410_v17  ;;  %v5121_v7 = vadd.f32 %v18478_v4, %v18404_v39  ;;  %v5390_v28 = vrot.slane %v5385_v6, 1 }
 0x477   :  { %v14344_v34 = vpack.c.bf16 %v5444_v5, %v5444_v5  ;;  %v14346_v0 = vpack.c.bf16 %v5446_v57, %v5446_v57  ;;  %v5463_v37 = vunpack.c.l.b16 %v14343_v60  ;;  %v5465_v1 = vunpack.c.l.b16 %v14345_v25 }
 0x478   :  { %v5389_v52 = vsel %vm1214_vm7, %v5388_v50, %v5387_v35  ;;  %v5182_v22 = vmul.f32 %v18432_v27, %v5129_v51  ;;  %v5180_v31 = vmul.f32 %v18432_v27, %v5121_v7  ;;  %v5226_v17 = vmax.f32 %v5206_v49, 0.0 }
 0x479   :  { %v5391_v16 = vsel %vm19429_vm9, %v5390_v28, %v5389_v52  ;;  %v5464_v3 = vunpack.c.l.b16 %v14344_v34  ;;  %v5466_v14 = vunpack.c.l.b16 %v14346_v0  ;;  %v5467_v18 = vrot.slane %v5463_v37, 5 }
 0x47a   :  { %v5392_v44 = vpack.c.b16 %v5391_v16, %v5391_v16  ;;  %v5470_v39 = vrot.slane %v5465_v1, 3  ;;  %v5209_v4 = vadd.f32 %v18437_v45, %v5182_v22  ;;  %v5207_v59 = vadd.f32 %v18437_v45, %v5180_v31 }
 0x47b   :  { %v5468_v54 = vrot.slane %v5464_v3, 4  ;;  %v5472_v12 = vrot.slane %v5466_v14, 2  ;;  %v5142_v56 = vadd.f32 %v18483_v61, %v18420_v9  ;;  %v5208_v6 = vadd.f32 %v18437_v45, %v18489_v62 }
 0x47c   :  { %v5397_v42 = vsel %vm17209_vm15, %v5392_v44, %v5396_v30  ;;  %v5134_v33 = vadd.f32 %v18485_v43, %v18414_v32  ;;  %v18536_v63 = vadd.f32 %v18491_v41, %v18422_v38  ;;  %v5227_v26 = vmax.f32 %v5207_v59, 0.0  ;;  %v5478_v43 = vld [vmem:[#allocation3 + $0x8] sm:$0xe] }
 0x47d   :  { %5398 = vst [vmem:[#allocation3 + $0x4] sm:$0xc] %v5397_v42  ;;  %v5469_v47 = vsel %vm1208_vm5, %v5468_v54, %v5467_v18  ;;  %v5185_v10 = vmul.f32 %v18432_v27, %v5142_v56  ;;  %v5137_v9 = vadd.f32 %v18493_v55, %v18416_v53  ;;  %v5483_v35 = vrot.slane %v5226_v17, 2 }
 0x47e   :  { %v5471_v61 = vsel %vm1211_vm6, %v5470_v39, %v5469_v47  ;;  %v5229_v62 = vmax.f32 %v5209_v4, 0.0  ;;  %v5183_v48 = vmul.f32 %v18432_v27, %v5134_v33  ;;  %vm19431_vm4 = vcmask 1043457  }
 0x47f   :  { %vm18546_vm9 = vmand %vm19431_vm4, %vm5476_vm11  ;;  %v5473_v38 = vsel %vm1214_vm7, %v5472_v12, %v5471_v61  ;;  %v5484_v41 = vrot.slane %v5227_v26, 2  ;;  %v5212_v5 = vadd.f32 %v18437_v45, %v5185_v10  ;;  %v5184_v53 = vmul.f32 %v18432_v27, %v5137_v9 }
 0x480   :  { %v5474_v55 = vpack.c.b16 %v5473_v38, %v5473_v38  ;;  %v5228_v57 = vmax.f32 %v5208_v6, 0.0  ;;  %v5210_v60 = vadd.f32 %v18437_v45, %v5183_v48  ;;  %v5158_v49 = vadd.f32 %v18504_v24, %v18434_v58 }
 0x481   :  { %v5485_v50 = vsel %vm3795_vm2, %v5483_v35, %v5484_v41  ;;  %v5489_v25 = vmax.f32 %v5226_v17, %v5484_v41  ;;  %v5232_v51 = vmax.f32 %v5212_v5, 0.0  ;;  %v5211_v7 = vadd.f32 %v18437_v45, %v5184_v53 }
 0x482   :  { %v5479_v28 = vsel %vm18546_vm9, %v5474_v55, %v5478_v43  ;;  %v5565_v34 = vrot.slane %v5229_v62, 2  ;;  %v5488_v0 = vmax.f32 %v5225_v13, %v5485_v50  ;;  %v5230_v37 = vmax.f32 %v5210_v60, 0.0 }
 0x483   :  { %5480 = vst [vmem:[#allocation3 + $0x8] sm:$0xe] %v5479_v28  ;;  %v5507_v52 = vrot.slane %v5489_v25, %v17121_v19  ;;  %v5647_v1 = vrot.slane %v5232_v51, 2  ;;  %v5231_v22 = vmax.f32 %v5211_v7, 0.0  ;;  %v5189_v58 = vmul.f32 %v18432_v27, %v5158_v49 }
 0x484   :  { %v5492_v24 = vcombine.high %v5488_v0, %v5488_v0  ;;  %v5566_v31 = vrot.slane %v5230_v37, 2  ;;  %v5150_v16 = vadd.f32 %v18507_v23, %v18426_v8  ;;  %v18568_v30 = vadd.f32 %v18509_v29, %v18440_v11 }
 0x485   :  { %v5508_v3 = vcombine.high %v5507_v52, %v5507_v52  ;;  %v13332_v40 = vrot.slane %v5507_v52, 9  ;;  %v5646_v13 = vrot.slane %v5231_v22, 2  ;;  %v5652_v14 = vmax.f32 %v5231_v22, %v5647_v1 }
 0x486   :  { %v5499_v17 = vrot.slane %v5492_v24, %v17121_v19  ;;  %v5567_v44 = vsel %vm3795_vm2, %v5565_v34, %v5566_v31  ;;  %v18573_v18 = vadd.f32 %v18437_v45, %v5189_v58  ;;  %v18576_v39 = vmul.f32 %v18432_v27, %v5150_v16 }
 0x487   :  { %v13333_v4 = vrot.slane %v5508_v3, 9  ;;  %v5527_v8 = vmax.f32 %v5507_v52, %v13332_v40  ;;  %v5569_v23 = vmax.f32 %v5228_v57, %v5567_v44  ;;  %v5648_v11 = vsel %vm3795_vm2, %v5646_v13, %v5647_v1 }
 0x488   :  { %v5500_v29 = vcombine.high %v5499_v17, %v5499_v17  ;;  %v13330_v54 = vrot.slane %v5499_v17, 9  ;;  %v5651_v12 = vmax.f32 %v5230_v37, %v5648_v11  ;;  %v5670_v59 = vrot.slane %v5652_v14, %v17121_v19 }
 0x489   :  { %v5528_v56 = vmax.f32 %v5508_v3, %v13333_v4  ;;  %v14349_v42 = vpack.c.bf16 %v5527_v8, %v5527_v8  ;;  %v5571_v6 = vcombine.high %v5569_v23, %v5569_v23  ;;  %v5578_v33 = vrot.slane %v5569_v23, %v17121_v19 }
 0x48a   :  { %v13331_v47 = vrot.slane %v5500_v29, 9  ;;  %v5525_v26 = vmax.f32 %v5499_v17, %v13330_v54  ;;  %v5655_v10 = vcombine.high %v5651_v12, %v5651_v12  ;;  %v5671_v9 = vcombine.high %v5670_v59, %v5670_v59 }
 0x48b   :  { %v14350_v61 = vpack.c.bf16 %v5528_v56, %v5528_v56  ;;  %v5547_v35 = vunpack.c.l.b16 %v14349_v42  ;;  %vm5558_vm11 = vsmask.f32 2306  ;;  %v5585_v62 = vrot.slane %v5571_v6, %v17121_v19  ;;  %v5638_v42 = vld [vmem:[#allocation3 + $0x18] sm:$0x8] }
 0x48c   :  { %v5586_v48 = vcombine.high %v5578_v33, %v5578_v33  ;;  %v5526_v38 = vmax.f32 %v5500_v29, %v13331_v47  ;;  %v14347_v43 = vpack.c.bf16 %v5525_v26, %v5525_v26  ;;  %v13338_v41 = vrot.slane %v5578_v33, 9 }
 0x48d   :  { %v5662_v5 = vrot.slane %v5655_v10, %v17121_v19  ;;  %v5548_v53 = vunpack.c.l.b16 %v14350_v61  ;;  %v5552_v55 = vrot.slane %v5547_v35, 5  ;;  %v5587_v57 = vcombine.high %v5585_v62, %v5585_v62  ;;  %v5560_v10 = vld [vmem:[#allocation3 + $0xc] sm:$0x7] }
 0x48e   :  { %v13339_v60 = vrot.slane %v5586_v48, 9  ;;  %v14348_v49 = vpack.c.bf16 %v5526_v38, %v5526_v38  ;;  %v5545_v50 = vunpack.c.l.b16 %v14347_v43  ;;  %v13340_v25 = vrot.slane %v5585_v62, 9 }
 0x48f   :  { %v5604_v51 = vmax.f32 %v5578_v33, %v13338_v41  ;;  %v5554_v7 = vrot.slane %v5548_v53, 4  ;;  %v13341_v28 = vrot.slane %v5587_v57, 9  ;;  %v5663_v0 = vcombine.high %v5662_v5, %v5662_v5 }
 0x490   :  { %v5605_v34 = vmax.f32 %v5586_v48, %v13339_v60  ;;  %v5546_v37 = vunpack.c.l.b16 %v14348_v49  ;;  %v5549_v52 = vrot.slane %v5545_v50, 7  ;;  %v5606_v1 = vmax.f32 %v5585_v62, %v13340_v25  ;;  %v18598_v25 = vld [vmem:[#allocation3 + $0x4] sm:$0xf] }
 0x491   :  { %v14351_v22 = vpack.c.bf16 %v5604_v51, %v5604_v51  ;;  %v5607_v58 = vmax.f32 %v5587_v57, %v13341_v28  ;;  %v13346_v31 = vrot.slane %v5662_v5, 9  ;;  %v13347_v16 = vrot.slane %v5663_v0, 9  ;;  %v5641_v51 = vld [vmem:[#allocation3 + $0x1c] sm:$0x3] }
 0x492   :  { %v14352_v24 = vpack.c.bf16 %v5605_v34, %v5605_v34  ;;  %v5550_v3 = vrot.slane %v5546_v37, 6  ;;  %v14353_v40 = vpack.c.bf16 %v5606_v1, %v5606_v1  ;;  %v13348_v14 = vrot.slane %v5670_v59, 9  ;;  %v5884_v1 = vld [vmem:[#allocation3] sm:$0xf] }
 0x493   :  { %v5624_v13 = vunpack.c.l.b16 %v14351_v22  ;;  %v14354_v17 = vpack.c.bf16 %v5607_v58, %v5607_v58  ;;  %v13349_v4 = vrot.slane %v5671_v9, 9  ;;  %v5688_v8 = vmax.f32 %v5662_v5, %v13346_v31  ;;  %v5724_v5 = vld [vmem:[#allocation3 + $0x20] sm:$0x1] }
 0x494   :  { %v5625_v44 = vunpack.c.l.b16 %v14352_v24  ;;  %v5551_v23 = vsel %vm1223_vm10, %v5550_v3, %v5549_v52  ;;  %v5626_v11 = vunpack.c.l.b16 %v14353_v40  ;;  %v5689_v54 = vmax.f32 %v5663_v0, %v13347_v16  ;;  %v18616_v3 = vld [vmem:[#allocation3 + $0x8] sm:$0xf] }
 0x495   :  { %v5628_v29 = vrot.slane %v5624_v13, 1  ;;  %v5553_v12 = vsel %vm1369_vm0, %v5552_v55, %v5551_v23  ;;  %v5627_v56 = vunpack.c.l.b16 %v14354_v17  ;;  %v5690_v6 = vmax.f32 %v5670_v59, %v13348_v14 }
 0x496   :  { %v5691_v33 = vmax.f32 %v5671_v9, %v13349_v4  ;;  %v5555_v47 = vsel %vm1208_vm5, %v5554_v7, %v5553_v12  ;;  %vm19434_vm4 = vcmask 1042432   ;;  %v5629_v61 = vrot.slane %v5626_v11, 7 }
 0x497   :  { %vm18588_vm1 = vmand %vm19434_vm4, %vm5558_vm11  ;;  %v5633_v35 = vpack.c.b16 %v5628_v29, %v5628_v29  ;;  %v14355_v62 = vpack.c.bf16 %v5688_v8, %v5688_v8  ;;  %v5556_v48 = vpack.c.b16 %v5555_v47, %v5555_v47  ;;  %v5631_v38 = vrot.slane %v5627_v56, 6 }
 0x498   :  { %v14356_v43 = vpack.c.bf16 %v5689_v54, %v5689_v54  ;;  %v14357_v41 = vpack.c.bf16 %v5690_v6, %v5690_v6  ;;  %v5630_v59 = vsel %vm19437_vm8, %v5629_v61, %v5625_v44  ;;  %v14359_v55 = vpack.c.bf16 %v5691_v33, %v5691_v33  ;;  %v5960_v44 = vld [vmem:[#allocation3] sm:$0xe] }
 0x499   :  { %v5639_v9 = vsel %vm17239_vm14, %v5633_v35, %v5638_v42  ;;  %v5708_v53 = vunpack.c.l.b16 %v14355_v62  ;;  %v5561_v57 = vsel %vm18588_vm1, %v5556_v48, %v5560_v10  ;;  %v5632_v60 = vsel %vm1223_vm10, %v5631_v38, %v5630_v59 }
 0x49a   :  { %5640 = vst [vmem:[#allocation3 + $0x18] sm:$0x8] %v5639_v9  ;;  %v5709_v49 = vunpack.c.l.b16 %v14356_v43  ;;  %v5710_v50 = vunpack.c.l.b16 %v14357_v41  ;;  %5562 = vst [vmem:[#allocation3 + $0xc] sm:$0x7] %v5561_v57  ;;  %v5634_v7 = vpack.c.b16 %v5632_v60, %v5632_v60  ;;  %v5186_v28 = vmul.f32 %v18432_v27, %v18536_v63  ;;  %v15252_v41 = vld [vmem:[#allocation16 + $0x100] ss:$8 sps:$4 sm:$0xff]  }
 0x49b   :  { %v5725_v36 = vsel %vm17310_vm13, %v14359_v55, %v5724_v5  ;;  %v5712_v34 = vrot.slane %v5708_v53, 3  ;;  %v5190_v52 = vmul.f32 %v18432_v27, %v18568_v30  ;;  %v5214_v22 = vadd.f32 %v18437_v45, %v18576_v39  ;;  %v5721_v39 = vld [vmem:[#allocation3 + $0x1c] sm:$0xc]  ;;  %v5980_v57 = vld [vmem:[#allocation3] sm:$0x8] }
 0x49c   :  { %v5713_v0 = vrot.slane %v5709_v49, 2  ;;  %v5715_v37 = vrot.slane %v5710_v50, 1  ;;  %5726 = vst [vmem:[#allocation3 + $0x20] sm:$0x1] %v5725_v36  ;;  %v5153_v58 = vadd.f32 %v18511_v46, %v18428_v21  ;;  %v13371_v24 = vcombine.low %v5884_v1, %v18598_v25  ;;  %v15257_v50 = vld [vmem:[#allocation16 + $0x114] ss:$8 sps:$4 sm:$0xff]  }
 0x49d   :  { %v5642_v20 = vsel %vm17157_vm12, %v5634_v7, %v5641_v51  ;;  %v5236_v31 = vmax.f32 %v18573_v18, 0.0  ;;  %v5217_v16 = vadd.f32 %v18437_v45, %v5190_v52  ;;  %vm19438_vm13 = vcmask 1047559  }
 0x49e   :  { %v5714_v63 = vsel %vm1214_vm7, %v5713_v0, %v5712_v34  ;;  %5643 = vst [vmem:[#allocation3 + $0x1c] sm:$0x3] %v5642_v20  ;;  %v5188_v40 = vmul.f32 %v18432_v27, %v5153_v58  ;;  %v5921_v21 = vshll.u32 %v13371_v24, 16  ;;  %v5213_v15 = vadd.f32 %v18437_v45, %v5186_v28 }
 0x49f   :  { %v5716_v30 = vsel %vm19438_vm13, %v5715_v37, %v5714_v63  ;;  %v5237_v13 = vmax.f32 %v5217_v16, 0.0  ;;  %v5234_v14 = vmax.f32 %v5214_v22, 0.0  ;;  %v13386_v18 = vcombine.low %v18598_v25, %v18616_v3 }
 0x4a0   :  { %v5717_v46 = vpack.c.b16 %v5716_v30, %v5716_v30  ;;  %v5215_v17 = vadd.f32 %v18437_v45, %v5188_v40  ;;  %v5806_v8 = vrot.slane %v5236_v31, 2  ;;  %v5923_v29 = vrot.slane %v5921_v21, 1 }
 0x4a1   :  { %v5807_v23 = vrot.slane %v5237_v13, 2  ;;  %v5913_v11 = vld [vmem:[#allocation3 + $0xc] sm:$0x1]  ;;  %v13378_v12 = vcombine.low %v5960_v44, %v18598_v25  ;;  %v5919_v42 = vshrl.u32 %v13371_v24, 16  ;;  %v5729_v6 = vrot.slane %v5234_v14, 2 }
 0x4a2   :  { %v5722_v4 = vsel %vm17209_vm15, %v5717_v46, %v5721_v39  ;;  %v5235_v27 = vmax.f32 %v5215_v17, 0.0  ;;  %v18627_v54 = vcombine.low %v18616_v3, %v5913_v11  ;;  %v5233_v10 = vmax.f32 %v5213_v15, 0.0  ;;  %v18635_v55 = vld [vmem:[#allocation3 + $0x18] sm:$0xf]  ;;  %v18654_v20 = vld [vmem:[#allocation3 + $0xc] sm:$0xf] }
 0x4a3   :  { %5723 = vst [vmem:[#allocation3 + $0x1c] sm:$0xc] %v5722_v4  ;;  %v5812_v56 = vmax.f32 %v5236_v31, %v5807_v23  ;;  %v5808_v45 = vsel %vm3795_vm2, %v5806_v8, %v5807_v23  ;;  %v5924_v35 = vor.u32 %v5923_v29, %v5919_v42  ;;  %v5965_v5 = vrot.slane %v13378_v12, 1  ;;  %v15255_v39 = vld [vmem:[#allocation16 + $0x110] ss:$8 sps:$4 sm:$0xff]  }
 0x4a4   :  { %v5730_v33 = vrot.slane %v5235_v27, 2  ;;  %v5811_v47 = vmax.f32 %v5235_v27, %v5808_v45  ;;  %v5926_v2 = vshll.u32 %v18627_v54, 16  ;;  %v5966_v62 = vrot.slane %v18627_v54, 1 }
 0x4a5   :  { %v5830_v61 = vrot.slane %v5812_v56, %v17121_v19  ;;  %vm19439_vm12 = vsmask.f32 7424  ;;  %v18640_v51 = vcombine.low %v5980_v57, %v18598_v25  ;;  %v13373_v58 = vcombine.low %v18635_v55, %v18635_v55  ;;  %v15258_v56 = vld [vmem:[#allocation16 + $0x120] ss:$8 sps:$4 sm:$0xff]   ;;  %v15344_v25 = vld [vmem:[#allocation16 + $0x2a4] ss:$8 sps:$4 sm:$0xff]  }
 0x4a6   :  { %v5731_v48 = vsel %vm3795_vm2, %v5729_v6, %v5730_v33  ;;  %v5815_v38 = vcombine.high %v5811_v47, %v5811_v47  ;;  %v5928_v43 = vrot.slane %v5926_v2, 1  ;;  %v18645_v7 = vsel %vm3567_vm3, %v5965_v5, %v5966_v62  ;;  %v15266_v2 = vld [vmem:[#allocation16 + $0x134] ss:$8 sps:$4 sm:$0xff]  }
 0x4a7   :  { %v5831_v59 = vcombine.high %v5830_v61, %v5830_v61  ;;  %v13365_v9 = vrot.slane %v5830_v61, 9  ;;  %v5733_v53 = vmax.f32 %v5233_v10, %v5731_v48  ;;  %v5930_v13 = vshrl.u32 %v18627_v54, 16  ;;  %v15327_v54 = vld [vmem:[#allocation16 + $0x250] ss:$8 sps:$4 sm:$0xff]  }
 0x4a8   :  { %v5822_v60 = vrot.slane %v5815_v38, %v17121_v19  ;;  %v5929_v49 = vsel %vm19439_vm12, %v5924_v35, %v5928_v43  ;;  %v18660_v44 = vcombine.low %v18616_v3, %v18654_v20  ;;  %v6015_v48 = vshrl.u32 %v18640_v51, 16 }
 0x4a9   :  { %v13366_v28 = vrot.slane %v5831_v59, 9  ;;  %v5850_v36 = vmax.f32 %v5830_v61, %v13365_v9  ;;  %v5735_v34 = vcombine.high %v5733_v53, %v5733_v53  ;;  %v5742_v0 = vrot.slane %v5733_v53, %v17121_v19  ;;  %7056 = vmatprep.mubr.bf16.mxu1 %v5929_v49  ;;  %v15264_v49 = vld [vmem:[#allocation16 + $0x130] ss:$8 sps:$4 sm:$0xff]  }
 0x4aa   :  { %v18648_v37 = vld [vmem:[#allocation3 + $0x1c] sm:$0xf]  ;;  %v5823_v52 = vcombine.high %v5822_v60, %v5822_v60  ;;  %v13363_v1 = vrot.slane %v5822_v60, 9  ;;  %7057 = vmatmul.mubr.bf16.vlgmr.msra.gmra.mrb[80].mxu1 %v13371_v24  ;;  %v5932_v35 = vor.u32 %v5930_v13, %v5928_v43  ;;  %vm19440_vm15 = vcmask 1043456  }
 0x4ab   :  { %v13376_v22 = vcombine.low %v18635_v55, %v18648_v37  ;;  %v5851_v63 = vmax.f32 %v5831_v59, %v13366_v28  ;;  %v14366_v31 = vpack.c.bf16 %v5850_v36, %v5850_v36  ;;  %v5749_v16 = vrot.slane %v5735_v34, %v17121_v19  ;;  %7088 = vmatpush1.bf16.msra.mxu1 %v15252_v41  ;;  %v15260_v24 = vld [vmem:[#allocation16 + $0x124] ss:$8 sps:$4 sm:$0xff]  }
 0x4ac   :  { %v5750_v30 = vcombine.high %v5742_v0, %v5742_v0  ;;  %v13355_v40 = vrot.slane %v5742_v0, 9  ;;  %v13364_v21 = vrot.slane %v5823_v52, 9  ;;  %v5848_v46 = vmax.f32 %v5822_v60, %v13363_v1  ;;  %7089 = vmatprep.subr.bf16.mxu1 %v15257_v50 }
 0x4ad   :  { %v14367_v15 = vpack.c.bf16 %v5851_v63, %v5851_v63  ;;  %v5751_v14 = vcombine.high %v5749_v16, %v5749_v16  ;;  %v13357_v4 = vrot.slane %v5749_v16, 9  ;;  %v5870_v29 = vunpack.c.l.b16 %v14366_v31  ;;  %v5982_v31 = vld [vmem:[#allocation3 + $0x18] sm:$0x8] }
 0x4ae   :  { %v13356_v17 = vrot.slane %v5750_v30, 9  ;;  %v5768_v8 = vmax.f32 %v5742_v0, %v13355_v40  ;;  %v5849_v23 = vmax.f32 %v5823_v52, %v13364_v21  ;;  %v14364_v11 = vpack.c.bf16 %v5848_v46, %v5848_v46  ;;  %v15269_v0 = vld [vmem:[#allocation16 + $0x144] ss:$8 sps:$4 sm:$0xff]  }
 0x4af   :  { %v13358_v27 = vrot.slane %v5751_v14, 9  ;;  %7090 = vmatpush1.bf16.msra.mxu1 %v15255_v39  ;;  %v5939_v45 = vshrl.u32 %v13376_v22, 16  ;;  %v5770_v42 = vmax.f32 %v5749_v16, %v13357_v4  ;;  %v5871_v38 = vunpack.c.l.b16 %v14367_v15  ;;  %v15267_v4 = vld [vmem:[#allocation16 + $0x140] ss:$8 sps:$4 sm:$0xff]  }
 0x4b0   :  { %v5769_v12 = vmax.f32 %v5750_v30, %v13356_v17  ;;  %v14360_v6 = vpack.c.bf16 %v5768_v8, %v5768_v8  ;;  %v14365_v33 = vpack.c.bf16 %v5849_v23, %v5849_v23  ;;  %v5868_v47 = vunpack.c.l.b16 %v14364_v11  ;;  %7091 = vmatprep.subr.bf16.mxu1 %v15260_v24  ;;  %v5801_v11 = vld [vmem:[#allocation3 + $0x20] sm:$0xe] }
 0x4b1   :  { %v5771_v10 = vmax.f32 %v5751_v14, %v13358_v27  ;;  %v14362_v41 = vpack.c.bf16 %v5770_v42, %v5770_v42  ;;  %v5941_v57 = vrot.slane %v5939_v45, 4  ;;  %v5942_v60 = vshll.u32 %v13376_v22, 16  ;;  %v5881_v14 = vld [vmem:[#allocation3 + $0x24] sm:$0x7] }
 0x4b2   :  { %v14361_v61 = vpack.c.bf16 %v5769_v12, %v5769_v12  ;;  %v5788_v5 = vunpack.c.l.b16 %v14360_v6  ;;  %v5869_v59 = vunpack.c.l.b16 %v14365_v33  ;;  %v5875_v50 = vrot.slane %v5870_v29, 5  ;;  %v15276_v12 = vld [vmem:[#allocation16 + $0x154] ss:$8 sps:$4 sm:$0xff]  }
 0x4b3   :  { %v14363_v9 = vpack.c.bf16 %v5771_v10, %v5771_v10  ;;  %7092 = vmatpush1.bf16.msra.mxu1 %v15258_v56  ;;  %v5790_v28 = vunpack.c.l.b16 %v14362_v41  ;;  %v5872_v36 = vrot.slane %v5868_v47, 7  ;;  %v5944_v63 = vrot.slane %v5942_v60, 5  ;;  %v6064_v47 = vld [vmem:[#allocation3 + $0x4] sm:$0xc] }
 0x4b4   :  { %v5789_v53 = vunpack.c.l.b16 %v14361_v61  ;;  %v5873_v34 = vrot.slane %v5869_v59, 6  ;;  %7093 = vmatprep.subr.bf16.mxu1 %v15266_v2  ;;  %v5792_v43 = vrot.slane %v5788_v5, 5  ;;  %v5877_v16 = vrot.slane %v5871_v38, 4  ;;  %v6140_v2 = vld [vmem:[#allocation3 + $0x4] sm:$0x8] }
 0x4b5   :  { %v5791_v52 = vunpack.c.l.b16 %v14363_v9  ;;  %v5795_v30 = vrot.slane %v5790_v28, 3  ;;  %v18665_v40 = vcombine.low %v5982_v31, %v18648_v37  ;;  %v18669_v24 = vor.u32 %v5944_v63, %v5941_v57  ;;  %v6065_v38 = vld [vmem:[#allocation3 + $0x10] sm:$0x3]  ;;  %v15279_v5 = vld [vmem:[#allocation16 + $0x164] ss:$8 sps:$4 sm:$0xff]  }
 0x4b6   :  { %v5793_v1 = vrot.slane %v5789_v53, 4  ;;  %v5874_v39 = vsel %vm1223_vm10, %v5873_v34, %v5872_v36  ;;  %v13372_v17 = vcombine.low %v18616_v3, %v18616_v3  ;;  %v6017_v8 = vrot.slane %v6015_v48, 3  ;;  %v6092_v48 = vld [vmem:[#allocation3 + $0x10] sm:$0x7]  ;;  %v15277_v28 = vld [vmem:[#allocation16 + $0x160] ss:$8 sps:$4 sm:$0xff]  }
 0x4b7   :  { %v5797_v21 = vrot.slane %v5791_v52, 2  ;;  %v5876_v46 = vsel %vm1369_vm0, %v5875_v50, %v5874_v39  ;;  %7094 = vmatpush1.bf16.msra.mxu1 %v15264_v49  ;;  %v5958_v27 = vsel %vm19440_vm15, %v5932_v35, %v18669_v24  ;;  %v6018_v56 = vshll.u32 %v18640_v51, 16  ;;  %v15282_v34 = vld [vmem:[#allocation16 + $0x174] ss:$8 sps:$4 sm:$0xff]  }
 0x4b8   :  { %v5794_v22 = vsel %vm1208_vm5, %v5793_v1, %v5792_v43  ;;  %v5878_v15 = vsel %vm1208_vm5, %v5877_v16, %v5876_v46  ;;  %7095 = vmatprep.subr.bf16.mxu1 %v15269_v0  ;;  %7066 = vmatprep.mubr.bf16.mxu1 %v5958_v27  ;;  %vm19441_vm5 = vmmov %vm19440_vm15  ;;  %v6023_v6 = vshrl.u32 %v18660_v44, 16  ;;  %v6026_v33 = vshll.u32 %v18660_v44, 16  ;;  %v15280_v16 = vld [vmem:[#allocation16 + $0x170] ss:$8 sps:$4 sm:$0xff]  }
 0x4b9   :  { %v5796_v13 = vsel %vm1211_vm6, %v5795_v30, %v5794_v22  ;;  %v5879_v29 = vpack.c.b16 %v5878_v15, %v5878_v15  ;;  %v5911_v42 = vsel %vm19441_vm5, %v13372_v17, %v13373_v58  ;;  %v6020_v61 = vrot.slane %v6018_v56, 4  ;;  %v15274_v58 = vld [vmem:[#allocation16 + $0x150] ss:$8 sps:$4 sm:$0xff]   ;;  %vm19442_vm0 = vmmov %vm19441_vm5 }
 0x4ba   :  { %v5798_v23 = vsel %vm1214_vm7, %v5797_v21, %v5796_v13  ;;  %7067 = vmatmul.mubr.bf16.gmra.mrb[84].mxu1 %v5911_v42  ;;  %v6036_v35 = vshrl.u32 %v18665_v40, 16  ;;  %vm6013_vm6 = vsmask.f32 4352  ;;  %v6025_v41 = vrot.slane %v6023_v6, 3  ;;  %v5981_v21 = vld [vmem:[#allocation3 + $0xc] sm:$0x7]  ;;  %vm19444_vm3 = vmmov %vm19442_vm0 }
 0x4bb   :  { %v5799_v45 = vpack.c.b16 %v5798_v23, %v5798_v23  ;;  %v5882_v10 = vsel %vm18588_vm1, %v5879_v29, %v5881_v14  ;;  %7096 = vmatpush1.bf16.msra.mxu1 %v15267_v4  ;;  %v6028_v44 = vrot.slane %v6026_v33, 4  ;;  %v6021_v26 = vor.u32 %v6020_v61, %v6017_v8  ;;  %v6067_v46 = vld [vmem:[#allocation3 + $0x28] sm:$0x3]  ;;  %v15285_v14 = vld [vmem:[#allocation16 + $0x184] ss:$8 sps:$4 sm:$0xff]   ;;  %vm19449_vm11 = vmmov %vm19442_vm0 }
 0x4bc   :  { %5883 = vst [vmem:[#allocation3 + $0x24] sm:$0x7] %v5882_v10  ;;  %7097 = vmatprep.subr.bf16.mxu1 %v15276_v12  ;;  %v18690_v59 = vrot.slane %v6036_v35, 7  ;;  %v6039_v9 = vshll.u32 %v18665_v40, 16  ;;  %v18694_v53 = vcombine.low %v6064_v47, %v18616_v3  ;;  %v18697_v32 = vcombine.low %v18654_v20, %v6092_v48  ;;  %v6066_v4 = vld [vmem:[#allocation3 + $0x1c] sm:$0xc]  ;;  %vm19450_vm4 = vmmov %vm19442_vm0 }
 0x4bd   :  { %v5802_v55 = vsel %vm18546_vm9, %v5799_v45, %v5801_v11  ;;  %v6029_v57 = vor.u32 %v6028_v44, %v6025_v41  ;;  %v13390_v60 = vcombine.low %v18654_v20, %v6065_v38  ;;  %v13395_v49 = vcombine.low %v6140_v2, %v18616_v3  ;;  %v15283_v12 = vld [vmem:[#allocation16 + $0x180] ss:$8 sps:$4 sm:$0xff]   ;;  %v6141_v45 = vld [vmem:[#allocation3 + $0x1c] sm:$0x8]  ;;  %v15288_v33 = vld [vmem:[#allocation16 + $0x194] ss:$8 sps:$4 sm:$0xff]  }
 0x4be   :  { %5803 = vst [vmem:[#allocation3 + $0x20] sm:$0xe] %v5802_v55  ;;  %v6041_v50 = vor.u32 %v6039_v9, %v18690_v59  ;;  %v6074_v52 = vrot.slane %v18694_v53, 2  ;;  %v6146_v63 = vrot.slane %v18697_v32, 3  ;;  %vm19443_vm14 = vcmask 1044480   ;;  %vm19451_vm13 = vmmov %vm19442_vm0 }
 0x4bf   :  { %7098 = vmatpush1.bf16.msra.mxu1 %v15274_v58  ;;  %v18703_v36 = vsel %vm6013_vm6, %v6021_v26, %v6029_v57  ;;  %v6075_v43 = vrot.slane %v13390_v60, 2  ;;  %v6145_v1 = vrot.slane %v13395_v49, 3  ;;  %v13381_v29 = vcombine.low %v18616_v3, %v5981_v21  ;;  %v15286_v58 = vld [vmem:[#allocation16 + $0x190] ss:$8 sps:$4 sm:$0xff]   ;;  %v15291_v9 = vld [vmem:[#allocation16 + $0x1a4] ss:$8 sps:$4 sm:$0xff]   ;;  %vm19448_vm9 = vmmov %vm19443_vm14 }
 0x4c0   :  { %7099 = vmatprep.subr.bf16.mxu1 %v15279_v5  ;;  %v18706_v0 = vsel %vm19442_vm0, %v6029_v57, %v6041_v50  ;;  %v5990_v55 = vrot.slane %v18640_v51, 3  ;;  %vm19446_vm1 = vcmask 1041408   ;;  %vm19447_vm8 = vsmask.f32 256  ;;  %v15289_v50 = vld [vmem:[#allocation16 + $0x1a0] ss:$8 sps:$4 sm:$0xff]   ;;  %vm19454_vm5 = vmmov %vm19442_vm0 }
 0x4c1   :  { %v18713_v39 = vsel %vm3795_vm2, %v6074_v52, %v6075_v43  ;;  %v18718_v13 = vsel %vm19443_vm14, %v6145_v1, %v6146_v63  ;;  %v5991_v48 = vrot.slane %v13381_v29, 3  ;;  %vm19445_vm2 = vsmask.f32 3328  ;;  %v15297_v52 = vld [vmem:[#allocation16 + $0x1c4] ss:$8 sps:$4 sm:$0xff]  }
 0x4c2   :  { %v15298_v1 = vld [vmem:[#allocation16 + $0x1d0] ss:$8 sps:$4 sm:$0xff]   ;;  %v5961_v29 = vld [vmem:[#allocation3 + $0x18] sm:$0xe]  ;;  %vm19452_vm12 = vcmask 1040384   ;;  %vm19453_vm15 = vcmask 1042432  }
 0x4c3   :  { %v5914_v31 = vld [vmem:[#allocation3 + $0x24] sm:$0x1]  ;;  %7100 = vmatpush1.bf16.msra.mxu1 %v15277_v28  ;;  %v5992_v49 = vsel %vm19448_vm9, %v5990_v55, %v5991_v48  ;;  %v15294_v28 = vld [vmem:[#allocation16 + $0x1b4] ss:$8 sps:$4 sm:$0xff]   ;;  %v15304_v21 = vld [vmem:[#allocation16 + $0x1f0] ss:$8 sps:$4 sm:$0xff]  }
 0x4c4   :  { %v18710_v30 = vld [vmem:[#allocation3 + $0x24] sm:$0xf]  ;;  %7101 = vmatprep.subr.bf16.mxu1 %v15282_v34  ;;  %v15292_v34 = vld [vmem:[#allocation16 + $0x1b0] ss:$8 sps:$4 sm:$0xff]   ;;  %v15330_v55 = vld [vmem:[#allocation16 + $0x260] ss:$8 sps:$4 sm:$0xff]  }
 0x4c5   :  { %v18715_v22 = vld [vmem:[#allocation3 + $0x20] sm:$0xf]  ;;  %v13392_v27 = vcombine.low %v18710_v30, %v6067_v46  ;;  %v15310_v46 = vld [vmem:[#allocation16 + $0x204] ss:$8 sps:$4 sm:$0xff]   ;;  %vm19455_vm6 = vsmask.f32 5376 }
 0x4c6   :  { %v18721_v15 = vcombine.low %v18715_v22, %v5914_v31  ;;  %v18725_v17 = vcombine.low %v18715_v22, %v18710_v30  ;;  %v18728_v8 = vcombine.low %v6066_v4, %v18715_v22  ;;  %v13396_v47 = vcombine.low %v6141_v45, %v18715_v22  ;;  %v15303_v31 = vld [vmem:[#allocation16 + $0x1e4] ss:$8 sps:$4 sm:$0xff]   ;;  %v15308_v4 = vld [vmem:[#allocation16 + $0x200] ss:$8 sps:$4 sm:$0xff]   ;;  %v15312_v45 = vld [vmem:[#allocation16 + $0x210] ss:$8 sps:$4 sm:$0xff]  }
 0x4c7   :  { %7102 = vmatpush1.bf16.msra.mxu1 %v15280_v16  ;;  %v6085_v38 = vrot.slane %v13392_v27, 6  ;;  %v13374_v26 = vcombine.low %v18648_v37, %v18715_v22  ;;  %v15306_v16 = vld [vmem:[#allocation16 + $0x1f4] ss:$8 sps:$4 sm:$0xff]   ;;  %v13379_v27 = vcombine.low %v5961_v29, %v18648_v37  ;;  %v15342_v3 = vld [vmem:[#allocation16 + $0x2a0] ss:$8 sps:$4 sm:$0xff]   ;;  %vm7485_vm9 = vcmask 1047558  }
 0x4c8   :  { %v5947_v23 = vshrl.u32 %v18721_v15, 16  ;;  %v5950_v11 = vshll.u32 %v18721_v15, 16  ;;  %v6043_v56 = vshrl.u32 %v18725_v17, 16  ;;  %7103 = vmatprep.subr.bf16.mxu1 %v15285_v14  ;;  %v6046_v10 = vshll.u32 %v18725_v17, 16  ;;  %v15366_v29 = vld [vmem:[#allocation16 + $0x310] ss:$8 sps:$4 sm:$0xff]  }
 0x4c9   :  { %v6084_v61 = vrot.slane %v18728_v8, 6  ;;  %v18749_v60 = vrot.slane %v13396_v47, 7  ;;  %v6000_v14 = vrot.slane %v18665_v40, 7  ;;  %v5972_v40 = vrot.slane %v13379_v27, 5  ;;  %v15322_v47 = vld [vmem:[#allocation16 + $0x234] ss:$8 sps:$4 sm:$0xff]  }
 0x4ca   :  { %v5949_v42 = vrot.slane %v5947_v23, 4  ;;  %v5952_v6 = vrot.slane %v5950_v11, 5  ;;  %v6045_v2 = vrot.slane %v6043_v56, 7  ;;  %v5983_v23 = vld [vmem:[#allocation3 + $0x24] sm:$0x7] }
 0x4cb   :  { %7104 = vmatpush1.bf16.msra.mxu1 %v15283_v12  ;;  %v18740_v44 = vsel %vm19444_vm3, %v6075_v43, %v6084_v61  ;;  %v18747_v57 = vsel %vm19446_vm1, %v6084_v61, %v6085_v38  ;;  %v15295_v43 = vld [vmem:[#allocation16 + $0x1c0] ss:$8 sps:$4 sm:$0xff]   ;;  %v15314_v11 = vld [vmem:[#allocation16 + $0x214] ss:$8 sps:$4 sm:$0xff]   ;;  %v6006_v12 = vsel %vm19450_vm4, %v5991_v48, %v6000_v14  ;;  %v13383_v56 = vcombine.low %v18715_v22, %v5983_v23  ;;  %v15320_v22 = vld [vmem:[#allocation16 + $0x230] ss:$8 sps:$4 sm:$0xff]  }
 0x4cc   :  { %v5953_v35 = vor.u32 %v5952_v6, %v5949_v42  ;;  %v6048_v41 = vor.u32 %v6046_v10, %v6045_v2  ;;  %7105 = vmatprep.subr.bf16.mxu1 %v15288_v33  ;;  %v15318_v42 = vld [vmem:[#allocation16 + $0x224] ss:$8 sps:$4 sm:$0xff]   ;;  %v15316_v33 = vld [vmem:[#allocation16 + $0x220] ss:$8 sps:$4 sm:$0xff]   ;;  %v5978_v2 = vsel %vm19451_vm13, %v5966_v62, %v5972_v40  ;;  %v5973_v61 = vrot.slane %v18721_v15, 5  ;;  %vm19457_vm3 = vmmov %vm19452_vm12 }
 0x4cd   :  { %v6001_v6 = vrot.slane %v13383_v56, 7  ;;  %v15325_v10 = vld [vmem:[#allocation16 + $0x244] ss:$8 sps:$4 sm:$0xff]   ;;  %v15329_v48 = vld [vmem:[#allocation16 + $0x254] ss:$8 sps:$4 sm:$0xff]   ;;  %vm7571_vm13 = vcmask 1045508  }
 0x4ce   :  { %v5954_v5 = vsel %vm19445_vm2, %v18669_v24, %v5953_v35  ;;  %v18753_v51 = vsel %vm19447_vm8, %v18690_v59, %v6048_v41  ;;  %v18758_v24 = vsel %vm19449_vm11, %v6146_v63, %v18749_v60  ;;  %v15300_v59 = vld [vmem:[#allocation16 + $0x1d4] ss:$8 sps:$4 sm:$0xff]   ;;  %v15301_v63 = vld [vmem:[#allocation16 + $0x1e0] ss:$8 sps:$4 sm:$0xff]   ;;  %v5974_v38 = vsel %vm19453_vm15, %v5972_v40, %v5973_v61  ;;  %v15332_v62 = vld [vmem:[#allocation16 + $0x264] ss:$8 sps:$4 sm:$0xff]  }
 0x4cf   :  { %7076 = vmatprep.mubr.bf16.mxu1 %v5954_v5  ;;  %7106 = vmatpush1.bf16.msra.mxu1 %v15286_v58  ;;  %v15323_v35 = vld [vmem:[#allocation16 + $0x240] ss:$8 sps:$4 sm:$0xff]   ;;  %v15335_v58 = vld [vmem:[#allocation16 + $0x274] ss:$8 sps:$4 sm:$0xff]   ;;  %v15333_v15 = vld [vmem:[#allocation16 + $0x270] ss:$8 sps:$4 sm:$0xff]  }
 0x4d0   :  { %7077 = vmatmul.mubr.bf16.gmra.mrb[88].mxu1 %v13374_v26  ;;  %7107 = vmatprep.subr.bf16.mxu1 %v15291_v9  ;;  %v15338_v41 = vld [vmem:[#allocation16 + $0x284] ss:$8 sps:$4 sm:$0xff]   ;;  %v15336_v5 = vld [vmem:[#allocation16 + $0x280] ss:$8 sps:$4 sm:$0xff]   ;;  %v15341_v26 = vld [vmem:[#allocation16 + $0x294] ss:$8 sps:$4 sm:$0xff]  }
 0x4d1   :  { %7119 = vmatprep.mubr.bf16.mxu1 %v5992_v49  ;;  %v15339_v9 = vld [vmem:[#allocation16 + $0x290] ss:$8 sps:$4 sm:$0xff]   ;;  %v15368_v23 = vld [vmem:[#allocation16 + $0x314] ss:$8 sps:$4 sm:$0xff]   ;;  %v15371_v27 = vld [vmem:[#allocation16 + $0x324] ss:$8 sps:$4 sm:$0xff]  }
 0x4d2   :  { %v15345_v49 = vld [vmem:[#allocation16 + $0x2b0] ss:$8 sps:$4 sm:$0xff]   ;;  %v15369_v56 = vld [vmem:[#allocation16 + $0x320] ss:$8 sps:$4 sm:$0xff]   ;;  %vm19456_vm14 = vsmask.f32 1280  ;;  %vm19459_vm2 = vmmov %vm19446_vm1 }
 0x4d3   :  { %7108 = vmatpush1.bf16.msra.mxu1 %v15289_v50  ;;  %v15350_v50 = vld [vmem:[#allocation16 + $0x2c4] ss:$8 sps:$4 sm:$0xff]   ;;  %v15385_v61 = vld [vmem:[#allocation16 + $0x360] ss:$8 sps:$4 sm:$0xff]   ;;  %vm7483_vm8 = vsmask.f32 3338  ;;  %vm19460_vm15 = vmmov %vm19446_vm1 }
 0x4d4   :  { %7109 = vmatprep.subr.bf16.mxu1 %v15294_v28  ;;  %v15348_v28 = vld [vmem:[#allocation16 + $0x2c0] ss:$8 sps:$4 sm:$0xff]   ;;  %vm7486_vm11 = vsmask.f32 7450  ;;  %vm7569_vm4 = vsmask.f32 1282 }
 0x4d7   :  { %7110 = vmatpush1.bf16.msra.mxu1 %v15292_v34  ;;  %v15353_v34 = vld [vmem:[#allocation16 + $0x2d4] ss:$8 sps:$4 sm:$0xff]  }
 0x4d8   :  { %7111 = vmatprep.subr.bf16.mxu1 %v15297_v52  ;;  %v15444_v52 = vld [vmem:[#allocation20] ss:$16 sps:$4 sm:$0xff]  }
 0x4db   :  { %7112 = vmatpush1.bf16.msra.mxu1 %v15295_v43  ;;  %v15446_v43 = vld [vmem:[#allocation20 + $0x4] ss:$16 sps:$4 sm:$0xff]  }
 0x4dc   :  { %7113 = vmatprep.subr.bf16.mxu1 %v15300_v59  ;;  %v15351_v59 = vld [vmem:[#allocation16 + $0x2d0] ss:$8 sps:$4 sm:$0xff]   ;;  %11497 = vmatprep.subr.bf16.mxu0 %v15446_v43 }
 0x4dd   :  { %11498 = vmatpush1.bf16.msra.mxu0 %v15444_v52 }
 0x4df   :  { %7114 = vmatpush1.bf16.msra.mxu1 %v15298_v1  ;;  %v15356_v1 = vld [vmem:[#allocation16 + $0x2e4] ss:$8 sps:$4 sm:$0xff]  }
 0x4e0   :  { %7115 = vmatprep.subr.bf16.mxu1 %v15303_v31  ;;  %v15354_v31 = vld [vmem:[#allocation16 + $0x2e0] ss:$8 sps:$4 sm:$0xff]  }
 0x4e3   :  { %7116 = vmatpush1.bf16.msra.mxu1 %v15301_v63  ;;  %v15359_v63 = vld [vmem:[#allocation16 + $0x2f4] ss:$8 sps:$4 sm:$0xff]  }
 0x4e4   :  { %7117 = vmatprep.subr.bf16.mxu1 %v15306_v16  ;;  %v15357_v16 = vld [vmem:[#allocation16 + $0x2f0] ss:$8 sps:$4 sm:$0xff]  }
 0x4e7   :  { %7118 = vmatpush1.bf16.msra.mxu1 %v15304_v21  ;;  %v15363_v21 = vld [vmem:[#allocation16 + $0x304] ss:$8 sps:$4 sm:$0xff]  }
 0x4e8   :  { %7150 = vmatprep.subr.bf16.mxu1 %v15310_v46  ;;  %v13388_v46 = vcombine.low %v18648_v37, %v18648_v37  ;;  %v6109_v37 = vshll.u32 %v18697_v32, 16 }
 0x4ea   :  { %7120 = vmatmul.mubr.bf16.vlgmr.msra.gmra.mrb[80].mxu1 %v18645_v7  ;;  %v6002_v7 = vsel %vm19452_vm12, %v6000_v14, %v6001_v6  ;;  %v15361_v14 = vld [vmem:[#allocation16 + $0x300] ss:$8 sps:$4 sm:$0xff]   ;;  %v6111_v40 = vrot.slane %v6109_v37, 3  ;;  %v15374_v6 = vld [vmem:[#allocation16 + $0x330] ss:$8 sps:$4 sm:$0xff]  }
 0x4eb   :  { %7129 = vmatprep.mubr.bf16.mxu1 %v6006_v12  ;;  %7151 = vmatpush1.bf16.msra.mxu1 %v15308_v4  ;;  %v13387_v4 = vcombine.low %v18654_v20, %v18654_v20  ;;  %v6106_v12 = vshrl.u32 %v18697_v32, 16  ;;  %v6098_v20 = vshrl.u32 %v18694_v53, 16  ;;  %vm7572_vm12 = vsmask.f32 5394 }
 0x4ec   :  { %7152 = vmatprep.subr.bf16.mxu1 %v15314_v11 }
 0x4ed   :  { %v6062_v11 = vsel %vm19454_vm5, %v13387_v4, %v13388_v46  ;;  %v15422_v46 = vld [vmem:[#allocation16 + $0x414] ss:$8 sps:$4 sm:$0xff]   ;;  %vm19461_vm5 = vmmov %vm19446_vm1 }
 0x4ef   :  { %7153 = vmatpush1.bf16.msra.mxu1 %v15312_v45  ;;  %v15376_v45 = vld [vmem:[#allocation16 + $0x334] ss:$8 sps:$4 sm:$0xff]  }
 0x4f0   :  { %7154 = vmatprep.subr.bf16.mxu1 %v15318_v42  ;;  %v6101_v42 = vshll.u32 %v18694_v53, 16 }
 0x4f2   :  { %7130 = vmatmul.mubr.bf16.gmra.mrb[84].mxu1 %v5978_v2  ;;  %v6103_v32 = vrot.slane %v6101_v42, 3  ;;  %v15433_v42 = vld [vmem:[#allocation16 + $0x450] ss:$8 sps:$4 sm:$0xff]  }
 0x4f3   :  { %7139 = vmatprep.mubr.bf16.mxu1 %v6002_v7  ;;  %7155 = vmatpush1.bf16.msra.mxu1 %v15316_v33  ;;  %v15379_v33 = vld [vmem:[#allocation16 + $0x344] ss:$8 sps:$4 sm:$0xff]   ;;  %v15377_v7 = vld [vmem:[#allocation16 + $0x340] ss:$8 sps:$4 sm:$0xff]  }
 0x4f4   :  { %7156 = vmatprep.subr.bf16.mxu1 %v15322_v47  ;;  %v6100_v47 = vrot.slane %v6098_v20, 2  ;;  %v15435_v20 = vld [vmem:[#allocation16 + $0x454] ss:$8 sps:$4 sm:$0xff]  }
 0x4f7   :  { %7157 = vmatpush1.bf16.msra.mxu1 %v15320_v22  ;;  %v6104_v22 = vor.u32 %v6103_v32, %v6100_v47  ;;  %v15449_v47 = vld [vmem:[#allocation20 + $0xc] ss:$16 sps:$4 sm:$0xff]   ;;  %v15447_v32 = vld [vmem:[#allocation20 + $0x8] ss:$16 sps:$4 sm:$0xff]  }
 0x4f8   :  { %7158 = vmatprep.subr.bf16.mxu1 %v15325_v10  ;;  %v15384_v10 = vld [vmem:[#allocation16 + $0x354] ss:$8 sps:$4 sm:$0xff]  }
 0x4fa   :  { %7140 = vmatmul.mubr.bf16.gmra.mrb[88].mxu1 %v5974_v38  ;;  %v15393_v38 = vld [vmem:[#allocation16 + $0x384] ss:$8 sps:$4 sm:$0xff]  }
 0x4fb   :  { %7159 = vmatpush1.bf16.msra.mxu1 %v15323_v35  ;;  %7182 = vmatprep.mubr.bf16.mxu1 %v13386_v18  ;;  %v15347_v18 = vld [vmem:[#allocation16 + $0x2b4] ss:$8 sps:$4 sm:$0xff]  }
 0x4fc   :  { %7160 = vmatprep.subr.bf16.mxu1 %v15329_v48  ;;  %v15390_v35 = vld [vmem:[#allocation16 + $0x374] ss:$8 sps:$4 sm:$0xff]   ;;  %v15388_v48 = vld [vmem:[#allocation16 + $0x370] ss:$8 sps:$4 sm:$0xff]  }
 0x4ff   :  { %7161 = vmatpush1.bf16.msra.mxu1 %v15327_v54  ;;  %v15391_v54 = vld [vmem:[#allocation16 + $0x380] ss:$8 sps:$4 sm:$0xff]  }
 0x500   :  { %7162 = vmatprep.subr.bf16.mxu1 %v15332_v62  ;;  %v15394_v62 = vld [vmem:[#allocation16 + $0x390] ss:$8 sps:$4 sm:$0xff]  }
 0x503   :  { %7163 = vmatpush1.bf16.msra.mxu1 %v15330_v55  ;;  %v15399_v55 = vld [vmem:[#allocation16 + $0x3a4] ss:$8 sps:$4 sm:$0xff]  }
 0x504   :  { %7164 = vmatprep.subr.bf16.mxu1 %v15335_v58  ;;  %v15397_v58 = vld [vmem:[#allocation16 + $0x3a0] ss:$8 sps:$4 sm:$0xff]  }
 0x507   :  { %7165 = vmatpush1.bf16.msra.mxu1 %v15333_v15  ;;  %v15402_v15 = vld [vmem:[#allocation16 + $0x3b4] ss:$8 sps:$4 sm:$0xff]  }
 0x508   :  { %7166 = vmatprep.subr.bf16.mxu1 %v15338_v41  ;;  %v15400_v41 = vld [vmem:[#allocation16 + $0x3b0] ss:$8 sps:$4 sm:$0xff]  }
 0x50b   :  { %7167 = vmatpush1.bf16.msra.mxu1 %v15336_v5  ;;  %v15405_v5 = vld [vmem:[#allocation16 + $0x3c4] ss:$8 sps:$4 sm:$0xff]  }
 0x50c   :  { %7168 = vmatprep.subr.bf16.mxu1 %v15341_v26  ;;  %v15403_v26 = vld [vmem:[#allocation16 + $0x3c0] ss:$8 sps:$4 sm:$0xff]  }
 0x50f   :  { %7169 = vmatpush1.bf16.msra.mxu1 %v15339_v9  ;;  %v15408_v9 = vld [vmem:[#allocation16 + $0x3d4] ss:$8 sps:$4 sm:$0xff]  }
 0x510   :  { %7170 = vmatprep.subr.bf16.mxu1 %v15344_v25  ;;  %v15406_v25 = vld [vmem:[#allocation16 + $0x3d0] ss:$8 sps:$4 sm:$0xff]  }
 0x513   :  { %7171 = vmatpush1.bf16.msra.mxu1 %v15342_v3  ;;  %v15411_v3 = vld [vmem:[#allocation16 + $0x3e4] ss:$8 sps:$4 sm:$0xff]  }
 0x514   :  { %7172 = vmatprep.subr.bf16.mxu1 %v15347_v18  ;;  %v6119_v18 = vshrl.u32 %v18728_v8, 16 }
 0x516   :  { %v6121_v43 = vrot.slane %v6119_v18, 6  ;;  %v15491_v18 = vld [vmem:[#allocation20 + $0xec] ss:$16 sps:$4 sm:$0xff]  }
 0x517   :  { %7173 = vmatpush1.bf16.msra.mxu1 %v15345_v49  ;;  %v6122_v49 = vshll.u32 %v18728_v8, 16  ;;  %v15416_v8 = vld [vmem:[#allocation16 + $0x400] ss:$8 sps:$4 sm:$0xff]  }
 0x518   :  { %7174 = vmatprep.subr.bf16.mxu1 %v15350_v50  ;;  %v6093_v50 = vld [vmem:[#allocation3 + $0x28] sm:$0x7] }
 0x519   :  { %v18794_v52 = vcombine.low %v18710_v30, %v6093_v50  ;;  %v15489_v50 = vld [vmem:[#allocation20 + $0xe8] ss:$16 sps:$4 sm:$0xff]  }
 0x51b   :  { %7175 = vmatpush1.bf16.msra.mxu1 %v15348_v28  ;;  %v15409_v28 = vld [vmem:[#allocation16 + $0x3e0] ss:$8 sps:$4 sm:$0xff]  }
 0x51c   :  { %7176 = vmatprep.subr.bf16.mxu1 %v15353_v34  ;;  %v15414_v34 = vld [vmem:[#allocation16 + $0x3f4] ss:$8 sps:$4 sm:$0xff]  }
 0x51f   :  { %7177 = vmatpush1.bf16.msra.mxu1 %v15351_v59  ;;  %v6124_v59 = vrot.slane %v6122_v49, 7  ;;  %v15486_v49 = vld [vmem:[#allocation20 + $0xe0] ss:$16 sps:$4 sm:$0xff]  }
 0x520   :  { %7178 = vmatprep.subr.bf16.mxu1 %v15356_v1  ;;  %v15412_v1 = vld [vmem:[#allocation16 + $0x3f0] ss:$8 sps:$4 sm:$0xff]  }
 0x523   :  { %7179 = vmatpush1.bf16.msra.mxu1 %v15354_v31  ;;  %v15418_v31 = vld [vmem:[#allocation16 + $0x404] ss:$8 sps:$4 sm:$0xff]  }
 0x524   :  { %7180 = vmatprep.subr.bf16.mxu1 %v15359_v63  ;;  %v6125_v63 = vor.u32 %v6124_v59, %v6121_v43  ;;  %v15495_v43 = vld [vmem:[#allocation20 + $0x108] ss:$16 sps:$4 sm:$0xff]   ;;  %v15500_v59 = vld [vmem:[#allocation20 + $0x124] ss:$16 sps:$4 sm:$0xff]  }
 0x527   :  { %7181 = vmatpush1.bf16.msra.mxu1 %v15357_v16  ;;  %v6127_v16 = vshrl.u32 %v18794_v52, 16 }
 0x528   :  { %7213 = vmatprep.subr.bf16.mxu1 %v15363_v21  ;;  %v6130_v21 = vshll.u32 %v18794_v52, 16 }
 0x52a   :  { %7183 = vmatmul.mubr.bf16.vlgmr.msra.gmra.mrb[80].mxu1 %v18703_v36  ;;  %v6108_v36 = vrot.slane %v6106_v12, 2  ;;  %v6132_v4 = vrot.slane %v6130_v21, 7  ;;  %v15428_v12 = vld [vmem:[#allocation16 + $0x434] ss:$8 sps:$4 sm:$0xff]   ;;  %v15509_v21 = vld [vmem:[#allocation20 + $0x14c] ss:$16 sps:$4 sm:$0xff]  }
 0x52b   :  { %7192 = vmatprep.mubr.bf16.mxu1 %v6062_v11  ;;  %7214 = vmatpush1.bf16.msra.mxu1 %v15361_v14  ;;  %v6129_v14 = vrot.slane %v6127_v16, 6  ;;  %v15425_v11 = vld [vmem:[#allocation16 + $0x424] ss:$8 sps:$4 sm:$0xff]   ;;  %v15506_v16 = vld [vmem:[#allocation20 + $0x144] ss:$16 sps:$4 sm:$0xff]  }
 0x52c   :  { %7215 = vmatprep.subr.bf16.mxu1 %v15368_v23  ;;  %v18786_v2 = vor.u32 %v6111_v40, %v6108_v36  ;;  %v15420_v23 = vld [vmem:[#allocation16 + $0x410] ss:$8 sps:$4 sm:$0xff]   ;;  %v15438_v40 = vld [vmem:[#allocation16 + $0x464] ss:$8 sps:$4 sm:$0xff]  }
 0x52d   :  { %v16386_v36 = vld [vmem:[#allocation4] sm:$0xff] }
 0x52e   :  { %v6113_v53 = vsel %vm19455_vm6, %v6104_v22, %v18786_v2  ;;  %v6138_v30 = vsel %vm19442_vm0, %v18786_v2, %v6125_v63  ;;  %v15452_v22 = vld [vmem:[#allocation20 + $0x24] ss:$16 sps:$4 sm:$0xff]   ;;  %vm19462_vm6 = vcmask 1043458  }
 0x52f   :  { %7216 = vmatpush1.bf16.msra.mxu1 %v15366_v29  ;;  %v6133_v29 = vor.u32 %v6132_v4, %v6129_v14  ;;  %11499 = vmatprep.subr.bf16.mxu0 %v15452_v22  ;;  %v15515_v14 = vld [vmem:[#allocation20 + $0x16c] ss:$16 sps:$4 sm:$0xff]   ;;  %v15510_v4 = vld [vmem:[#allocation20 + $0x160] ss:$16 sps:$4 sm:$0xff]   ;;  %vm18863_vm0 = vmand %vm19462_vm6, %vm7483_vm8 }
 0x530   :  { %7217 = vmatprep.subr.bf16.mxu1 %v15371_v27  ;;  %v15423_v27 = vld [vmem:[#allocation16 + $0x420] ss:$8 sps:$4 sm:$0xff]   ;;  %vm18890_vm8 = vmand %vm7571_vm13, %vm7572_vm12 }
 0x531   :  { %v6134_v37 = vsel %vm19456_vm14, %v6125_v63, %v6133_v29  ;;  %v15501_v63 = vld [vmem:[#allocation20 + $0x128] ss:$16 sps:$4 sm:$0xff]   ;;  %v15521_v29 = vld [vmem:[#allocation20 + $0x18c] ss:$16 sps:$4 sm:$0xff]   ;;  %vm18869_vm14 = vmand %vm7485_vm9, %vm7486_vm11 }
 0x532   :  { %7193 = vmatmul.mubr.bf16.gmra.mrb[84].mxu1 %v18706_v0  ;;  %v15382_v0 = vld [vmem:[#allocation16 + $0x350] ss:$8 sps:$4 sm:$0xff]   ;;  %v7339_v22 = vld [vmem:[#allocation17] sm:$0x3] }
 0x533   :  { %7202 = vmatprep.mubr.bf16.mxu1 %v18725_v17  ;;  %7218 = vmatpush1.bf16.msra.mxu1 %v15369_v56  ;;  %v15387_v17 = vld [vmem:[#allocation16 + $0x364] ss:$8 sps:$4 sm:$0xff]  }
 0x534   :  { %7219 = vmatprep.subr.bf16.mxu1 %v15376_v45  ;;  %v15432_v56 = vld [vmem:[#allocation16 + $0x444] ss:$8 sps:$4 sm:$0xff]   ;;  %v15430_v45 = vld [vmem:[#allocation16 + $0x440] ss:$8 sps:$4 sm:$0xff]  }
 0x537   :  { %7220 = vmatpush1.bf16.msra.mxu1 %v15374_v6  ;;  %v15441_v6 = vld [vmem:[#allocation16 + $0x474] ss:$8 sps:$4 sm:$0xff]  }
 0x538   :  { %7221 = vmatprep.subr.bf16.mxu1 %v15379_v33  ;;  %v15439_v33 = vld [vmem:[#allocation16 + $0x470] ss:$8 sps:$4 sm:$0xff]  }
 0x53a   :  { %7203 = vmatmul.mubr.bf16.gmra.mrb[88].mxu1 %v18753_v51  ;;  %v15396_v51 = vld [vmem:[#allocation16 + $0x394] ss:$8 sps:$4 sm:$0xff]  }
 0x53b   :  { %7222 = vmatpush1.bf16.msra.mxu1 %v15377_v7  ;;  %7245 = vmatprep.mubr.bf16.mxu1 %v6113_v53  ;;  %v15450_v7 = vld [vmem:[#allocation20 + $0x20] ss:$16 sps:$4 sm:$0xff]   ;;  %v15455_v53 = vld [vmem:[#allocation20 + $0x2c] ss:$16 sps:$4 sm:$0xff]  }
 0x53c   :  { %7223 = vmatprep.subr.bf16.mxu1 %v15384_v10  ;;  %v15453_v10 = vld [vmem:[#allocation20 + $0x28] ss:$16 sps:$4 sm:$0xff]   ;;  %11500 = vmatpush1.bf16.msra.mxu0 %v15450_v7 }
 0x53f   :  { %7224 = vmatpush1.bf16.msra.mxu1 %v15382_v0  ;;  %v15458_v0 = vld [vmem:[#allocation20 + $0x44] ss:$16 sps:$4 sm:$0xff]  }
 0x540   :  { %7225 = vmatprep.subr.bf16.mxu1 %v15387_v17  ;;  %v15459_v17 = vld [vmem:[#allocation20 + $0x48] ss:$16 sps:$4 sm:$0xff]   ;;  %11501 = vmatprep.subr.bf16.mxu0 %v15458_v0 }
 0x543   :  { %7226 = vmatpush1.bf16.msra.mxu1 %v15385_v61  ;;  %v15461_v61 = vld [vmem:[#allocation20 + $0x4c] ss:$16 sps:$4 sm:$0xff]  }
 0x544   :  { %7227 = vmatprep.subr.bf16.mxu1 %v15390_v35  ;;  %v15464_v35 = vld [vmem:[#allocation20 + $0x64] ss:$16 sps:$4 sm:$0xff]  }
 0x547   :  { %7228 = vmatpush1.bf16.msra.mxu1 %v15388_v48  ;;  %v15467_v48 = vld [vmem:[#allocation20 + $0x6c] ss:$16 sps:$4 sm:$0xff]  }
 0x548   :  { %7229 = vmatprep.subr.bf16.mxu1 %v15393_v38  ;;  %v15470_v38 = vld [vmem:[#allocation20 + $0x84] ss:$16 sps:$4 sm:$0xff]  }
 0x54b   :  { %7230 = vmatpush1.bf16.msra.mxu1 %v15391_v54  ;;  %v15473_v54 = vld [vmem:[#allocation20 + $0x8c] ss:$16 sps:$4 sm:$0xff]  }
 0x54c   :  { %7231 = vmatprep.subr.bf16.mxu1 %v15396_v51  ;;  %v15468_v51 = vld [vmem:[#allocation20 + $0x80] ss:$16 sps:$4 sm:$0xff]  }
 0x54f   :  { %7232 = vmatpush1.bf16.msra.mxu1 %v15394_v62  ;;  %v15471_v62 = vld [vmem:[#allocation20 + $0x88] ss:$16 sps:$4 sm:$0xff]  }
 0x550   :  { %7233 = vmatprep.subr.bf16.mxu1 %v15399_v55  ;;  %v15474_v55 = vld [vmem:[#allocation20 + $0xa0] ss:$16 sps:$4 sm:$0xff]  }
 0x553   :  { %7234 = vmatpush1.bf16.msra.mxu1 %v15397_v58  ;;  %v15476_v58 = vld [vmem:[#allocation20 + $0xa4] ss:$16 sps:$4 sm:$0xff]  }
 0x554   :  { %7235 = vmatprep.subr.bf16.mxu1 %v15402_v15  ;;  %v15477_v15 = vld [vmem:[#allocation20 + $0xa8] ss:$16 sps:$4 sm:$0xff]  }
 0x557   :  { %7236 = vmatpush1.bf16.msra.mxu1 %v15400_v41  ;;  %v15479_v41 = vld [vmem:[#allocation20 + $0xac] ss:$16 sps:$4 sm:$0xff]  }
 0x558   :  { %7237 = vmatprep.subr.bf16.mxu1 %v15405_v5  ;;  %v15480_v5 = vld [vmem:[#allocation20 + $0xc0] ss:$16 sps:$4 sm:$0xff]  }
 0x55b   :  { %7238 = vmatpush1.bf16.msra.mxu1 %v15403_v26  ;;  %v15482_v26 = vld [vmem:[#allocation20 + $0xc4] ss:$16 sps:$4 sm:$0xff]  }
 0x55c   :  { %7239 = vmatprep.subr.bf16.mxu1 %v15408_v9  ;;  %v15483_v9 = vld [vmem:[#allocation20 + $0xc8] ss:$16 sps:$4 sm:$0xff]  }
 0x55f   :  { %7240 = vmatpush1.bf16.msra.mxu1 %v15406_v25  ;;  %v15485_v25 = vld [vmem:[#allocation20 + $0xcc] ss:$16 sps:$4 sm:$0xff]  }
 0x560   :  { %7241 = vmatprep.subr.bf16.mxu1 %v15411_v3  ;;  %v15488_v3 = vld [vmem:[#allocation20 + $0xe4] ss:$16 sps:$4 sm:$0xff]  }
 0x563   :  { %7242 = vmatpush1.bf16.msra.mxu1 %v15409_v28  ;;  %v15494_v28 = vld [vmem:[#allocation20 + $0x104] ss:$16 sps:$4 sm:$0xff]  }
 0x564   :  { %7243 = vmatprep.subr.bf16.mxu1 %v15414_v34  ;;  %v15497_v34 = vld [vmem:[#allocation20 + $0x10c] ss:$16 sps:$4 sm:$0xff]  }
 0x567   :  { %7244 = vmatpush1.bf16.msra.mxu1 %v15412_v1  ;;  %v15503_v1 = vld [vmem:[#allocation20 + $0x12c] ss:$16 sps:$4 sm:$0xff]  }
 0x568   :  { %7276 = vmatprep.subr.bf16.mxu1 %v15418_v31  ;;  %v15498_v31 = vld [vmem:[#allocation20 + $0x120] ss:$16 sps:$4 sm:$0xff]  }
 0x56a   :  { %7246 = vmatmul.mubr.bf16.vlgmr.msra.gmra.mrb[80].mxu1 %v18713_v39  ;;  %v15426_v39 = vld [vmem:[#allocation16 + $0x430] ss:$8 sps:$4 sm:$0xff]  }
 0x56b   :  { %7255 = vmatprep.mubr.bf16.mxu1 %v6138_v30  ;;  %7277 = vmatpush1.bf16.msra.mxu1 %v15416_v8  ;;  %v15504_v8 = vld [vmem:[#allocation20 + $0x140] ss:$16 sps:$4 sm:$0xff]   ;;  %v15512_v30 = vld [vmem:[#allocation20 + $0x164] ss:$16 sps:$4 sm:$0xff]  }
 0x56c   :  { %7278 = vmatprep.subr.bf16.mxu1 %v15422_v46  ;;  %v15507_v46 = vld [vmem:[#allocation20 + $0x148] ss:$16 sps:$4 sm:$0xff]  }
 0x56f   :  { %7279 = vmatpush1.bf16.msra.mxu1 %v15420_v23  ;;  %v15513_v23 = vld [vmem:[#allocation20 + $0x168] ss:$16 sps:$4 sm:$0xff]  }
 0x570   :  { %7280 = vmatprep.subr.bf16.mxu1 %v15425_v11  ;;  %v15518_v11 = vld [vmem:[#allocation20 + $0x184] ss:$16 sps:$4 sm:$0xff]  }
 0x572   :  { %7256 = vmatmul.mubr.bf16.gmra.mrb[84].mxu1 %v18740_v44  ;;  %v15436_v44 = vld [vmem:[#allocation16 + $0x460] ss:$8 sps:$4 sm:$0xff]  }
 0x573   :  { %7265 = vmatprep.mubr.bf16.mxu1 %v6134_v37  ;;  %7281 = vmatpush1.bf16.msra.mxu1 %v15423_v27  ;;  %v15516_v27 = vld [vmem:[#allocation20 + $0x180] ss:$16 sps:$4 sm:$0xff]   ;;  %v15524_v37 = vld [vmem:[#allocation20 + $0x1a4] ss:$16 sps:$4 sm:$0xff]  }
 0x574   :  { %7282 = vmatprep.subr.bf16.mxu1 %v15428_v12  ;;  %v15519_v12 = vld [vmem:[#allocation20 + $0x188] ss:$16 sps:$4 sm:$0xff]  }
 0x577   :  { %7283 = vmatpush1.bf16.msra.mxu1 %v15426_v39  ;;  %v15527_v39 = vld [vmem:[#allocation20 + $0x1ac] ss:$16 sps:$4 sm:$0xff]  }
 0x578   :  { %7284 = vmatprep.subr.bf16.mxu1 %v15432_v56  ;;  %v15522_v56 = vld [vmem:[#allocation20 + $0x1a0] ss:$16 sps:$4 sm:$0xff]  }
 0x57a   :  { %7266 = vmatmul.mubr.bf16.gmra.mrb[88].mxu1 %v18747_v57  ;;  %v6153_v57 = vrot.slane %v18794_v52, 7  ;;  %v15492_v52 = vld [vmem:[#allocation20 + $0x100] ss:$16 sps:$4 sm:$0xff]  }
 0x57b   :  { %7285 = vmatpush1.bf16.msra.mxu1 %v15430_v45  ;;  %7308 = vmatprep.mubr.bf16.mxu1 %v16386_v36  ;;  %v15525_v45 = vld [vmem:[#allocation20 + $0x1a8] ss:$16 sps:$4 sm:$0xff]  }
 0x57c   :  { %7286 = vmatprep.subr.bf16.mxu1 %v15435_v20  ;;  %v6154_v2 = vsel %vm19457_vm3, %v18749_v60, %v6153_v57  ;;  %v15465_v60 = vld [vmem:[#allocation20 + $0x68] ss:$16 sps:$4 sm:$0xff]   ;;  %v15530_v20 = vld [vmem:[#allocation20 + $0x1c4] ss:$16 sps:$4 sm:$0xff]   ;;  %v15547_v57 = vld [vmem:[#allocation20 + $0x20c] ss:$16 sps:$4 sm:$0xff]  }
 0x57d   :  { %vm7488_vm3 = vmor %vm18869_vm14, %vm18863_vm0 }
 0x57f   :  { %7287 = vmatpush1.bf16.msra.mxu1 %v15433_v42  ;;  %v15533_v42 = vld [vmem:[#allocation20 + $0x1cc] ss:$16 sps:$4 sm:$0xff]  }
 0x580   :  { %7288 = vmatprep.subr.bf16.mxu1 %v15438_v40  ;;  %v15531_v40 = vld [vmem:[#allocation20 + $0x1c8] ss:$16 sps:$4 sm:$0xff]  }
 0x583   :  { %7289 = vmatpush1.bf16.msra.mxu1 %v15436_v44  ;;  %v15536_v44 = vld [vmem:[#allocation20 + $0x1e4] ss:$16 sps:$4 sm:$0xff]  }
 0x584   :  { %7290 = vmatprep.subr.bf16.mxu1 %v15441_v6  ;;  %v15539_v6 = vld [vmem:[#allocation20 + $0x1ec] ss:$16 sps:$4 sm:$0xff]  }
 0x587   :  { %7291 = vmatpush1.bf16.msra.mxu1 %v15439_v33  ;;  %v15534_v33 = vld [vmem:[#allocation20 + $0x1e0] ss:$16 sps:$4 sm:$0xff]  }
 0x588   :  { %11884 = vmatprep.subr.bf16.mxu1 %v15449_v47  ;;  %v15537_v47 = vld [vmem:[#allocation20 + $0x1e8] ss:$16 sps:$4 sm:$0xff]  }
 0x58a   :  { %7309 = vmatmul.mubr.bf16.vlgmr.msra.gmra.mrb[80].mxu1 %v18718_v13  ;;  %v15456_v13 = vld [vmem:[#allocation20 + $0x40] ss:$16 sps:$4 sm:$0xff]  }
 0x58b   :  { %7318 = vmatprep.mubr.bf16.mxu1 %v16386_v36  ;;  %11885 = vmatpush1.bf16.msra.mxu1 %v15447_v32  ;;  %v15544_v32 = vld [vmem:[#allocation20 + $0x204] ss:$16 sps:$4 sm:$0xff]  }
 0x58c   :  { %11886 = vmatprep.subr.bf16.mxu1 %v15455_v53  ;;  %11502 = vmatpush1.bf16.msra.mxu0 %v15456_v13  ;;  %v7363_v53 = vld [vmem:[#allocation19] sm:$0x3] }
 0x58d   :  { %11503 = vmatprep.subr.bf16.mxu0 %v15464_v35 }
 0x58f   :  { %11887 = vmatpush1.bf16.msra.mxu1 %v15453_v10 }
 0x590   :  { %11888 = vmatprep.subr.bf16.mxu1 %v15461_v61 }
 0x592   :  { %7319 = vmatmul.mubr.bf16.gmra.mrb[84].mxu1 %v18758_v24  ;;  %v15462_v24 = vld [vmem:[#allocation20 + $0x60] ss:$16 sps:$4 sm:$0xff]  }
 0x593   :  { %7328 = vmatprep.mubr.bf16.mxu1 %v16386_v36  ;;  %11889 = vmatpush1.bf16.msra.mxu1 %v15459_v17  ;;  %v15528_v36 = vld [vmem:[#allocation20 + $0x1c0] ss:$16 sps:$4 sm:$0xff]  }
 0x594   :  { %11890 = vmatprep.subr.bf16.mxu1 %v15467_v48  ;;  %11504 = vmatpush1.bf16.msra.mxu0 %v15462_v24 }
 0x595   :  { %11505 = vmatprep.subr.bf16.mxu0 %v15470_v38 }
 0x597   :  { %11891 = vmatpush1.bf16.msra.mxu1 %v15465_v60 }
 0x598   :  { %11892 = vmatprep.subr.bf16.mxu1 %v15473_v54  ;;  %11506 = vmatpush1.bf16.msra.mxu0 %v15468_v51 }
 0x599   :  { %11507 = vmatprep.subr.bf16.mxu0 %v15476_v58 }
 0x59a   :  { %7329 = vmatmul.mubr.bf16.gmra.mrb[88].mxu1 %v6154_v2  ;;  %v19458_v2 = vld [vmem:[#allocation35_spill] sm:$0xff] }
 0x59b   :  { %11893 = vmatpush1.bf16.msra.mxu1 %v15471_v62  ;;  %v18810_v7 = vsub.s32 0, %v19458_v2  ;;  %v18813_v10 = vsub.s32 1, %v19458_v2 }
 0x59c   :  { %11894 = vmatprep.subr.bf16.mxu1 %v15479_v41  ;;  %11508 = vmatpush1.bf16.msra.mxu0 %v15474_v55 }
 0x59d   :  { %11509 = vmatprep.subr.bf16.mxu0 %v15482_v26  ;;  %v7344_v13 = vrot.slane %v7339_v22, %v18810_v7  ;;  %v18817_v0 = vrot.slane %v7339_v22, %v18813_v10  ;;  %v18820_v17 = vrot.slane %v7363_v53, %v18810_v7  ;;  %v18823_v24 = vrot.slane %v7363_v53, %v18813_v10 }
 0x59f   :  { %11895 = vmatpush1.bf16.msra.mxu1 %v15477_v15 }
 0x5a0   :  { %11896 = vmatprep.subr.bf16.mxu1 %v15485_v25  ;;  %11510 = vmatpush1.bf16.msra.mxu0 %v15480_v5 }
 0x5a1   :  { %11511 = vmatprep.subr.bf16.mxu0 %v15488_v3 }
 0x5a3   :  { %11897 = vmatpush1.bf16.msra.mxu1 %v15483_v9 }
 0x5a4   :  { %11898 = vmatprep.subr.bf16.mxu1 %v15491_v18  ;;  %11512 = vmatpush1.bf16.msra.mxu0 %v15486_v49 }
 0x5a5   :  { %11513 = vmatprep.subr.bf16.mxu0 %v15494_v28 }
 0x5a7   :  { %11899 = vmatpush1.bf16.msra.mxu1 %v15489_v50 }
 0x5a8   :  { %11900 = vmatprep.subr.bf16.mxu1 %v15497_v34  ;;  %11514 = vmatpush1.bf16.msra.mxu0 %v15492_v52 }
 0x5a9   :  { %11515 = vmatprep.subr.bf16.mxu0 %v15500_v59 }
 0x5ab   :  { %11901 = vmatpush1.bf16.msra.mxu1 %v15495_v43 }
 0x5ac   :  { %11902 = vmatprep.subr.bf16.mxu1 %v15503_v1  ;;  %11516 = vmatpush1.bf16.msra.mxu0 %v15498_v31 }
 0x5ad   :  { %11517 = vmatprep.subr.bf16.mxu0 %v15506_v16 }
 0x5af   :  { %11903 = vmatpush1.bf16.msra.mxu1 %v15501_v63 }
 0x5b0   :  { %11904 = vmatprep.subr.bf16.mxu1 %v15509_v21  ;;  %11518 = vmatpush1.bf16.msra.mxu0 %v15504_v8 }
 0x5b1   :  { %11519 = vmatprep.subr.bf16.mxu0 %v15512_v30 }
 0x5b3   :  { %11905 = vmatpush1.bf16.msra.mxu1 %v15507_v46 }
 0x5b4   :  { %11906 = vmatprep.subr.bf16.mxu1 %v15515_v14  ;;  %11520 = vmatpush1.bf16.msra.mxu0 %v15510_v4 }
 0x5b5   :  { %11521 = vmatprep.subr.bf16.mxu0 %v15518_v11 }
 0x5b7   :  { %11907 = vmatpush1.bf16.msra.mxu1 %v15513_v23 }
 0x5b8   :  { %11908 = vmatprep.subr.bf16.mxu1 %v15521_v29  ;;  %11522 = vmatpush1.bf16.msra.mxu0 %v15516_v27 }
 0x5b9   :  { %11523 = vmatprep.subr.bf16.mxu0 %v15524_v37 }
 0x5bb   :  { %11909 = vmatpush1.bf16.msra.mxu1 %v15519_v12 }
 0x5bc   :  { %11910 = vmatprep.subr.bf16.mxu1 %v15527_v39  ;;  %11524 = vmatpush1.bf16.msra.mxu0 %v15522_v56 }
 0x5bd   :  { %11525 = vmatprep.subr.bf16.mxu0 %v15530_v20 }
 0x5bf   :  { %11911 = vmatpush1.bf16.msra.mxu1 %v15525_v45 }
 0x5c0   :  { %11912 = vmatprep.subr.bf16.mxu1 %v15533_v42  ;;  %11526 = vmatpush1.bf16.msra.mxu0 %v15528_v36 }
 0x5c1   :  { %11527 = vmatprep.subr.bf16.mxu0 %v15536_v44 }
 0x5c3   :  { %11913 = vmatpush1.bf16.msra.mxu1 %v15531_v40  ;;  %v18841_v40 = vsub.s32 2, %v19458_v2 }
 0x5c4   :  { %11914 = vmatprep.subr.bf16.mxu1 %v15539_v6  ;;  %11528 = vmatpush1.bf16.msra.mxu0 %v15534_v33 }
 0x5c5   :  { %11540 = vmatprep.subr.bf16.mxu0 %v15544_v32 }
 0x5c7   :  { %11915 = vmatpush1.bf16.msra.mxu1 %v15537_v47 }
 0x5c8   :  { %11927 = vmatprep.subr.bf16.mxu1 %v15547_v57 }
 0x65d   :  { %v7310_v61 = vpop.f32.mrb[80].mxu1 }
 0x65e   :  { %v7351_v35 = vmul.f32 %v7344_v13, %v7310_v61  ;;  %v7312_v60 = vpop.f32.mrb[81].mxu1 }
 0x65f   :  { %v7352_v48 = vmul.f32 %v18817_v0, %v7312_v60  ;;  %v7314_v38 = vpop.f32.mrb[82].mxu1 }
 0x660   :  { %v7375_v54 = vadd.f32 %v18820_v17, %v7351_v35  ;;  %v7353_v51 = vmul.f32 %v7344_v13, %v7314_v38  ;;  %v7316_v62 = vpop.f32.mrb[83].mxu1 }
 0x661   :  { %v7376_v55 = vadd.f32 %v18823_v24, %v7352_v48  ;;  %v7354_v58 = vmul.f32 %v18817_v0, %v7316_v62 }
 0x662   :  { %v7387_v15 = vmax.f32 %v7375_v54, 0.0  ;;  %v7377_v41 = vadd.f32 %v18820_v17, %v7353_v51 }
 0x663   :  { %v7388_v5 = vmax.f32 %v7376_v55, 0.0  ;;  %v7378_v26 = vadd.f32 %v18823_v24, %v7354_v58 }
 0x664   :  { %v7389_v9 = vmax.f32 %v7377_v41, 0.0  ;;  %v7404_v18 = vrot.slane %v7387_v15, 6 }
 0x665   :  { %v7390_v25 = vmax.f32 %v7378_v26, 0.0  ;;  %v7320_v3 = vpop.f32.mrb[84].mxu1  ;;  %v7407_v34 = vrot.slane %v7388_v5, 6 }
 0x666   :  { %v7405_v49 = vrot.slane %v7389_v9, 6  ;;  %v7355_v50 = vmul.f32 %v7344_v13, %v7320_v3  ;;  %v7322_v28 = vpop.f32.mrb[85].mxu1 }
 0x667   :  { %v7408_v52 = vrot.slane %v7390_v25, 6  ;;  %v7356_v43 = vmul.f32 %v18817_v0, %v7322_v28  ;;  %v7324_v59 = vpop.f32.mrb[86].mxu1 }
 0x668   :  { %v7406_v1 = vsel %vm19459_vm2, %v7404_v18, %v7405_v49  ;;  %v7379_v31 = vadd.f32 %v18820_v17, %v7355_v50  ;;  %v7357_v63 = vmul.f32 %v7344_v13, %v7324_v59  ;;  %v7326_v16 = vpop.f32.mrb[87].mxu1  ;;  %vm19467_vm2 = vmmov %vm19446_vm1 }
 0x669   :  { %v7412_v21 = vmax.f32 %v7387_v15, %v7406_v1  ;;  %v7409_v8 = vsel %vm19446_vm1, %v7407_v34, %v7408_v52  ;;  %v7380_v46 = vadd.f32 %v18823_v24, %v7356_v43  ;;  %v7358_v30 = vmul.f32 %v18817_v0, %v7326_v16  ;;  %vm18884_vm1 = vmand %vm19467_vm2, %vm7569_vm4 }
 0x66a   :  { %v7413_v14 = vmax.f32 %v7388_v5, %v7409_v8  ;;  %v7391_v4 = vmax.f32 %v7379_v31, 0.0  ;;  %v7381_v23 = vadd.f32 %v18820_v17, %v7357_v63  ;;  %vm7574_vm9 = vmor %vm18890_vm8, %vm18884_vm1 }
 0x66b   :  { %v7392_v11 = vmax.f32 %v7380_v46, 0.0  ;;  %v7382_v29 = vadd.f32 %v18823_v24, %v7358_v30 }
 0x66c   :  { %v7416_v27 = vcombine.low %v7412_v21, %v7413_v14  ;;  %v7494_v12 = vrot.slane %v7391_v4, 6  ;;  %v7393_v39 = vmax.f32 %v7381_v23, 0.0 }
 0x66d   :  { %v7495_v37 = vrot.slane %v7392_v11, 6  ;;  %v7330_v56 = vpop.f32.mrb[88].mxu1  ;;  %v7394_v6 = vmax.f32 %v7382_v29, 0.0 }
 0x66e   :  { %v7423_v45 = vrot.slane %v7416_v27, %v17121_v19  ;;  %v7498_v20 = vmax.f32 %v7389_v9, %v7494_v12  ;;  %v7359_v42 = vmul.f32 %v7344_v13, %v7330_v56  ;;  %v7332_v36 = vpop.f32.mrb[89].mxu1  ;;  %v7582_v60 = vrot.slane %v7393_v39, 6 }
 0x66f   :  { %v7499_v44 = vmax.f32 %v7390_v25, %v7495_v37  ;;  %v7360_v33 = vmul.f32 %v18817_v0, %v7332_v36  ;;  %v7334_v47 = vpop.f32.mrb[90].mxu1  ;;  %v7585_v15 = vrot.slane %v7394_v6, 6 }
 0x670   :  { %v7424_v32 = vcombine.high %v7423_v45, %v7423_v45  ;;  %v13541_v57 = vrot.slane %v7423_v45, 9  ;;  %v7383_v22 = vadd.f32 %v18820_v17, %v7359_v42  ;;  %v7361_v53 = vmul.f32 %v7344_v13, %v7334_v47  ;;  %v7336_v61 = vpop.f32.mrb[91].mxu1 }
 0x671   :  { %v7502_v35 = vcombine.high %v7498_v20, %v7499_v44  ;;  %v18846_v48 = vadd.f32 %v18823_v24, %v7360_v33  ;;  %v7362_v38 = vmul.f32 %v18817_v0, %v7336_v61 }
 0x672   :  { %v13542_v54 = vrot.slane %v7424_v32, 9  ;;  %v7433_v51 = vmax.f32 %v7423_v45, %v13541_v57  ;;  %v7395_v62 = vmax.f32 %v7383_v22, 0.0  ;;  %v7385_v55 = vadd.f32 %v18820_v17, %v7361_v53  ;;  %v7489_v22 = vld [vmem:[#allocation4] sm:$0xcc] }
 0x673   :  { %v7509_v58 = vrot.slane %v7502_v35, %v17121_v19  ;;  %v7396_v41 = vmax.f32 %v18846_v48, 0.0  ;;  %v7386_v13 = vadd.f32 %v18823_v24, %v7362_v38 }
 0x674   :  { %v7434_v5 = vmax.f32 %v7424_v32, %v13542_v54  ;;  %v7440_v26 = vrot.slane %v7433_v51, %v18810_v7  ;;  %v7444_v9 = vrot.slane %v7433_v51, %v18841_v40  ;;  %v7583_v25 = vrot.slane %v7395_v62, 6  ;;  %v15542_v54 = vld [vmem:[#allocation20 + $0x200] ss:$16 sps:$4 sm:$0xff]  }
 0x675   :  { %v7510_v0 = vcombine.high %v7509_v58, %v7509_v58  ;;  %v13545_v3 = vrot.slane %v7509_v58, 9  ;;  %v7586_v18 = vrot.slane %v7396_v41, 6  ;;  %v7397_v17 = vmax.f32 %v7385_v55, 0.0 }
 0x676   :  { %v7448_v49 = vrot.slane %v7434_v5, %v18810_v7  ;;  %v7452_v50 = vrot.slane %v7434_v5, %v18841_v40  ;;  %v14368_v28 = vpack.c.bf16 %v7444_v9, %v7440_v26  ;;  %v7584_v24 = vsel %vm19460_vm15, %v7582_v60, %v7583_v25 }
 0x677   :  { %v13546_v34 = vrot.slane %v7510_v0, 9  ;;  %v7519_v52 = vmax.f32 %v7509_v58, %v13545_v3  ;;  %v7590_v43 = vmax.f32 %v7393_v39, %v7584_v24  ;;  %v7587_v59 = vsel %vm19461_vm5, %v7585_v15, %v7586_v18 }
 0x678   :  { %v14369_v1 = vpack.c.bf16 %v7452_v50, %v7448_v49  ;;  %v7471_v31 = vunpack.c.l.b16 %v14368_v28  ;;  %v7472_v63 = vunpack.c.h.b16 %v14368_v28  ;;  %v7591_v16 = vmax.f32 %v7394_v6, %v7587_v59 }
 0x679   :  { %v7520_v21 = vmax.f32 %v7510_v0, %v13546_v34  ;;  %v7526_v8 = vrot.slane %v7519_v52, %v18810_v7  ;;  %v7530_v46 = vrot.slane %v7519_v52, %v18841_v40  ;;  %v7667_v30 = vrot.slane %v7397_v17, 6 }
 0x67a   :  { %v7473_v4 = vunpack.c.l.b16 %v14369_v1  ;;  %v7474_v23 = vunpack.c.h.b16 %v14369_v1  ;;  %v7475_v11 = vrot.slane %v7471_v31, 3  ;;  %v7478_v29 = vrot.slane %v7472_v63, 3 }
 0x67b   :  { %v7534_v12 = vrot.slane %v7520_v21, %v18810_v7  ;;  %v7538_v37 = vrot.slane %v7520_v21, %v18841_v40  ;;  %v14370_v39 = vpack.c.bf16 %v7530_v46, %v7526_v8  ;;  %v7594_v56 = vcombine.low %v7590_v43, %v7591_v16 }
 0x67c   :  { %v7476_v45 = vrot.slane %v7473_v4, 2  ;;  %v7479_v20 = vrot.slane %v7474_v23, 2  ;;  %v7671_v42 = vmax.f32 %v7395_v62, %v7667_v30  ;;  %v7398_v36 = vmax.f32 %v7386_v13, 0.0 }
 0x67d   :  { %v14371_v44 = vpack.c.bf16 %v7538_v37, %v7534_v12  ;;  %v7557_v6 = vunpack.c.l.b16 %v14370_v39  ;;  %v7558_v33 = vunpack.c.h.b16 %v14370_v39  ;;  %v7601_v47 = vrot.slane %v7594_v56, %v17121_v19 }
 0x67e   :  { %v7477_v32 = vsel %vm1214_vm7, %v7476_v45, %v7475_v11  ;;  %v7480_v57 = vsel %vm1214_vm7, %v7479_v20, %v7478_v29  ;;  %v7668_v53 = vrot.slane %v7398_v36, 6  ;;  %v7662_v36 = vld [vmem:[#allocation4 + $0x18] sm:$0xcc] }
 0x67f   :  { %v7481_v61 = vpack.c.b16 %v7480_v57, %v7477_v32  ;;  %v7559_v35 = vunpack.c.l.b16 %v14371_v44  ;;  %v7560_v60 = vunpack.c.h.b16 %v14371_v44  ;;  %v7561_v38 = vrot.slane %v7557_v6, 7 }
 0x680   :  { %v7602_v51 = vcombine.high %v7601_v47, %v7601_v47  ;;  %v13549_v62 = vrot.slane %v7601_v47, 9  ;;  %v7672_v55 = vmax.f32 %v7396_v41, %v7668_v53  ;;  %v7564_v13 = vrot.slane %v7558_v33, 7  ;;  %v7575_v41 = vld [vmem:[#allocation4 + $0x8] sm:$0x33] }
 0x681   :  { %v7490_v58 = vsel %vm7488_vm3, %v7481_v61, %v7489_v22  ;;  %v7562_v15 = vrot.slane %v7559_v35, 6  ;;  %v7565_v5 = vrot.slane %v7560_v60, 6 }
 0x682   :  { %7491 = vst [vmem:[#allocation4] sm:$0xcc] %v7490_v58  ;;  %v13550_v26 = vrot.slane %v7602_v51, 9  ;;  %v7611_v9 = vmax.f32 %v7601_v47, %v13549_v62  ;;  %v7675_v25 = vcombine.high %v7671_v42, %v7672_v55  ;;  %v7742_v62 = vld [vmem:[#allocation4 + $0x20] sm:$0x33] }
 0x683   :  { %v7563_v0 = vsel %vm1223_vm10, %v7562_v15, %v7561_v38  ;;  %v7566_v3 = vsel %vm1223_vm10, %v7565_v5, %v7564_v13 }
 0x684   :  { %v7567_v18 = vpack.c.b16 %v7566_v3, %v7563_v0  ;;  %v7612_v17 = vmax.f32 %v7602_v51, %v13550_v26  ;;  %v7618_v49 = vrot.slane %v7611_v9, %v18810_v7  ;;  %v7622_v50 = vrot.slane %v7611_v9, %v18841_v40 }
 0x685   :  { %v7682_v28 = vrot.slane %v7675_v25, %v17121_v19  ;;  %v15545_v25 = vld [vmem:[#allocation20 + $0x208] ss:$16 sps:$4 sm:$0xff]  }
 0x686   :  { %v7576_v24 = vsel %vm7574_vm9, %v7567_v18, %v7575_v41  ;;  %v7626_v34 = vrot.slane %v7612_v17, %v18810_v7  ;;  %v7630_v52 = vrot.slane %v7612_v17, %v18841_v40  ;;  %v14372_v43 = vpack.c.bf16 %v7622_v50, %v7618_v49  ;;  %v15552_v41 = vld [vmem:[#allocation20 + $0x224] ss:$16 sps:$4 sm:$0xff]   ;;  %v15555_v18 = vld [vmem:[#allocation20 + $0x22c] ss:$16 sps:$4 sm:$0xff]   ;;  %v15550_v17 = vld [vmem:[#allocation20 + $0x220] ss:$16 sps:$4 sm:$0xff]  }
 0x687   :  { %7577 = vst [vmem:[#allocation4 + $0x8] sm:$0x33] %v7576_v24  ;;  %v7683_v59 = vcombine.high %v7682_v28, %v7682_v28  ;;  %v13553_v1 = vrot.slane %v7682_v28, 9  ;;  %v15560_v24 = vld [vmem:[#allocation20 + $0x244] ss:$16 sps:$4 sm:$0xff]  }
 0x688   :  { %v14373_v31 = vpack.c.bf16 %v7630_v52, %v7626_v34  ;;  %v7649_v63 = vunpack.c.l.b16 %v14372_v43  ;;  %v7650_v16 = vunpack.c.h.b16 %v14372_v43  ;;  %v15563_v43 = vld [vmem:[#allocation20 + $0x24c] ss:$16 sps:$4 sm:$0xff]  }
 0x689   :  { %v13554_v21 = vrot.slane %v7683_v59, 9  ;;  %v7692_v8 = vmax.f32 %v7682_v28, %v13553_v1  ;;  %v18928_v58 = vld [vmem:[#allocation4] sm:$0xff] }
 0x68a   :  { %v7651_v19 = vunpack.c.l.b16 %v14373_v31  ;;  %v7652_v46 = vunpack.c.h.b16 %v14373_v31  ;;  %v7653_v11 = vrot.slane %v7649_v63, 3  ;;  %v7656_v12 = vrot.slane %v7650_v16, 3  ;;  %v15553_v28 = vld [vmem:[#allocation20 + $0x228] ss:$16 sps:$4 sm:$0xff]   ;;  %v15558_v63 = vld [vmem:[#allocation20 + $0x240] ss:$16 sps:$4 sm:$0xff]  }
 0x68b   :  { %v7693_v30 = vmax.f32 %v7683_v59, %v13554_v21  ;;  %v7699_v4 = vrot.slane %v7692_v8, %v18810_v7  ;;  %v7703_v23 = vrot.slane %v7692_v8, %v18841_v40  ;;  %v13558_v13 = vcombine.high %v18928_v58, %v18928_v58  ;;  %v18953_v34 = vld [vmem:[#allocation4] sm:$0xee] }
 0x68c   :  { %v7654_v29 = vrot.slane %v7651_v19, 2  ;;  %v7657_v37 = vrot.slane %v7652_v46, 2  ;;  %v13557_v26 = vcombine.low %v18928_v58, %v18928_v58  ;;  %v15561_v16 = vld [vmem:[#allocation20 + $0x248] ss:$16 sps:$4 sm:$0xff]   ;;  %v15566_v19 = vld [vmem:[#allocation20 + $0x264] ss:$16 sps:$4 sm:$0xff]  }
 0x68d   :  { %v7707_v39 = vrot.slane %v7693_v30, %v18810_v7  ;;  %v7711_v56 = vrot.slane %v7693_v30, %v18841_v40  ;;  %v14374_v45 = vpack.c.bf16 %v7703_v23, %v7699_v4  ;;  %v15569_v46 = vld [vmem:[#allocation20 + $0x26c] ss:$16 sps:$4 sm:$0xff]   ;;  %v18965_v30 = vld [vmem:[#allocation4] sm:$0xcc] }
 0x68e   :  { %v7655_v20 = vsel %vm1214_vm7, %v7654_v29, %v7653_v11  ;;  %v7658_v42 = vsel %vm1214_vm7, %v7657_v37, %v7656_v12  ;;  %v18930_v27 = vld [vmem:[#allocation4 + $0x8] sm:$0x11]  ;;  %vm19472_vm7 = vcmask 1043456  }
 0x68f   :  { %v7659_v44 = vpack.c.b16 %v7658_v42, %v7655_v20  ;;  %v14375_v6 = vpack.c.bf16 %v7711_v56, %v7707_v39  ;;  %v7730_v33 = vunpack.c.l.b16 %v14374_v45  ;;  %v7731_v47 = vunpack.c.h.b16 %v14374_v45  ;;  %v18959_v1 = vld [vmem:[#allocation4 + $0x8] sm:$0x77]  ;;  %v7923_v45 = vld [vmem:[#allocation4] sm:$0x88]  ;;  %vm19474_vm11 = vmmov %vm19472_vm7 }
 0x690   :  { %v13562_v48 = vcombine.high %v18928_v58, %v18930_v27  ;;  %v13565_v59 = vcombine.low %v18953_v34, %v18930_v27  ;;  %v13573_v12 = vcombine.low %v18965_v30, %v18959_v1  ;;  %vm19475_vm4 = vmmov %vm19472_vm7 }
 0x691   :  { %v7663_v32 = vsel %vm7488_vm3, %v7659_v44, %v7662_v36  ;;  %v7732_v57 = vunpack.c.l.b16 %v14375_v6  ;;  %v7733_v22 = vunpack.c.h.b16 %v14375_v6  ;;  %v7734_v53 = vrot.slane %v7730_v33, 7  ;;  %v15564_v33 = vld [vmem:[#allocation20 + $0x260] ss:$16 sps:$4 sm:$0xff]   ;;  %vm19476_vm13 = vmmov %vm19475_vm4 }
 0x692   :  { %7664 = vst [vmem:[#allocation4 + $0x18] sm:$0xcc] %v7663_v32  ;;  %v7737_v35 = vrot.slane %v7731_v47, 7  ;;  %v7782_v49 = vshll.u32 %v13562_v48, 16  ;;  %v7780_v37 = vshrl.u32 %v13562_v48, 16  ;;  %v7822_v39 = vrot.slane %v13565_v59, 1  ;;  %vm19477_vm12 = vmmov %vm19475_vm4 }
 0x693   :  { %v7735_v61 = vrot.slane %v7732_v57, 6  ;;  %v7738_v60 = vrot.slane %v7733_v22, 6  ;;  %v13578_v44 = vcombine.high %v7923_v45, %v18959_v1  ;;  %v13577_v6 = vcombine.low %v7923_v45, %v18959_v1  ;;  %v15578_v59 = vld [vmem:[#allocation20 + $0x2a4] ss:$16 sps:$4 sm:$0xff]   ;;  %vm19478_vm15 = vmmov %vm19475_vm4 }
 0x694   :  { %v7784_v8 = vrot.slane %v7782_v49, 1  ;;  %vm19479_vm5 = vmmov %vm19475_vm4 }
 0x695   :  { %v7736_v38 = vsel %vm1223_vm10, %v7735_v61, %v7734_v53  ;;  %v7739_v51 = vsel %vm1223_vm10, %v7738_v60, %v7737_v35  ;;  %vm19473_vm10 = vmmov %vm19472_vm7  ;;  %v15567_v53 = vld [vmem:[#allocation20 + $0x268] ss:$16 sps:$4 sm:$0xff]   ;;  %v15572_v61 = vld [vmem:[#allocation20 + $0x284] ss:$16 sps:$4 sm:$0xff]   ;;  %v7879_v35 = vshrl.u32 %v13573_v12, 16  ;;  %v7882_v60 = vshll.u32 %v13573_v12, 16 }
 0x696   :  { %v7740_v55 = vpack.c.b16 %v7739_v51, %v7736_v38  ;;  %v7785_v57 = vor.u32 %v7784_v8, %v7780_v37  ;;  %v15575_v38 = vld [vmem:[#allocation20 + $0x28c] ss:$16 sps:$4 sm:$0xff]   ;;  %v7930_v48 = vrot.slane %v13577_v6, 3  ;;  %v15576_v12 = vld [vmem:[#allocation20 + $0x2a0] ss:$16 sps:$4 sm:$0xff]   ;;  %vm19480_vm6 = vmmov %vm19475_vm4 }
 0x697   :  { %v7884_v49 = vrot.slane %v7882_v60, 3  ;;  %v15579_v37 = vld [vmem:[#allocation20 + $0x2a8] ss:$16 sps:$4 sm:$0xff]   ;;  %vm19481_vm0 = vmmov %vm19475_vm4 }
 0x698   :  { %v7743_v14 = vsel %vm7574_vm9, %v7740_v55, %v7742_v62  ;;  %v7947_v55 = vld [vmem:[#allocation4 + $0x8] sm:$0xff]  ;;  %vm19482_vm14 = vmmov %vm19481_vm0 }
 0x699   :  { %7744 = vst [vmem:[#allocation4 + $0x20] sm:$0x33] %v7743_v14  ;;  %v18937_v15 = vld [vmem:[#allocation4 + $0x18] sm:$0xff]  ;;  %v7967_v14 = vld [vmem:[#allocation4 + $0x10] sm:$0x11]  ;;  %vm19483_vm3 = vmmov %vm19481_vm0 }
 0x69a   :  { %v13560_v5 = vcombine.high %v18937_v15, %v18937_v15  ;;  %v13559_v9 = vcombine.low %v18937_v15, %v18937_v15  ;;  %v18951_v50 = vld [vmem:[#allocation4 + $0x18] sm:$0xee]  ;;  %vm19484_vm2 = vmmov %vm19481_vm0 }
 0x69b   :  { %v18967_v11 = vld [vmem:[#allocation4 + $0x18] sm:$0xcc]  ;;  %vm19485_vm1 = vmmov %vm19481_vm0 }
 0x69c   :  { %v7763_v0 = vsel %vm19472_vm7, %v13558_v13, %v13560_v5  ;;  %v7759_v3 = vsel %vm19473_vm10, %v13557_v26, %v13559_v9  ;;  %v7924_v36 = vld [vmem:[#allocation4 + $0x18] sm:$0x88]  ;;  %v15573_v26 = vld [vmem:[#allocation20 + $0x288] ss:$16 sps:$4 sm:$0xff]   ;;  %v7931_v9 = vrot.slane %v13578_v44, 3  ;;  %vm19486_vm8 = vmmov %vm19481_vm0 }
 0x69d   :  { %11529 = vmatprep.mubr.bf16.mxu0 %v7763_v0  ;;  %11916 = vmatprep.mubr.bf16.mxu1 %v7763_v0  ;;  %v15570_v5 = vld [vmem:[#allocation20 + $0x280] ss:$16 sps:$4 sm:$0xff]   ;;  %vm19487_vm9 = vmmov %vm19481_vm0 }
 0x69e   :  { %11530 = vmatmul.mubr.bf16.vlgmr.msra.gmra.mrb[164].mxu0 %v7759_v3  ;;  %11917 = vmatmul.mubr.bf16.vlgmr.msra.gmra.mrb[92].mxu1 %v7759_v3  ;;  %vm19488_vm7 = vmmov %vm19481_vm0 }
 0x69f   :  { %11541 = vmatpush1.bf16.msra.mxu0 %v15542_v54  ;;  %11928 = vmatpush1.bf16.msra.mxu1 %v15545_v25  ;;  %v8017_v54 = vld [vmem:[#allocation4 + $0x8] sm:$0xee]  ;;  %vm19489_vm10 = vmmov %vm19481_vm0 }
 0x6a0   :  { %11542 = vmatprep.subr.bf16.mxu0 %v15552_v41  ;;  %11929 = vmatprep.subr.bf16.mxu1 %v15555_v18  ;;  %v18955_v52 = vld [vmem:[#allocation4 + $0x20] sm:$0x11]  ;;  %v7968_v18 = vld [vmem:[#allocation4 + $0x28] sm:$0x11] }
 0x6a1   :  { %v13564_v31 = vcombine.high %v18937_v15, %v18955_v52  ;;  %v13567_v21 = vcombine.low %v18951_v50, %v18955_v52  ;;  %v18969_v29 = vld [vmem:[#allocation4 + $0x20] sm:$0x77] }
 0x6a2   :  { %v13575_v32 = vcombine.low %v18967_v11, %v18969_v29  ;;  %v13580_v51 = vcombine.high %v7924_v36, %v18969_v29  ;;  %v13579_v62 = vcombine.low %v7924_v36, %v18969_v29  ;;  %v15587_v36 = vld [vmem:[#allocation20 + $0x2cc] ss:$16 sps:$4 sm:$0xff]  }
 0x6a3   :  { %11543 = vmatpush1.bf16.msra.mxu0 %v15550_v17  ;;  %11930 = vmatpush1.bf16.msra.mxu1 %v15553_v28  ;;  %v7800_v4 = vshrl.u32 %v13564_v31, 16  ;;  %v7803_v23 = vshll.u32 %v13564_v31, 16  ;;  %v7829_v56 = vrot.slane %v13567_v21, 5  ;;  %v7881_v17 = vrot.slane %v7879_v35, 2  ;;  %v7948_v28 = vld [vmem:[#allocation4 + $0x20] sm:$0xff] }
 0x6a4   :  { %11544 = vmatprep.subr.bf16.mxu0 %v15560_v24  ;;  %11931 = vmatprep.subr.bf16.mxu1 %v15563_v43  ;;  %v7900_v25 = vshrl.u32 %v13575_v32, 16  ;;  %v7903_v0 = vshll.u32 %v13575_v32, 16  ;;  %v7938_v3 = vrot.slane %v13580_v51, 7  ;;  %v7937_v41 = vrot.slane %v13579_v62, 7  ;;  %v8018_v43 = vld [vmem:[#allocation4 + $0x20] sm:$0xee] }
 0x6a5   :  { %v7802_v20 = vrot.slane %v7800_v4, 4  ;;  %v7805_v42 = vrot.slane %v7803_v23, 5  ;;  %v18976_v47 = vsel %vm19474_vm11, %v7822_v39, %v7829_v56  ;;  %v13585_v24 = vcombine.low %v7947_v55, %v7967_v14  ;;  %v15581_v31 = vld [vmem:[#allocation20 + $0x2ac] ss:$16 sps:$4 sm:$0xff]   ;;  %v15585_v35 = vld [vmem:[#allocation20 + $0x2c8] ss:$16 sps:$4 sm:$0xff]  }
 0x6a6   :  { %v7902_v21 = vrot.slane %v7900_v25, 6  ;;  %v7905_v8 = vrot.slane %v7903_v0, 7  ;;  %v13592_v4 = vcombine.high %v8018_v43, %v7968_v18  ;;  %v13589_v23 = vcombine.low %v8017_v54, %v7967_v14  ;;  %v15590_v51 = vld [vmem:[#allocation20 + $0x2e4] ss:$16 sps:$4 sm:$0xff]   ;;  %v15593_v62 = vld [vmem:[#allocation20 + $0x2ec] ss:$16 sps:$4 sm:$0xff]  }
 0x6a7   :  { %v7806_v22 = vor.u32 %v7805_v42, %v7802_v20  ;;  %11545 = vmatpush1.bf16.msra.mxu0 %v15558_v63  ;;  %11932 = vmatpush1.bf16.msra.mxu1 %v15561_v16  ;;  %v18984_v63 = vsel %vm19476_vm13, %v7931_v9, %v7938_v3  ;;  %v18987_v16 = vsel %vm19477_vm12, %v7930_v48, %v7937_v41  ;;  %v7977_v45 = vshll.u32 %v13585_v24, 16  ;;  %v15584_v42 = vld [vmem:[#allocation20 + $0x2c4] ss:$16 sps:$4 sm:$0xff]   ;;  %v15591_v9 = vld [vmem:[#allocation20 + $0x2e8] ss:$16 sps:$4 sm:$0xff]  }
 0x6a8   :  { %11546 = vmatprep.subr.bf16.mxu0 %v15566_v19  ;;  %11933 = vmatprep.subr.bf16.mxu1 %v15569_v46  ;;  %v13590_v19 = vcombine.high %v8017_v54, %v7967_v14  ;;  %v13587_v46 = vcombine.low %v7948_v28, %v7968_v18  ;;  %v7885_v39 = vor.u32 %v7884_v49, %v7881_v17  ;;  %v15596_v25 = vld [vmem:[#allocation20 + $0x304] ss:$16 sps:$4 sm:$0xff]   ;;  %v15599_v0 = vld [vmem:[#allocation20 + $0x30c] ss:$16 sps:$4 sm:$0xff]   ;;  %v15594_v41 = vld [vmem:[#allocation20 + $0x300] ss:$16 sps:$4 sm:$0xff]  }
 0x6a9   :  { %v7813_v13 = vsel %vm19475_vm4, %v7785_v57, %v7806_v22  ;;  %v7906_v56 = vor.u32 %v7905_v8, %v7902_v21  ;;  %v13591_v20 = vcombine.low %v8018_v43, %v7968_v18  ;;  %v8032_v57 = vrot.slane %v13592_v4, 5  ;;  %v15597_v18 = vld [vmem:[#allocation20 + $0x308] ss:$16 sps:$4 sm:$0xff]   ;;  %v15602_v17 = vld [vmem:[#allocation20 + $0x324] ss:$16 sps:$4 sm:$0xff]  }
 0x6aa   :  { %11572 = vmatprep.mubr.bf16.mxu0 %v7813_v13  ;;  %11959 = vmatprep.mubr.bf16.mxu1 %v7813_v13  ;;  %v7994_v6 = vshrl.u32 %v13587_v46, 16  ;;  %v7997_v32 = vshll.u32 %v13587_v46, 16  ;;  %v8024_v22 = vrot.slane %v13589_v23, 1  ;;  %v7979_v60 = vrot.slane %v7977_v45, 1  ;;  %v15605_v49 = vld [vmem:[#allocation20 + $0x32c] ss:$16 sps:$4 sm:$0xff]  }
 0x6ab   :  { %11547 = vmatpush1.bf16.msra.mxu0 %v15564_v33  ;;  %11934 = vmatpush1.bf16.msra.mxu1 %v15567_v53  ;;  %v18990_v44 = vsel %vm19478_vm15, %v7885_v39, %v7906_v56  ;;  %v8025_v33 = vrot.slane %v13590_v19, 1  ;;  %v8031_v53 = vrot.slane %v13591_v20, 5  ;;  %v7975_v13 = vshrl.u32 %v13585_v24, 16  ;;  %v15600_v28 = vld [vmem:[#allocation20 + $0x320] ss:$16 sps:$4 sm:$0xff]  }
 0x6ac   :  { %11548 = vmatprep.subr.bf16.mxu0 %v15572_v61  ;;  %11935 = vmatprep.subr.bf16.mxu1 %v15575_v38  ;;  %v15582_v61 = vld [vmem:[#allocation20 + $0x2c0] ss:$16 sps:$4 sm:$0xff]   ;;  %v7996_v38 = vrot.slane %v7994_v6, 4  ;;  %v15603_v24 = vld [vmem:[#allocation20 + $0x328] ss:$16 sps:$4 sm:$0xff]   ;;  %v13563_v20 = vcombine.low %v18937_v15, %v18955_v52  ;;  %v13561_v6 = vcombine.low %v18928_v58, %v18930_v27  ;;  %v13568_v58 = vcombine.high %v18951_v50, %v18955_v52 }
 0x6ad   :  { %v18993_v55 = vsel %vm19479_vm5, %v8025_v33, %v8032_v57  ;;  %v18996_v14 = vsel %vm19480_vm6, %v8024_v22, %v8031_v53  ;;  %v7980_v48 = vor.u32 %v7979_v60, %v7975_v13  ;;  %v15608_v43 = vld [vmem:[#allocation20 + $0x344] ss:$16 sps:$4 sm:$0xff]   ;;  %v15609_v21 = vld [vmem:[#allocation20 + $0x348] ss:$16 sps:$4 sm:$0xff]   ;;  %v15617_v19 = vld [vmem:[#allocation20 + $0x36c] ss:$16 sps:$4 sm:$0xff]  }
 0x6ae   :  { %v15614_v8 = vld [vmem:[#allocation20 + $0x364] ss:$16 sps:$4 sm:$0xff]   ;;  %v15612_v46 = vld [vmem:[#allocation20 + $0x360] ss:$16 sps:$4 sm:$0xff]   ;;  %v15615_v4 = vld [vmem:[#allocation20 + $0x368] ss:$16 sps:$4 sm:$0xff]  }
 0x6af   :  { %11549 = vmatpush1.bf16.msra.mxu0 %v15570_v5  ;;  %11936 = vmatpush1.bf16.msra.mxu1 %v15573_v26  ;;  %v7999_v5 = vrot.slane %v7997_v32, 5  ;;  %v15588_v26 = vld [vmem:[#allocation20 + $0x2e0] ss:$16 sps:$4 sm:$0xff]   ;;  %v15620_v23 = vld [vmem:[#allocation20 + $0x384] ss:$16 sps:$4 sm:$0xff]   ;;  %v7792_v57 = vshrl.u32 %v13563_v20, 16 }
 0x6b0   :  { %11550 = vmatprep.subr.bf16.mxu0 %v15578_v59  ;;  %11937 = vmatprep.subr.bf16.mxu1 %v15581_v31  ;;  %v15611_v59 = vld [vmem:[#allocation20 + $0x34c] ss:$16 sps:$4 sm:$0xff]   ;;  %v15606_v31 = vld [vmem:[#allocation20 + $0x340] ss:$16 sps:$4 sm:$0xff]   ;;  %v15621_v39 = vld [vmem:[#allocation20 + $0x388] ss:$16 sps:$4 sm:$0xff]  }
 0x6b1   :  { %v8000_v54 = vor.u32 %v7999_v5, %v7996_v38  ;;  %v15626_v56 = vld [vmem:[#allocation20 + $0x3a4] ss:$16 sps:$4 sm:$0xff]   ;;  %v15629_v45 = vld [vmem:[#allocation20 + $0x3ac] ss:$16 sps:$4 sm:$0xff]   ;;  %v7795_v22 = vshll.u32 %v13563_v20, 16  ;;  %v7794_v38 = vrot.slane %v7792_v57, 4 }
 0x6b2   :  { %v15632_v33 = vld [vmem:[#allocation20 + $0x3c4] ss:$16 sps:$4 sm:$0xff]   ;;  %v15635_v32 = vld [vmem:[#allocation20 + $0x3cc] ss:$16 sps:$4 sm:$0xff]   ;;  %v15630_v53 = vld [vmem:[#allocation20 + $0x3c0] ss:$16 sps:$4 sm:$0xff]  }
 0x6b3   :  { %11551 = vmatpush1.bf16.msra.mxu0 %v15576_v12  ;;  %11938 = vmatpush1.bf16.msra.mxu1 %v15579_v37  ;;  %v18999_v3 = vsel %vm19481_vm0, %v7980_v48, %v8000_v54  ;;  %v15623_v12 = vld [vmem:[#allocation20 + $0x38c] ss:$16 sps:$4 sm:$0xff]   ;;  %v15618_v37 = vld [vmem:[#allocation20 + $0x380] ss:$16 sps:$4 sm:$0xff]   ;;  %v15638_v15 = vld [vmem:[#allocation20 + $0x3e4] ss:$16 sps:$4 sm:$0xff]   ;;  %v13566_v48 = vcombine.high %v18953_v34, %v18930_v27 }
 0x6b4   :  { %11552 = vmatprep.subr.bf16.mxu0 %v15584_v42  ;;  %11939 = vmatprep.subr.bf16.mxu1 %v15587_v36  ;;  %v15624_v42 = vld [vmem:[#allocation20 + $0x3a0] ss:$16 sps:$4 sm:$0xff]   ;;  %v15627_v36 = vld [vmem:[#allocation20 + $0x3a8] ss:$16 sps:$4 sm:$0xff]   ;;  %v15641_v60 = vld [vmem:[#allocation20 + $0x3ec] ss:$16 sps:$4 sm:$0xff]  }
 0x6b5   :  { %v15639_v13 = vld [vmem:[#allocation20 + $0x3e8] ss:$16 sps:$4 sm:$0xff]   ;;  %v7773_v54 = vshrl.u32 %v13561_v6, 16  ;;  %v7823_v52 = vrot.slane %v13566_v48, 1  ;;  %v15652_v27 = vld [vmem:[#allocation20 + $0x420] ss:$16 sps:$4 sm:$0xff]  }
 0x6b6   :  { %v15647_v50 = vld [vmem:[#allocation20 + $0x408] ss:$16 sps:$4 sm:$0xff]   ;;  %v15676_v20 = vld [vmem:[#allocation20 + $0x4a0] ss:$16 sps:$4 sm:$0xff]   ;;  %v15690_v57 = vld [vmem:[#allocation20 + $0x4e4] ss:$16 sps:$4 sm:$0xff]  }
 0x6b7   :  { %11553 = vmatpush1.bf16.msra.mxu0 %v15582_v61  ;;  %11940 = vmatpush1.bf16.msra.mxu1 %v15585_v35  ;;  %v15633_v61 = vld [vmem:[#allocation20 + $0x3c8] ss:$16 sps:$4 sm:$0xff]   ;;  %v7775_v35 = vshll.u32 %v13561_v6, 16  ;;  %v15687_v6 = vld [vmem:[#allocation20 + $0x4cc] ss:$16 sps:$4 sm:$0xff]   ;;  %vm19490_vm11 = vcmask 1040384  }
 0x6b8   :  { %11554 = vmatprep.subr.bf16.mxu0 %v15590_v51  ;;  %11941 = vmatprep.subr.bf16.mxu1 %v15593_v62  ;;  %v7797_v51 = vrot.slane %v7795_v22, 5  ;;  %v15636_v62 = vld [vmem:[#allocation20 + $0x3e0] ss:$16 sps:$4 sm:$0xff]   ;;  %v15655_v34 = vld [vmem:[#allocation20 + $0x428] ss:$16 sps:$4 sm:$0xff]   ;;  %vm12840_vm4 = vcmask 91136  }
 0x6b9   :  { %v7777_v5 = vrot.slane %v7775_v35, 1  ;;  %v15693_v22 = vld [vmem:[#allocation20 + $0x4ec] ss:$16 sps:$4 sm:$0xff]   ;;  %v15696_v35 = vld [vmem:[#allocation20 + $0x504] ss:$16 sps:$4 sm:$0xff]  }
 0x6ba   :  { %v15709_v48 = vld [vmem:[#allocation20 + $0x548] ss:$16 sps:$4 sm:$0xff]  }
 0x6bb   :  { %11555 = vmatpush1.bf16.msra.mxu0 %v15588_v26  ;;  %11942 = vmatpush1.bf16.msra.mxu1 %v15591_v9  ;;  %v15646_v26 = vld [vmem:[#allocation20 + $0x404] ss:$16 sps:$4 sm:$0xff]   ;;  %v15649_v9 = vld [vmem:[#allocation20 + $0x40c] ss:$16 sps:$4 sm:$0xff]  }
 0x6bc   :  { %11556 = vmatprep.subr.bf16.mxu0 %v15596_v25  ;;  %11943 = vmatprep.subr.bf16.mxu1 %v15599_v0  ;;  %v7798_v25 = vor.u32 %v7797_v51, %v7794_v38  ;;  %v7830_v0 = vrot.slane %v13568_v58, 5  ;;  %v15697_v38 = vld [vmem:[#allocation20 + $0x508] ss:$16 sps:$4 sm:$0xff]   ;;  %v15702_v51 = vld [vmem:[#allocation20 + $0x524] ss:$16 sps:$4 sm:$0xff]  }
 0x6bd   :  { %v15705_v58 = vld [vmem:[#allocation20 + $0x52c] ss:$16 sps:$4 sm:$0xff]  }
 0x6bf   :  { %11557 = vmatpush1.bf16.msra.mxu0 %v15594_v41  ;;  %11944 = vmatpush1.bf16.msra.mxu1 %v15597_v18  ;;  %v7778_v41 = vor.u32 %v7777_v5, %v7773_v54  ;;  %v15644_v18 = vld [vmem:[#allocation20 + $0x400] ss:$16 sps:$4 sm:$0xff]   ;;  %v15708_v5 = vld [vmem:[#allocation20 + $0x544] ss:$16 sps:$4 sm:$0xff]  }
 0x6c0   :  { %11558 = vmatprep.subr.bf16.mxu0 %v15602_v17  ;;  %11945 = vmatprep.subr.bf16.mxu1 %v15605_v49  ;;  %v15654_v49 = vld [vmem:[#allocation20 + $0x424] ss:$16 sps:$4 sm:$0xff]  }
 0x6c1   :  { %v7809_v17 = vsel %vm19482_vm14, %v7778_v41, %v7798_v25  ;;  %v15714_v54 = vld [vmem:[#allocation20 + $0x564] ss:$16 sps:$4 sm:$0xff]   ;;  %v15717_v25 = vld [vmem:[#allocation20 + $0x56c] ss:$16 sps:$4 sm:$0xff]   ;;  %v15715_v41 = vld [vmem:[#allocation20 + $0x568] ss:$16 sps:$4 sm:$0xff]  }
 0x6c3   :  { %11559 = vmatpush1.bf16.msra.mxu0 %v15600_v28  ;;  %11946 = vmatpush1.bf16.msra.mxu1 %v15603_v24  ;;  %v15657_v28 = vld [vmem:[#allocation20 + $0x42c] ss:$16 sps:$4 sm:$0xff]   ;;  %v7837_v24 = vsel %vm19483_vm3, %v7823_v52, %v7830_v0  ;;  %v15712_v0 = vld [vmem:[#allocation20 + $0x560] ss:$16 sps:$4 sm:$0xff]  }
 0x6c4   :  { %11560 = vmatprep.subr.bf16.mxu0 %v15608_v43  ;;  %11947 = vmatprep.subr.bf16.mxu1 %v15611_v59  ;;  %v15660_v43 = vld [vmem:[#allocation20 + $0x444] ss:$16 sps:$4 sm:$0xff]   ;;  %v15663_v59 = vld [vmem:[#allocation20 + $0x44c] ss:$16 sps:$4 sm:$0xff]   ;;  %v15718_v52 = vld [vmem:[#allocation20 + $0x580] ss:$16 sps:$4 sm:$0xff]  }
 0x6c7   :  { %11561 = vmatpush1.bf16.msra.mxu0 %v15606_v31  ;;  %11948 = vmatpush1.bf16.msra.mxu1 %v15609_v21  ;;  %v15658_v31 = vld [vmem:[#allocation20 + $0x440] ss:$16 sps:$4 sm:$0xff]   ;;  %v15661_v21 = vld [vmem:[#allocation20 + $0x448] ss:$16 sps:$4 sm:$0xff]  }
 0x6c8   :  { %11562 = vmatprep.subr.bf16.mxu0 %v15614_v8  ;;  %11949 = vmatprep.subr.bf16.mxu1 %v15617_v19  ;;  %v15666_v8 = vld [vmem:[#allocation20 + $0x464] ss:$16 sps:$4 sm:$0xff]   ;;  %v15669_v19 = vld [vmem:[#allocation20 + $0x46c] ss:$16 sps:$4 sm:$0xff]  }
 0x6cb   :  { %11563 = vmatpush1.bf16.msra.mxu0 %v15612_v46  ;;  %11950 = vmatpush1.bf16.msra.mxu1 %v15615_v4  ;;  %v15664_v46 = vld [vmem:[#allocation20 + $0x460] ss:$16 sps:$4 sm:$0xff]   ;;  %v15667_v4 = vld [vmem:[#allocation20 + $0x468] ss:$16 sps:$4 sm:$0xff]  }
 0x6cc   :  { %11564 = vmatprep.subr.bf16.mxu0 %v15620_v23  ;;  %11951 = vmatprep.subr.bf16.mxu1 %v15623_v12  ;;  %v15672_v23 = vld [vmem:[#allocation20 + $0x484] ss:$16 sps:$4 sm:$0xff]   ;;  %v15675_v12 = vld [vmem:[#allocation20 + $0x48c] ss:$16 sps:$4 sm:$0xff]  }
 0x6cf   :  { %11565 = vmatpush1.bf16.msra.mxu0 %v15618_v37  ;;  %11952 = vmatpush1.bf16.msra.mxu1 %v15621_v39  ;;  %v15670_v37 = vld [vmem:[#allocation20 + $0x480] ss:$16 sps:$4 sm:$0xff]   ;;  %v15673_v39 = vld [vmem:[#allocation20 + $0x488] ss:$16 sps:$4 sm:$0xff]  }
 0x6d0   :  { %11566 = vmatprep.subr.bf16.mxu0 %v15626_v56  ;;  %11953 = vmatprep.subr.bf16.mxu1 %v15629_v45  ;;  %v15678_v56 = vld [vmem:[#allocation20 + $0x4a4] ss:$16 sps:$4 sm:$0xff]   ;;  %v15681_v45 = vld [vmem:[#allocation20 + $0x4ac] ss:$16 sps:$4 sm:$0xff]  }
 0x6d3   :  { %11567 = vmatpush1.bf16.msra.mxu0 %v15624_v42  ;;  %11954 = vmatpush1.bf16.msra.mxu1 %v15627_v36  ;;  %v15679_v42 = vld [vmem:[#allocation20 + $0x4a8] ss:$16 sps:$4 sm:$0xff]   ;;  %v15684_v36 = vld [vmem:[#allocation20 + $0x4c4] ss:$16 sps:$4 sm:$0xff]  }
 0x6d4   :  { %11568 = vmatprep.subr.bf16.mxu0 %v15632_v33  ;;  %11955 = vmatprep.subr.bf16.mxu1 %v15635_v32  ;;  %v15682_v33 = vld [vmem:[#allocation20 + $0x4c0] ss:$16 sps:$4 sm:$0xff]   ;;  %v15685_v32 = vld [vmem:[#allocation20 + $0x4c8] ss:$16 sps:$4 sm:$0xff]  }
 0x6d7   :  { %11569 = vmatpush1.bf16.msra.mxu0 %v15630_v53  ;;  %11956 = vmatpush1.bf16.msra.mxu1 %v15633_v61  ;;  %v15688_v53 = vld [vmem:[#allocation20 + $0x4e0] ss:$16 sps:$4 sm:$0xff]   ;;  %v15691_v61 = vld [vmem:[#allocation20 + $0x4e8] ss:$16 sps:$4 sm:$0xff]  }
 0x6d8   :  { %11570 = vmatprep.subr.bf16.mxu0 %v15638_v15  ;;  %11957 = vmatprep.subr.bf16.mxu1 %v15641_v60  ;;  %v15699_v15 = vld [vmem:[#allocation20 + $0x50c] ss:$16 sps:$4 sm:$0xff]   ;;  %v15694_v60 = vld [vmem:[#allocation20 + $0x500] ss:$16 sps:$4 sm:$0xff]  }
 0x6db   :  { %11571 = vmatpush1.bf16.msra.mxu0 %v15636_v62  ;;  %11958 = vmatpush1.bf16.msra.mxu1 %v15639_v13  ;;  %v15700_v62 = vld [vmem:[#allocation20 + $0x520] ss:$16 sps:$4 sm:$0xff]   ;;  %v15703_v13 = vld [vmem:[#allocation20 + $0x528] ss:$16 sps:$4 sm:$0xff]  }
 0x6dc   :  { %11583 = vmatprep.subr.bf16.mxu0 %v15646_v26  ;;  %11970 = vmatprep.subr.bf16.mxu1 %v15649_v9  ;;  %v15711_v26 = vld [vmem:[#allocation20 + $0x54c] ss:$16 sps:$4 sm:$0xff]   ;;  %v15706_v9 = vld [vmem:[#allocation20 + $0x540] ss:$16 sps:$4 sm:$0xff]  }
 0x6de   :  { %11573 = vmatmul.mubr.bf16.vlgmr.msra.gmra.mrb[164].mxu0 %v7809_v17  ;;  %11960 = vmatmul.mubr.bf16.vlgmr.msra.gmra.mrb[92].mxu1 %v7809_v17  ;;  %v15721_v17 = vld [vmem:[#allocation20 + $0x588] ss:$16 sps:$4 sm:$0xff]  }
 0x6df   :  { %11584 = vmatpush1.bf16.msra.mxu0 %v15644_v18  ;;  %11615 = vmatprep.mubr.bf16.mxu0 %v7837_v24  ;;  %v15720_v18 = vld [vmem:[#allocation20 + $0x584] ss:$16 sps:$4 sm:$0xff]  }
 0x6e0   :  { %11971 = vmatpush1.bf16.msra.mxu1 %v15647_v50  ;;  %12002 = vmatprep.mubr.bf16.mxu1 %v7837_v24  ;;  %v15723_v50 = vld [vmem:[#allocation20 + $0x58c] ss:$16 sps:$4 sm:$0xff]   ;;  %v15724_v24 = vld [vmem:[#allocation20 + $0x5a0] ss:$16 sps:$4 sm:$0xff]  }
 0x6e1   :  { %11585 = vmatprep.subr.bf16.mxu0 %v15654_v49  ;;  %11972 = vmatprep.subr.bf16.mxu1 %v15657_v28  ;;  %v15726_v49 = vld [vmem:[#allocation20 + $0x5a4] ss:$16 sps:$4 sm:$0xff]   ;;  %v15729_v28 = vld [vmem:[#allocation20 + $0x5ac] ss:$16 sps:$4 sm:$0xff]  }
 0x6e3   :  { %11586 = vmatpush1.bf16.msra.mxu0 %v15652_v27  ;;  %v15727_v27 = vld [vmem:[#allocation20 + $0x5a8] ss:$16 sps:$4 sm:$0xff]  }
 0x6e4   :  { %11973 = vmatpush1.bf16.msra.mxu1 %v15655_v34  ;;  %11587 = vmatprep.subr.bf16.mxu0 %v15660_v43  ;;  %v15732_v34 = vld [vmem:[#allocation20 + $0x5c4] ss:$16 sps:$4 sm:$0xff]   ;;  %v15735_v43 = vld [vmem:[#allocation20 + $0x5cc] ss:$16 sps:$4 sm:$0xff]  }
 0x6e5   :  { %11974 = vmatprep.subr.bf16.mxu1 %v15663_v59  ;;  %v15730_v59 = vld [vmem:[#allocation20 + $0x5c0] ss:$16 sps:$4 sm:$0xff]  }
 0x6e7   :  { %11588 = vmatpush1.bf16.msra.mxu0 %v15658_v31  ;;  %v15733_v31 = vld [vmem:[#allocation20 + $0x5c8] ss:$16 sps:$4 sm:$0xff]  }
 0x6e8   :  { %11975 = vmatpush1.bf16.msra.mxu1 %v15661_v21  ;;  %11589 = vmatprep.subr.bf16.mxu0 %v15666_v8  ;;  %v15738_v21 = vld [vmem:[#allocation20 + $0x5e4] ss:$16 sps:$4 sm:$0xff]  }
 0x6e9   :  { %11976 = vmatprep.subr.bf16.mxu1 %v15669_v19  ;;  %v19011_v8 = vld [vmem:[#allocation4 + $0x20] sm:$0x33]  ;;  %v15741_v19 = vld [vmem:[#allocation20 + $0x5ec] ss:$16 sps:$4 sm:$0xff]  }
 0x6eb   :  { %11590 = vmatpush1.bf16.msra.mxu0 %v15664_v46  ;;  %v19013_v46 = vld [vmem:[#allocation4 + $0x8] sm:$0x33] }
 0x6ec   :  { %11977 = vmatpush1.bf16.msra.mxu1 %v15667_v4  ;;  %11591 = vmatprep.subr.bf16.mxu0 %v15672_v23  ;;  %v15736_v4 = vld [vmem:[#allocation20 + $0x5e0] ss:$16 sps:$4 sm:$0xff]   ;;  %v13572_v23 = vcombine.high %v18967_v11, %v19011_v8 }
 0x6ed   :  { %11978 = vmatprep.subr.bf16.mxu1 %v15675_v12  ;;  %v15739_v12 = vld [vmem:[#allocation20 + $0x5e8] ss:$16 sps:$4 sm:$0xff]  }
 0x6ef   :  { %11592 = vmatpush1.bf16.msra.mxu0 %v15670_v37  ;;  %v15746_v37 = vld [vmem:[#allocation20 + $0x604] ss:$16 sps:$4 sm:$0xff]  }
 0x6f0   :  { %11979 = vmatpush1.bf16.msra.mxu1 %v15673_v39  ;;  %11593 = vmatprep.subr.bf16.mxu0 %v15678_v56  ;;  %v15749_v39 = vld [vmem:[#allocation20 + $0x60c] ss:$16 sps:$4 sm:$0xff]   ;;  %v13570_v56 = vcombine.high %v18965_v30, %v19013_v46 }
 0x6f1   :  { %11980 = vmatprep.subr.bf16.mxu1 %v15681_v45  ;;  %v15744_v45 = vld [vmem:[#allocation20 + $0x600] ss:$16 sps:$4 sm:$0xff]  }
 0x6f3   :  { %11594 = vmatpush1.bf16.msra.mxu0 %v15676_v20  ;;  %v7862_v20 = vrot.slane %v13572_v23, 6  ;;  %v15806_v23 = vld [vmem:[#allocation20 + $0x740] ss:$16 sps:$4 sm:$0xff]  }
 0x6f4   :  { %11981 = vmatpush1.bf16.msra.mxu1 %v15679_v42  ;;  %11595 = vmatprep.subr.bf16.mxu0 %v15684_v36  ;;  %v15747_v42 = vld [vmem:[#allocation20 + $0x608] ss:$16 sps:$4 sm:$0xff]   ;;  %v7852_v36 = vrot.slane %v13570_v56, 2  ;;  %v15812_v56 = vld [vmem:[#allocation20 + $0x760] ss:$16 sps:$4 sm:$0xff]  }
 0x6f5   :  { %11982 = vmatprep.subr.bf16.mxu1 %v15687_v6  ;;  %v15754_v6 = vld [vmem:[#allocation20 + $0x624] ss:$16 sps:$4 sm:$0xff]  }
 0x6f7   :  { %11596 = vmatpush1.bf16.msra.mxu0 %v15682_v33  ;;  %v15757_v33 = vld [vmem:[#allocation20 + $0x62c] ss:$16 sps:$4 sm:$0xff]  }
 0x6f8   :  { %11983 = vmatpush1.bf16.msra.mxu1 %v15685_v32  ;;  %11597 = vmatprep.subr.bf16.mxu0 %v15690_v57  ;;  %v7869_v32 = vsel %vm19484_vm2, %v7852_v36, %v7862_v20  ;;  %v15752_v57 = vld [vmem:[#allocation20 + $0x620] ss:$16 sps:$4 sm:$0xff]   ;;  %v15820_v20 = vld [vmem:[#allocation20 + $0x784] ss:$16 sps:$4 sm:$0xff]  }
 0x6f9   :  { %11984 = vmatprep.subr.bf16.mxu1 %v15693_v22  ;;  %v15755_v22 = vld [vmem:[#allocation20 + $0x628] ss:$16 sps:$4 sm:$0xff]   ;;  %v15818_v36 = vld [vmem:[#allocation20 + $0x780] ss:$16 sps:$4 sm:$0xff]  }
 0x6fb   :  { %11598 = vmatpush1.bf16.msra.mxu0 %v15688_v53  ;;  %v15760_v53 = vld [vmem:[#allocation20 + $0x644] ss:$16 sps:$4 sm:$0xff]  }
 0x6fc   :  { %11985 = vmatpush1.bf16.msra.mxu1 %v15691_v61  ;;  %11599 = vmatprep.subr.bf16.mxu0 %v15696_v35  ;;  %v15763_v61 = vld [vmem:[#allocation20 + $0x64c] ss:$16 sps:$4 sm:$0xff]   ;;  %v15758_v35 = vld [vmem:[#allocation20 + $0x640] ss:$16 sps:$4 sm:$0xff]  }
 0x6fd   :  { %11986 = vmatprep.subr.bf16.mxu1 %v15699_v15  ;;  %v15761_v15 = vld [vmem:[#allocation20 + $0x648] ss:$16 sps:$4 sm:$0xff]  }
 0x6ff   :  { %11600 = vmatpush1.bf16.msra.mxu0 %v15694_v60  ;;  %v15766_v60 = vld [vmem:[#allocation20 + $0x664] ss:$16 sps:$4 sm:$0xff]  }
 0x700   :  { %11987 = vmatpush1.bf16.msra.mxu1 %v15697_v38  ;;  %11601 = vmatprep.subr.bf16.mxu0 %v15702_v51  ;;  %v15764_v38 = vld [vmem:[#allocation20 + $0x660] ss:$16 sps:$4 sm:$0xff]   ;;  %v15767_v51 = vld [vmem:[#allocation20 + $0x668] ss:$16 sps:$4 sm:$0xff]  }
 0x701   :  { %11988 = vmatprep.subr.bf16.mxu1 %v15705_v58  ;;  %v15772_v58 = vld [vmem:[#allocation20 + $0x684] ss:$16 sps:$4 sm:$0xff]  }
 0x703   :  { %11602 = vmatpush1.bf16.msra.mxu0 %v15700_v62  ;;  %v15775_v62 = vld [vmem:[#allocation20 + $0x68c] ss:$16 sps:$4 sm:$0xff]  }
 0x704   :  { %11989 = vmatpush1.bf16.msra.mxu1 %v15703_v13  ;;  %11603 = vmatprep.subr.bf16.mxu0 %v15708_v5  ;;  %v15770_v13 = vld [vmem:[#allocation20 + $0x680] ss:$16 sps:$4 sm:$0xff]   ;;  %v15773_v5 = vld [vmem:[#allocation20 + $0x688] ss:$16 sps:$4 sm:$0xff]  }
 0x705   :  { %11990 = vmatprep.subr.bf16.mxu1 %v15711_v26  ;;  %v15778_v26 = vld [vmem:[#allocation20 + $0x6a4] ss:$16 sps:$4 sm:$0xff]  }
 0x707   :  { %11604 = vmatpush1.bf16.msra.mxu0 %v15706_v9  ;;  %v15781_v9 = vld [vmem:[#allocation20 + $0x6ac] ss:$16 sps:$4 sm:$0xff]  }
 0x708   :  { %11991 = vmatpush1.bf16.msra.mxu1 %v15709_v48  ;;  %11605 = vmatprep.subr.bf16.mxu0 %v15714_v54  ;;  %v15776_v48 = vld [vmem:[#allocation20 + $0x6a0] ss:$16 sps:$4 sm:$0xff]   ;;  %v15779_v54 = vld [vmem:[#allocation20 + $0x6a8] ss:$16 sps:$4 sm:$0xff]  }
 0x709   :  { %11992 = vmatprep.subr.bf16.mxu1 %v15717_v25  ;;  %v15784_v25 = vld [vmem:[#allocation20 + $0x6c4] ss:$16 sps:$4 sm:$0xff]  }
 0x70b   :  { %11606 = vmatpush1.bf16.msra.mxu0 %v15712_v0  ;;  %v15787_v0 = vld [vmem:[#allocation20 + $0x6cc] ss:$16 sps:$4 sm:$0xff]  }
 0x70c   :  { %11993 = vmatpush1.bf16.msra.mxu1 %v15715_v41  ;;  %11607 = vmatprep.subr.bf16.mxu0 %v15720_v18  ;;  %v15782_v41 = vld [vmem:[#allocation20 + $0x6c0] ss:$16 sps:$4 sm:$0xff]   ;;  %v15785_v18 = vld [vmem:[#allocation20 + $0x6c8] ss:$16 sps:$4 sm:$0xff]  }
 0x70d   :  { %11994 = vmatprep.subr.bf16.mxu1 %v15723_v50  ;;  %v15790_v50 = vld [vmem:[#allocation20 + $0x6e4] ss:$16 sps:$4 sm:$0xff]  }
 0x70f   :  { %11608 = vmatpush1.bf16.msra.mxu0 %v15718_v52  ;;  %v15793_v52 = vld [vmem:[#allocation20 + $0x6ec] ss:$16 sps:$4 sm:$0xff]  }
 0x710   :  { %11995 = vmatpush1.bf16.msra.mxu1 %v15721_v17  ;;  %11609 = vmatprep.subr.bf16.mxu0 %v15726_v49  ;;  %v15788_v17 = vld [vmem:[#allocation20 + $0x6e0] ss:$16 sps:$4 sm:$0xff]   ;;  %v15791_v49 = vld [vmem:[#allocation20 + $0x6e8] ss:$16 sps:$4 sm:$0xff]  }
 0x711   :  { %11996 = vmatprep.subr.bf16.mxu1 %v15729_v28  ;;  %v15796_v28 = vld [vmem:[#allocation20 + $0x704] ss:$16 sps:$4 sm:$0xff]  }
 0x713   :  { %11610 = vmatpush1.bf16.msra.mxu0 %v15724_v24  ;;  %v15799_v24 = vld [vmem:[#allocation20 + $0x70c] ss:$16 sps:$4 sm:$0xff]  }
 0x714   :  { %11997 = vmatpush1.bf16.msra.mxu1 %v15727_v27  ;;  %11611 = vmatprep.subr.bf16.mxu0 %v15732_v34  ;;  %v15794_v27 = vld [vmem:[#allocation20 + $0x700] ss:$16 sps:$4 sm:$0xff]   ;;  %v15797_v34 = vld [vmem:[#allocation20 + $0x708] ss:$16 sps:$4 sm:$0xff]  }
 0x715   :  { %11998 = vmatprep.subr.bf16.mxu1 %v15735_v43  ;;  %v15802_v43 = vld [vmem:[#allocation20 + $0x724] ss:$16 sps:$4 sm:$0xff]  }
 0x717   :  { %11612 = vmatpush1.bf16.msra.mxu0 %v15730_v59  ;;  %v15805_v59 = vld [vmem:[#allocation20 + $0x72c] ss:$16 sps:$4 sm:$0xff]  }
 0x718   :  { %11999 = vmatpush1.bf16.msra.mxu1 %v15733_v31  ;;  %11613 = vmatprep.subr.bf16.mxu0 %v15738_v21  ;;  %v15800_v31 = vld [vmem:[#allocation20 + $0x720] ss:$16 sps:$4 sm:$0xff]   ;;  %v15803_v21 = vld [vmem:[#allocation20 + $0x728] ss:$16 sps:$4 sm:$0xff]  }
 0x719   :  { %12000 = vmatprep.subr.bf16.mxu1 %v15741_v19  ;;  %v15808_v19 = vld [vmem:[#allocation20 + $0x744] ss:$16 sps:$4 sm:$0xff]  }
 0x71b   :  { %11614 = vmatpush1.bf16.msra.mxu0 %v15736_v4  ;;  %v15811_v4 = vld [vmem:[#allocation20 + $0x74c] ss:$16 sps:$4 sm:$0xff]  }
 0x71c   :  { %12001 = vmatpush1.bf16.msra.mxu1 %v15739_v12  ;;  %11626 = vmatprep.subr.bf16.mxu0 %v15746_v37  ;;  %v15809_v12 = vld [vmem:[#allocation20 + $0x748] ss:$16 sps:$4 sm:$0xff]   ;;  %v15814_v37 = vld [vmem:[#allocation20 + $0x764] ss:$16 sps:$4 sm:$0xff]  }
 0x71d   :  { %12013 = vmatprep.subr.bf16.mxu1 %v15749_v39  ;;  %v15817_v39 = vld [vmem:[#allocation20 + $0x76c] ss:$16 sps:$4 sm:$0xff]  }
 0x71e   :  { %11616 = vmatmul.mubr.bf16.vlgmr.msra.gmra.mrb[164].mxu0 %v18976_v47 }
 0x71f   :  { %12003 = vmatmul.mubr.bf16.vlgmr.msra.gmra.mrb[92].mxu1 %v18976_v47  ;;  %11627 = vmatpush1.bf16.msra.mxu0 %v15744_v45  ;;  %v15769_v47 = vld [vmem:[#allocation20 + $0x66c] ss:$16 sps:$4 sm:$0xff]   ;;  %v15815_v45 = vld [vmem:[#allocation20 + $0x768] ss:$16 sps:$4 sm:$0xff]  }
 0x720   :  { %11658 = vmatprep.mubr.bf16.mxu0 %v7869_v32  ;;  %12014 = vmatpush1.bf16.msra.mxu1 %v15747_v42  ;;  %v15823_v42 = vld [vmem:[#allocation20 + $0x78c] ss:$16 sps:$4 sm:$0xff]  }
 0x721   :  { %12045 = vmatprep.mubr.bf16.mxu1 %v7869_v32  ;;  %11628 = vmatprep.subr.bf16.mxu0 %v15754_v6  ;;  %v15821_v6 = vld [vmem:[#allocation20 + $0x788] ss:$16 sps:$4 sm:$0xff]   ;;  %v15829_v32 = vld [vmem:[#allocation20 + $0x7ac] ss:$16 sps:$4 sm:$0xff]  }
 0x722   :  { %12015 = vmatprep.subr.bf16.mxu1 %v15757_v33  ;;  %v15826_v33 = vld [vmem:[#allocation20 + $0x7a4] ss:$16 sps:$4 sm:$0xff]  }
 0x723   :  { %11629 = vmatpush1.bf16.msra.mxu0 %v15752_v57  ;;  %v15824_v57 = vld [vmem:[#allocation20 + $0x7a0] ss:$16 sps:$4 sm:$0xff]  }
 0x724   :  { %12016 = vmatpush1.bf16.msra.mxu1 %v15755_v22  ;;  %11630 = vmatprep.subr.bf16.mxu0 %v15760_v53  ;;  %v13576_v22 = vcombine.high %v18967_v11, %v18969_v29  ;;  %v15827_v53 = vld [vmem:[#allocation20 + $0x7a8] ss:$16 sps:$4 sm:$0xff]   ;;  %v13571_v29 = vcombine.low %v18967_v11, %v19011_v8  ;;  %v15844_v8 = vld [vmem:[#allocation20 + $0x800] ss:$16 sps:$4 sm:$0xff]  }
 0x725   :  { %12017 = vmatprep.subr.bf16.mxu1 %v15763_v61  ;;  %v15832_v61 = vld [vmem:[#allocation20 + $0x7c4] ss:$16 sps:$4 sm:$0xff]  }
 0x727   :  { %11631 = vmatpush1.bf16.msra.mxu0 %v15758_v35  ;;  %v15835_v35 = vld [vmem:[#allocation20 + $0x7cc] ss:$16 sps:$4 sm:$0xff]  }
 0x728   :  { %12018 = vmatpush1.bf16.msra.mxu1 %v15761_v15  ;;  %11632 = vmatprep.subr.bf16.mxu0 %v15766_v60  ;;  %v13574_v15 = vcombine.high %v18965_v30, %v18959_v1  ;;  %v15830_v60 = vld [vmem:[#allocation20 + $0x7c0] ss:$16 sps:$4 sm:$0xff]   ;;  %v13569_v1 = vcombine.low %v18965_v30, %v19013_v46 }
 0x729   :  { %12019 = vmatprep.subr.bf16.mxu1 %v15769_v47  ;;  %v7908_v47 = vshrl.u32 %v13576_v22, 16 }
 0x72a   :  { %v7851_v11 = vrot.slane %v13569_v1, 2  ;;  %v15906_v1 = vld [vmem:[#allocation20 + $0x940] ss:$16 sps:$4 sm:$0xff]  }
 0x72b   :  { %11633 = vmatpush1.bf16.msra.mxu0 %v15764_v38  ;;  %v7911_v38 = vshll.u32 %v13576_v22, 16  ;;  %v15885_v22 = vld [vmem:[#allocation20 + $0x8c8] ss:$16 sps:$4 sm:$0xff]  }
 0x72c   :  { %12020 = vmatpush1.bf16.msra.mxu1 %v15767_v51  ;;  %11634 = vmatprep.subr.bf16.mxu0 %v15772_v58  ;;  %v15833_v51 = vld [vmem:[#allocation20 + $0x7c8] ss:$16 sps:$4 sm:$0xff]   ;;  %v15838_v58 = vld [vmem:[#allocation20 + $0x7e4] ss:$16 sps:$4 sm:$0xff]  }
 0x72d   :  { %12021 = vmatprep.subr.bf16.mxu1 %v15775_v62  ;;  %v15841_v62 = vld [vmem:[#allocation20 + $0x7ec] ss:$16 sps:$4 sm:$0xff]  }
 0x72f   :  { %11635 = vmatpush1.bf16.msra.mxu0 %v15770_v13  ;;  %v7887_v13 = vshrl.u32 %v13574_v15, 16 }
 0x730   :  { %12022 = vmatpush1.bf16.msra.mxu1 %v15773_v5  ;;  %11636 = vmatprep.subr.bf16.mxu0 %v15778_v26  ;;  %v7890_v5 = vshll.u32 %v13574_v15, 16  ;;  %v15836_v26 = vld [vmem:[#allocation20 + $0x7e0] ss:$16 sps:$4 sm:$0xff]   ;;  %v15891_v15 = vld [vmem:[#allocation20 + $0x8e8] ss:$16 sps:$4 sm:$0xff]  }
 0x731   :  { %12023 = vmatprep.subr.bf16.mxu1 %v15781_v9  ;;  %v7910_v9 = vrot.slane %v7908_v47, 6  ;;  %v15899_v47 = vld [vmem:[#allocation20 + $0x90c] ss:$16 sps:$4 sm:$0xff]  }
 0x733   :  { %11637 = vmatpush1.bf16.msra.mxu0 %v15776_v48  ;;  %v7913_v48 = vrot.slane %v7911_v38, 7  ;;  %v15894_v38 = vld [vmem:[#allocation20 + $0x900] ss:$16 sps:$4 sm:$0xff]  }
 0x734   :  { %12024 = vmatpush1.bf16.msra.mxu1 %v15779_v54  ;;  %11638 = vmatprep.subr.bf16.mxu0 %v15784_v25  ;;  %v15839_v54 = vld [vmem:[#allocation20 + $0x7e8] ss:$16 sps:$4 sm:$0xff]   ;;  %v15846_v25 = vld [vmem:[#allocation20 + $0x804] ss:$16 sps:$4 sm:$0xff]  }
 0x735   :  { %12025 = vmatprep.subr.bf16.mxu1 %v15787_v0  ;;  %v7861_v0 = vrot.slane %v13571_v29, 6  ;;  %v15900_v29 = vld [vmem:[#allocation20 + $0x920] ss:$16 sps:$4 sm:$0xff]  }
 0x737   :  { %11639 = vmatpush1.bf16.msra.mxu0 %v15782_v41  ;;  %v15849_v41 = vld [vmem:[#allocation20 + $0x80c] ss:$16 sps:$4 sm:$0xff]   ;;  %v7865_v30 = vsel %vm19485_vm1, %v7851_v11, %v7861_v0  ;;  %v15915_v0 = vld [vmem:[#allocation20 + $0x968] ss:$16 sps:$4 sm:$0xff]  }
 0x738   :  { %12026 = vmatpush1.bf16.msra.mxu1 %v15785_v18  ;;  %11640 = vmatprep.subr.bf16.mxu0 %v15790_v50  ;;  %v7889_v18 = vrot.slane %v7887_v13, 2  ;;  %v7892_v50 = vrot.slane %v7890_v5, 3  ;;  %v15903_v13 = vld [vmem:[#allocation20 + $0x928] ss:$16 sps:$4 sm:$0xff]   ;;  %v15908_v5 = vld [vmem:[#allocation20 + $0x944] ss:$16 sps:$4 sm:$0xff]  }
 0x739   :  { %12027 = vmatprep.subr.bf16.mxu1 %v15793_v52  ;;  %v7914_v52 = vor.u32 %v7913_v48, %v7910_v9  ;;  %v15909_v9 = vld [vmem:[#allocation20 + $0x948] ss:$16 sps:$4 sm:$0xff]   ;;  %v15914_v48 = vld [vmem:[#allocation20 + $0x964] ss:$16 sps:$4 sm:$0xff]  }
 0x73a   :  { %v7893_v46 = vor.u32 %v7892_v50, %v7889_v18  ;;  %v15923_v18 = vld [vmem:[#allocation20 + $0x98c] ss:$16 sps:$4 sm:$0xff]   ;;  %v15918_v50 = vld [vmem:[#allocation20 + $0x980] ss:$16 sps:$4 sm:$0xff]   ;;  %v15921_v11 = vld [vmem:[#allocation20 + $0x988] ss:$16 sps:$4 sm:$0xff]  }
 0x73b   :  { %11641 = vmatpush1.bf16.msra.mxu0 %v15788_v17  ;;  %v15847_v17 = vld [vmem:[#allocation20 + $0x808] ss:$16 sps:$4 sm:$0xff]  }
 0x73c   :  { %12028 = vmatpush1.bf16.msra.mxu1 %v15791_v49  ;;  %11642 = vmatprep.subr.bf16.mxu0 %v15796_v28  ;;  %v15854_v49 = vld [vmem:[#allocation20 + $0x824] ss:$16 sps:$4 sm:$0xff]   ;;  %v15857_v28 = vld [vmem:[#allocation20 + $0x82c] ss:$16 sps:$4 sm:$0xff]  }
 0x73d   :  { %12029 = vmatprep.subr.bf16.mxu1 %v15799_v24  ;;  %v7921_v24 = vsel %vm19486_vm8, %v7893_v46, %v7914_v52  ;;  %v15929_v52 = vld [vmem:[#allocation20 + $0x9ac] ss:$16 sps:$4 sm:$0xff]   ;;  %v15932_v46 = vld [vmem:[#allocation20 + $0x9c4] ss:$16 sps:$4 sm:$0xff]  }
 0x73f   :  { %11643 = vmatpush1.bf16.msra.mxu0 %v15794_v27  ;;  %v15852_v27 = vld [vmem:[#allocation20 + $0x820] ss:$16 sps:$4 sm:$0xff]  }
 0x740   :  { %12030 = vmatpush1.bf16.msra.mxu1 %v15797_v34  ;;  %11644 = vmatprep.subr.bf16.mxu0 %v15802_v43  ;;  %v15855_v34 = vld [vmem:[#allocation20 + $0x828] ss:$16 sps:$4 sm:$0xff]   ;;  %v15860_v43 = vld [vmem:[#allocation20 + $0x844] ss:$16 sps:$4 sm:$0xff]  }
 0x741   :  { %12031 = vmatprep.subr.bf16.mxu1 %v15805_v59  ;;  %v15863_v59 = vld [vmem:[#allocation20 + $0x84c] ss:$16 sps:$4 sm:$0xff]  }
 0x743   :  { %11645 = vmatpush1.bf16.msra.mxu0 %v15800_v31  ;;  %v15858_v31 = vld [vmem:[#allocation20 + $0x840] ss:$16 sps:$4 sm:$0xff]  }
 0x744   :  { %12032 = vmatpush1.bf16.msra.mxu1 %v15803_v21  ;;  %11646 = vmatprep.subr.bf16.mxu0 %v15808_v19  ;;  %v15861_v21 = vld [vmem:[#allocation20 + $0x848] ss:$16 sps:$4 sm:$0xff]   ;;  %v15866_v19 = vld [vmem:[#allocation20 + $0x864] ss:$16 sps:$4 sm:$0xff]  }
 0x745   :  { %12033 = vmatprep.subr.bf16.mxu1 %v15811_v4  ;;  %v15869_v4 = vld [vmem:[#allocation20 + $0x86c] ss:$16 sps:$4 sm:$0xff]  }
 0x747   :  { %11647 = vmatpush1.bf16.msra.mxu0 %v15806_v23  ;;  %v15864_v23 = vld [vmem:[#allocation20 + $0x860] ss:$16 sps:$4 sm:$0xff]  }
 0x748   :  { %12034 = vmatpush1.bf16.msra.mxu1 %v15809_v12  ;;  %11648 = vmatprep.subr.bf16.mxu0 %v15814_v37  ;;  %v15867_v12 = vld [vmem:[#allocation20 + $0x868] ss:$16 sps:$4 sm:$0xff]   ;;  %v15872_v37 = vld [vmem:[#allocation20 + $0x884] ss:$16 sps:$4 sm:$0xff]  }
 0x749   :  { %12035 = vmatprep.subr.bf16.mxu1 %v15817_v39  ;;  %v15875_v39 = vld [vmem:[#allocation20 + $0x88c] ss:$16 sps:$4 sm:$0xff]  }
 0x74b   :  { %11649 = vmatpush1.bf16.msra.mxu0 %v15812_v56  ;;  %v15870_v56 = vld [vmem:[#allocation20 + $0x880] ss:$16 sps:$4 sm:$0xff]  }
 0x74c   :  { %12036 = vmatpush1.bf16.msra.mxu1 %v15815_v45  ;;  %11650 = vmatprep.subr.bf16.mxu0 %v15820_v20  ;;  %v15873_v45 = vld [vmem:[#allocation20 + $0x888] ss:$16 sps:$4 sm:$0xff]   ;;  %v15878_v20 = vld [vmem:[#allocation20 + $0x8a4] ss:$16 sps:$4 sm:$0xff]  }
 0x74d   :  { %12037 = vmatprep.subr.bf16.mxu1 %v15823_v42  ;;  %v15881_v42 = vld [vmem:[#allocation20 + $0x8ac] ss:$16 sps:$4 sm:$0xff]  }
 0x74f   :  { %11651 = vmatpush1.bf16.msra.mxu0 %v15818_v36  ;;  %v15876_v36 = vld [vmem:[#allocation20 + $0x8a0] ss:$16 sps:$4 sm:$0xff]  }
 0x750   :  { %12038 = vmatpush1.bf16.msra.mxu1 %v15821_v6  ;;  %11652 = vmatprep.subr.bf16.mxu0 %v15826_v33  ;;  %v15879_v6 = vld [vmem:[#allocation20 + $0x8a8] ss:$16 sps:$4 sm:$0xff]   ;;  %v15884_v33 = vld [vmem:[#allocation20 + $0x8c4] ss:$16 sps:$4 sm:$0xff]  }
 0x751   :  { %12039 = vmatprep.subr.bf16.mxu1 %v15829_v32  ;;  %v15887_v32 = vld [vmem:[#allocation20 + $0x8cc] ss:$16 sps:$4 sm:$0xff]  }
 0x753   :  { %11653 = vmatpush1.bf16.msra.mxu0 %v15824_v57  ;;  %v15882_v57 = vld [vmem:[#allocation20 + $0x8c0] ss:$16 sps:$4 sm:$0xff]  }
 0x754   :  { %12040 = vmatpush1.bf16.msra.mxu1 %v15827_v53  ;;  %11654 = vmatprep.subr.bf16.mxu0 %v15832_v61  ;;  %v15890_v53 = vld [vmem:[#allocation20 + $0x8e4] ss:$16 sps:$4 sm:$0xff]   ;;  %v15893_v61 = vld [vmem:[#allocation20 + $0x8ec] ss:$16 sps:$4 sm:$0xff]  }
 0x755   :  { %12041 = vmatprep.subr.bf16.mxu1 %v15835_v35  ;;  %v15888_v35 = vld [vmem:[#allocation20 + $0x8e0] ss:$16 sps:$4 sm:$0xff]  }
 0x757   :  { %11655 = vmatpush1.bf16.msra.mxu0 %v15830_v60  ;;  %v15896_v60 = vld [vmem:[#allocation20 + $0x904] ss:$16 sps:$4 sm:$0xff]  }
 0x758   :  { %12042 = vmatpush1.bf16.msra.mxu1 %v15833_v51  ;;  %11656 = vmatprep.subr.bf16.mxu0 %v15838_v58  ;;  %v15897_v51 = vld [vmem:[#allocation20 + $0x908] ss:$16 sps:$4 sm:$0xff]   ;;  %v15902_v58 = vld [vmem:[#allocation20 + $0x924] ss:$16 sps:$4 sm:$0xff]  }
 0x759   :  { %12043 = vmatprep.subr.bf16.mxu1 %v15841_v62  ;;  %v15905_v62 = vld [vmem:[#allocation20 + $0x92c] ss:$16 sps:$4 sm:$0xff]  }
 0x75b   :  { %11657 = vmatpush1.bf16.msra.mxu0 %v15836_v26  ;;  %v15911_v26 = vld [vmem:[#allocation20 + $0x94c] ss:$16 sps:$4 sm:$0xff]  }
 0x75c   :  { %12044 = vmatpush1.bf16.msra.mxu1 %v15839_v54  ;;  %11669 = vmatprep.subr.bf16.mxu0 %v15846_v25  ;;  %v15917_v54 = vld [vmem:[#allocation20 + $0x96c] ss:$16 sps:$4 sm:$0xff]   ;;  %v15912_v25 = vld [vmem:[#allocation20 + $0x960] ss:$16 sps:$4 sm:$0xff]  }
 0x75d   :  { %12056 = vmatprep.subr.bf16.mxu1 %v15849_v41  ;;  %v15920_v41 = vld [vmem:[#allocation20 + $0x984] ss:$16 sps:$4 sm:$0xff]  }
 0x75e   :  { %11659 = vmatmul.mubr.bf16.vlgmr.msra.gmra.mrb[164].mxu0 %v7865_v30 }
 0x75f   :  { %12046 = vmatmul.mubr.bf16.vlgmr.msra.gmra.mrb[92].mxu1 %v7865_v30  ;;  %11670 = vmatpush1.bf16.msra.mxu0 %v15844_v8  ;;  %v15926_v8 = vld [vmem:[#allocation20 + $0x9a4] ss:$16 sps:$4 sm:$0xff]   ;;  %v15927_v30 = vld [vmem:[#allocation20 + $0x9a8] ss:$16 sps:$4 sm:$0xff]  }
 0x760   :  { %11701 = vmatprep.mubr.bf16.mxu0 %v7921_v24  ;;  %12057 = vmatpush1.bf16.msra.mxu1 %v15847_v17  ;;  %v15924_v17 = vld [vmem:[#allocation20 + $0x9a0] ss:$16 sps:$4 sm:$0xff]  }
 0x761   :  { %12088 = vmatprep.mubr.bf16.mxu1 %v7921_v24  ;;  %11671 = vmatprep.subr.bf16.mxu0 %v15854_v49  ;;  %v15935_v49 = vld [vmem:[#allocation20 + $0x9cc] ss:$16 sps:$4 sm:$0xff]   ;;  %v15933_v24 = vld [vmem:[#allocation20 + $0x9c8] ss:$16 sps:$4 sm:$0xff]  }
 0x762   :  { %12058 = vmatprep.subr.bf16.mxu1 %v15857_v28  ;;  %v15930_v28 = vld [vmem:[#allocation20 + $0x9c0] ss:$16 sps:$4 sm:$0xff]  }
 0x763   :  { %11672 = vmatpush1.bf16.msra.mxu0 %v15852_v27  ;;  %v15938_v27 = vld [vmem:[#allocation20 + $0x9e4] ss:$16 sps:$4 sm:$0xff]  }
 0x764   :  { %12059 = vmatpush1.bf16.msra.mxu1 %v15855_v34  ;;  %11673 = vmatprep.subr.bf16.mxu0 %v15860_v43  ;;  %v15941_v34 = vld [vmem:[#allocation20 + $0x9ec] ss:$16 sps:$4 sm:$0xff]   ;;  %v15936_v43 = vld [vmem:[#allocation20 + $0x9e0] ss:$16 sps:$4 sm:$0xff]  }
 0x765   :  { %12060 = vmatprep.subr.bf16.mxu1 %v15863_v59  ;;  %v15939_v59 = vld [vmem:[#allocation20 + $0x9e8] ss:$16 sps:$4 sm:$0xff]  }
 0x767   :  { %11674 = vmatpush1.bf16.msra.mxu0 %v15858_v31  ;;  %v15946_v31 = vld [vmem:[#allocation20 + $0xa04] ss:$16 sps:$4 sm:$0xff]  }
 0x768   :  { %12061 = vmatpush1.bf16.msra.mxu1 %v15861_v21  ;;  %11675 = vmatprep.subr.bf16.mxu0 %v15866_v19  ;;  %v15949_v21 = vld [vmem:[#allocation20 + $0xa0c] ss:$16 sps:$4 sm:$0xff]   ;;  %v15944_v19 = vld [vmem:[#allocation20 + $0xa00] ss:$16 sps:$4 sm:$0xff]  }
 0x769   :  { %12062 = vmatprep.subr.bf16.mxu1 %v15869_v4  ;;  %v15947_v4 = vld [vmem:[#allocation20 + $0xa08] ss:$16 sps:$4 sm:$0xff]  }
 0x76b   :  { %11676 = vmatpush1.bf16.msra.mxu0 %v15864_v23  ;;  %v15954_v23 = vld [vmem:[#allocation20 + $0xa24] ss:$16 sps:$4 sm:$0xff]  }
 0x76c   :  { %12063 = vmatpush1.bf16.msra.mxu1 %v15867_v12  ;;  %11677 = vmatprep.subr.bf16.mxu0 %v15872_v37  ;;  %v15957_v12 = vld [vmem:[#allocation20 + $0xa2c] ss:$16 sps:$4 sm:$0xff]   ;;  %v15952_v37 = vld [vmem:[#allocation20 + $0xa20] ss:$16 sps:$4 sm:$0xff]  }
 0x76d   :  { %12064 = vmatprep.subr.bf16.mxu1 %v15875_v39  ;;  %v15955_v39 = vld [vmem:[#allocation20 + $0xa28] ss:$16 sps:$4 sm:$0xff]  }
 0x76f   :  { %11678 = vmatpush1.bf16.msra.mxu0 %v15870_v56  ;;  %v15960_v56 = vld [vmem:[#allocation20 + $0xa44] ss:$16 sps:$4 sm:$0xff]  }
 0x770   :  { %12065 = vmatpush1.bf16.msra.mxu1 %v15873_v45  ;;  %11679 = vmatprep.subr.bf16.mxu0 %v15878_v20  ;;  %v15963_v45 = vld [vmem:[#allocation20 + $0xa4c] ss:$16 sps:$4 sm:$0xff]   ;;  %v15958_v20 = vld [vmem:[#allocation20 + $0xa40] ss:$16 sps:$4 sm:$0xff]  }
 0x771   :  { %12066 = vmatprep.subr.bf16.mxu1 %v15881_v42  ;;  %v15961_v42 = vld [vmem:[#allocation20 + $0xa48] ss:$16 sps:$4 sm:$0xff]  }
 0x773   :  { %11680 = vmatpush1.bf16.msra.mxu0 %v15876_v36  ;;  %v15966_v36 = vld [vmem:[#allocation20 + $0xa64] ss:$16 sps:$4 sm:$0xff]  }
 0x774   :  { %12067 = vmatpush1.bf16.msra.mxu1 %v15879_v6  ;;  %11681 = vmatprep.subr.bf16.mxu0 %v15884_v33  ;;  %v15964_v6 = vld [vmem:[#allocation20 + $0xa60] ss:$16 sps:$4 sm:$0xff]   ;;  %v15967_v33 = vld [vmem:[#allocation20 + $0xa68] ss:$16 sps:$4 sm:$0xff]  }
 0x775   :  { %12068 = vmatprep.subr.bf16.mxu1 %v15887_v32  ;;  %v15972_v32 = vld [vmem:[#allocation20 + $0xa84] ss:$16 sps:$4 sm:$0xff]  }
 0x777   :  { %11682 = vmatpush1.bf16.msra.mxu0 %v15882_v57  ;;  %v15975_v57 = vld [vmem:[#allocation20 + $0xa8c] ss:$16 sps:$4 sm:$0xff]  }
 0x778   :  { %12069 = vmatpush1.bf16.msra.mxu1 %v15885_v22  ;;  %11683 = vmatprep.subr.bf16.mxu0 %v15890_v53  ;;  %v15973_v22 = vld [vmem:[#allocation20 + $0xa88] ss:$16 sps:$4 sm:$0xff]   ;;  %v15978_v53 = vld [vmem:[#allocation20 + $0xaa4] ss:$16 sps:$4 sm:$0xff]  }
 0x779   :  { %12070 = vmatprep.subr.bf16.mxu1 %v15893_v61  ;;  %v15981_v61 = vld [vmem:[#allocation20 + $0xaac] ss:$16 sps:$4 sm:$0xff]  }
 0x77b   :  { %11684 = vmatpush1.bf16.msra.mxu0 %v15888_v35  ;;  %v15976_v35 = vld [vmem:[#allocation20 + $0xaa0] ss:$16 sps:$4 sm:$0xff]  }
 0x77c   :  { %12071 = vmatpush1.bf16.msra.mxu1 %v15891_v15  ;;  %11685 = vmatprep.subr.bf16.mxu0 %v15896_v60  ;;  %v15979_v15 = vld [vmem:[#allocation20 + $0xaa8] ss:$16 sps:$4 sm:$0xff]   ;;  %v15984_v60 = vld [vmem:[#allocation20 + $0xac4] ss:$16 sps:$4 sm:$0xff]  }
 0x77d   :  { %12072 = vmatprep.subr.bf16.mxu1 %v15899_v47  ;;  %v15987_v47 = vld [vmem:[#allocation20 + $0xacc] ss:$16 sps:$4 sm:$0xff]  }
 0x77f   :  { %11686 = vmatpush1.bf16.msra.mxu0 %v15894_v38  ;;  %v15982_v38 = vld [vmem:[#allocation20 + $0xac0] ss:$16 sps:$4 sm:$0xff]  }
 0x780   :  { %12073 = vmatpush1.bf16.msra.mxu1 %v15897_v51  ;;  %11687 = vmatprep.subr.bf16.mxu0 %v15902_v58  ;;  %v15985_v51 = vld [vmem:[#allocation20 + $0xac8] ss:$16 sps:$4 sm:$0xff]   ;;  %v15990_v58 = vld [vmem:[#allocation20 + $0xae4] ss:$16 sps:$4 sm:$0xff]  }
 0x781   :  { %12074 = vmatprep.subr.bf16.mxu1 %v15905_v62  ;;  %v15993_v62 = vld [vmem:[#allocation20 + $0xaec] ss:$16 sps:$4 sm:$0xff]  }
 0x783   :  { %11688 = vmatpush1.bf16.msra.mxu0 %v15900_v29  ;;  %v15988_v29 = vld [vmem:[#allocation20 + $0xae0] ss:$16 sps:$4 sm:$0xff]  }
 0x784   :  { %12075 = vmatpush1.bf16.msra.mxu1 %v15903_v13  ;;  %11689 = vmatprep.subr.bf16.mxu0 %v15908_v5  ;;  %v15991_v13 = vld [vmem:[#allocation20 + $0xae8] ss:$16 sps:$4 sm:$0xff]   ;;  %v15996_v5 = vld [vmem:[#allocation20 + $0xb04] ss:$16 sps:$4 sm:$0xff]  }
 0x785   :  { %12076 = vmatprep.subr.bf16.mxu1 %v15911_v26  ;;  %v15999_v26 = vld [vmem:[#allocation20 + $0xb0c] ss:$16 sps:$4 sm:$0xff]  }
 0x787   :  { %11690 = vmatpush1.bf16.msra.mxu0 %v15906_v1  ;;  %v15994_v1 = vld [vmem:[#allocation20 + $0xb00] ss:$16 sps:$4 sm:$0xff]  }
 0x788   :  { %12077 = vmatpush1.bf16.msra.mxu1 %v15909_v9  ;;  %11691 = vmatprep.subr.bf16.mxu0 %v15914_v48  ;;  %v15997_v9 = vld [vmem:[#allocation20 + $0xb08] ss:$16 sps:$4 sm:$0xff]   ;;  %v16002_v48 = vld [vmem:[#allocation20 + $0xb24] ss:$16 sps:$4 sm:$0xff]  }
 0x789   :  { %12078 = vmatprep.subr.bf16.mxu1 %v15917_v54  ;;  %v16005_v54 = vld [vmem:[#allocation20 + $0xb2c] ss:$16 sps:$4 sm:$0xff]  }
 0x78b   :  { %11692 = vmatpush1.bf16.msra.mxu0 %v15912_v25  ;;  %v16000_v25 = vld [vmem:[#allocation20 + $0xb20] ss:$16 sps:$4 sm:$0xff]  }
 0x78c   :  { %12079 = vmatpush1.bf16.msra.mxu1 %v15915_v0  ;;  %11693 = vmatprep.subr.bf16.mxu0 %v15920_v41  ;;  %v16003_v0 = vld [vmem:[#allocation20 + $0xb28] ss:$16 sps:$4 sm:$0xff]   ;;  %v16008_v41 = vld [vmem:[#allocation20 + $0xb44] ss:$16 sps:$4 sm:$0xff]  }
 0x78d   :  { %12080 = vmatprep.subr.bf16.mxu1 %v15923_v18  ;;  %v16011_v18 = vld [vmem:[#allocation20 + $0xb4c] ss:$16 sps:$4 sm:$0xff]  }
 0x78f   :  { %11694 = vmatpush1.bf16.msra.mxu0 %v15918_v50  ;;  %v16006_v50 = vld [vmem:[#allocation20 + $0xb40] ss:$16 sps:$4 sm:$0xff]  }
 0x790   :  { %12081 = vmatpush1.bf16.msra.mxu1 %v15921_v11  ;;  %11695 = vmatprep.subr.bf16.mxu0 %v15926_v8  ;;  %v16009_v11 = vld [vmem:[#allocation20 + $0xb48] ss:$16 sps:$4 sm:$0xff]   ;;  %v16014_v8 = vld [vmem:[#allocation20 + $0xb64] ss:$16 sps:$4 sm:$0xff]  }
 0x791   :  { %12082 = vmatprep.subr.bf16.mxu1 %v15929_v52  ;;  %v16017_v52 = vld [vmem:[#allocation20 + $0xb6c] ss:$16 sps:$4 sm:$0xff]  }
 0x793   :  { %11696 = vmatpush1.bf16.msra.mxu0 %v15924_v17  ;;  %v16012_v17 = vld [vmem:[#allocation20 + $0xb60] ss:$16 sps:$4 sm:$0xff]  }
 0x794   :  { %12083 = vmatpush1.bf16.msra.mxu1 %v15927_v30  ;;  %11697 = vmatprep.subr.bf16.mxu0 %v15932_v46  ;;  %v16015_v30 = vld [vmem:[#allocation20 + $0xb68] ss:$16 sps:$4 sm:$0xff]   ;;  %v16020_v46 = vld [vmem:[#allocation20 + $0xb84] ss:$16 sps:$4 sm:$0xff]  }
 0x795   :  { %12084 = vmatprep.subr.bf16.mxu1 %v15935_v49  ;;  %v16023_v49 = vld [vmem:[#allocation20 + $0xb8c] ss:$16 sps:$4 sm:$0xff]  }
 0x797   :  { %11698 = vmatpush1.bf16.msra.mxu0 %v15930_v28  ;;  %v16018_v28 = vld [vmem:[#allocation20 + $0xb80] ss:$16 sps:$4 sm:$0xff]  }
 0x798   :  { %12085 = vmatpush1.bf16.msra.mxu1 %v15933_v24  ;;  %11699 = vmatprep.subr.bf16.mxu0 %v15938_v27  ;;  %v16021_v24 = vld [vmem:[#allocation20 + $0xb88] ss:$16 sps:$4 sm:$0xff]   ;;  %v16026_v27 = vld [vmem:[#allocation20 + $0xba4] ss:$16 sps:$4 sm:$0xff]  }
 0x799   :  { %12086 = vmatprep.subr.bf16.mxu1 %v15941_v34  ;;  %v16029_v34 = vld [vmem:[#allocation20 + $0xbac] ss:$16 sps:$4 sm:$0xff]  }
 0x79b   :  { %11700 = vmatpush1.bf16.msra.mxu0 %v15936_v43  ;;  %v16024_v43 = vld [vmem:[#allocation20 + $0xba0] ss:$16 sps:$4 sm:$0xff]  }
 0x79c   :  { %12087 = vmatpush1.bf16.msra.mxu1 %v15939_v59  ;;  %11712 = vmatprep.subr.bf16.mxu0 %v15946_v31  ;;  %v16027_v59 = vld [vmem:[#allocation20 + $0xba8] ss:$16 sps:$4 sm:$0xff]   ;;  %v16032_v31 = vld [vmem:[#allocation20 + $0xbc4] ss:$16 sps:$4 sm:$0xff]  }
 0x79d   :  { %12099 = vmatprep.subr.bf16.mxu1 %v15949_v21  ;;  %v16035_v21 = vld [vmem:[#allocation20 + $0xbcc] ss:$16 sps:$4 sm:$0xff]  }
 0x79e   :  { %11702 = vmatmul.mubr.bf16.vlgmr.msra.gmra.mrb[164].mxu0 %v18990_v44 }
 0x79f   :  { %12089 = vmatmul.mubr.bf16.vlgmr.msra.gmra.mrb[92].mxu1 %v18990_v44  ;;  %11713 = vmatpush1.bf16.msra.mxu0 %v15944_v19  ;;  %v15969_v44 = vld [vmem:[#allocation20 + $0xa6c] ss:$16 sps:$4 sm:$0xff]   ;;  %v16030_v19 = vld [vmem:[#allocation20 + $0xbc0] ss:$16 sps:$4 sm:$0xff]  }
 0x7a0   :  { %11744 = vmatprep.mubr.bf16.mxu0 %v18984_v63  ;;  %12100 = vmatpush1.bf16.msra.mxu1 %v15947_v4  ;;  %v16033_v4 = vld [vmem:[#allocation20 + $0xbc8] ss:$16 sps:$4 sm:$0xff]  }
 0x7a1   :  { %12131 = vmatprep.mubr.bf16.mxu1 %v18984_v63  ;;  %11714 = vmatprep.subr.bf16.mxu0 %v15954_v23  ;;  %v15970_v63 = vld [vmem:[#allocation20 + $0xa80] ss:$16 sps:$4 sm:$0xff]   ;;  %v16038_v23 = vld [vmem:[#allocation20 + $0xbe4] ss:$16 sps:$4 sm:$0xff]  }
 0x7a2   :  { %12101 = vmatprep.subr.bf16.mxu1 %v15957_v12  ;;  %v16041_v12 = vld [vmem:[#allocation20 + $0xbec] ss:$16 sps:$4 sm:$0xff]  }
 0x7a3   :  { %11715 = vmatpush1.bf16.msra.mxu0 %v15952_v37  ;;  %v16036_v37 = vld [vmem:[#allocation20 + $0xbe0] ss:$16 sps:$4 sm:$0xff]  }
 0x7a4   :  { %12102 = vmatpush1.bf16.msra.mxu1 %v15955_v39  ;;  %11716 = vmatprep.subr.bf16.mxu0 %v15960_v56  ;;  %v16039_v39 = vld [vmem:[#allocation20 + $0xbe8] ss:$16 sps:$4 sm:$0xff]   ;;  %v16046_v56 = vld [vmem:[#allocation20 + $0xc04] ss:$16 sps:$4 sm:$0xff]  }
 0x7a5   :  { %12103 = vmatprep.subr.bf16.mxu1 %v15963_v45  ;;  %v16049_v45 = vld [vmem:[#allocation20 + $0xc0c] ss:$16 sps:$4 sm:$0xff]  }
 0x7a7   :  { %11717 = vmatpush1.bf16.msra.mxu0 %v15958_v20  ;;  %v16044_v20 = vld [vmem:[#allocation20 + $0xc00] ss:$16 sps:$4 sm:$0xff]  }
 0x7a8   :  { %12104 = vmatpush1.bf16.msra.mxu1 %v15961_v42  ;;  %11718 = vmatprep.subr.bf16.mxu0 %v15966_v36  ;;  %v19036_v42 = vld [vmem:[#allocation4 + $0x20] sm:$0xff] }
 0x7a9   :  { %12105 = vmatprep.subr.bf16.mxu1 %v15969_v44  ;;  %v13584_v36 = vcombine.high %v19036_v42, %v19036_v42  ;;  %v16047_v44 = vld [vmem:[#allocation20 + $0xc08] ss:$16 sps:$4 sm:$0xff]  }
 0x7ab   :  { %11719 = vmatpush1.bf16.msra.mxu0 %v15964_v6  ;;  %v19040_v6 = vld [vmem:[#allocation4 + $0x8] sm:$0xff] }
 0x7ac   :  { %12106 = vmatpush1.bf16.msra.mxu1 %v15967_v33  ;;  %11720 = vmatprep.subr.bf16.mxu0 %v15972_v32  ;;  %v13582_v33 = vcombine.high %v19040_v6, %v19040_v6  ;;  %v16054_v32 = vld [vmem:[#allocation20 + $0xc24] ss:$16 sps:$4 sm:$0xff]  }
 0x7ad   :  { %12107 = vmatprep.subr.bf16.mxu1 %v15975_v57  ;;  %v16057_v57 = vld [vmem:[#allocation20 + $0xc2c] ss:$16 sps:$4 sm:$0xff]  }
 0x7af   :  { %11721 = vmatpush1.bf16.msra.mxu0 %v15970_v63  ;;  %v7965_v63 = vsel %vm19487_vm9, %v13582_v33, %v13584_v36  ;;  %v16389_v36 = vld [vmem:[#allocation4 + $0x28] sm:$0x11]  ;;  %v16127_v33 = vld [vmem:[#allocation20 + $0xda8] ss:$16 sps:$4 sm:$0xff]  }
 0x7b0   :  { %12108 = vmatpush1.bf16.msra.mxu1 %v15973_v22  ;;  %11722 = vmatprep.subr.bf16.mxu0 %v15978_v53  ;;  %v16052_v22 = vld [vmem:[#allocation20 + $0xc20] ss:$16 sps:$4 sm:$0xff]   ;;  %v16055_v53 = vld [vmem:[#allocation20 + $0xc28] ss:$16 sps:$4 sm:$0xff]  }
 0x7b1   :  { %12109 = vmatprep.subr.bf16.mxu1 %v15981_v61  ;;  %v16060_v61 = vld [vmem:[#allocation20 + $0xc44] ss:$16 sps:$4 sm:$0xff]  }
 0x7b3   :  { %11723 = vmatpush1.bf16.msra.mxu0 %v15976_v35  ;;  %v16063_v35 = vld [vmem:[#allocation20 + $0xc4c] ss:$16 sps:$4 sm:$0xff]  }
 0x7b4   :  { %12110 = vmatpush1.bf16.msra.mxu1 %v15979_v15  ;;  %11724 = vmatprep.subr.bf16.mxu0 %v15984_v60  ;;  %v16058_v15 = vld [vmem:[#allocation20 + $0xc40] ss:$16 sps:$4 sm:$0xff]   ;;  %v16061_v60 = vld [vmem:[#allocation20 + $0xc48] ss:$16 sps:$4 sm:$0xff]  }
 0x7b5   :  { %12111 = vmatprep.subr.bf16.mxu1 %v15987_v47  ;;  %v16066_v47 = vld [vmem:[#allocation20 + $0xc64] ss:$16 sps:$4 sm:$0xff]  }
 0x7b7   :  { %11725 = vmatpush1.bf16.msra.mxu0 %v15982_v38  ;;  %v16064_v38 = vld [vmem:[#allocation20 + $0xc60] ss:$16 sps:$4 sm:$0xff]  }
 0x7b8   :  { %12112 = vmatpush1.bf16.msra.mxu1 %v15985_v51  ;;  %11726 = vmatprep.subr.bf16.mxu0 %v15990_v58  ;;  %v16067_v51 = vld [vmem:[#allocation20 + $0xc68] ss:$16 sps:$4 sm:$0xff]   ;;  %v16072_v58 = vld [vmem:[#allocation20 + $0xc84] ss:$16 sps:$4 sm:$0xff]  }
 0x7b9   :  { %12113 = vmatprep.subr.bf16.mxu1 %v15993_v62  ;;  %v16075_v62 = vld [vmem:[#allocation20 + $0xc8c] ss:$16 sps:$4 sm:$0xff]  }
 0x7bb   :  { %11727 = vmatpush1.bf16.msra.mxu0 %v15988_v29  ;;  %v16070_v29 = vld [vmem:[#allocation20 + $0xc80] ss:$16 sps:$4 sm:$0xff]  }
 0x7bc   :  { %12114 = vmatpush1.bf16.msra.mxu1 %v15991_v13  ;;  %11728 = vmatprep.subr.bf16.mxu0 %v15996_v5  ;;  %v16073_v13 = vld [vmem:[#allocation20 + $0xc88] ss:$16 sps:$4 sm:$0xff]   ;;  %v16078_v5 = vld [vmem:[#allocation20 + $0xca4] ss:$16 sps:$4 sm:$0xff]  }
 0x7bd   :  { %12115 = vmatprep.subr.bf16.mxu1 %v15999_v26  ;;  %v16081_v26 = vld [vmem:[#allocation20 + $0xcac] ss:$16 sps:$4 sm:$0xff]  }
 0x7bf   :  { %11729 = vmatpush1.bf16.msra.mxu0 %v15994_v1  ;;  %v16076_v1 = vld [vmem:[#allocation20 + $0xca0] ss:$16 sps:$4 sm:$0xff]  }
 0x7c0   :  { %12116 = vmatpush1.bf16.msra.mxu1 %v15997_v9  ;;  %11730 = vmatprep.subr.bf16.mxu0 %v16002_v48  ;;  %v16079_v9 = vld [vmem:[#allocation20 + $0xca8] ss:$16 sps:$4 sm:$0xff]   ;;  %v16084_v48 = vld [vmem:[#allocation20 + $0xcc4] ss:$16 sps:$4 sm:$0xff]  }
 0x7c1   :  { %12117 = vmatprep.subr.bf16.mxu1 %v16005_v54  ;;  %v16087_v54 = vld [vmem:[#allocation20 + $0xccc] ss:$16 sps:$4 sm:$0xff]  }
 0x7c3   :  { %11731 = vmatpush1.bf16.msra.mxu0 %v16000_v25  ;;  %v16082_v25 = vld [vmem:[#allocation20 + $0xcc0] ss:$16 sps:$4 sm:$0xff]  }
 0x7c4   :  { %12118 = vmatpush1.bf16.msra.mxu1 %v16003_v0  ;;  %11732 = vmatprep.subr.bf16.mxu0 %v16008_v41  ;;  %v16085_v0 = vld [vmem:[#allocation20 + $0xcc8] ss:$16 sps:$4 sm:$0xff]   ;;  %v16090_v41 = vld [vmem:[#allocation20 + $0xce4] ss:$16 sps:$4 sm:$0xff]  }
 0x7c5   :  { %12119 = vmatprep.subr.bf16.mxu1 %v16011_v18  ;;  %v16093_v18 = vld [vmem:[#allocation20 + $0xcec] ss:$16 sps:$4 sm:$0xff]  }
 0x7c7   :  { %11733 = vmatpush1.bf16.msra.mxu0 %v16006_v50  ;;  %v16088_v50 = vld [vmem:[#allocation20 + $0xce0] ss:$16 sps:$4 sm:$0xff]  }
 0x7c8   :  { %12120 = vmatpush1.bf16.msra.mxu1 %v16009_v11  ;;  %11734 = vmatprep.subr.bf16.mxu0 %v16014_v8  ;;  %v16091_v11 = vld [vmem:[#allocation20 + $0xce8] ss:$16 sps:$4 sm:$0xff]   ;;  %v16096_v8 = vld [vmem:[#allocation20 + $0xd04] ss:$16 sps:$4 sm:$0xff]  }
 0x7c9   :  { %12121 = vmatprep.subr.bf16.mxu1 %v16017_v52  ;;  %v16099_v52 = vld [vmem:[#allocation20 + $0xd0c] ss:$16 sps:$4 sm:$0xff]  }
 0x7cb   :  { %11735 = vmatpush1.bf16.msra.mxu0 %v16012_v17  ;;  %v16094_v17 = vld [vmem:[#allocation20 + $0xd00] ss:$16 sps:$4 sm:$0xff]  }
 0x7cc   :  { %12122 = vmatpush1.bf16.msra.mxu1 %v16015_v30  ;;  %11736 = vmatprep.subr.bf16.mxu0 %v16020_v46  ;;  %v16097_v30 = vld [vmem:[#allocation20 + $0xd08] ss:$16 sps:$4 sm:$0xff]   ;;  %v16102_v46 = vld [vmem:[#allocation20 + $0xd24] ss:$16 sps:$4 sm:$0xff]  }
 0x7cd   :  { %12123 = vmatprep.subr.bf16.mxu1 %v16023_v49  ;;  %v16105_v49 = vld [vmem:[#allocation20 + $0xd2c] ss:$16 sps:$4 sm:$0xff]  }
 0x7cf   :  { %11737 = vmatpush1.bf16.msra.mxu0 %v16018_v28  ;;  %v16100_v28 = vld [vmem:[#allocation20 + $0xd20] ss:$16 sps:$4 sm:$0xff]  }
 0x7d0   :  { %12124 = vmatpush1.bf16.msra.mxu1 %v16021_v24  ;;  %11738 = vmatprep.subr.bf16.mxu0 %v16026_v27  ;;  %v16103_v24 = vld [vmem:[#allocation20 + $0xd28] ss:$16 sps:$4 sm:$0xff]   ;;  %v16108_v27 = vld [vmem:[#allocation20 + $0xd44] ss:$16 sps:$4 sm:$0xff]  }
 0x7d1   :  { %12125 = vmatprep.subr.bf16.mxu1 %v16029_v34  ;;  %v16111_v34 = vld [vmem:[#allocation20 + $0xd4c] ss:$16 sps:$4 sm:$0xff]  }
 0x7d3   :  { %11739 = vmatpush1.bf16.msra.mxu0 %v16024_v43  ;;  %v16106_v43 = vld [vmem:[#allocation20 + $0xd40] ss:$16 sps:$4 sm:$0xff]  }
 0x7d4   :  { %12126 = vmatpush1.bf16.msra.mxu1 %v16027_v59  ;;  %11740 = vmatprep.subr.bf16.mxu0 %v16032_v31  ;;  %v16109_v59 = vld [vmem:[#allocation20 + $0xd48] ss:$16 sps:$4 sm:$0xff]   ;;  %v16114_v31 = vld [vmem:[#allocation20 + $0xd64] ss:$16 sps:$4 sm:$0xff]  }
 0x7d5   :  { %12127 = vmatprep.subr.bf16.mxu1 %v16035_v21  ;;  %v16117_v21 = vld [vmem:[#allocation20 + $0xd6c] ss:$16 sps:$4 sm:$0xff]  }
 0x7d7   :  { %11741 = vmatpush1.bf16.msra.mxu0 %v16030_v19  ;;  %v16112_v19 = vld [vmem:[#allocation20 + $0xd60] ss:$16 sps:$4 sm:$0xff]  }
 0x7d8   :  { %12128 = vmatpush1.bf16.msra.mxu1 %v16033_v4  ;;  %11742 = vmatprep.subr.bf16.mxu0 %v16038_v23  ;;  %v16115_v4 = vld [vmem:[#allocation20 + $0xd68] ss:$16 sps:$4 sm:$0xff]   ;;  %v16120_v23 = vld [vmem:[#allocation20 + $0xd84] ss:$16 sps:$4 sm:$0xff]  }
 0x7d9   :  { %12129 = vmatprep.subr.bf16.mxu1 %v16041_v12  ;;  %v16123_v12 = vld [vmem:[#allocation20 + $0xd8c] ss:$16 sps:$4 sm:$0xff]  }
 0x7db   :  { %11743 = vmatpush1.bf16.msra.mxu0 %v16036_v37  ;;  %v16118_v37 = vld [vmem:[#allocation20 + $0xd80] ss:$16 sps:$4 sm:$0xff]  }
 0x7dc   :  { %12130 = vmatpush1.bf16.msra.mxu1 %v16039_v39  ;;  %11755 = vmatprep.subr.bf16.mxu0 %v16046_v56  ;;  %v16121_v39 = vld [vmem:[#allocation20 + $0xd88] ss:$16 sps:$4 sm:$0xff]   ;;  %v16126_v56 = vld [vmem:[#allocation20 + $0xda4] ss:$16 sps:$4 sm:$0xff]  }
 0x7dd   :  { %12142 = vmatprep.subr.bf16.mxu1 %v16049_v45  ;;  %v16129_v45 = vld [vmem:[#allocation20 + $0xdac] ss:$16 sps:$4 sm:$0xff]  }
 0x7de   :  { %11745 = vmatmul.mubr.bf16.vlgmr.msra.gmra.mrb[164].mxu0 %v18987_v16 }
 0x7df   :  { %12132 = vmatmul.mubr.bf16.vlgmr.msra.gmra.mrb[92].mxu1 %v18987_v16  ;;  %11756 = vmatpush1.bf16.msra.mxu0 %v16044_v20  ;;  %v16069_v16 = vld [vmem:[#allocation20 + $0xc6c] ss:$16 sps:$4 sm:$0xff]   ;;  %v16124_v20 = vld [vmem:[#allocation20 + $0xda0] ss:$16 sps:$4 sm:$0xff]  }
 0x7e0   :  { %11787 = vmatprep.mubr.bf16.mxu0 %v7965_v63  ;;  %12143 = vmatpush1.bf16.msra.mxu1 %v16047_v44  ;;  %v13588_v44 = vcombine.high %v19036_v42, %v16389_v36  ;;  %v16191_v36 = vld [vmem:[#allocation20 + $0xee8] ss:$16 sps:$4 sm:$0xff]  }
 0x7e1   :  { %12174 = vmatprep.mubr.bf16.mxu1 %v7965_v63  ;;  %11757 = vmatprep.subr.bf16.mxu0 %v16054_v32  ;;  %v16132_v32 = vld [vmem:[#allocation20 + $0xdc4] ss:$16 sps:$4 sm:$0xff]  }
 0x7e2   :  { %12144 = vmatprep.subr.bf16.mxu1 %v16057_v57  ;;  %v16135_v57 = vld [vmem:[#allocation20 + $0xdcc] ss:$16 sps:$4 sm:$0xff]   ;;  %v16390_v63 = vld [vmem:[#allocation4 + $0x10] sm:$0x11] }
 0x7e3   :  { %11758 = vmatpush1.bf16.msra.mxu0 %v16052_v22  ;;  %v13586_v22 = vcombine.high %v19040_v6, %v16390_v63  ;;  %v16202_v63 = vld [vmem:[#allocation20 + $0xf24] ss:$16 sps:$4 sm:$0xff]  }
 0x7e4   :  { %12145 = vmatpush1.bf16.msra.mxu1 %v16055_v53  ;;  %11759 = vmatprep.subr.bf16.mxu0 %v16060_v61  ;;  %v16130_v53 = vld [vmem:[#allocation20 + $0xdc0] ss:$16 sps:$4 sm:$0xff]   ;;  %v8002_v61 = vshrl.u32 %v13588_v44, 16 }
 0x7e5   :  { %12146 = vmatprep.subr.bf16.mxu1 %v16063_v35  ;;  %v8005_v35 = vshll.u32 %v13588_v44, 16  ;;  %v16196_v44 = vld [vmem:[#allocation20 + $0xf04] ss:$16 sps:$4 sm:$0xff]  }
 0x7e7   :  { %11760 = vmatpush1.bf16.msra.mxu0 %v16058_v15  ;;  %v16133_v15 = vld [vmem:[#allocation20 + $0xdc8] ss:$16 sps:$4 sm:$0xff]  }
 0x7e8   :  { %12147 = vmatpush1.bf16.msra.mxu1 %v16061_v60  ;;  %11761 = vmatprep.subr.bf16.mxu0 %v16066_v47  ;;  %v16138_v60 = vld [vmem:[#allocation20 + $0xde4] ss:$16 sps:$4 sm:$0xff]   ;;  %v16141_v47 = vld [vmem:[#allocation20 + $0xdec] ss:$16 sps:$4 sm:$0xff]  }
 0x7e9   :  { %12148 = vmatprep.subr.bf16.mxu1 %v16069_v16  ;;  %v7984_v16 = vshll.u32 %v13586_v22, 16 }
 0x7eb   :  { %11762 = vmatpush1.bf16.msra.mxu0 %v16064_v38  ;;  %v16136_v38 = vld [vmem:[#allocation20 + $0xde0] ss:$16 sps:$4 sm:$0xff]  }
 0x7ec   :  { %12149 = vmatpush1.bf16.msra.mxu1 %v16067_v51  ;;  %11763 = vmatprep.subr.bf16.mxu0 %v16072_v58  ;;  %v8004_v51 = vrot.slane %v8002_v61, 4  ;;  %v8007_v58 = vrot.slane %v8005_v35, 5  ;;  %v16203_v61 = vld [vmem:[#allocation20 + $0xf28] ss:$16 sps:$4 sm:$0xff]   ;;  %v16208_v35 = vld [vmem:[#allocation20 + $0xf44] ss:$16 sps:$4 sm:$0xff]  }
 0x7ed   :  { %12150 = vmatprep.subr.bf16.mxu1 %v16075_v62  ;;  %v16139_v62 = vld [vmem:[#allocation20 + $0xde8] ss:$16 sps:$4 sm:$0xff]  }
 0x7ef   :  { %11764 = vmatpush1.bf16.msra.mxu0 %v16070_v29  ;;  %v16146_v29 = vld [vmem:[#allocation20 + $0xe04] ss:$16 sps:$4 sm:$0xff]  }
 0x7f0   :  { %12151 = vmatpush1.bf16.msra.mxu1 %v16073_v13  ;;  %11765 = vmatprep.subr.bf16.mxu0 %v16078_v5  ;;  %v13583_v13 = vcombine.low %v19036_v42, %v19036_v42  ;;  %v16149_v5 = vld [vmem:[#allocation20 + $0xe0c] ss:$16 sps:$4 sm:$0xff]  }
 0x7f1   :  { %12152 = vmatprep.subr.bf16.mxu1 %v16081_v26  ;;  %v7986_v26 = vrot.slane %v7984_v16, 1  ;;  %v16214_v16 = vld [vmem:[#allocation20 + $0xf64] ss:$16 sps:$4 sm:$0xff]  }
 0x7f3   :  { %11766 = vmatpush1.bf16.msra.mxu0 %v16076_v1  ;;  %v13581_v1 = vcombine.low %v19040_v6, %v19040_v6  ;;  %v16155_v6 = vld [vmem:[#allocation20 + $0xe28] ss:$16 sps:$4 sm:$0xff]  }
 0x7f4   :  { %12153 = vmatpush1.bf16.msra.mxu1 %v16079_v9  ;;  %11767 = vmatprep.subr.bf16.mxu0 %v16084_v48  ;;  %v16144_v9 = vld [vmem:[#allocation20 + $0xe00] ss:$16 sps:$4 sm:$0xff]   ;;  %v7982_v48 = vshrl.u32 %v13586_v22, 16  ;;  %v16205_v22 = vld [vmem:[#allocation20 + $0xf2c] ss:$16 sps:$4 sm:$0xff]  }
 0x7f5   :  { %12154 = vmatprep.subr.bf16.mxu1 %v16087_v54  ;;  %v8008_v54 = vor.u32 %v8007_v58, %v8004_v51  ;;  %v16212_v51 = vld [vmem:[#allocation20 + $0xf60] ss:$16 sps:$4 sm:$0xff]   ;;  %v16215_v58 = vld [vmem:[#allocation20 + $0xf68] ss:$16 sps:$4 sm:$0xff]  }
 0x7f7   :  { %11768 = vmatpush1.bf16.msra.mxu0 %v16082_v25  ;;  %v16147_v25 = vld [vmem:[#allocation20 + $0xe08] ss:$16 sps:$4 sm:$0xff]  }
 0x7f8   :  { %12155 = vmatpush1.bf16.msra.mxu1 %v16085_v0  ;;  %11769 = vmatprep.subr.bf16.mxu0 %v16090_v41  ;;  %v7961_v0 = vsel %vm19488_vm7, %v13581_v1, %v13583_v13  ;;  %v7987_v41 = vor.u32 %v7986_v26, %v7982_v48  ;;  %v16218_v13 = vld [vmem:[#allocation20 + $0xf80] ss:$16 sps:$4 sm:$0xff]   ;;  %v16226_v26 = vld [vmem:[#allocation20 + $0xfa4] ss:$16 sps:$4 sm:$0xff]   ;;  %v16229_v1 = vld [vmem:[#allocation20 + $0xfac] ss:$16 sps:$4 sm:$0xff]  }
 0x7f9   :  { %12156 = vmatprep.subr.bf16.mxu1 %v16093_v18  ;;  %v16154_v18 = vld [vmem:[#allocation20 + $0xe24] ss:$16 sps:$4 sm:$0xff]   ;;  %v16227_v48 = vld [vmem:[#allocation20 + $0xfa8] ss:$16 sps:$4 sm:$0xff]  }
 0x7fa   :  { %v8015_v42 = vsel %vm19489_vm10, %v7987_v41, %v8008_v54  ;;  %v16232_v54 = vld [vmem:[#allocation20 + $0xfc4] ss:$16 sps:$4 sm:$0xff]   ;;  %v16233_v41 = vld [vmem:[#allocation20 + $0xfc8] ss:$16 sps:$4 sm:$0xff]  }
 0x7fb   :  { %11770 = vmatpush1.bf16.msra.mxu0 %v16088_v50  ;;  %v16157_v50 = vld [vmem:[#allocation20 + $0xe2c] ss:$16 sps:$4 sm:$0xff]  }
 0x7fc   :  { %12157 = vmatpush1.bf16.msra.mxu1 %v16091_v11  ;;  %11771 = vmatprep.subr.bf16.mxu0 %v16096_v8  ;;  %v16152_v11 = vld [vmem:[#allocation20 + $0xe20] ss:$16 sps:$4 sm:$0xff]   ;;  %v16160_v8 = vld [vmem:[#allocation20 + $0xe44] ss:$16 sps:$4 sm:$0xff]  }
 0x7fd   :  { %12158 = vmatprep.subr.bf16.mxu1 %v16099_v52  ;;  %v16163_v52 = vld [vmem:[#allocation20 + $0xe4c] ss:$16 sps:$4 sm:$0xff]  }
 0x7ff   :  { %11772 = vmatpush1.bf16.msra.mxu0 %v16094_v17  ;;  %v16158_v17 = vld [vmem:[#allocation20 + $0xe40] ss:$16 sps:$4 sm:$0xff]  }
 0x800   :  { %12159 = vmatpush1.bf16.msra.mxu1 %v16097_v30  ;;  %11773 = vmatprep.subr.bf16.mxu0 %v16102_v46  ;;  %v16161_v30 = vld [vmem:[#allocation20 + $0xe48] ss:$16 sps:$4 sm:$0xff]   ;;  %v16166_v46 = vld [vmem:[#allocation20 + $0xe64] ss:$16 sps:$4 sm:$0xff]  }
 0x801   :  { %12160 = vmatprep.subr.bf16.mxu1 %v16105_v49  ;;  %v16169_v49 = vld [vmem:[#allocation20 + $0xe6c] ss:$16 sps:$4 sm:$0xff]  }
 0x803   :  { %11774 = vmatpush1.bf16.msra.mxu0 %v16100_v28  ;;  %v16164_v28 = vld [vmem:[#allocation20 + $0xe60] ss:$16 sps:$4 sm:$0xff]  }
 0x804   :  { %12161 = vmatpush1.bf16.msra.mxu1 %v16103_v24  ;;  %11775 = vmatprep.subr.bf16.mxu0 %v16108_v27  ;;  %v16167_v24 = vld [vmem:[#allocation20 + $0xe68] ss:$16 sps:$4 sm:$0xff]   ;;  %v16172_v27 = vld [vmem:[#allocation20 + $0xe84] ss:$16 sps:$4 sm:$0xff]  }
 0x805   :  { %12162 = vmatprep.subr.bf16.mxu1 %v16111_v34  ;;  %v16175_v34 = vld [vmem:[#allocation20 + $0xe8c] ss:$16 sps:$4 sm:$0xff]  }
 0x807   :  { %11776 = vmatpush1.bf16.msra.mxu0 %v16106_v43  ;;  %v16170_v43 = vld [vmem:[#allocation20 + $0xe80] ss:$16 sps:$4 sm:$0xff]  }
 0x808   :  { %12163 = vmatpush1.bf16.msra.mxu1 %v16109_v59  ;;  %11777 = vmatprep.subr.bf16.mxu0 %v16114_v31  ;;  %v16173_v59 = vld [vmem:[#allocation20 + $0xe88] ss:$16 sps:$4 sm:$0xff]   ;;  %v16178_v31 = vld [vmem:[#allocation20 + $0xea4] ss:$16 sps:$4 sm:$0xff]  }
 0x809   :  { %12164 = vmatprep.subr.bf16.mxu1 %v16117_v21  ;;  %v16181_v21 = vld [vmem:[#allocation20 + $0xeac] ss:$16 sps:$4 sm:$0xff]  }
 0x80b   :  { %11778 = vmatpush1.bf16.msra.mxu0 %v16112_v19  ;;  %v16176_v19 = vld [vmem:[#allocation20 + $0xea0] ss:$16 sps:$4 sm:$0xff]  }
 0x80c   :  { %12165 = vmatpush1.bf16.msra.mxu1 %v16115_v4  ;;  %11779 = vmatprep.subr.bf16.mxu0 %v16120_v23  ;;  %v16179_v4 = vld [vmem:[#allocation20 + $0xea8] ss:$16 sps:$4 sm:$0xff]   ;;  %v16184_v23 = vld [vmem:[#allocation20 + $0xec4] ss:$16 sps:$4 sm:$0xff]  }
 0x80d   :  { %12166 = vmatprep.subr.bf16.mxu1 %v16123_v12  ;;  %v16187_v12 = vld [vmem:[#allocation20 + $0xecc] ss:$16 sps:$4 sm:$0xff]  }
 0x80f   :  { %11780 = vmatpush1.bf16.msra.mxu0 %v16118_v37  ;;  %v16182_v37 = vld [vmem:[#allocation20 + $0xec0] ss:$16 sps:$4 sm:$0xff]  }
 0x810   :  { %12167 = vmatpush1.bf16.msra.mxu1 %v16121_v39  ;;  %11781 = vmatprep.subr.bf16.mxu0 %v16126_v56  ;;  %v16185_v39 = vld [vmem:[#allocation20 + $0xec8] ss:$16 sps:$4 sm:$0xff]   ;;  %v16190_v56 = vld [vmem:[#allocation20 + $0xee4] ss:$16 sps:$4 sm:$0xff]  }
 0x811   :  { %12168 = vmatprep.subr.bf16.mxu1 %v16129_v45  ;;  %v16193_v45 = vld [vmem:[#allocation20 + $0xeec] ss:$16 sps:$4 sm:$0xff]  }
 0x813   :  { %11782 = vmatpush1.bf16.msra.mxu0 %v16124_v20  ;;  %v16188_v20 = vld [vmem:[#allocation20 + $0xee0] ss:$16 sps:$4 sm:$0xff]  }
 0x814   :  { %12169 = vmatpush1.bf16.msra.mxu1 %v16127_v33  ;;  %11783 = vmatprep.subr.bf16.mxu0 %v16132_v32  ;;  %v16199_v33 = vld [vmem:[#allocation20 + $0xf0c] ss:$16 sps:$4 sm:$0xff]   ;;  %v16194_v32 = vld [vmem:[#allocation20 + $0xf00] ss:$16 sps:$4 sm:$0xff]  }
 0x815   :  { %12170 = vmatprep.subr.bf16.mxu1 %v16135_v57  ;;  %v16197_v57 = vld [vmem:[#allocation20 + $0xf08] ss:$16 sps:$4 sm:$0xff]  }
 0x817   :  { %11784 = vmatpush1.bf16.msra.mxu0 %v16130_v53  ;;  %v16200_v53 = vld [vmem:[#allocation20 + $0xf20] ss:$16 sps:$4 sm:$0xff]  }
 0x818   :  { %12171 = vmatpush1.bf16.msra.mxu1 %v16133_v15  ;;  %11785 = vmatprep.subr.bf16.mxu0 %v16138_v60  ;;  %v16211_v15 = vld [vmem:[#allocation20 + $0xf4c] ss:$16 sps:$4 sm:$0xff]   ;;  %v16206_v60 = vld [vmem:[#allocation20 + $0xf40] ss:$16 sps:$4 sm:$0xff]  }
 0x819   :  { %12172 = vmatprep.subr.bf16.mxu1 %v16141_v47  ;;  %v16209_v47 = vld [vmem:[#allocation20 + $0xf48] ss:$16 sps:$4 sm:$0xff]  }
 0x81b   :  { %11786 = vmatpush1.bf16.msra.mxu0 %v16136_v38  ;;  %v16217_v38 = vld [vmem:[#allocation20 + $0xf6c] ss:$16 sps:$4 sm:$0xff]  }
 0x81c   :  { %12173 = vmatpush1.bf16.msra.mxu1 %v16139_v62  ;;  %11798 = vmatprep.subr.bf16.mxu0 %v16146_v29  ;;  %v16220_v62 = vld [vmem:[#allocation20 + $0xf84] ss:$16 sps:$4 sm:$0xff]   ;;  %v16223_v29 = vld [vmem:[#allocation20 + $0xf8c] ss:$16 sps:$4 sm:$0xff]  }
 0x81d   :  { %12185 = vmatprep.subr.bf16.mxu1 %v16149_v5  ;;  %v16221_v5 = vld [vmem:[#allocation20 + $0xf88] ss:$16 sps:$4 sm:$0xff]  }
 0x81e   :  { %11788 = vmatmul.mubr.bf16.vlgmr.msra.gmra.mrb[164].mxu0 %v7961_v0 }
 0x81f   :  { %12175 = vmatmul.mubr.bf16.vlgmr.msra.gmra.mrb[92].mxu1 %v7961_v0  ;;  %11799 = vmatpush1.bf16.msra.mxu0 %v16144_v9  ;;  %v16224_v9 = vld [vmem:[#allocation20 + $0xfa0] ss:$16 sps:$4 sm:$0xff]  }
 0x820   :  { %11830 = vmatprep.mubr.bf16.mxu0 %v8015_v42  ;;  %12186 = vmatpush1.bf16.msra.mxu1 %v16147_v25  ;;  %v16235_v25 = vld [vmem:[#allocation20 + $0xfcc] ss:$16 sps:$4 sm:$0xff]   ;;  %v16230_v0 = vld [vmem:[#allocation20 + $0xfc0] ss:$16 sps:$4 sm:$0xff]  }
 0x821   :  { %12217 = vmatprep.mubr.bf16.mxu1 %v8015_v42  ;;  %11800 = vmatprep.subr.bf16.mxu0 %v16154_v18  ;;  %v16238_v18 = vld [vmem:[#allocation20 + $0xfe4] ss:$16 sps:$4 sm:$0xff]   ;;  %v16236_v42 = vld [vmem:[#allocation20 + $0xfe0] ss:$16 sps:$4 sm:$0xff]  }
 0x822   :  { %12187 = vmatprep.subr.bf16.mxu1 %v16157_v50  ;;  %v16241_v50 = vld [vmem:[#allocation20 + $0xfec] ss:$16 sps:$4 sm:$0xff]  }
 0x823   :  { %11801 = vmatpush1.bf16.msra.mxu0 %v16152_v11  ;;  %v16239_v11 = vld [vmem:[#allocation20 + $0xfe8] ss:$16 sps:$4 sm:$0xff]  }
 0x824   :  { %12188 = vmatpush1.bf16.msra.mxu1 %v16155_v6  ;;  %11802 = vmatprep.subr.bf16.mxu0 %v16160_v8  ;;  %v16246_v6 = vld [vmem:[#allocation20 + $0x1004] ss:$16 sps:$4 sm:$0xff]   ;;  %v16249_v8 = vld [vmem:[#allocation20 + $0x100c] ss:$16 sps:$4 sm:$0xff]  }
 0x825   :  { %12189 = vmatprep.subr.bf16.mxu1 %v16163_v52  ;;  %v16244_v52 = vld [vmem:[#allocation20 + $0x1000] ss:$16 sps:$4 sm:$0xff]  }
 0x827   :  { %11803 = vmatpush1.bf16.msra.mxu0 %v16158_v17  ;;  %v16247_v17 = vld [vmem:[#allocation20 + $0x1008] ss:$16 sps:$4 sm:$0xff]  }
 0x828   :  { %12190 = vmatpush1.bf16.msra.mxu1 %v16161_v30  ;;  %11804 = vmatprep.subr.bf16.mxu0 %v16166_v46  ;;  %v16254_v30 = vld [vmem:[#allocation20 + $0x1024] ss:$16 sps:$4 sm:$0xff]   ;;  %v16257_v46 = vld [vmem:[#allocation20 + $0x102c] ss:$16 sps:$4 sm:$0xff]  }
 0x829   :  { %12191 = vmatprep.subr.bf16.mxu1 %v16169_v49  ;;  %v16252_v49 = vld [vmem:[#allocation20 + $0x1020] ss:$16 sps:$4 sm:$0xff]  }
 0x82b   :  { %11805 = vmatpush1.bf16.msra.mxu0 %v16164_v28  ;;  %v16255_v28 = vld [vmem:[#allocation20 + $0x1028] ss:$16 sps:$4 sm:$0xff]  }
 0x82c   :  { %12192 = vmatpush1.bf16.msra.mxu1 %v16167_v24  ;;  %11806 = vmatprep.subr.bf16.mxu0 %v16172_v27  ;;  %v16260_v24 = vld [vmem:[#allocation20 + $0x1044] ss:$16 sps:$4 sm:$0xff]   ;;  %v16263_v27 = vld [vmem:[#allocation20 + $0x104c] ss:$16 sps:$4 sm:$0xff]  }
 0x82d   :  { %12193 = vmatprep.subr.bf16.mxu1 %v16175_v34  ;;  %v16258_v34 = vld [vmem:[#allocation20 + $0x1040] ss:$16 sps:$4 sm:$0xff]  }
 0x82f   :  { %11807 = vmatpush1.bf16.msra.mxu0 %v16170_v43  ;;  %v16261_v43 = vld [vmem:[#allocation20 + $0x1048] ss:$16 sps:$4 sm:$0xff]  }
 0x830   :  { %12194 = vmatpush1.bf16.msra.mxu1 %v16173_v59  ;;  %11808 = vmatprep.subr.bf16.mxu0 %v16178_v31  ;;  %v16266_v59 = vld [vmem:[#allocation20 + $0x1064] ss:$16 sps:$4 sm:$0xff]   ;;  %v16264_v31 = vld [vmem:[#allocation20 + $0x1060] ss:$16 sps:$4 sm:$0xff]  }
 0x831   :  { %12195 = vmatprep.subr.bf16.mxu1 %v16181_v21  ;;  %v16267_v21 = vld [vmem:[#allocation20 + $0x1068] ss:$16 sps:$4 sm:$0xff]  }
 0x833   :  { %11809 = vmatpush1.bf16.msra.mxu0 %v16176_v19  ;;  %v16272_v19 = vld [vmem:[#allocation20 + $0x1084] ss:$16 sps:$4 sm:$0xff]  }
 0x834   :  { %12196 = vmatpush1.bf16.msra.mxu1 %v16179_v4  ;;  %11810 = vmatprep.subr.bf16.mxu0 %v16184_v23  ;;  %v16275_v4 = vld [vmem:[#allocation20 + $0x108c] ss:$16 sps:$4 sm:$0xff]   ;;  %v16273_v23 = vld [vmem:[#allocation20 + $0x1088] ss:$16 sps:$4 sm:$0xff]  }
 0x835   :  { %12197 = vmatprep.subr.bf16.mxu1 %v16187_v12  ;;  %v16278_v12 = vld [vmem:[#allocation20 + $0x10a4] ss:$16 sps:$4 sm:$0xff]  }
 0x837   :  { %11811 = vmatpush1.bf16.msra.mxu0 %v16182_v37  ;;  %v16281_v37 = vld [vmem:[#allocation20 + $0x10ac] ss:$16 sps:$4 sm:$0xff]  }
 0x838   :  { %12198 = vmatpush1.bf16.msra.mxu1 %v16185_v39  ;;  %11812 = vmatprep.subr.bf16.mxu0 %v16190_v56  ;;  %v16276_v39 = vld [vmem:[#allocation20 + $0x10a0] ss:$16 sps:$4 sm:$0xff]   ;;  %v16279_v56 = vld [vmem:[#allocation20 + $0x10a8] ss:$16 sps:$4 sm:$0xff]  }
 0x839   :  { %12199 = vmatprep.subr.bf16.mxu1 %v16193_v45  ;;  %v16284_v45 = vld [vmem:[#allocation20 + $0x10c4] ss:$16 sps:$4 sm:$0xff]  }
 0x83b   :  { %11813 = vmatpush1.bf16.msra.mxu0 %v16188_v20  ;;  %v16287_v20 = vld [vmem:[#allocation20 + $0x10cc] ss:$16 sps:$4 sm:$0xff]  }
 0x83c   :  { %12200 = vmatpush1.bf16.msra.mxu1 %v16191_v36  ;;  %11814 = vmatprep.subr.bf16.mxu0 %v16196_v44  ;;  %v16282_v36 = vld [vmem:[#allocation20 + $0x10c0] ss:$16 sps:$4 sm:$0xff]   ;;  %v16285_v44 = vld [vmem:[#allocation20 + $0x10c8] ss:$16 sps:$4 sm:$0xff]  }
 0x83d   :  { %12201 = vmatprep.subr.bf16.mxu1 %v16199_v33  ;;  %v16290_v33 = vld [vmem:[#allocation20 + $0x10e4] ss:$16 sps:$4 sm:$0xff]  }
 0x83f   :  { %11815 = vmatpush1.bf16.msra.mxu0 %v16194_v32  ;;  %v16293_v32 = vld [vmem:[#allocation20 + $0x10ec] ss:$16 sps:$4 sm:$0xff]  }
 0x840   :  { %12202 = vmatpush1.bf16.msra.mxu1 %v16197_v57  ;;  %11816 = vmatprep.subr.bf16.mxu0 %v16202_v63  ;;  %v16288_v57 = vld [vmem:[#allocation20 + $0x10e0] ss:$16 sps:$4 sm:$0xff]   ;;  %v16291_v63 = vld [vmem:[#allocation20 + $0x10e8] ss:$16 sps:$4 sm:$0xff]  }
 0x841   :  { %12203 = vmatprep.subr.bf16.mxu1 %v16205_v22  ;;  %v16296_v22 = vld [vmem:[#allocation20 + $0x1104] ss:$16 sps:$4 sm:$0xff]  }
 0x843   :  { %11817 = vmatpush1.bf16.msra.mxu0 %v16200_v53  ;;  %v16299_v53 = vld [vmem:[#allocation20 + $0x110c] ss:$16 sps:$4 sm:$0xff]  }
 0x844   :  { %12204 = vmatpush1.bf16.msra.mxu1 %v16203_v61  ;;  %11818 = vmatprep.subr.bf16.mxu0 %v16208_v35  ;;  %v16294_v61 = vld [vmem:[#allocation20 + $0x1100] ss:$16 sps:$4 sm:$0xff]   ;;  %v16297_v35 = vld [vmem:[#allocation20 + $0x1108] ss:$16 sps:$4 sm:$0xff]  }
 0x845   :  { %12205 = vmatprep.subr.bf16.mxu1 %v16211_v15  ;;  %v16302_v15 = vld [vmem:[#allocation20 + $0x1124] ss:$16 sps:$4 sm:$0xff]  }
 0x847   :  { %11819 = vmatpush1.bf16.msra.mxu0 %v16206_v60  ;;  %v16305_v60 = vld [vmem:[#allocation20 + $0x112c] ss:$16 sps:$4 sm:$0xff]  }
 0x848   :  { %12206 = vmatpush1.bf16.msra.mxu1 %v16209_v47  ;;  %11820 = vmatprep.subr.bf16.mxu0 %v16214_v16  ;;  %v16300_v47 = vld [vmem:[#allocation20 + $0x1120] ss:$16 sps:$4 sm:$0xff]   ;;  %v16303_v16 = vld [vmem:[#allocation20 + $0x1128] ss:$16 sps:$4 sm:$0xff]  }
 0x849   :  { %12207 = vmatprep.subr.bf16.mxu1 %v16217_v38  ;;  %v16308_v38 = vld [vmem:[#allocation20 + $0x1144] ss:$16 sps:$4 sm:$0xff]  }
 0x84b   :  { %11821 = vmatpush1.bf16.msra.mxu0 %v16212_v51  ;;  %v16311_v51 = vld [vmem:[#allocation20 + $0x114c] ss:$16 sps:$4 sm:$0xff]  }
 0x84c   :  { %12208 = vmatpush1.bf16.msra.mxu1 %v16215_v58  ;;  %11822 = vmatprep.subr.bf16.mxu0 %v16220_v62  ;;  %v16306_v58 = vld [vmem:[#allocation20 + $0x1140] ss:$16 sps:$4 sm:$0xff]   ;;  %v16309_v62 = vld [vmem:[#allocation20 + $0x1148] ss:$16 sps:$4 sm:$0xff]  }
 0x84d   :  { %12209 = vmatprep.subr.bf16.mxu1 %v16223_v29  ;;  %v16314_v29 = vld [vmem:[#allocation20 + $0x1164] ss:$16 sps:$4 sm:$0xff]  }
 0x84f   :  { %11823 = vmatpush1.bf16.msra.mxu0 %v16218_v13  ;;  %v16317_v13 = vld [vmem:[#allocation20 + $0x116c] ss:$16 sps:$4 sm:$0xff]  }
 0x850   :  { %12210 = vmatpush1.bf16.msra.mxu1 %v16221_v5  ;;  %11824 = vmatprep.subr.bf16.mxu0 %v16226_v26  ;;  %v16312_v5 = vld [vmem:[#allocation20 + $0x1160] ss:$16 sps:$4 sm:$0xff]   ;;  %v16315_v26 = vld [vmem:[#allocation20 + $0x1168] ss:$16 sps:$4 sm:$0xff]  }
 0x851   :  { %12211 = vmatprep.subr.bf16.mxu1 %v16229_v1  ;;  %v16320_v1 = vld [vmem:[#allocation20 + $0x1184] ss:$16 sps:$4 sm:$0xff]  }
 0x853   :  { %11825 = vmatpush1.bf16.msra.mxu0 %v16224_v9  ;;  %v16323_v9 = vld [vmem:[#allocation20 + $0x118c] ss:$16 sps:$4 sm:$0xff]  }
 0x854   :  { %12212 = vmatpush1.bf16.msra.mxu1 %v16227_v48  ;;  %11826 = vmatprep.subr.bf16.mxu0 %v16232_v54  ;;  %v16318_v48 = vld [vmem:[#allocation20 + $0x1180] ss:$16 sps:$4 sm:$0xff]   ;;  %v16321_v54 = vld [vmem:[#allocation20 + $0x1188] ss:$16 sps:$4 sm:$0xff]  }
 0x855   :  { %12213 = vmatprep.subr.bf16.mxu1 %v16235_v25  ;;  %v16326_v25 = vld [vmem:[#allocation20 + $0x11a4] ss:$16 sps:$4 sm:$0xff]  }
 0x857   :  { %11827 = vmatpush1.bf16.msra.mxu0 %v16230_v0  ;;  %v16329_v0 = vld [vmem:[#allocation20 + $0x11ac] ss:$16 sps:$4 sm:$0xff]  }
 0x858   :  { %12214 = vmatpush1.bf16.msra.mxu1 %v16233_v41  ;;  %11828 = vmatprep.subr.bf16.mxu0 %v16238_v18  ;;  %v16324_v41 = vld [vmem:[#allocation20 + $0x11a0] ss:$16 sps:$4 sm:$0xff]   ;;  %v16327_v18 = vld [vmem:[#allocation20 + $0x11a8] ss:$16 sps:$4 sm:$0xff]  }
 0x859   :  { %12215 = vmatprep.subr.bf16.mxu1 %v16241_v50  ;;  %v16332_v50 = vld [vmem:[#allocation20 + $0x11c4] ss:$16 sps:$4 sm:$0xff]  }
 0x85b   :  { %11829 = vmatpush1.bf16.msra.mxu0 %v16236_v42  ;;  %v16335_v42 = vld [vmem:[#allocation20 + $0x11cc] ss:$16 sps:$4 sm:$0xff]  }
 0x85c   :  { %12216 = vmatpush1.bf16.msra.mxu1 %v16239_v11  ;;  %11841 = vmatprep.subr.bf16.mxu0 %v16246_v6  ;;  %v16330_v11 = vld [vmem:[#allocation20 + $0x11c0] ss:$16 sps:$4 sm:$0xff]   ;;  %v16333_v6 = vld [vmem:[#allocation20 + $0x11c8] ss:$16 sps:$4 sm:$0xff]  }
 0x85d   :  { %12228 = vmatprep.subr.bf16.mxu1 %v16249_v8  ;;  %v16338_v8 = vld [vmem:[#allocation20 + $0x11e4] ss:$16 sps:$4 sm:$0xff]  }
 0x85e   :  { %11831 = vmatmul.mubr.bf16.vlgmr.msra.gmra.mrb[164].mxu0 %v18999_v3 }
 0x85f   :  { %12218 = vmatmul.mubr.bf16.vlgmr.msra.gmra.mrb[92].mxu1 %v18999_v3  ;;  %11842 = vmatpush1.bf16.msra.mxu0 %v16244_v52  ;;  %v16269_v3 = vld [vmem:[#allocation20 + $0x106c] ss:$16 sps:$4 sm:$0xff]  }
 0x860   :  { %11873 = vmatprep.mubr.bf16.mxu0 %v18993_v55  ;;  %12229 = vmatpush1.bf16.msra.mxu1 %v16247_v17  ;;  %v16341_v52 = vld [vmem:[#allocation20 + $0x11ec] ss:$16 sps:$4 sm:$0xff]   ;;  %v16336_v17 = vld [vmem:[#allocation20 + $0x11e0] ss:$16 sps:$4 sm:$0xff]  }
 0x861   :  { %12260 = vmatprep.mubr.bf16.mxu1 %v18993_v55  ;;  %11843 = vmatprep.subr.bf16.mxu0 %v16254_v30  ;;  %v16270_v55 = vld [vmem:[#allocation20 + $0x1080] ss:$16 sps:$4 sm:$0xff]   ;;  %v16339_v30 = vld [vmem:[#allocation20 + $0x11e8] ss:$16 sps:$4 sm:$0xff]  }
 0x862   :  { %12230 = vmatprep.subr.bf16.mxu1 %v16257_v46  ;;  %v19062_v46 = vld [vmem:[%s19315_s13 + $0x40] sm:$0xff]  }
 0x863   :  { %11844 = vmatpush1.bf16.msra.mxu0 %v16252_v49  ;;  %v19067_v49 = vld [vmem:[%s19315_s13] sm:$0xff]  }
 0x864   :  { %12231 = vmatpush1.bf16.msra.mxu1 %v16255_v28  ;;  %11845 = vmatprep.subr.bf16.mxu0 %v16260_v24  ;;  %v19073_v28 = vld [vmem:[%s19315_s13 + $0x48] sm:$0xff]  }
 0x865   :  { %12232 = vmatprep.subr.bf16.mxu1 %v16263_v27  ;;  %v19081_v24 = vld [vmem:[%s19315_s13 + $0x8] sm:$0xff]   ;;  %v19087_v27 = vld [vmem:[%s19315_s13 + $0x50] sm:$0xff]  }
 0x867   :  { %11846 = vmatpush1.bf16.msra.mxu0 %v16258_v34  ;;  %v19099_v34 = vld [vmem:[%s19315_s13 + $0x58] sm:$0xff]  }
 0x868   :  { %12233 = vmatpush1.bf16.msra.mxu1 %v16261_v43  ;;  %11847 = vmatprep.subr.bf16.mxu0 %v16266_v59  ;;  %v19105_v43 = vld [vmem:[%s19315_s13 + $0x18] sm:$0xff]   ;;  %v19112_v59 = vld [vmem:[%s19315_s13 + $0x60] sm:$0xff]  }
 0x869   :  { %12234 = vmatprep.subr.bf16.mxu1 %v16269_v3  ;;  %v19117_v3 = vld [vmem:[%s19315_s13 + $0x20] sm:$0xff]  }
 0x86b   :  { %11848 = vmatpush1.bf16.msra.mxu0 %v16264_v31  ;;  %v19122_v31 = vld [vmem:[%s19315_s13 + $0x68] sm:$0xff]  }
 0x86c   :  { %12235 = vmatpush1.bf16.msra.mxu1 %v16267_v21  ;;  %11849 = vmatprep.subr.bf16.mxu0 %v16272_v19  ;;  %v19129_v21 = vld [vmem:[%s19315_s13 + $0x28] sm:$0xff]   ;;  %v19135_v19 = vld [vmem:[%s19315_s13 + $0x70] sm:$0xff]  }
 0x86d   :  { %12236 = vmatprep.subr.bf16.mxu1 %v16275_v4  ;;  %v19141_v4 = vld [vmem:[%s19315_s13 + $0x30] sm:$0xff]  }
 0x86f   :  { %11850 = vmatpush1.bf16.msra.mxu0 %v16270_v55  ;;  %v19147_v55 = vld [vmem:[%s19315_s13 + $0x78] sm:$0xff]  }
 0x870   :  { %12237 = vmatpush1.bf16.msra.mxu1 %v16273_v23  ;;  %11851 = vmatprep.subr.bf16.mxu0 %v16278_v12  ;;  %v19153_v23 = vld [vmem:[%s19315_s13 + $0x38] sm:$0xff]   ;;  %v19159_v12 = vld [vmem:[%s19315_s13 + $0xc0] sm:$0xff]  }
 0x871   :  { %12238 = vmatprep.subr.bf16.mxu1 %v16281_v37  ;;  %v12271_v37 = vld [vmem:[#allocation22] sm:$0xf] }
 0x873   :  { %11852 = vmatpush1.bf16.msra.mxu0 %v16276_v39  ;;  %v12287_v39 = vsub.s32 3, %v19458_v2 }
 0x874   :  { %12239 = vmatpush1.bf16.msra.mxu1 %v16279_v56  ;;  %11853 = vmatprep.subr.bf16.mxu0 %v16284_v45  ;;  %v12301_v56 = vld [vmem:[#allocation23] sm:$0xf]  ;;  %v12276_v45 = vrot.slane %v12271_v37, %v18810_v7 }
 0x875   :  { %12240 = vmatprep.subr.bf16.mxu1 %v16287_v20  ;;  %v12280_v20 = vrot.slane %v12271_v37, %v18813_v10 }
 0x877   :  { %11854 = vmatpush1.bf16.msra.mxu0 %v16282_v36  ;;  %v12306_v36 = vrot.slane %v12301_v56, %v18810_v7  ;;  %v12314_v7 = vrot.slane %v12301_v56, %v18841_v40 }
 0x878   :  { %12241 = vmatpush1.bf16.msra.mxu1 %v16285_v44  ;;  %11855 = vmatprep.subr.bf16.mxu0 %v16290_v33  ;;  %v12288_v44 = vrot.slane %v12271_v37, %v12287_v39 }
 0x879   :  { %12242 = vmatprep.subr.bf16.mxu1 %v16293_v32  ;;  %v12310_v32 = vrot.slane %v12301_v56, %v18813_v10 }
 0x87b   :  { %11856 = vmatpush1.bf16.msra.mxu0 %v16288_v57 }
 0x87c   :  { %12243 = vmatpush1.bf16.msra.mxu1 %v16291_v63  ;;  %11857 = vmatprep.subr.bf16.mxu0 %v16296_v22 }
 0x87d   :  { %12244 = vmatprep.subr.bf16.mxu1 %v16299_v53  ;;  %v12318_v53 = vrot.slane %v12301_v56, %v12287_v39  ;;  %v19184_v56 = vld [vmem:[%s19315_s13 + $0xc8] sm:$0xff]  }
 0x87f   :  { %11858 = vmatpush1.bf16.msra.mxu0 %v16294_v61  ;;  %v12284_v61 = vrot.slane %v12271_v37, %v18841_v40  ;;  %v19179_v37 = vld [vmem:[%s19315_s13 + $0x80] sm:$0xff]  }
 0x880   :  { %12245 = vmatpush1.bf16.msra.mxu1 %v16297_v35  ;;  %11859 = vmatprep.subr.bf16.mxu0 %v16302_v15 }
 0x881   :  { %12246 = vmatprep.subr.bf16.mxu1 %v16305_v60 }
 0x883   :  { %11860 = vmatpush1.bf16.msra.mxu0 %v16300_v47 }
 0x884   :  { %12247 = vmatpush1.bf16.msra.mxu1 %v16303_v16  ;;  %11861 = vmatprep.subr.bf16.mxu0 %v16308_v38 }
 0x885   :  { %12248 = vmatprep.subr.bf16.mxu1 %v16311_v51 }
 0x887   :  { %11862 = vmatpush1.bf16.msra.mxu0 %v16306_v58 }
 0x888   :  { %12249 = vmatpush1.bf16.msra.mxu1 %v16309_v62  ;;  %11863 = vmatprep.subr.bf16.mxu0 %v16314_v29 }
 0x889   :  { %12250 = vmatprep.subr.bf16.mxu1 %v16317_v13 }
 0x88b   :  { %11864 = vmatpush1.bf16.msra.mxu0 %v16312_v5 }
 0x88c   :  { %12251 = vmatpush1.bf16.msra.mxu1 %v16315_v26  ;;  %11865 = vmatprep.subr.bf16.mxu0 %v16320_v1 }
 0x88d   :  { %12252 = vmatprep.subr.bf16.mxu1 %v16323_v9 }
 0x88f   :  { %11866 = vmatpush1.bf16.msra.mxu0 %v16318_v48 }
 0x890   :  { %12253 = vmatpush1.bf16.msra.mxu1 %v16321_v54  ;;  %11867 = vmatprep.subr.bf16.mxu0 %v16326_v25 }
 0x891   :  { %12254 = vmatprep.subr.bf16.mxu1 %v16329_v0 }
 0x893   :  { %11868 = vmatpush1.bf16.msra.mxu0 %v16324_v41 }
 0x894   :  { %12255 = vmatpush1.bf16.msra.mxu1 %v16327_v18  ;;  %11869 = vmatprep.subr.bf16.mxu0 %v16332_v50 }
 0x895   :  { %12256 = vmatprep.subr.bf16.mxu1 %v16335_v42 }
 0x897   :  { %11870 = vmatpush1.bf16.msra.mxu0 %v16330_v11 }
 0x898   :  { %12257 = vmatpush1.bf16.msra.mxu1 %v16333_v6  ;;  %11871 = vmatprep.subr.bf16.mxu0 %v16338_v8 }
 0x899   :  { %12258 = vmatprep.subr.bf16.mxu1 %v16341_v52 }
 0x89b   :  { %11872 = vmatpush1.bf16.msra.mxu0 %v16336_v17 }
 0x89c   :  { %12259 = vmatpush1.bf16.msra.mxu1 %v16339_v30  ;;  %14732 = vmatprep.subr.bf16.mxu0 %v19062_v46 }
 0x89e   :  { %11874 = vmatmul.mubr.bf16.vlgmr.msra.gmra.mrb[164].mxu0 %v18996_v14 }
 0x89f   :  { %12261 = vmatmul.mubr.bf16.vlgmr.msra.gmra.mrb[92].mxu1 %v18996_v14  ;;  %14733 = vmatpush3.bf16.msra.mxu0 %v19067_v49  ;;  %v19093_v14 = vld [vmem:[%s19315_s13 + $0x10] sm:$0xff]  }
 0x8a0   :  { %14734 = vmatprep.subr.bf16.mxu0 %v19073_v28 }
 0x8a3   :  { %14735 = vmatpush3.bf16.msra.mxu0 %v19081_v24 }
 0x8a4   :  { %14736 = vmatprep.subr.bf16.mxu0 %v19087_v27 }
 0x8a7   :  { %14737 = vmatpush3.bf16.msra.mxu0 %v19093_v14 }
 0x8a8   :  { %14738 = vmatprep.subr.bf16.mxu0 %v19099_v34 }
 0x8ab   :  { %14739 = vmatpush3.bf16.msra.mxu0 %v19105_v43 }
 0x8ac   :  { %14740 = vmatprep.subr.bf16.mxu0 %v19112_v59 }
 0x8af   :  { %14741 = vmatpush3.bf16.msra.mxu0 %v19117_v3 }
 0x8b0   :  { %14742 = vmatprep.subr.bf16.mxu0 %v19122_v31 }
 0x8b3   :  { %14743 = vmatpush3.bf16.msra.mxu0 %v19129_v21 }
 0x8b4   :  { %14744 = vmatprep.subr.bf16.mxu0 %v19135_v19 }
 0x8b7   :  { %14745 = vmatpush3.bf16.msra.mxu0 %v19141_v4 }
 0x8b8   :  { %14746 = vmatprep.subr.bf16.mxu0 %v19147_v55 }
 0x8bb   :  { %14747 = vmatpush3.bf16.msra.mxu0 %v19153_v23 }
 0x8bc   :  { %14754 = vmatprep.subr.bf16.mxu0 %v19159_v12 }
 0x971   :  { %v11875_v33 = vpop.f32.mrb[164].mxu0 }
 0x972   :  { %v12293_v57 = vmul.f32 %v12276_v45, %v11875_v33  ;;  %v12262_v63 = vpop.f32.mrb[92].mxu1  ;;  %v11877_v22 = vpop.f32.mrb[165].mxu0  ;;  %v19196_v33 = vld [vmem:[%s19315_s13 + $0xd0] sm:$0xff]  }
 0x973   :  { %v12294_v35 = vmul.f32 %v12280_v20, %v11877_v22  ;;  %v12264_v15 = vpop.f32.mrb[93].mxu1  ;;  %v11879_v2 = vpop.f32.mrb[166].mxu0  ;;  %v19202_v22 = vld [vmem:[%s19315_s13 + $0x90] sm:$0xff]  }
 0x974   :  { %v12323_v60 = vadd.f32 %v12306_v36, %v12293_v57  ;;  %v12296_v47 = vmul.f32 %v12288_v44, %v12264_v15  ;;  %v12297_v16 = vmul.f32 %v12276_v45, %v11879_v2  ;;  %v12266_v38 = vpop.f32.mrb[94].mxu1  ;;  %v11881_v51 = vpop.f32.mrb[167].mxu0  ;;  %v19220_v15 = vld [vmem:[%s19315_s13 + $0xe0] sm:$0xff]  }
 0x975   :  { %v12324_v58 = vadd.f32 %v12310_v32, %v12294_v35  ;;  %v12299_v62 = vmul.f32 %v12284_v61, %v12266_v38  ;;  %v12268_v29 = vpop.f32.mrb[95].mxu1  ;;  %v12298_v57 = vmul.f32 %v12280_v20, %v11881_v51  ;;  %v19214_v20 = vld [vmem:[%s19315_s13 + $0x98] sm:$0xff]   ;;  %v19238_v38 = vld [vmem:[%s19315_s13 + $0xa8] sm:$0xff]  }
 0x976   :  { %v12331_v10 = vmax.f32 %v12323_v60, 0.0  ;;  %v12326_v13 = vadd.f32 %v12318_v53, %v12296_v47  ;;  %v19170_v5 = vadd.f32 %v12306_v36, %v12297_v16  ;;  %v12300_v26 = vmul.f32 %v12288_v44, %v12268_v29  ;;  %v19190_v36 = vld [vmem:[%s19315_s13 + $0x88] sm:$0xff]  }
 0x977   :  { %v12332_v1 = vmax.f32 %v12324_v58, 0.0  ;;  %v19172_v9 = vadd.f32 %v12314_v7, %v12299_v62  ;;  %v12295_v44 = vmul.f32 %v12284_v61, %v12262_v63  ;;  %v19208_v63 = vld [vmem:[%s19315_s13 + $0xd8] sm:$0xff]   ;;  %v12328_v61 = vadd.f32 %v12310_v32, %v12298_v57  ;;  %v19226_v32 = vld [vmem:[%s19315_s13 + $0xa0] sm:$0xff]   ;;  %v19232_v47 = vld [vmem:[%s19315_s13 + $0xe8] sm:$0xff]  }
 0x978   :  { %v12343_v48 = vrot.slane %v12331_v10, 4  ;;  %v12334_v54 = vmax.f32 %v12326_v13, 0.0  ;;  %v19174_v25 = vadd.f32 %v12318_v53, %v12300_v26  ;;  %v16373_v62 = vld [vmem:[%s19315_s13 + $0xb0] sm:$0xff]   ;;  %v16375_v26 = vld [vmem:[%s19315_s13 + $0xb8] sm:$0xff]  }
 0x979   :  { %v12344_v0 = vrot.slane %v12332_v1, 4  ;;  %v12325_v53 = vadd.f32 %v12314_v7, %v12295_v44  ;;  %v12336_v2 = vmax.f32 %v12328_v61, 0.0  ;;  %v19244_v7 = vld [vmem:[%s19315_s13 + $0xf0] sm:$0xff]  }
 0x97a   :  { %v12351_v41 = vmax.f32 %v12331_v10, %v12343_v48  ;;  %v12346_v18 = vrot.slane %v12334_v54, 4  ;;  %v16374_v10 = vld [vmem:[%s19315_s13 + $0xf8] sm:$0xff]   ;;  %s16736_s13 = smov [#allocation26]  }
 0x97b   :  { %v12352_v50 = vmax.f32 %v12332_v1, %v12344_v0  ;;  %v12333_v35 = vmax.f32 %v12325_v53, 0.0  ;;  %v12376_v16 = vrot.slane %v12336_v2, 4  ;;  %s12848_s9 = sshll.u32 %s16736_s13, 4  ;;  %s12849_s9 = int_to_ptr.vmem [resolvable:$true] %s12848_s9 }
 0x97c   :  { %v12359_v40 = vrot.slane %v12351_v41, 1  ;;  %v12354_v42 = vmax.f32 %v12334_v54, %v12346_v18  ;;  %v12338_v18 = vmax.f32 %v19174_v25, 0.0  ;;  %s16677_s21 = scalar_lea.vmem %s12849_s9, 32  ;;  %p16682_p7 = scmp.lt.s32.totalorder %s12849_s9, %s12849_s9 }
 0x97d   :  { %v12360_v11 = vrot.slane %v12352_v50, 1  ;;  %v12345_v60 = vrot.slane %v12333_v35, 4  ;;  %v12384_v58 = vmax.f32 %v12336_v2, %v12376_v16  ;;  %p16678_p6 = scmp.ne.s32.totalorder %s12849_s9, %s16677_s21  ;;  %p16683_p8 = scmp.lt.s32.totalorder %s16677_s21, %s16677_s21 }
 0x97e   :  { %v12367_v6 = vmax.f32 %v12351_v41, %v12359_v40  ;;  %v12362_v8 = vrot.slane %v12354_v42, 1  ;;  %v12335_v41 = vmax.f32 %v19170_v5, 0.0 }
 0x97f   :  { %v12368_v52 = vmax.f32 %v12352_v50, %v12360_v11  ;;  %v12353_v51 = vmax.f32 %v12333_v35, %v12345_v60  ;;  %v12392_v13 = vrot.slane %v12384_v58, 1  ;;  %p16684_p9 = por %p16683_p8, %p16682_p7 }
 0x980   :  { %v12370_v17 = vmax.f32 %v12354_v42, %v12362_v8  ;;  %v12403_v39 = vpack.c.bf16 %v12367_v6, %v12367_v6 }
 0x981   :  { %v12404_v30 = vpack.c.bf16 %v12368_v52, %v12368_v52  ;;  %v12361_v29 = vrot.slane %v12353_v51, 1  ;;  %v12400_v48 = vmax.f32 %v12384_v58, %v12392_v13  ;;  %p16685_p10 = pnand %p16684_p9, %p16678_p6 }
 0x982   :  { %v12406_v45 = vpack.c.bf16 %v12370_v17, %v12370_v17 }
 0x983   :  { %12695 = vmatprep.mubr.bf16.mxu0 %v12404_v30  ;;  %v12369_v1 = vmax.f32 %v12353_v51, %v12361_v29  ;;  %v12744_v0 = vpack.c.bf16 %v12400_v48, %v12400_v48 }
 0x984   :  { %12696 = vmatmul.mubr.bf16.vlgmr.msra.gmra.mrb[168].mxu0 %v12403_v39 }
 0x985   :  { %14755 = vmatpush3.bf16.msra.mxu0 %v19179_v37  ;;  %12735 = vmatprep.mubr.bf16.mxu0 %v12406_v45  ;;  %v12405_v54 = vpack.c.bf16 %v12369_v1, %v12369_v1 }
 0x986   :  { %14756 = vmatprep.subr.bf16.mxu0 %v19184_v56 }
 0x989   :  { %14757 = vmatpush3.bf16.msra.mxu0 %v19190_v36 }
 0x98a   :  { %14758 = vmatprep.subr.bf16.mxu0 %v19196_v33 }
 0x98d   :  { %14759 = vmatpush3.bf16.msra.mxu0 %v19202_v22 }
 0x98e   :  { %14760 = vmatprep.subr.bf16.mxu0 %v19208_v63 }
 0x991   :  { %14761 = vmatpush3.bf16.msra.mxu0 %v19214_v20 }
 0x992   :  { %14762 = vmatprep.subr.bf16.mxu0 %v19220_v15 }
 0x995   :  { %14763 = vmatpush3.bf16.msra.mxu0 %v19226_v32 }
 0x996   :  { %14764 = vmatprep.subr.bf16.mxu0 %v19232_v47 }
 0x999   :  { %14765 = vmatpush3.bf16.msra.mxu0 %v19238_v38 }
 0x99a   :  { %14766 = vmatprep.subr.bf16.mxu0 %v19244_v7 }
 0x99d   :  { %14767 = vmatpush3.bf16.msra.mxu0 %v16373_v62 }
 0x99e   :  { %14768 = vmatprep.subr.bf16.mxu0 %v16374_v10 }
 0x9a1   :  { %14769 = vmatpush3.bf16.msra.mxu0 %v16375_v26 }
 0x9a2   :  { %14776 = vmatprep.subr.bf16.mxu0 %v19062_v46  ;;  %v12375_v46 = vrot.slane %v12335_v41, 4 }
 0x9a4   :  { %12736 = vmatmul.mubr.bf16.vlgmr.msra.gmra.mrb[172].mxu0 %v12405_v54 }
 0x9a5   :  { %14777 = vmatpush3.bf16.msra.mxu0 %v19067_v49  ;;  %12779 = vmatprep.mubr.bf16.mxu0 %v12744_v0  ;;  %v12378_v49 = vrot.slane %v12338_v18, 4 }
 0x9a6   :  { %14778 = vmatprep.subr.bf16.mxu0 %v19073_v28  ;;  %v12383_v28 = vmax.f32 %v12335_v41, %v12375_v46 }
 0x9a9   :  { %14779 = vmatpush3.bf16.msra.mxu0 %v19081_v24  ;;  %v12386_v24 = vmax.f32 %v12338_v18, %v12378_v49 }
 0x9aa   :  { %14780 = vmatprep.subr.bf16.mxu0 %v19087_v27  ;;  %v12391_v27 = vrot.slane %v12383_v28, 1 }
 0x9ad   :  { %14781 = vmatpush3.bf16.msra.mxu0 %v19093_v14  ;;  %v12394_v14 = vrot.slane %v12386_v24, 1 }
 0x9ae   :  { %14782 = vmatprep.subr.bf16.mxu0 %v19099_v34  ;;  %v12399_v34 = vmax.f32 %v12383_v28, %v12391_v27 }
 0x9b1   :  { %14783 = vmatpush3.bf16.msra.mxu0 %v19105_v43  ;;  %v12402_v43 = vmax.f32 %v12386_v24, %v12394_v14 }
 0x9b2   :  { %14784 = vmatprep.subr.bf16.mxu0 %v19112_v59  ;;  %v12743_v59 = vpack.c.bf16 %v12399_v34, %v12399_v34 }
 0x9b5   :  { %14785 = vmatpush3.bf16.msra.mxu0 %v19117_v3  ;;  %v12746_v3 = vpack.c.bf16 %v12402_v43, %v12402_v43 }
 0x9b6   :  { %14786 = vmatprep.subr.bf16.mxu0 %v19122_v31  ;;  %v12337_v31 = vmax.f32 %v19172_v9, 0.0 }
 0x9b9   :  { %14787 = vmatpush3.bf16.msra.mxu0 %v19129_v21  ;;  %v12377_v21 = vrot.slane %v12337_v31, 4 }
 0x9ba   :  { %14788 = vmatprep.subr.bf16.mxu0 %v19135_v19 }
 0x9bb   :  { %v12385_v19 = vmax.f32 %v12337_v31, %v12377_v21 }
 0x9bd   :  { %14789 = vmatpush3.bf16.msra.mxu0 %v19141_v4  ;;  %v12393_v4 = vrot.slane %v12385_v19, 1 }
 0x9be   :  { %14790 = vmatprep.subr.bf16.mxu0 %v19147_v55 }
 0x9bf   :  { %v12401_v55 = vmax.f32 %v12385_v19, %v12393_v4 }
 0x9c1   :  { %14791 = vmatpush3.bf16.msra.mxu0 %v19153_v23  ;;  %v12745_v23 = vpack.c.bf16 %v12401_v55, %v12401_v55 }
 0x9c2   :  { %14798 = vmatprep.subr.bf16.mxu0 %v19159_v12 }
 0x9c4   :  { %12780 = vmatmul.mubr.bf16.vlgmr.msra.gmra.mrb[176].mxu0 %v12743_v59 }
 0x9c5   :  { %14799 = vmatpush3.bf16.msra.mxu0 %v19179_v37  ;;  %12819 = vmatprep.mubr.bf16.mxu0 %v12746_v3 }
 0x9c6   :  { %14800 = vmatprep.subr.bf16.mxu0 %v19184_v56 }
 0x9c9   :  { %14801 = vmatpush3.bf16.msra.mxu0 %v19190_v36 }
 0x9ca   :  { %14802 = vmatprep.subr.bf16.mxu0 %v19196_v33 }
 0x9cd   :  { %14803 = vmatpush3.bf16.msra.mxu0 %v19202_v22 }
 0x9ce   :  { %14804 = vmatprep.subr.bf16.mxu0 %v19208_v63  ;;  %v14201_v63 = vld [vmem:[#allocation25] ss:$0 sm:$0xff] }
 0x9d1   :  { %14805 = vmatpush3.bf16.msra.mxu0 %v19214_v20 }
 0x9d2   :  { %14806 = vmatprep.subr.bf16.mxu0 %v19220_v15 }
 0x9d5   :  { %14807 = vmatpush3.bf16.msra.mxu0 %v19226_v32 }
 0x9d6   :  { %14808 = vmatprep.subr.bf16.mxu0 %v19232_v47 }
 0x9d9   :  { %14809 = vmatpush3.bf16.msra.mxu0 %v19238_v38 }
 0x9da   :  { %14810 = vmatprep.subr.bf16.mxu0 %v19244_v7 }
 0x9dd   :  { %14811 = vmatpush3.bf16.msra.mxu0 %v16373_v62 }
 0x9de   :  { %14812 = vmatprep.subr.bf16.mxu0 %v16374_v10 }
 0x9e1   :  { %14813 = vmatpush3.bf16.msra.mxu0 %v16375_v26 }
 0x9e4   :  { %12820 = vmatmul.mubr.bf16.vlgmr.msra.gmra.mrb[180].mxu0 %v12745_v23 }
 0xa57   :  { %v14748_v12 = vpop.f32.mrb[168].mxu0 }
 0xa58   :  { %v14749_v5 = vpop.f32.mrb[169].mxu0 }
 0xa59   :  { %v14750_v9 = vadd.f32 %v14749_v5, %v14748_v12  ;;  %v14751_v25 = vpop.f32.mrb[170].mxu0 }
 0xa5a   :  { %v14752_v50 = vpop.f32.mrb[171].mxu0 }
 0xa77   :  { %v14770_v40 = vpop.f32.mrb[172].mxu0 }
 0xa78   :  { %v14771_v42 = vpop.f32.mrb[173].mxu0 }
 0xa79   :  { %v14772_v11 = vadd.f32 %v14771_v42, %v14770_v40  ;;  %v14773_v6 = vpop.f32.mrb[174].mxu0 }
 0xa7a   :  { %v14774_v8 = vpop.f32.mrb[175].mxu0 }
 0xa7b   :  { %v12738_v52 = vadd.f32 %v14772_v11, %v14750_v9 }
 0xa97   :  { %v14792_v17 = vpop.f32.mrb[176].mxu0 }
 0xa98   :  { %v14793_v30 = vpop.f32.mrb[177].mxu0 }
 0xa99   :  { %v14794_v37 = vadd.f32 %v14793_v30, %v14792_v17  ;;  %v14795_v39 = vpop.f32.mrb[178].mxu0 }
 0xa9a   :  { %v14796_v56 = vpop.f32.mrb[179].mxu0 }
 0xab7   :  { %v14814_v45 = vpop.f32.mrb[180].mxu0 }
 0xab8   :  { %v14815_v36 = vpop.f32.mrb[181].mxu0 }
 0xab9   :  { %v14816_v44 = vadd.f32 %v14815_v36, %v14814_v45  ;;  %v14817_v33 = vpop.f32.mrb[182].mxu0 }
 0xaba   :  { %v14818_v57 = vpop.f32.mrb[183].mxu0 }
 0xabb   :  { %v12822_v22 = vadd.f32 %v14816_v44, %v14794_v37 }
 0xabd   :  { %v12828_v53 = vrot.slane %v12822_v22, 7 }
 0xabf   :  { %v12831_v61 = vsel %vm19490_vm11, %v12738_v52, %v12828_v53 }
 0xac0   :  { %v12839_v20 = vadd.f32 %v14201_v63, %v12831_v61 }
 0xac2   :  { %12841 = vst.msk [vmem:[#allocation26] sm:$0x3] %vm12840_vm4, %v12839_v20 }
 0xac3   :  { %16688 = shalt.err (!%p16685_p10)
}
 0xac4   :  { %s16689_s26 = scalar_lea.hbm %s19317_s15, 32 }
 0xac5   :  { %p16690_p11 = scmp.ne.s32.totalorder %s19317_s15, %s16689_s26  ;;  %p16693_p12 = scmp.lt.u32.totalorder %s16689_s26, %s19317_s15 }
 0xac7   :  { %p16695_p13 = pnand %p16693_p12, %p16690_p11 }
 0xac9   :  { %16698 = shalt.err (!%p16695_p13)
}
 0xaca   :  { %12851 = dma.vmem_to_hbm [thread:$0]  %s12849_s9, 32, %s19317_s15, [#allocation7]  }
 0xacb   :  { %16713 = dma.done.wait [#allocation7], 32  }
 0xacc   :  { %16714 = vsyncadd [#allocation7], 4294967264 }
 0xacd   :  { %12855 = vsyncpa [#allocation6], 1 }
 0xace   :  { %12856 = vsyncpa [#allocation9], 1 }
 0xacf   :  { %12857 = vsyncpa [#allocation12], 1 }
 0xad0   :  { %12858 = vsyncpa [#allocation15], 1 }
 0xad1   :  { %12859 = vsyncpa [#allocation18], 1 }
 0xad2   :  { %12860 = vsyncpa [#allocation21], 1 }
 0xad3   :  { %12861 = vsyncpa [#allocation24], 1 }
 0xad4   :  { %12862 = vsyncpa [#allocation7], 1 }

</bundles_post_ra>
